<compile_context>
chip_gen: v6e
topology: v6e:2x2x1
jax: 0.10.0
libtpu: 0.0.40
codegen_flags: <defaults>
</compile_context>

<pallas_src>
import math

import jax
import jax.numpy as jnp
import numpy as np
from jax.experimental import pallas as pl
from jax.experimental.pallas import tpu as pltpu

NEG_SLOPE = 0.2  # LeakyReLU negative_slope of the module


# --------------------------------------------------------------------------
# Fused Trajectory_Block kernel (one program per B_TILE images)
# --------------------------------------------------------------------------
def _make_traj_kernel(H, W, C, B_TILE):
    M = H * W
    LPAD = pl.cdiv(W + 1, 128) * 128   # 128-aligned left halo (>= W+1 zero cols)
    RPAD = pl.cdiv(W + 1, 128) * 128   # 128-aligned right halo
    P = LPAD + M + RPAD                # padded flattened width per copy

    def kernel(x_ref, wpair_ref, bpair_ref, wsolo_ref, bsolo_ref, o_ref,
               pad_ref, slab_ref):
        # x_ref:    (B_TILE, C, M)    f32   channels on sublanes, H*W on lanes
        # pad_ref:  (B_TILE*3, C, P)  bf16  3 edge-masked, zero-haloed copies/img
        # slab_ref: (9*C, B_TILE*M)   bf16  im2col slab, tap-major row blocks

        # Hoisted broadcasts (JAX does not CSE broadcast_in_dim in a loop).
        jj = jax.lax.broadcasted_iota(jnp.int32, (1, M), 1) % W
        not_last = jnp.broadcast_to((jj != (W - 1)).astype(jnp.float32), (C, M))
        not_first = jnp.broadcast_to((jj != 0).astype(jnp.float32), (C, M))

        # Zero only the halo columns once; interiors are rewritten every layer.
        pad_ref[:, :, :LPAD] = jnp.zeros((B_TILE * 3, C, LPAD), jnp.bfloat16)
        pad_ref[:, :, LPAD + M:] = jnp.zeros((B_TILE * 3, C, RPAD), jnp.bfloat16)

        def leaky(y):
            return jnp.maximum(y, NEG_SLOPE * y)   # slope < 1 -> exact LeakyReLU

        def stage(get_img):
            """Build the (9*C, B_TILE*M) bf16 im2col slab for one 3x3 layer."""
            for b in range(B_TILE):
                a = get_img(b)                         # (C, M) f32 activation
                a_c = a.astype(jnp.bfloat16)
                # 3 pre-masked copies: masks in f32, single bf16 cast each.
                pad_ref[3 * b + 0, :, pl.ds(LPAD, M)] = a_c
                pad_ref[3 * b + 1, :, pl.ds(LPAD, M)] = (a * not_last).astype(jnp.bfloat16)
                pad_ref[3 * b + 2, :, pl.ds(LPAD, M)] = (a * not_first).astype(jnp.bfloat16)
                # Center tap written directly (no read-back from pad_ref).
                slab_ref[4 * C:5 * C, b * M:(b + 1) * M] = a_c
            for kh in range(3):
                for kw in range(3):
                    di, dj = kh - 1, kw - 1
                    if di == 0 and dj == 0:
                        continue
                    # dj=-1 taps read the col-(W-1)-zeroed copy; dj=+1 the
                    # col-0-zeroed copy; dj=0 the plain copy.  Row edges and
                    # corners fall in the zero halos / zeroed columns.
                    cpy = 0 if dj == 0 else (1 if dj == -1 else 2)
                    t = kh * 3 + kw
                    for b in range(B_TILE):
                        slab_ref[t * C:(t + 1) * C, b * M:(b + 1) * M] = \
                            pad_ref[3 * b + cpy, :, pl.ds(LPAD + di * W + dj, M)]

        def matmul_pair(i):
            # (128,576) @ (576, B_TILE*M): rows 0:C = 3x3 conv, rows C: = 1x1 conv.
            y = jnp.dot(wpair_ref[i], slab_ref[...],
                        preferred_element_type=jnp.float32) + bpair_ref[i]
            y = leaky(y)
            return y[:C], y[C:]

        def matmul_solo(i):
            y = jnp.dot(wsolo_ref[i], slab_ref[...],
                        preferred_element_type=jnp.float32) + bsolo_ref[i]
            return leaky(y)

        # nn.Dropout layers are the identity in eval/inference mode.
        stage(lambda b: x_ref[b])
        traj_1, x_0 = matmul_pair(0)          # f0 + r0 on x

        stage(lambda b: traj_1[:, b * M:(b + 1) * M])
        traj_2, x_1 = matmul_pair(1)          # f1 + r1 on traj_1

        stage(lambda b: traj_2[:, b * M:(b + 1) * M])
        traj_3, x_2 = matmul_pair(2)          # f2 + r2 on traj_2

        a3 = traj_3 + x_2
        stage(lambda b: a3[:, b * M:(b + 1) * M])
        traj_4 = matmul_solo(0)               # f3 on traj_3 + x_2

        a4 = traj_4 + x_1
        stage(lambda b: a4[:, b * M:(b + 1) * M])
        traj_5 = matmul_solo(1)               # f4 on traj_4 + x_1

        out = traj_5 + x_0
        for b in range(B_TILE):
            o_ref[b] = out[:, b * M:(b + 1) * M].astype(o_ref.dtype)

    scratch = [
        pltpu.VMEM((B_TILE * 3, C, P), jnp.bfloat16),    # padded edge-masked copies
        pltpu.VMEM((9 * C, B_TILE * M), jnp.bfloat16),   # im2col slab
    ]
    return kernel, scratch, P


def _choose_b_tile(N, M, max_pixels=4096, target_lanes=1024):
    """Largest batch-tile that fits the VMEM pixel budget, reaches ~1024 lanes
    if possible, and never shrinks the grid below 2 when N >= 2 (megacore)."""
    best = 1
    for b in range(1, N + 1):
        if N % b:
            continue
        if b * M > max_pixels:
            break
        if N >= 2 and (N // b) < 2:
            continue
        best = b
        if b * M >= target_lanes:
            break
    return best


# --------------------------------------------------------------------------
# Wrapper: NCHW in, NCHW out (no layout transposes anywhere)
# --------------------------------------------------------------------------
def trajectory_block(x_nchw, params, b_tile=None):
    """Forward pass of Trajectory_Block. x_nchw: (N, 64, H, W) float32."""
    N, C, H, W = x_nchw.shape
    M = H * W
    x2 = x_nchw.reshape(N, C, M)               # free reshape, stays channel-major
    if b_tile is None:
        b_tile = _choose_b_tile(N, M)
    assert N % b_tile == 0

    wpair, bpair = params["wpair"], params["bpair"]
    wsolo, bsolo = params["wsolo"], params["bsolo"]
    kernel, scratch, P = _make_traj_kernel(H, W, C, b_tile)

    # Conservative VMEM estimate -> per-generation-safe limit (cap 48 MiB:
    # within v5e/v6e 128 MiB and v7x 64 MiB physical VMEM).
    param_bytes = sum(int(np.prod(p.shape)) * p.dtype.itemsize
                      for p in (wpair, bpair, wsolo, bsolo))
    est = (2 * 2 * b_tile * C * M * 4          # double-buffered in/out blocks
           + 2 * param_bytes                   # weight/bias blocks
           + b_tile * 3 * C * P * 2            # padded-copies scratch
           + 9 * C * b_tile * M * 2            # im2col slab scratch
           + 8 * C * b_tile * M * 4)           # live f32 intermediates (headroom)
    vmem_limit = int(min(max(2 * est, 32 * 1024 * 1024), 48 * 1024 * 1024))

    out = pl.pallas_call(
        kernel,
        out_shape=jax.ShapeDtypeStruct((N, C, M), jnp.float32),
        grid_spec=pltpu.PrefetchScalarGridSpec(
            num_scalar_prefetch=0,
            grid=(N // b_tile,),               # one program per B_TILE images
            in_specs=[
                pl.BlockSpec((b_tile, C, M), lambda n: (n, 0, 0)),
                pl.BlockSpec(wpair.shape, lambda n: (0, 0, 0)),  # (3,128,576) bf16
                pl.BlockSpec(bpair.shape, lambda n: (0, 0, 0)),  # (3,128,1)   f32
                pl.BlockSpec(wsolo.shape, lambda n: (0, 0, 0)),  # (2, 64,576) bf16
                pl.BlockSpec(bsolo.shape, lambda n: (0, 0, 0)),  # (2, 64,1)   f32
            ],
            out_specs=pl.BlockSpec((b_tile, C, M), lambda n: (n, 0, 0)),
            scratch_shapes=scratch,
        ),
        compiler_params=pltpu.CompilerParams(
            dimension_semantics=("parallel",),   # megacore-shard over batch
            vmem_limit_bytes=vmem_limit,
        ),
    )(x2, wpair, bpair, wsolo, bsolo)
    return out.reshape(N, C, H, W)


# --------------------------------------------------------------------------
# Parameter packing: per-layer HWIO conv weights -> fused kernel layout
# --------------------------------------------------------------------------
def pack_params(raw):
    wf, bf = [], []
    for i in range(5):
        w = raw[f"f{i}_w"]                              # (3, 3, Ci, Co)
        ci, co = w.shape[2], w.shape[3]
        # (Co, 9*Ci): tap-major along the contraction dim, matching the order
        # in which the kernel fills the 9 slab row-blocks (t = kh*3 + kw).
        wcat = jnp.transpose(w.reshape(9, ci, co), (2, 0, 1)).reshape(co, 9 * ci)
        wf.append(wcat)
        bf.append(raw[f"f{i}_b"].reshape(co, 1))
    wr, br = [], []
    for j in range(3):
        w = raw[f"r{j}_w"]                              # (1, 1, Ci, Co)
        wr.append(w[0, 0].T)                            # (Co, Ci)
        br.append(raw[f"r{j}_b"].reshape(-1, 1))

    C = wr[0].shape[0]
    wpair, bpair = [], []
    for i in range(3):
        # Zero-pad the 1x1 weight into the center-tap columns [4C, 5C) and
        # stack it under the 3x3 weight: one (128,576) matmul per layer-pair.
        wr_full = jnp.zeros((C, 9 * C), jnp.float32).at[:, 4 * C:5 * C].set(wr[i])
        wpair.append(jnp.concatenate([wf[i], wr_full], axis=0))   # (2C, 9C)
        bpair.append(jnp.concatenate([bf[i], br[i]], axis=0))     # (2C, 1)
    return {
        "wpair": jnp.stack(wpair).astype(jnp.bfloat16),  # (3, 128, 576)
        "bpair": jnp.stack(bpair).astype(jnp.float32),   # (3, 128, 1)
        "wsolo": jnp.stack([wf[3], wf[4]]).astype(jnp.bfloat16),  # (2, 64, 576)
        "bsolo": jnp.stack([bf[3], bf[4]]).astype(jnp.float32),   # (2, 64, 1)
    }


# --------------------------------------------------------------------------
# Pure-JAX reference (lax.conv), numerically matched to the kernel:
# bf16 matmul operands, f32 accumulation, f32 bias/activation/residual math.
# --------------------------------------------------------------------------
def _conv_lrelu_ref(x_nchw, w_hwio, b, padding):
    y = jax.lax.conv_general_dilated(
        x_nchw.astype(jnp.bfloat16), w_hwio.astype(jnp.bfloat16),
        window_strides=(1, 1), padding=padding,
        dimension_numbers=("NCHW", "HWIO", "NCHW"),
        preferred_element_type=jnp.float32)
    y = y + b.reshape(1, -1, 1, 1)
    return jnp.where(y > 0, y, NEG_SLOPE * y)


def trajectory_block_ref(x_nchw, raw):
    f = lambda xx, i: _conv_lrelu_ref(xx, raw[f"f{i}_w"], raw[f"f{i}_b"], "SAME")
    r = lambda xx, j: _conv_lrelu_ref(xx, raw[f"r{j}_w"], raw[f"r{j}_b"], "VALID")
    x_0 = r(x_nchw, 0)
    traj_1 = f(x_nchw, 0)
    x_1 = r(traj_1, 1)
    traj_2 = f(traj_1, 1)
    x_2 = r(traj_2, 2)
    traj_3 = f(traj_2, 2)
    traj_4 = f(traj_3 + x_2, 3)
    traj_5 = f(traj_4 + x_1, 4)
    return traj_5 + x_0


# --------------------------------------------------------------------------
# Deterministic init (xavier_uniform, gain = calculate_gain('leaky_relu'))
# --------------------------------------------------------------------------
def init_raw_params(key, channels=64):
    gain = math.sqrt(2.0 / (1.0 + 0.01 ** 2))  # torch calculate_gain('leaky_relu')

    def xavier(k, ksize):
        fan_in = channels * ksize * ksize
        fan_out = channels * ksize * ksize
        bound = gain * math.sqrt(6.0 / (fan_in + fan_out))
        return jax.random.uniform(k, (ksize, ksize, channels, channels),
                                  jnp.float32, -bound, bound)

    raw = {}
    keys = jax.random.split(key, 16)
    for i in range(5):
        raw[f"f{i}_w"] = xavier(keys[i], 3)
        # Module init sets biases to 0; small random biases here so the bias
        # path of the kernel is actually exercised by the correctness check.
        raw[f"f{i}_b"] = jax.random.uniform(keys[5 + i], (channels,),
                                            jnp.float32, -0.1, 0.1)
    for j in range(3):
        raw[f"r{j}_w"] = xavier(keys[10 + j], 1)
        raw[f"r{j}_b"] = jax.random.uniform(keys[13 + j], (channels,),
                                            jnp.float32, -0.1, 0.1)
    return raw


# --------------------------------------------------------------------------
if __name__ == "__main__":
    key = jax.random.PRNGKey(0)
    k_params, k_x = jax.random.split(key)

    N, C, H, W = 2, 64, 16, 16        # C = 64 is fixed by the module definition
    raw = init_raw_params(k_params, channels=C)
    params = pack_params(raw)
    x = jax.random.normal(k_x, (N, C, H, W), jnp.float32)

    out = jax.jit(trajectory_block)(x, params)
    out = jax.block_until_ready(out)
    assert out.shape == (N, C, H, W) and out.dtype == jnp.float32

    ref = trajectory_block_ref(x, raw)
    np.testing.assert_allclose(np.asarray(out), np.asarray(ref),
                               rtol=2e-2, atol=2e-2)
    print("KERNEL_OK")
</pallas_src>

<mosaic_0001>
module attributes {stable_mosaic.version = 11 : i64} {
  func.func @kernel(%arg0: i32, %arg1: memref<1x64x256xf32, #tpu.memory_space<vmem>>, %arg2: memref<3x128x576xbf16, #tpu.memory_space<vmem>>, %arg3: memref<3x128x1xf32, #tpu.memory_space<vmem>>, %arg4: memref<2x64x576xbf16, #tpu.memory_space<vmem>>, %arg5: memref<2x64x1xf32, #tpu.memory_space<vmem>>, %arg6: memref<1x64x256xf32, #tpu.memory_space<vmem>>, %arg7: memref<3x64x512xbf16, #tpu.memory_space<vmem>>, %arg8: memref<576x256xbf16, #tpu.memory_space<vmem>>) attributes {dimension_semantics = [#tpu.dimension_semantics<parallel>], iteration_bounds = array<i64: 2>, scalar_prefetch = 0 : i64, scratch_operands = 2 : i64, tpu.core_type = #tpu.core_type<tc>, window_params = [{transform_indices = @transform_0, window_bounds = array<i64: 1, 64, 256>}, {pipeline_mode = #tpu.pipeline_mode<synchronous>, transform_indices = @transform_1, window_bounds = array<i64: 3, 128, 576>}, {pipeline_mode = #tpu.pipeline_mode<synchronous>, transform_indices = @transform_2, window_bounds = array<i64: 3, 128, 1>}, {pipeline_mode = #tpu.pipeline_mode<synchronous>, transform_indices = @transform_3, window_bounds = array<i64: 2, 64, 576>}, {pipeline_mode = #tpu.pipeline_mode<synchronous>, transform_indices = @transform_4, window_bounds = array<i64: 2, 64, 1>}, {transform_indices = @transform_5, window_bounds = array<i64: 1, 64, 256>}]} {
    %0 = tpu.iota {dimensions = array<i32: 1>} : vector<1x256xi32>
    %c16_i32 = arith.constant 16 : i32
    %c0_i32 = arith.constant 0 : i32
    %1 = arith.cmpi eq, %c16_i32, %c0_i32 : i32
    %c1_i32 = arith.constant 1 : i32
    %2 = arith.select %1, %c1_i32, %c16_i32 : i32
    %3 = vector.broadcast %2 : i32 to vector<1x256xi32>
    %4 = arith.remsi %0, %3 : vector<1x256xi32>
    %c0_i32_0 = arith.constant 0 : i32
    %5 = vector.broadcast %c0_i32_0 : i32 to vector<1x256xi32>
    %6 = arith.cmpi ne, %4, %5 : vector<1x256xi32>
    %c0_i32_1 = arith.constant 0 : i32
    %7 = vector.broadcast %c0_i32_1 : i32 to vector<1x256xi32>
    %8 = arith.cmpi slt, %4, %7 : vector<1x256xi32>
    %c0_i32_2 = arith.constant 0 : i32
    %9 = arith.cmpi slt, %2, %c0_i32_2 : i32
    %10 = vector.broadcast %9 : i1 to vector<1x256xi1>
    %11 = vector.broadcast %10 : vector<1x256xi1> to vector<1x256xi1>
    %12 = arith.xori %8, %11 : vector<1x256xi1>
    %13 = arith.andi %12, %6 : vector<1x256xi1>
    %14 = vector.broadcast %2 : i32 to vector<1x256xi32>
    %15 = arith.addi %4, %14 : vector<1x256xi32>
    %16 = arith.select %13, %15, %4 : vector<1x256xi1>, vector<1x256xi32>
    %c15_i32 = arith.constant 15 : i32
    %17 = vector.broadcast %c15_i32 : i32 to vector<1x256xi32>
    %18 = arith.cmpi ne, %16, %17 : vector<1x256xi32>
    %19 = arith.extui %18 : vector<1x256xi1> to vector<1x256xi32>
    %20 = arith.sitofp %19 : vector<1x256xi32> to vector<1x256xf32>
    %21 = vector.shape_cast %20 : vector<1x256xf32> to vector<1x256xf32>
    %22 = vector.broadcast %21 : vector<1x256xf32> to vector<64x256xf32>
    %c0_i32_3 = arith.constant 0 : i32
    %23 = vector.broadcast %c0_i32_3 : i32 to vector<1x256xi32>
    %24 = arith.cmpi ne, %16, %23 : vector<1x256xi32>
    %25 = arith.extui %24 : vector<1x256xi1> to vector<1x256xi32>
    %26 = arith.sitofp %25 : vector<1x256xi32> to vector<1x256xf32>
    %27 = vector.shape_cast %26 : vector<1x256xf32> to vector<1x256xf32>
    %28 = vector.broadcast %27 : vector<1x256xf32> to vector<64x256xf32>
    %cst = arith.constant 0.000000e+00 : bf16
    %29 = vector.broadcast %cst : bf16 to vector<3x64x128xbf16>
    %c0 = arith.constant 0 : index
    %c0_4 = arith.constant 0 : index
    %c0_5 = arith.constant 0 : index
    %30 = vector.load %arg7[%c0, %c0_4, %c0_5] : memref<3x64x512xbf16, #tpu.memory_space<vmem>>, vector<3x64x128xbf16>
    tpu.vector_store %arg7[%c0, %c0_4, %c0_5], %29 {strides = array<i32>} : memref<3x64x512xbf16, #tpu.memory_space<vmem>>, vector<3x64x128xbf16>,
    %cst_6 = arith.constant 0.000000e+00 : bf16
    %31 = vector.broadcast %cst_6 : bf16 to vector<3x64x128xbf16>
    %c0_7 = arith.constant 0 : index
    %c0_8 = arith.constant 0 : index
    %c384 = arith.constant 384 : index
    %32 = vector.load %arg7[%c0_7, %c0_8, %c384] : memref<3x64x512xbf16, #tpu.memory_space<vmem>>, vector<3x64x128xbf16>
    tpu.vector_store %arg7[%c0_7, %c0_8, %c384], %31 {strides = array<i32>} : memref<3x64x512xbf16, #tpu.memory_space<vmem>>, vector<3x64x128xbf16>,
    %c0_9 = arith.constant 0 : index
    %c0_10 = arith.constant 0 : index
    %c0_11 = arith.constant 0 : index
    %33 = vector.load %arg1[%c0_9, %c0_10, %c0_11] : memref<1x64x256xf32, #tpu.memory_space<vmem>>, vector<1x64x256xf32>
    %34 = vector.shape_cast %33 : vector<1x64x256xf32> to vector<64x256xf32>
    %35 = arith.truncf %34 : vector<64x256xf32> to vector<64x256xbf16>
    %c0_12 = arith.constant 0 : index
    %c0_13 = arith.constant 0 : index
    %c128 = arith.constant 128 : index
    %36 = vector.load %arg7[%c0_12, %c0_13, %c128] : memref<3x64x512xbf16, #tpu.memory_space<vmem>>, vector<1x64x256xbf16>
    %37 = vector.shape_cast %36 : vector<1x64x256xbf16> to vector<64x256xbf16>
    %38 = vector.shape_cast %35 : vector<64x256xbf16> to vector<1x64x256xbf16>
    tpu.vector_store %arg7[%c0_12, %c0_13, %c128], %38 {strides = array<i32>} : memref<3x64x512xbf16, #tpu.memory_space<vmem>>, vector<1x64x256xbf16>,
    %39 = arith.mulf %34, %22 : vector<64x256xf32>
    %40 = arith.truncf %39 : vector<64x256xf32> to vector<64x256xbf16>
    %c1 = arith.constant 1 : index
    %c0_14 = arith.constant 0 : index
    %c128_15 = arith.constant 128 : index
    %41 = vector.load %arg7[%c1, %c0_14, %c128_15] : memref<3x64x512xbf16, #tpu.memory_space<vmem>>, vector<1x64x256xbf16>
    %42 = vector.shape_cast %41 : vector<1x64x256xbf16> to vector<64x256xbf16>
    %43 = vector.shape_cast %40 : vector<64x256xbf16> to vector<1x64x256xbf16>
    tpu.vector_store %arg7[%c1, %c0_14, %c128_15], %43 {strides = array<i32>} : memref<3x64x512xbf16, #tpu.memory_space<vmem>>, vector<1x64x256xbf16>,
    %44 = arith.mulf %34, %28 : vector<64x256xf32>
    %45 = arith.truncf %44 : vector<64x256xf32> to vector<64x256xbf16>
    %c2 = arith.constant 2 : index
    %c0_16 = arith.constant 0 : index
    %c128_17 = arith.constant 128 : index
    %46 = vector.load %arg7[%c2, %c0_16, %c128_17] : memref<3x64x512xbf16, #tpu.memory_space<vmem>>, vector<1x64x256xbf16>
    %47 = vector.shape_cast %46 : vector<1x64x256xbf16> to vector<64x256xbf16>
    %48 = vector.shape_cast %45 : vector<64x256xbf16> to vector<1x64x256xbf16>
    tpu.vector_store %arg7[%c2, %c0_16, %c128_17], %48 {strides = array<i32>} : memref<3x64x512xbf16, #tpu.memory_space<vmem>>, vector<1x64x256xbf16>,
    %c256 = arith.constant 256 : index
    %c0_18 = arith.constant 0 : index
    %49 = vector.load %arg8[%c256, %c0_18] : memref<576x256xbf16, #tpu.memory_space<vmem>>, vector<64x256xbf16>
    tpu.vector_store %arg8[%c256, %c0_18], %35 {strides = array<i32>} : memref<576x256xbf16, #tpu.memory_space<vmem>>, vector<64x256xbf16>,
    %c1_19 = arith.constant 1 : index
    %c0_20 = arith.constant 0 : index
    %c111 = arith.constant 111 : index
    %50 = vector.load %arg7[%c1_19, %c0_20, %c111] : memref<3x64x512xbf16, #tpu.memory_space<vmem>>, vector<1x64x256xbf16>
    %51 = vector.shape_cast %50 : vector<1x64x256xbf16> to vector<64x256xbf16>
    %c0_21 = arith.constant 0 : index
    %c0_22 = arith.constant 0 : index
    %52 = vector.load %arg8[%c0_21, %c0_22] : memref<576x256xbf16, #tpu.memory_space<vmem>>, vector<64x256xbf16>
    tpu.vector_store %arg8[%c0_21, %c0_22], %51 {strides = array<i32>} : memref<576x256xbf16, #tpu.memory_space<vmem>>, vector<64x256xbf16>,
    %c0_23 = arith.constant 0 : index
    %c0_24 = arith.constant 0 : index
    %c112 = arith.constant 112 : index
    %53 = vector.load %arg7[%c0_23, %c0_24, %c112] : memref<3x64x512xbf16, #tpu.memory_space<vmem>>, vector<1x64x256xbf16>
    %54 = vector.shape_cast %53 : vector<1x64x256xbf16> to vector<64x256xbf16>
    %c64 = arith.constant 64 : index
    %c0_25 = arith.constant 0 : index
    %55 = vector.load %arg8[%c64, %c0_25] : memref<576x256xbf16, #tpu.memory_space<vmem>>, vector<64x256xbf16>
    tpu.vector_store %arg8[%c64, %c0_25], %54 {strides = array<i32>} : memref<576x256xbf16, #tpu.memory_space<vmem>>, vector<64x256xbf16>,
    %c2_26 = arith.constant 2 : index
    %c0_27 = arith.constant 0 : index
    %c113 = arith.constant 113 : index
    %56 = vector.load %arg7[%c2_26, %c0_27, %c113] : memref<3x64x512xbf16, #tpu.memory_space<vmem>>, vector<1x64x256xbf16>
    %57 = vector.shape_cast %56 : vector<1x64x256xbf16> to vector<64x256xbf16>
    %c128_28 = arith.constant 128 : index
    %c0_29 = arith.constant 0 : index
    %58 = vector.load %arg8[%c128_28, %c0_29] : memref<576x256xbf16, #tpu.memory_space<vmem>>, vector<64x256xbf16>
    tpu.vector_store %arg8[%c128_28, %c0_29], %57 {strides = array<i32>} : memref<576x256xbf16, #tpu.memory_space<vmem>>, vector<64x256xbf16>,
    %c1_30 = arith.constant 1 : index
    %c0_31 = arith.constant 0 : index
    %c127 = arith.constant 127 : index
    %59 = vector.load %arg7[%c1_30, %c0_31, %c127] : memref<3x64x512xbf16, #tpu.memory_space<vmem>>, vector<1x64x256xbf16>
    %60 = vector.shape_cast %59 : vector<1x64x256xbf16> to vector<64x256xbf16>
    %c192 = arith.constant 192 : index
    %c0_32 = arith.constant 0 : index
    %61 = vector.load %arg8[%c192, %c0_32] : memref<576x256xbf16, #tpu.memory_space<vmem>>, vector<64x256xbf16>
    tpu.vector_store %arg8[%c192, %c0_32], %60 {strides = array<i32>} : memref<576x256xbf16, #tpu.memory_space<vmem>>, vector<64x256xbf16>,
    %c2_33 = arith.constant 2 : index
    %c0_34 = arith.constant 0 : index
    %c129 = arith.constant 129 : index
    %62 = vector.load %arg7[%c2_33, %c0_34, %c129] : memref<3x64x512xbf16, #tpu.memory_space<vmem>>, vector<1x64x256xbf16>
    %63 = vector.shape_cast %62 : vector<1x64x256xbf16> to vector<64x256xbf16>
    %c320 = arith.constant 320 : index
    %c0_35 = arith.constant 0 : index
    %64 = vector.load %arg8[%c320, %c0_35] : memref<576x256xbf16, #tpu.memory_space<vmem>>, vector<64x256xbf16>
    tpu.vector_store %arg8[%c320, %c0_35], %63 {strides = array<i32>} : memref<576x256xbf16, #tpu.memory_space<vmem>>, vector<64x256xbf16>,
    %c1_36 = arith.constant 1 : index
    %c0_37 = arith.constant 0 : index
    %c143 = arith.constant 143 : index
    %65 = vector.load %arg7[%c1_36, %c0_37, %c143] : memref<3x64x512xbf16, #tpu.memory_space<vmem>>, vector<1x64x256xbf16>
    %66 = vector.shape_cast %65 : vector<1x64x256xbf16> to vector<64x256xbf16>
    %c384_38 = arith.constant 384 : index
    %c0_39 = arith.constant 0 : index
    %67 = vector.load %arg8[%c384_38, %c0_39] : memref<576x256xbf16, #tpu.memory_space<vmem>>, vector<64x256xbf16>
    tpu.vector_store %arg8[%c384_38, %c0_39], %66 {strides = array<i32>} : memref<576x256xbf16, #tpu.memory_space<vmem>>, vector<64x256xbf16>,
    %c0_40 = arith.constant 0 : index
    %c0_41 = arith.constant 0 : index
    %c144 = arith.constant 144 : index
    %68 = vector.load %arg7[%c0_40, %c0_41, %c144] : memref<3x64x512xbf16, #tpu.memory_space<vmem>>, vector<1x64x256xbf16>
    %69 = vector.shape_cast %68 : vector<1x64x256xbf16> to vector<64x256xbf16>
    %c448 = arith.constant 448 : index
    %c0_42 = arith.constant 0 : index
    %70 = vector.load %arg8[%c448, %c0_42] : memref<576x256xbf16, #tpu.memory_space<vmem>>, vector<64x256xbf16>
    tpu.vector_store %arg8[%c448, %c0_42], %69 {strides = array<i32>} : memref<576x256xbf16, #tpu.memory_space<vmem>>, vector<64x256xbf16>,
    %c2_43 = arith.constant 2 : index
    %c0_44 = arith.constant 0 : index
    %c145 = arith.constant 145 : index
    %71 = vector.load %arg7[%c2_43, %c0_44, %c145] : memref<3x64x512xbf16, #tpu.memory_space<vmem>>, vector<1x64x256xbf16>
    %72 = vector.shape_cast %71 : vector<1x64x256xbf16> to vector<64x256xbf16>
    %c512 = arith.constant 512 : index
    %c0_45 = arith.constant 0 : index
    %73 = vector.load %arg8[%c512, %c0_45] : memref<576x256xbf16, #tpu.memory_space<vmem>>, vector<64x256xbf16>
    tpu.vector_store %arg8[%c512, %c0_45], %72 {strides = array<i32>} : memref<576x256xbf16, #tpu.memory_space<vmem>>, vector<64x256xbf16>,
    %c0_46 = arith.constant 0 : index
    %c0_47 = arith.constant 0 : index
    %c0_48 = arith.constant 0 : index
    %74 = vector.load %arg2[%c0_46, %c0_47, %c0_48] : memref<3x128x576xbf16, #tpu.memory_space<vmem>>, vector<1x128x576xbf16>
    %75 = vector.shape_cast %74 : vector<1x128x576xbf16> to vector<128x576xbf16>
    %c0_49 = arith.constant 0 : index
    %c0_50 = arith.constant 0 : index
    %76 = vector.load %arg8[%c0_49, %c0_50] : memref<576x256xbf16, #tpu.memory_space<vmem>>, vector<576x256xbf16>
    %cst_51 = arith.constant dense<0.000000e+00> : vector<128x256xf32>
    %77 = tpu.matmul %75, %76, %cst_51 {dimension_numbers = #tpu.dot_dimension_numbers<[1], [0], [0], [1], [0, 0, 1, 1], [], []>} : vector<128x576xbf16>, vector<576x256xbf16>, vector<128x256xf32> -> vector<128x256xf32>
    %c0_52 = arith.constant 0 : index
    %c0_53 = arith.constant 0 : index
    %c0_54 = arith.constant 0 : index
    %78 = vector.load %arg3[%c0_52, %c0_53, %c0_54] : memref<3x128x1xf32, #tpu.memory_space<vmem>>, vector<1x128x1xf32>
    %79 = vector.shape_cast %78 : vector<1x128x1xf32> to vector<128x1xf32>
    %80 = vector.broadcast %79 : vector<128x1xf32> to vector<128x256xf32>
    %81 = arith.addf %77, %80 : vector<128x256xf32>
    %cst_55 = arith.constant 2.000000e-01 : f32
    %82 = vector.broadcast %cst_55 : f32 to vector<128x256xf32>
    %83 = arith.mulf %82, %81 : vector<128x256xf32>
    %84 = arith.maximumf %81, %83 : vector<128x256xf32>
    %85 = vector.extract_strided_slice %84 {offsets = [0, 0], sizes = [64, 256], strides = [1, 1]} : vector<128x256xf32> to vector<64x256xf32>
    %86 = vector.extract_strided_slice %84 {offsets = [64, 0], sizes = [64, 256], strides = [1, 1]} : vector<128x256xf32> to vector<64x256xf32>
    %87 = arith.truncf %85 : vector<64x256xf32> to vector<64x256xbf16>
    %c0_56 = arith.constant 0 : index
    %c0_57 = arith.constant 0 : index
    %c128_58 = arith.constant 128 : index
    %88 = vector.load %arg7[%c0_56, %c0_57, %c128_58] : memref<3x64x512xbf16, #tpu.memory_space<vmem>>, vector<1x64x256xbf16>
    %89 = vector.shape_cast %88 : vector<1x64x256xbf16> to vector<64x256xbf16>
    %90 = vector.shape_cast %87 : vector<64x256xbf16> to vector<1x64x256xbf16>
    tpu.vector_store %arg7[%c0_56, %c0_57, %c128_58], %90 {strides = array<i32>} : memref<3x64x512xbf16, #tpu.memory_space<vmem>>, vector<1x64x256xbf16>,
    %91 = arith.mulf %85, %22 : vector<64x256xf32>
    %92 = arith.truncf %91 : vector<64x256xf32> to vector<64x256xbf16>
    %c1_59 = arith.constant 1 : index
    %c0_60 = arith.constant 0 : index
    %c128_61 = arith.constant 128 : index
    %93 = vector.load %arg7[%c1_59, %c0_60, %c128_61] : memref<3x64x512xbf16, #tpu.memory_space<vmem>>, vector<1x64x256xbf16>
    %94 = vector.shape_cast %93 : vector<1x64x256xbf16> to vector<64x256xbf16>
    %95 = vector.shape_cast %92 : vector<64x256xbf16> to vector<1x64x256xbf16>
    tpu.vector_store %arg7[%c1_59, %c0_60, %c128_61], %95 {strides = array<i32>} : memref<3x64x512xbf16, #tpu.memory_space<vmem>>, vector<1x64x256xbf16>,
    %96 = arith.mulf %85, %28 : vector<64x256xf32>
    %97 = arith.truncf %96 : vector<64x256xf32> to vector<64x256xbf16>
    %c2_62 = arith.constant 2 : index
    %c0_63 = arith.constant 0 : index
    %c128_64 = arith.constant 128 : index
    %98 = vector.load %arg7[%c2_62, %c0_63, %c128_64] : memref<3x64x512xbf16, #tpu.memory_space<vmem>>, vector<1x64x256xbf16>
    %99 = vector.shape_cast %98 : vector<1x64x256xbf16> to vector<64x256xbf16>
    %100 = vector.shape_cast %97 : vector<64x256xbf16> to vector<1x64x256xbf16>
    tpu.vector_store %arg7[%c2_62, %c0_63, %c128_64], %100 {strides = array<i32>} : memref<3x64x512xbf16, #tpu.memory_space<vmem>>, vector<1x64x256xbf16>,
    %c256_65 = arith.constant 256 : index
    %c0_66 = arith.constant 0 : index
    %101 = vector.load %arg8[%c256_65, %c0_66] : memref<576x256xbf16, #tpu.memory_space<vmem>>, vector<64x256xbf16>
    tpu.vector_store %arg8[%c256_65, %c0_66], %87 {strides = array<i32>} : memref<576x256xbf16, #tpu.memory_space<vmem>>, vector<64x256xbf16>,
    %c1_67 = arith.constant 1 : index
    %c0_68 = arith.constant 0 : index
    %c111_69 = arith.constant 111 : index
    %102 = vector.load %arg7[%c1_67, %c0_68, %c111_69] : memref<3x64x512xbf16, #tpu.memory_space<vmem>>, vector<1x64x256xbf16>
    %103 = vector.shape_cast %102 : vector<1x64x256xbf16> to vector<64x256xbf16>
    %c0_70 = arith.constant 0 : index
    %c0_71 = arith.constant 0 : index
    %104 = vector.load %arg8[%c0_70, %c0_71] : memref<576x256xbf16, #tpu.memory_space<vmem>>, vector<64x256xbf16>
    tpu.vector_store %arg8[%c0_70, %c0_71], %103 {strides = array<i32>} : memref<576x256xbf16, #tpu.memory_space<vmem>>, vector<64x256xbf16>,
    %c0_72 = arith.constant 0 : index
    %c0_73 = arith.constant 0 : index
    %c112_74 = arith.constant 112 : index
    %105 = vector.load %arg7[%c0_72, %c0_73, %c112_74] : memref<3x64x512xbf16, #tpu.memory_space<vmem>>, vector<1x64x256xbf16>
    %106 = vector.shape_cast %105 : vector<1x64x256xbf16> to vector<64x256xbf16>
    %c64_75 = arith.constant 64 : index
    %c0_76 = arith.constant 0 : index
    %107 = vector.load %arg8[%c64_75, %c0_76] : memref<576x256xbf16, #tpu.memory_space<vmem>>, vector<64x256xbf16>
    tpu.vector_store %arg8[%c64_75, %c0_76], %106 {strides = array<i32>} : memref<576x256xbf16, #tpu.memory_space<vmem>>, vector<64x256xbf16>,
    %c2_77 = arith.constant 2 : index
    %c0_78 = arith.constant 0 : index
    %c113_79 = arith.constant 113 : index
    %108 = vector.load %arg7[%c2_77, %c0_78, %c113_79] : memref<3x64x512xbf16, #tpu.memory_space<vmem>>, vector<1x64x256xbf16>
    %109 = vector.shape_cast %108 : vector<1x64x256xbf16> to vector<64x256xbf16>
    %c128_80 = arith.constant 128 : index
    %c0_81 = arith.constant 0 : index
    %110 = vector.load %arg8[%c128_80, %c0_81] : memref<576x256xbf16, #tpu.memory_space<vmem>>, vector<64x256xbf16>
    tpu.vector_store %arg8[%c128_80, %c0_81], %109 {strides = array<i32>} : memref<576x256xbf16, #tpu.memory_space<vmem>>, vector<64x256xbf16>,
    %c1_82 = arith.constant 1 : index
    %c0_83 = arith.constant 0 : index
    %c127_84 = arith.constant 127 : index
    %111 = vector.load %arg7[%c1_82, %c0_83, %c127_84] : memref<3x64x512xbf16, #tpu.memory_space<vmem>>, vector<1x64x256xbf16>
    %112 = vector.shape_cast %111 : vector<1x64x256xbf16> to vector<64x256xbf16>
    %c192_85 = arith.constant 192 : index
    %c0_86 = arith.constant 0 : index
    %113 = vector.load %arg8[%c192_85, %c0_86] : memref<576x256xbf16, #tpu.memory_space<vmem>>, vector<64x256xbf16>
    tpu.vector_store %arg8[%c192_85, %c0_86], %112 {strides = array<i32>} : memref<576x256xbf16, #tpu.memory_space<vmem>>, vector<64x256xbf16>,
    %c2_87 = arith.constant 2 : index
    %c0_88 = arith.constant 0 : index
    %c129_89 = arith.constant 129 : index
    %114 = vector.load %arg7[%c2_87, %c0_88, %c129_89] : memref<3x64x512xbf16, #tpu.memory_space<vmem>>, vector<1x64x256xbf16>
    %115 = vector.shape_cast %114 : vector<1x64x256xbf16> to vector<64x256xbf16>
    %c320_90 = arith.constant 320 : index
    %c0_91 = arith.constant 0 : index
    %116 = vector.load %arg8[%c320_90, %c0_91] : memref<576x256xbf16, #tpu.memory_space<vmem>>, vector<64x256xbf16>
    tpu.vector_store %arg8[%c320_90, %c0_91], %115 {strides = array<i32>} : memref<576x256xbf16, #tpu.memory_space<vmem>>, vector<64x256xbf16>,
    %c1_92 = arith.constant 1 : index
    %c0_93 = arith.constant 0 : index
    %c143_94 = arith.constant 143 : index
    %117 = vector.load %arg7[%c1_92, %c0_93, %c143_94] : memref<3x64x512xbf16, #tpu.memory_space<vmem>>, vector<1x64x256xbf16>
    %118 = vector.shape_cast %117 : vector<1x64x256xbf16> to vector<64x256xbf16>
    %c384_95 = arith.constant 384 : index
    %c0_96 = arith.constant 0 : index
    %119 = vector.load %arg8[%c384_95, %c0_96] : memref<576x256xbf16, #tpu.memory_space<vmem>>, vector<64x256xbf16>
    tpu.vector_store %arg8[%c384_95, %c0_96], %118 {strides = array<i32>} : memref<576x256xbf16, #tpu.memory_space<vmem>>, vector<64x256xbf16>,
    %c0_97 = arith.constant 0 : index
    %c0_98 = arith.constant 0 : index
    %c144_99 = arith.constant 144 : index
    %120 = vector.load %arg7[%c0_97, %c0_98, %c144_99] : memref<3x64x512xbf16, #tpu.memory_space<vmem>>, vector<1x64x256xbf16>
    %121 = vector.shape_cast %120 : vector<1x64x256xbf16> to vector<64x256xbf16>
    %c448_100 = arith.constant 448 : index
    %c0_101 = arith.constant 0 : index
    %122 = vector.load %arg8[%c448_100, %c0_101] : memref<576x256xbf16, #tpu.memory_space<vmem>>, vector<64x256xbf16>
    tpu.vector_store %arg8[%c448_100, %c0_101], %121 {strides = array<i32>} : memref<576x256xbf16, #tpu.memory_space<vmem>>, vector<64x256xbf16>,
    %c2_102 = arith.constant 2 : index
    %c0_103 = arith.constant 0 : index
    %c145_104 = arith.constant 145 : index
    %123 = vector.load %arg7[%c2_102, %c0_103, %c145_104] : memref<3x64x512xbf16, #tpu.memory_space<vmem>>, vector<1x64x256xbf16>
    %124 = vector.shape_cast %123 : vector<1x64x256xbf16> to vector<64x256xbf16>
    %c512_105 = arith.constant 512 : index
    %c0_106 = arith.constant 0 : index
    %125 = vector.load %arg8[%c512_105, %c0_106] : memref<576x256xbf16, #tpu.memory_space<vmem>>, vector<64x256xbf16>
    tpu.vector_store %arg8[%c512_105, %c0_106], %124 {strides = array<i32>} : memref<576x256xbf16, #tpu.memory_space<vmem>>, vector<64x256xbf16>,
    %c1_107 = arith.constant 1 : index
    %c0_108 = arith.constant 0 : index
    %c0_109 = arith.constant 0 : index
    %126 = vector.load %arg2[%c1_107, %c0_108, %c0_109] : memref<3x128x576xbf16, #tpu.memory_space<vmem>>, vector<1x128x576xbf16>
    %127 = vector.shape_cast %126 : vector<1x128x576xbf16> to vector<128x576xbf16>
    %c0_110 = arith.constant 0 : index
    %c0_111 = arith.constant 0 : index
    %128 = vector.load %arg8[%c0_110, %c0_111] : memref<576x256xbf16, #tpu.memory_space<vmem>>, vector<576x256xbf16>
    %cst_112 = arith.constant dense<0.000000e+00> : vector<128x256xf32>
    %129 = tpu.matmul %127, %128, %cst_112 {dimension_numbers = #tpu.dot_dimension_numbers<[1], [0], [0], [1], [0, 0, 1, 1], [], []>} : vector<128x576xbf16>, vector<576x256xbf16>, vector<128x256xf32> -> vector<128x256xf32>
    %c1_113 = arith.constant 1 : index
    %c0_114 = arith.constant 0 : index
    %c0_115 = arith.constant 0 : index
    %130 = vector.load %arg3[%c1_113, %c0_114, %c0_115] : memref<3x128x1xf32, #tpu.memory_space<vmem>>, vector<1x128x1xf32>
    %131 = vector.shape_cast %130 : vector<1x128x1xf32> to vector<128x1xf32>
    %132 = vector.broadcast %131 : vector<128x1xf32> to vector<128x256xf32>
    %133 = arith.addf %129, %132 : vector<128x256xf32>
    %cst_116 = arith.constant 2.000000e-01 : f32
    %134 = vector.broadcast %cst_116 : f32 to vector<128x256xf32>
    %135 = arith.mulf %134, %133 : vector<128x256xf32>
    %136 = arith.maximumf %133, %135 : vector<128x256xf32>
    %137 = vector.extract_strided_slice %136 {offsets = [0, 0], sizes = [64, 256], strides = [1, 1]} : vector<128x256xf32> to vector<64x256xf32>
    %138 = vector.extract_strided_slice %136 {offsets = [64, 0], sizes = [64, 256], strides = [1, 1]} : vector<128x256xf32> to vector<64x256xf32>
    %139 = arith.truncf %137 : vector<64x256xf32> to vector<64x256xbf16>
    %c0_117 = arith.constant 0 : index
    %c0_118 = arith.constant 0 : index
    %c128_119 = arith.constant 128 : index
    %140 = vector.load %arg7[%c0_117, %c0_118, %c128_119] : memref<3x64x512xbf16, #tpu.memory_space<vmem>>, vector<1x64x256xbf16>
    %141 = vector.shape_cast %140 : vector<1x64x256xbf16> to vector<64x256xbf16>
    %142 = vector.shape_cast %139 : vector<64x256xbf16> to vector<1x64x256xbf16>
    tpu.vector_store %arg7[%c0_117, %c0_118, %c128_119], %142 {strides = array<i32>} : memref<3x64x512xbf16, #tpu.memory_space<vmem>>, vector<1x64x256xbf16>,
    %143 = arith.mulf %137, %22 : vector<64x256xf32>
    %144 = arith.truncf %143 : vector<64x256xf32> to vector<64x256xbf16>
    %c1_120 = arith.constant 1 : index
    %c0_121 = arith.constant 0 : index
    %c128_122 = arith.constant 128 : index
    %145 = vector.load %arg7[%c1_120, %c0_121, %c128_122] : memref<3x64x512xbf16, #tpu.memory_space<vmem>>, vector<1x64x256xbf16>
    %146 = vector.shape_cast %145 : vector<1x64x256xbf16> to vector<64x256xbf16>
    %147 = vector.shape_cast %144 : vector<64x256xbf16> to vector<1x64x256xbf16>
    tpu.vector_store %arg7[%c1_120, %c0_121, %c128_122], %147 {strides = array<i32>} : memref<3x64x512xbf16, #tpu.memory_space<vmem>>, vector<1x64x256xbf16>,
    %148 = arith.mulf %137, %28 : vector<64x256xf32>
    %149 = arith.truncf %148 : vector<64x256xf32> to vector<64x256xbf16>
    %c2_123 = arith.constant 2 : index
    %c0_124 = arith.constant 0 : index
    %c128_125 = arith.constant 128 : index
    %150 = vector.load %arg7[%c2_123, %c0_124, %c128_125] : memref<3x64x512xbf16, #tpu.memory_space<vmem>>, vector<1x64x256xbf16>
    %151 = vector.shape_cast %150 : vector<1x64x256xbf16> to vector<64x256xbf16>
    %152 = vector.shape_cast %149 : vector<64x256xbf16> to vector<1x64x256xbf16>
    tpu.vector_store %arg7[%c2_123, %c0_124, %c128_125], %152 {strides = array<i32>} : memref<3x64x512xbf16, #tpu.memory_space<vmem>>, vector<1x64x256xbf16>,
    %c256_126 = arith.constant 256 : index
    %c0_127 = arith.constant 0 : index
    %153 = vector.load %arg8[%c256_126, %c0_127] : memref<576x256xbf16, #tpu.memory_space<vmem>>, vector<64x256xbf16>
    tpu.vector_store %arg8[%c256_126, %c0_127], %139 {strides = array<i32>} : memref<576x256xbf16, #tpu.memory_space<vmem>>, vector<64x256xbf16>,
    %c1_128 = arith.constant 1 : index
    %c0_129 = arith.constant 0 : index
    %c111_130 = arith.constant 111 : index
    %154 = vector.load %arg7[%c1_128, %c0_129, %c111_130] : memref<3x64x512xbf16, #tpu.memory_space<vmem>>, vector<1x64x256xbf16>
    %155 = vector.shape_cast %154 : vector<1x64x256xbf16> to vector<64x256xbf16>
    %c0_131 = arith.constant 0 : index
    %c0_132 = arith.constant 0 : index
    %156 = vector.load %arg8[%c0_131, %c0_132] : memref<576x256xbf16, #tpu.memory_space<vmem>>, vector<64x256xbf16>
    tpu.vector_store %arg8[%c0_131, %c0_132], %155 {strides = array<i32>} : memref<576x256xbf16, #tpu.memory_space<vmem>>, vector<64x256xbf16>,
    %c0_133 = arith.constant 0 : index
    %c0_134 = arith.constant 0 : index
    %c112_135 = arith.constant 112 : index
    %157 = vector.load %arg7[%c0_133, %c0_134, %c112_135] : memref<3x64x512xbf16, #tpu.memory_space<vmem>>, vector<1x64x256xbf16>
    %158 = vector.shape_cast %157 : vector<1x64x256xbf16> to vector<64x256xbf16>
    %c64_136 = arith.constant 64 : index
    %c0_137 = arith.constant 0 : index
    %159 = vector.load %arg8[%c64_136, %c0_137] : memref<576x256xbf16, #tpu.memory_space<vmem>>, vector<64x256xbf16>
    tpu.vector_store %arg8[%c64_136, %c0_137], %158 {strides = array<i32>} : memref<576x256xbf16, #tpu.memory_space<vmem>>, vector<64x256xbf16>,
    %c2_138 = arith.constant 2 : index
    %c0_139 = arith.constant 0 : index
    %c113_140 = arith.constant 113 : index
    %160 = vector.load %arg7[%c2_138, %c0_139, %c113_140] : memref<3x64x512xbf16, #tpu.memory_space<vmem>>, vector<1x64x256xbf16>
    %161 = vector.shape_cast %160 : vector<1x64x256xbf16> to vector<64x256xbf16>
    %c128_141 = arith.constant 128 : index
    %c0_142 = arith.constant 0 : index
    %162 = vector.load %arg8[%c128_141, %c0_142] : memref<576x256xbf16, #tpu.memory_space<vmem>>, vector<64x256xbf16>
    tpu.vector_store %arg8[%c128_141, %c0_142], %161 {strides = array<i32>} : memref<576x256xbf16, #tpu.memory_space<vmem>>, vector<64x256xbf16>,
    %c1_143 = arith.constant 1 : index
    %c0_144 = arith.constant 0 : index
    %c127_145 = arith.constant 127 : index
    %163 = vector.load %arg7[%c1_143, %c0_144, %c127_145] : memref<3x64x512xbf16, #tpu.memory_space<vmem>>, vector<1x64x256xbf16>
    %164 = vector.shape_cast %163 : vector<1x64x256xbf16> to vector<64x256xbf16>
    %c192_146 = arith.constant 192 : index
    %c0_147 = arith.constant 0 : index
    %165 = vector.load %arg8[%c192_146, %c0_147] : memref<576x256xbf16, #tpu.memory_space<vmem>>, vector<64x256xbf16>
    tpu.vector_store %arg8[%c192_146, %c0_147], %164 {strides = array<i32>} : memref<576x256xbf16, #tpu.memory_space<vmem>>, vector<64x256xbf16>,
    %c2_148 = arith.constant 2 : index
    %c0_149 = arith.constant 0 : index
    %c129_150 = arith.constant 129 : index
    %166 = vector.load %arg7[%c2_148, %c0_149, %c129_150] : memref<3x64x512xbf16, #tpu.memory_space<vmem>>, vector<1x64x256xbf16>
    %167 = vector.shape_cast %166 : vector<1x64x256xbf16> to vector<64x256xbf16>
    %c320_151 = arith.constant 320 : index
    %c0_152 = arith.constant 0 : index
    %168 = vector.load %arg8[%c320_151, %c0_152] : memref<576x256xbf16, #tpu.memory_space<vmem>>, vector<64x256xbf16>
    tpu.vector_store %arg8[%c320_151, %c0_152], %167 {strides = array<i32>} : memref<576x256xbf16, #tpu.memory_space<vmem>>, vector<64x256xbf16>,
    %c1_153 = arith.constant 1 : index
    %c0_154 = arith.constant 0 : index
    %c143_155 = arith.constant 143 : index
    %169 = vector.load %arg7[%c1_153, %c0_154, %c143_155] : memref<3x64x512xbf16, #tpu.memory_space<vmem>>, vector<1x64x256xbf16>
    %170 = vector.shape_cast %169 : vector<1x64x256xbf16> to vector<64x256xbf16>
    %c384_156 = arith.constant 384 : index
    %c0_157 = arith.constant 0 : index
    %171 = vector.load %arg8[%c384_156, %c0_157] : memref<576x256xbf16, #tpu.memory_space<vmem>>, vector<64x256xbf16>
    tpu.vector_store %arg8[%c384_156, %c0_157], %170 {strides = array<i32>} : memref<576x256xbf16, #tpu.memory_space<vmem>>, vector<64x256xbf16>,
    %c0_158 = arith.constant 0 : index
    %c0_159 = arith.constant 0 : index
    %c144_160 = arith.constant 144 : index
    %172 = vector.load %arg7[%c0_158, %c0_159, %c144_160] : memref<3x64x512xbf16, #tpu.memory_space<vmem>>, vector<1x64x256xbf16>
    %173 = vector.shape_cast %172 : vector<1x64x256xbf16> to vector<64x256xbf16>
    %c448_161 = arith.constant 448 : index
    %c0_162 = arith.constant 0 : index
    %174 = vector.load %arg8[%c448_161, %c0_162] : memref<576x256xbf16, #tpu.memory_space<vmem>>, vector<64x256xbf16>
    tpu.vector_store %arg8[%c448_161, %c0_162], %173 {strides = array<i32>} : memref<576x256xbf16, #tpu.memory_space<vmem>>, vector<64x256xbf16>,
    %c2_163 = arith.constant 2 : index
    %c0_164 = arith.constant 0 : index
    %c145_165 = arith.constant 145 : index
    %175 = vector.load %arg7[%c2_163, %c0_164, %c145_165] : memref<3x64x512xbf16, #tpu.memory_space<vmem>>, vector<1x64x256xbf16>
    %176 = vector.shape_cast %175 : vector<1x64x256xbf16> to vector<64x256xbf16>
    %c512_166 = arith.constant 512 : index
    %c0_167 = arith.constant 0 : index
    %177 = vector.load %arg8[%c512_166, %c0_167] : memref<576x256xbf16, #tpu.memory_space<vmem>>, vector<64x256xbf16>
    tpu.vector_store %arg8[%c512_166, %c0_167], %176 {strides = array<i32>} : memref<576x256xbf16, #tpu.memory_space<vmem>>, vector<64x256xbf16>,
    %c2_168 = arith.constant 2 : index
    %c0_169 = arith.constant 0 : index
    %c0_170 = arith.constant 0 : index
    %178 = vector.load %arg2[%c2_168, %c0_169, %c0_170] : memref<3x128x576xbf16, #tpu.memory_space<vmem>>, vector<1x128x576xbf16>
    %179 = vector.shape_cast %178 : vector<1x128x576xbf16> to vector<128x576xbf16>
    %c0_171 = arith.constant 0 : index
    %c0_172 = arith.constant 0 : index
    %180 = vector.load %arg8[%c0_171, %c0_172] : memref<576x256xbf16, #tpu.memory_space<vmem>>, vector<576x256xbf16>
    %cst_173 = arith.constant dense<0.000000e+00> : vector<128x256xf32>
    %181 = tpu.matmul %179, %180, %cst_173 {dimension_numbers = #tpu.dot_dimension_numbers<[1], [0], [0], [1], [0, 0, 1, 1], [], []>} : vector<128x576xbf16>, vector<576x256xbf16>, vector<128x256xf32> -> vector<128x256xf32>
    %c2_174 = arith.constant 2 : index
    %c0_175 = arith.constant 0 : index
    %c0_176 = arith.constant 0 : index
    %182 = vector.load %arg3[%c2_174, %c0_175, %c0_176] : memref<3x128x1xf32, #tpu.memory_space<vmem>>, vector<1x128x1xf32>
    %183 = vector.shape_cast %182 : vector<1x128x1xf32> to vector<128x1xf32>
    %184 = vector.broadcast %183 : vector<128x1xf32> to vector<128x256xf32>
    %185 = arith.addf %181, %184 : vector<128x256xf32>
    %cst_177 = arith.constant 2.000000e-01 : f32
    %186 = vector.broadcast %cst_177 : f32 to vector<128x256xf32>
    %187 = arith.mulf %186, %185 : vector<128x256xf32>
    %188 = arith.maximumf %185, %187 : vector<128x256xf32>
    %189 = vector.extract_strided_slice %188 {offsets = [0, 0], sizes = [64, 256], strides = [1, 1]} : vector<128x256xf32> to vector<64x256xf32>
    %190 = vector.extract_strided_slice %188 {offsets = [64, 0], sizes = [64, 256], strides = [1, 1]} : vector<128x256xf32> to vector<64x256xf32>
    %191 = arith.addf %189, %190 : vector<64x256xf32>
    %192 = arith.truncf %191 : vector<64x256xf32> to vector<64x256xbf16>
    %c0_178 = arith.constant 0 : index
    %c0_179 = arith.constant 0 : index
    %c128_180 = arith.constant 128 : index
    %193 = vector.load %arg7[%c0_178, %c0_179, %c128_180] : memref<3x64x512xbf16, #tpu.memory_space<vmem>>, vector<1x64x256xbf16>
    %194 = vector.shape_cast %193 : vector<1x64x256xbf16> to vector<64x256xbf16>
    %195 = vector.shape_cast %192 : vector<64x256xbf16> to vector<1x64x256xbf16>
    tpu.vector_store %arg7[%c0_178, %c0_179, %c128_180], %195 {strides = array<i32>} : memref<3x64x512xbf16, #tpu.memory_space<vmem>>, vector<1x64x256xbf16>,
    %196 = arith.mulf %191, %22 : vector<64x256xf32>
    %197 = arith.truncf %196 : vector<64x256xf32> to vector<64x256xbf16>
    %c1_181 = arith.constant 1 : index
    %c0_182 = arith.constant 0 : index
    %c128_183 = arith.constant 128 : index
    %198 = vector.load %arg7[%c1_181, %c0_182, %c128_183] : memref<3x64x512xbf16, #tpu.memory_space<vmem>>, vector<1x64x256xbf16>
    %199 = vector.shape_cast %198 : vector<1x64x256xbf16> to vector<64x256xbf16>
    %200 = vector.shape_cast %197 : vector<64x256xbf16> to vector<1x64x256xbf16>
    tpu.vector_store %arg7[%c1_181, %c0_182, %c128_183], %200 {strides = array<i32>} : memref<3x64x512xbf16, #tpu.memory_space<vmem>>, vector<1x64x256xbf16>,
    %201 = arith.mulf %191, %28 : vector<64x256xf32>
    %202 = arith.truncf %201 : vector<64x256xf32> to vector<64x256xbf16>
    %c2_184 = arith.constant 2 : index
    %c0_185 = arith.constant 0 : index
    %c128_186 = arith.constant 128 : index
    %203 = vector.load %arg7[%c2_184, %c0_185, %c128_186] : memref<3x64x512xbf16, #tpu.memory_space<vmem>>, vector<1x64x256xbf16>
    %204 = vector.shape_cast %203 : vector<1x64x256xbf16> to vector<64x256xbf16>
    %205 = vector.shape_cast %202 : vector<64x256xbf16> to vector<1x64x256xbf16>
    tpu.vector_store %arg7[%c2_184, %c0_185, %c128_186], %205 {strides = array<i32>} : memref<3x64x512xbf16, #tpu.memory_space<vmem>>, vector<1x64x256xbf16>,
    %c256_187 = arith.constant 256 : index
    %c0_188 = arith.constant 0 : index
    %206 = vector.load %arg8[%c256_187, %c0_188] : memref<576x256xbf16, #tpu.memory_space<vmem>>, vector<64x256xbf16>
    tpu.vector_store %arg8[%c256_187, %c0_188], %192 {strides = array<i32>} : memref<576x256xbf16, #tpu.memory_space<vmem>>, vector<64x256xbf16>,
    %c1_189 = arith.constant 1 : index
    %c0_190 = arith.constant 0 : index
    %c111_191 = arith.constant 111 : index
    %207 = vector.load %arg7[%c1_189, %c0_190, %c111_191] : memref<3x64x512xbf16, #tpu.memory_space<vmem>>, vector<1x64x256xbf16>
    %208 = vector.shape_cast %207 : vector<1x64x256xbf16> to vector<64x256xbf16>
    %c0_192 = arith.constant 0 : index
    %c0_193 = arith.constant 0 : index
    %209 = vector.load %arg8[%c0_192, %c0_193] : memref<576x256xbf16, #tpu.memory_space<vmem>>, vector<64x256xbf16>
    tpu.vector_store %arg8[%c0_192, %c0_193], %208 {strides = array<i32>} : memref<576x256xbf16, #tpu.memory_space<vmem>>, vector<64x256xbf16>,
    %c0_194 = arith.constant 0 : index
    %c0_195 = arith.constant 0 : index
    %c112_196 = arith.constant 112 : index
    %210 = vector.load %arg7[%c0_194, %c0_195, %c112_196] : memref<3x64x512xbf16, #tpu.memory_space<vmem>>, vector<1x64x256xbf16>
    %211 = vector.shape_cast %210 : vector<1x64x256xbf16> to vector<64x256xbf16>
    %c64_197 = arith.constant 64 : index
    %c0_198 = arith.constant 0 : index
    %212 = vector.load %arg8[%c64_197, %c0_198] : memref<576x256xbf16, #tpu.memory_space<vmem>>, vector<64x256xbf16>
    tpu.vector_store %arg8[%c64_197, %c0_198], %211 {strides = array<i32>} : memref<576x256xbf16, #tpu.memory_space<vmem>>, vector<64x256xbf16>,
    %c2_199 = arith.constant 2 : index
    %c0_200 = arith.constant 0 : index
    %c113_201 = arith.constant 113 : index
    %213 = vector.load %arg7[%c2_199, %c0_200, %c113_201] : memref<3x64x512xbf16, #tpu.memory_space<vmem>>, vector<1x64x256xbf16>
    %214 = vector.shape_cast %213 : vector<1x64x256xbf16> to vector<64x256xbf16>
    %c128_202 = arith.constant 128 : index
    %c0_203 = arith.constant 0 : index
    %215 = vector.load %arg8[%c128_202, %c0_203] : memref<576x256xbf16, #tpu.memory_space<vmem>>, vector<64x256xbf16>
    tpu.vector_store %arg8[%c128_202, %c0_203], %214 {strides = array<i32>} : memref<576x256xbf16, #tpu.memory_space<vmem>>, vector<64x256xbf16>,
    %c1_204 = arith.constant 1 : index
    %c0_205 = arith.constant 0 : index
    %c127_206 = arith.constant 127 : index
    %216 = vector.load %arg7[%c1_204, %c0_205, %c127_206] : memref<3x64x512xbf16, #tpu.memory_space<vmem>>, vector<1x64x256xbf16>
    %217 = vector.shape_cast %216 : vector<1x64x256xbf16> to vector<64x256xbf16>
    %c192_207 = arith.constant 192 : index
    %c0_208 = arith.constant 0 : index
    %218 = vector.load %arg8[%c192_207, %c0_208] : memref<576x256xbf16, #tpu.memory_space<vmem>>, vector<64x256xbf16>
    tpu.vector_store %arg8[%c192_207, %c0_208], %217 {strides = array<i32>} : memref<576x256xbf16, #tpu.memory_space<vmem>>, vector<64x256xbf16>,
    %c2_209 = arith.constant 2 : index
    %c0_210 = arith.constant 0 : index
    %c129_211 = arith.constant 129 : index
    %219 = vector.load %arg7[%c2_209, %c0_210, %c129_211] : memref<3x64x512xbf16, #tpu.memory_space<vmem>>, vector<1x64x256xbf16>
    %220 = vector.shape_cast %219 : vector<1x64x256xbf16> to vector<64x256xbf16>
    %c320_212 = arith.constant 320 : index
    %c0_213 = arith.constant 0 : index
    %221 = vector.load %arg8[%c320_212, %c0_213] : memref<576x256xbf16, #tpu.memory_space<vmem>>, vector<64x256xbf16>
    tpu.vector_store %arg8[%c320_212, %c0_213], %220 {strides = array<i32>} : memref<576x256xbf16, #tpu.memory_space<vmem>>, vector<64x256xbf16>,
    %c1_214 = arith.constant 1 : index
    %c0_215 = arith.constant 0 : index
    %c143_216 = arith.constant 143 : index
    %222 = vector.load %arg7[%c1_214, %c0_215, %c143_216] : memref<3x64x512xbf16, #tpu.memory_space<vmem>>, vector<1x64x256xbf16>
    %223 = vector.shape_cast %222 : vector<1x64x256xbf16> to vector<64x256xbf16>
    %c384_217 = arith.constant 384 : index
    %c0_218 = arith.constant 0 : index
    %224 = vector.load %arg8[%c384_217, %c0_218] : memref<576x256xbf16, #tpu.memory_space<vmem>>, vector<64x256xbf16>
    tpu.vector_store %arg8[%c384_217, %c0_218], %223 {strides = array<i32>} : memref<576x256xbf16, #tpu.memory_space<vmem>>, vector<64x256xbf16>,
    %c0_219 = arith.constant 0 : index
    %c0_220 = arith.constant 0 : index
    %c144_221 = arith.constant 144 : index
    %225 = vector.load %arg7[%c0_219, %c0_220, %c144_221] : memref<3x64x512xbf16, #tpu.memory_space<vmem>>, vector<1x64x256xbf16>
    %226 = vector.shape_cast %225 : vector<1x64x256xbf16> to vector<64x256xbf16>
    %c448_222 = arith.constant 448 : index
    %c0_223 = arith.constant 0 : index
    %227 = vector.load %arg8[%c448_222, %c0_223] : memref<576x256xbf16, #tpu.memory_space<vmem>>, vector<64x256xbf16>
    tpu.vector_store %arg8[%c448_222, %c0_223], %226 {strides = array<i32>} : memref<576x256xbf16, #tpu.memory_space<vmem>>, vector<64x256xbf16>,
    %c2_224 = arith.constant 2 : index
    %c0_225 = arith.constant 0 : index
    %c145_226 = arith.constant 145 : index
    %228 = vector.load %arg7[%c2_224, %c0_225, %c145_226] : memref<3x64x512xbf16, #tpu.memory_space<vmem>>, vector<1x64x256xbf16>
    %229 = vector.shape_cast %228 : vector<1x64x256xbf16> to vector<64x256xbf16>
    %c512_227 = arith.constant 512 : index
    %c0_228 = arith.constant 0 : index
    %230 = vector.load %arg8[%c512_227, %c0_228] : memref<576x256xbf16, #tpu.memory_space<vmem>>, vector<64x256xbf16>
    tpu.vector_store %arg8[%c512_227, %c0_228], %229 {strides = array<i32>} : memref<576x256xbf16, #tpu.memory_space<vmem>>, vector<64x256xbf16>,
    %c0_229 = arith.constant 0 : index
    %c0_230 = arith.constant 0 : index
    %c0_231 = arith.constant 0 : index
    %231 = vector.load %arg4[%c0_229, %c0_230, %c0_231] : memref<2x64x576xbf16, #tpu.memory_space<vmem>>, vector<1x64x576xbf16>
    %232 = vector.shape_cast %231 : vector<1x64x576xbf16> to vector<64x576xbf16>
    %c0_232 = arith.constant 0 : index
    %c0_233 = arith.constant 0 : index
    %233 = vector.load %arg8[%c0_232, %c0_233] : memref<576x256xbf16, #tpu.memory_space<vmem>>, vector<576x256xbf16>
    %cst_234 = arith.constant dense<0.000000e+00> : vector<64x256xf32>
    %234 = tpu.matmul %232, %233, %cst_234 {dimension_numbers = #tpu.dot_dimension_numbers<[1], [0], [0], [1], [0, 0, 1, 1], [], []>} : vector<64x576xbf16>, vector<576x256xbf16>, vector<64x256xf32> -> vector<64x256xf32>
    %c0_235 = arith.constant 0 : index
    %c0_236 = arith.constant 0 : index
    %c0_237 = arith.constant 0 : index
    %235 = vector.load %arg5[%c0_235, %c0_236, %c0_237] : memref<2x64x1xf32, #tpu.memory_space<vmem>>, vector<1x64x1xf32>
    %236 = vector.shape_cast %235 : vector<1x64x1xf32> to vector<64x1xf32>
    %237 = vector.broadcast %236 : vector<64x1xf32> to vector<64x256xf32>
    %238 = arith.addf %234, %237 : vector<64x256xf32>
    %cst_238 = arith.constant 2.000000e-01 : f32
    %239 = vector.broadcast %cst_238 : f32 to vector<64x256xf32>
    %240 = arith.mulf %239, %238 : vector<64x256xf32>
    %241 = arith.maximumf %238, %240 : vector<64x256xf32>
    %242 = arith.addf %241, %138 : vector<64x256xf32>
    %243 = arith.truncf %242 : vector<64x256xf32> to vector<64x256xbf16>
    %c0_239 = arith.constant 0 : index
    %c0_240 = arith.constant 0 : index
    %c128_241 = arith.constant 128 : index
    %244 = vector.load %arg7[%c0_239, %c0_240, %c128_241] : memref<3x64x512xbf16, #tpu.memory_space<vmem>>, vector<1x64x256xbf16>
    %245 = vector.shape_cast %244 : vector<1x64x256xbf16> to vector<64x256xbf16>
    %246 = vector.shape_cast %243 : vector<64x256xbf16> to vector<1x64x256xbf16>
    tpu.vector_store %arg7[%c0_239, %c0_240, %c128_241], %246 {strides = array<i32>} : memref<3x64x512xbf16, #tpu.memory_space<vmem>>, vector<1x64x256xbf16>,
    %247 = arith.mulf %242, %22 : vector<64x256xf32>
    %248 = arith.truncf %247 : vector<64x256xf32> to vector<64x256xbf16>
    %c1_242 = arith.constant 1 : index
    %c0_243 = arith.constant 0 : index
    %c128_244 = arith.constant 128 : index
    %249 = vector.load %arg7[%c1_242, %c0_243, %c128_244] : memref<3x64x512xbf16, #tpu.memory_space<vmem>>, vector<1x64x256xbf16>
    %250 = vector.shape_cast %249 : vector<1x64x256xbf16> to vector<64x256xbf16>
    %251 = vector.shape_cast %248 : vector<64x256xbf16> to vector<1x64x256xbf16>
    tpu.vector_store %arg7[%c1_242, %c0_243, %c128_244], %251 {strides = array<i32>} : memref<3x64x512xbf16, #tpu.memory_space<vmem>>, vector<1x64x256xbf16>,
    %252 = arith.mulf %242, %28 : vector<64x256xf32>
    %253 = arith.truncf %252 : vector<64x256xf32> to vector<64x256xbf16>
    %c2_245 = arith.constant 2 : index
    %c0_246 = arith.constant 0 : index
    %c128_247 = arith.constant 128 : index
    %254 = vector.load %arg7[%c2_245, %c0_246, %c128_247] : memref<3x64x512xbf16, #tpu.memory_space<vmem>>, vector<1x64x256xbf16>
    %255 = vector.shape_cast %254 : vector<1x64x256xbf16> to vector<64x256xbf16>
    %256 = vector.shape_cast %253 : vector<64x256xbf16> to vector<1x64x256xbf16>
    tpu.vector_store %arg7[%c2_245, %c0_246, %c128_247], %256 {strides = array<i32>} : memref<3x64x512xbf16, #tpu.memory_space<vmem>>, vector<1x64x256xbf16>,
    %c256_248 = arith.constant 256 : index
    %c0_249 = arith.constant 0 : index
    %257 = vector.load %arg8[%c256_248, %c0_249] : memref<576x256xbf16, #tpu.memory_space<vmem>>, vector<64x256xbf16>
    tpu.vector_store %arg8[%c256_248, %c0_249], %243 {strides = array<i32>} : memref<576x256xbf16, #tpu.memory_space<vmem>>, vector<64x256xbf16>,
    %c1_250 = arith.constant 1 : index
    %c0_251 = arith.constant 0 : index
    %c111_252 = arith.constant 111 : index
    %258 = vector.load %arg7[%c1_250, %c0_251, %c111_252] : memref<3x64x512xbf16, #tpu.memory_space<vmem>>, vector<1x64x256xbf16>
    %259 = vector.shape_cast %258 : vector<1x64x256xbf16> to vector<64x256xbf16>
    %c0_253 = arith.constant 0 : index
    %c0_254 = arith.constant 0 : index
    %260 = vector.load %arg8[%c0_253, %c0_254] : memref<576x256xbf16, #tpu.memory_space<vmem>>, vector<64x256xbf16>
    tpu.vector_store %arg8[%c0_253, %c0_254], %259 {strides = array<i32>} : memref<576x256xbf16, #tpu.memory_space<vmem>>, vector<64x256xbf16>,
    %c0_255 = arith.constant 0 : index
    %c0_256 = arith.constant 0 : index
    %c112_257 = arith.constant 112 : index
    %261 = vector.load %arg7[%c0_255, %c0_256, %c112_257] : memref<3x64x512xbf16, #tpu.memory_space<vmem>>, vector<1x64x256xbf16>
    %262 = vector.shape_cast %261 : vector<1x64x256xbf16> to vector<64x256xbf16>
    %c64_258 = arith.constant 64 : index
    %c0_259 = arith.constant 0 : index
    %263 = vector.load %arg8[%c64_258, %c0_259] : memref<576x256xbf16, #tpu.memory_space<vmem>>, vector<64x256xbf16>
    tpu.vector_store %arg8[%c64_258, %c0_259], %262 {strides = array<i32>} : memref<576x256xbf16, #tpu.memory_space<vmem>>, vector<64x256xbf16>,
    %c2_260 = arith.constant 2 : index
    %c0_261 = arith.constant 0 : index
    %c113_262 = arith.constant 113 : index
    %264 = vector.load %arg7[%c2_260, %c0_261, %c113_262] : memref<3x64x512xbf16, #tpu.memory_space<vmem>>, vector<1x64x256xbf16>
    %265 = vector.shape_cast %264 : vector<1x64x256xbf16> to vector<64x256xbf16>
    %c128_263 = arith.constant 128 : index
    %c0_264 = arith.constant 0 : index
    %266 = vector.load %arg8[%c128_263, %c0_264] : memref<576x256xbf16, #tpu.memory_space<vmem>>, vector<64x256xbf16>
    tpu.vector_store %arg8[%c128_263, %c0_264], %265 {strides = array<i32>} : memref<576x256xbf16, #tpu.memory_space<vmem>>, vector<64x256xbf16>,
    %c1_265 = arith.constant 1 : index
    %c0_266 = arith.constant 0 : index
    %c127_267 = arith.constant 127 : index
    %267 = vector.load %arg7[%c1_265, %c0_266, %c127_267] : memref<3x64x512xbf16, #tpu.memory_space<vmem>>, vector<1x64x256xbf16>
    %268 = vector.shape_cast %267 : vector<1x64x256xbf16> to vector<64x256xbf16>
    %c192_268 = arith.constant 192 : index
    %c0_269 = arith.constant 0 : index
    %269 = vector.load %arg8[%c192_268, %c0_269] : memref<576x256xbf16, #tpu.memory_space<vmem>>, vector<64x256xbf16>
    tpu.vector_store %arg8[%c192_268, %c0_269], %268 {strides = array<i32>} : memref<576x256xbf16, #tpu.memory_space<vmem>>, vector<64x256xbf16>,
    %c2_270 = arith.constant 2 : index
    %c0_271 = arith.constant 0 : index
    %c129_272 = arith.constant 129 : index
    %270 = vector.load %arg7[%c2_270, %c0_271, %c129_272] : memref<3x64x512xbf16, #tpu.memory_space<vmem>>, vector<1x64x256xbf16>
    %271 = vector.shape_cast %270 : vector<1x64x256xbf16> to vector<64x256xbf16>
    %c320_273 = arith.constant 320 : index
    %c0_274 = arith.constant 0 : index
    %272 = vector.load %arg8[%c320_273, %c0_274] : memref<576x256xbf16, #tpu.memory_space<vmem>>, vector<64x256xbf16>
    tpu.vector_store %arg8[%c320_273, %c0_274], %271 {strides = array<i32>} : memref<576x256xbf16, #tpu.memory_space<vmem>>, vector<64x256xbf16>,
    %c1_275 = arith.constant 1 : index
    %c0_276 = arith.constant 0 : index
    %c143_277 = arith.constant 143 : index
    %273 = vector.load %arg7[%c1_275, %c0_276, %c143_277] : memref<3x64x512xbf16, #tpu.memory_space<vmem>>, vector<1x64x256xbf16>
    %274 = vector.shape_cast %273 : vector<1x64x256xbf16> to vector<64x256xbf16>
    %c384_278 = arith.constant 384 : index
    %c0_279 = arith.constant 0 : index
    %275 = vector.load %arg8[%c384_278, %c0_279] : memref<576x256xbf16, #tpu.memory_space<vmem>>, vector<64x256xbf16>
    tpu.vector_store %arg8[%c384_278, %c0_279], %274 {strides = array<i32>} : memref<576x256xbf16, #tpu.memory_space<vmem>>, vector<64x256xbf16>,
    %c0_280 = arith.constant 0 : index
    %c0_281 = arith.constant 0 : index
    %c144_282 = arith.constant 144 : index
    %276 = vector.load %arg7[%c0_280, %c0_281, %c144_282] : memref<3x64x512xbf16, #tpu.memory_space<vmem>>, vector<1x64x256xbf16>
    %277 = vector.shape_cast %276 : vector<1x64x256xbf16> to vector<64x256xbf16>
    %c448_283 = arith.constant 448 : index
    %c0_284 = arith.constant 0 : index
    %278 = vector.load %arg8[%c448_283, %c0_284] : memref<576x256xbf16, #tpu.memory_space<vmem>>, vector<64x256xbf16>
    tpu.vector_store %arg8[%c448_283, %c0_284], %277 {strides = array<i32>} : memref<576x256xbf16, #tpu.memory_space<vmem>>, vector<64x256xbf16>,
    %c2_285 = arith.constant 2 : index
    %c0_286 = arith.constant 0 : index
    %c145_287 = arith.constant 145 : index
    %279 = vector.load %arg7[%c2_285, %c0_286, %c145_287] : memref<3x64x512xbf16, #tpu.memory_space<vmem>>, vector<1x64x256xbf16>
    %280 = vector.shape_cast %279 : vector<1x64x256xbf16> to vector<64x256xbf16>
    %c512_288 = arith.constant 512 : index
    %c0_289 = arith.constant 0 : index
    %281 = vector.load %arg8[%c512_288, %c0_289] : memref<576x256xbf16, #tpu.memory_space<vmem>>, vector<64x256xbf16>
    tpu.vector_store %arg8[%c512_288, %c0_289], %280 {strides = array<i32>} : memref<576x256xbf16, #tpu.memory_space<vmem>>, vector<64x256xbf16>,
    %c1_290 = arith.constant 1 : index
    %c0_291 = arith.constant 0 : index
    %c0_292 = arith.constant 0 : index
    %282 = vector.load %arg4[%c1_290, %c0_291, %c0_292] : memref<2x64x576xbf16, #tpu.memory_space<vmem>>, vector<1x64x576xbf16>
    %283 = vector.shape_cast %282 : vector<1x64x576xbf16> to vector<64x576xbf16>
    %c0_293 = arith.constant 0 : index
    %c0_294 = arith.constant 0 : index
    %284 = vector.load %arg8[%c0_293, %c0_294] : memref<576x256xbf16, #tpu.memory_space<vmem>>, vector<576x256xbf16>
    %cst_295 = arith.constant dense<0.000000e+00> : vector<64x256xf32>
    %285 = tpu.matmul %283, %284, %cst_295 {dimension_numbers = #tpu.dot_dimension_numbers<[1], [0], [0], [1], [0, 0, 1, 1], [], []>} : vector<64x576xbf16>, vector<576x256xbf16>, vector<64x256xf32> -> vector<64x256xf32>
    %c1_296 = arith.constant 1 : index
    %c0_297 = arith.constant 0 : index
    %c0_298 = arith.constant 0 : index
    %286 = vector.load %arg5[%c1_296, %c0_297, %c0_298] : memref<2x64x1xf32, #tpu.memory_space<vmem>>, vector<1x64x1xf32>
    %287 = vector.shape_cast %286 : vector<1x64x1xf32> to vector<64x1xf32>
    %288 = vector.broadcast %287 : vector<64x1xf32> to vector<64x256xf32>
    %289 = arith.addf %285, %288 : vector<64x256xf32>
    %cst_299 = arith.constant 2.000000e-01 : f32
    %290 = vector.broadcast %cst_299 : f32 to vector<64x256xf32>
    %291 = arith.mulf %290, %289 : vector<64x256xf32>
    %292 = arith.maximumf %289, %291 : vector<64x256xf32>
    %293 = arith.addf %292, %86 : vector<64x256xf32>
    %c0_300 = arith.constant 0 : index
    %c0_301 = arith.constant 0 : index
    %c0_302 = arith.constant 0 : index
    %294 = vector.load %arg6[%c0_300, %c0_301, %c0_302] : memref<1x64x256xf32, #tpu.memory_space<vmem>>, vector<1x64x256xf32>
    %295 = vector.shape_cast %294 : vector<1x64x256xf32> to vector<64x256xf32>
    %296 = vector.shape_cast %293 : vector<64x256xf32> to vector<1x64x256xf32>
    tpu.vector_store %arg6[%c0_300, %c0_301, %c0_302], %296 {strides = array<i32>} : memref<1x64x256xf32, #tpu.memory_space<vmem>>, vector<1x64x256xf32>,
    return
  }
  func.func @transform_0(%arg0: i32) -> (i32, i32, i32) {
    %c0_i32 = arith.constant 0 : i32
    %c0_i32_0 = arith.constant 0 : i32
    %c0_i32_1 = arith.constant 0 : i32
    return %arg0, %c0_i32, %c0_i32_0 : i32, i32, i32
  }
  func.func @transform_1(%arg0: i32) -> (i32, i32, i32) {
    %c0_i32 = arith.constant 0 : i32
    %c0_i32_0 = arith.constant 0 : i32
    %c0_i32_1 = arith.constant 0 : i32
    %c0_i32_2 = arith.constant 0 : i32
    return %c0_i32, %c0_i32_0, %c0_i32_1 : i32, i32, i32
  }
  func.func @transform_2(%arg0: i32) -> (i32, i32, i32) {
    %c0_i32 = arith.constant 0 : i32
    %c0_i32_0 = arith.constant 0 : i32
    %c0_i32_1 = arith.constant 0 : i32
    %c0_i32_2 = arith.constant 0 : i32
    return %c0_i32, %c0_i32_0, %c0_i32_1 : i32, i32, i32
  }
  func.func @transform_3(%arg0: i32) -> (i32, i32, i32) {
    %c0_i32 = arith.constant 0 : i32
    %c0_i32_0 = arith.constant 0 : i32
    %c0_i32_1 = arith.constant 0 : i32
    %c0_i32_2 = arith.constant 0 : i32
    return %c0_i32, %c0_i32_0, %c0_i32_1 : i32, i32, i32
  }
  func.func @transform_4(%arg0: i32) -> (i32, i32, i32) {
    %c0_i32 = arith.constant 0 : i32
    %c0_i32_0 = arith.constant 0 : i32
    %c0_i32_1 = arith.constant 0 : i32
    %c0_i32_2 = arith.constant 0 : i32
    return %c0_i32, %c0_i32_0, %c0_i32_1 : i32, i32, i32
  }
  func.func @transform_5(%arg0: i32) -> (i32, i32, i32) {
    %c0_i32 = arith.constant 0 : i32
    %c0_i32_0 = arith.constant 0 : i32
    %c0_i32_1 = arith.constant 0 : i32
    return %arg0, %c0_i32, %c0_i32_0 : i32, i32, i32
  }
}

</mosaic_0001>

<bundles_post_ra>
// kernel: trajectory_block.1
= control target key start
LH: loop header
LB: loop body
LE: loop exit
PB: predicated region body
PF: predicated region fallthrough
CT: control target
= control target key end

     0   :  { %s13061_s18 = smov 0   ;;  %s18796_s0 = inlined_call_operand.vmem [shape: f32[2,64,256], index: 0, kind: input, shape index: {}]   ;;  %s18797_s1 = inlined_call_operand.vmem [shape: bf16[3,128,576], index: 1, kind: input, shape index: {}]   ;;  %s18798_s2 = inlined_call_operand.vmem [shape: f32[3,128,1], index: 2, kind: input, shape index: {}]   ;;  %s18799_s3 = inlined_call_operand.vmem [shape: bf16[2,64,576], index: 3, kind: input, shape index: {}]   ;;  %s18800_s4 = inlined_call_operand.vmem [shape: f32[2,64,1], index: 4, kind: input, shape index: {}]   ;;  %s18801_s5 = inlined_call_operand.vmem [shape: f32[2,64,256], index: 5, kind: output, shape index: {}]  }
   0x1 LB: > { %s11329_s19 = sadd.s32 4294967295, %s13019_s18   ;;  %p11333_p0 = scmp.ge.s32.totalorder %s13019_s18, 1  ;;  %s13019_s18 = sphi %s13061_s18, %s15_s18  }
   0x2   : > { %p187_p1 = scmp.lt.s32.totalorder %s13019_s18, 3 }
   0x4   : > { %p188_p2 = pnand %p11333_p0, %p187_p1 }
   0x6   : > { %191 = sbr.rel (%p188_p2) target bundleno = 2886 (0xb46), region = 40 }
   0xb   : > { %p13071_p3 = scmp.lt.s32.totalorder %s11329_s19, 1  ;;  %v226_v0 = vlaneseq  ;;  %v18802_v1 = vmov 0   ;;  %v13022_v13 = vmov 0.0   ;;  %s13023_s25 = smov 16   ;;  %vm619_vm4 = vcmask 1043456  }
   0xc   : > { %272 = vst [vmem:[#allocation2 + $0x70] sm:$0xf] %v18802_v1  ;;  %265 = vst [vmem:[#allocation2] sm:$0xf] %v18802_v1  ;;  %12437 = vset.pattern.permute.xlu1 %v18802_v1  ;;  %12436 = vset.pattern.permute.xlu0 %v18802_v1  ;;  %s13024_s26 = smov 17   ;;  %s13025_s27 = smov 1  }
   0xd   : > { %266 = vst [vmem:[#allocation2 + $0x10] sm:$0xf] %v18802_v1  ;;  %267 = vst [vmem:[#allocation2 + $0x20] sm:$0xf] %v18802_v1  ;;  %s19421_s19 = smov (!%p13071_p3, %s11329_s19), 1  ;;  %v227_v2 = vand.u32 127, %v226_v0 }
   0xe   : > { %268 = vst [vmem:[#allocation2 + $0x30] sm:$0xf] %v18802_v1  ;;  %269 = vst [vmem:[#allocation2 + $0x40] sm:$0xf] %v18802_v1  ;;  %s12176_s21 = sshll.u32 %s19421_s19, 7  ;;  %s13026_s28 = smov 15  }
   0xf   : > { %270 = vst [vmem:[#allocation2 + $0x50] sm:$0xf] %v18802_v1  ;;  %271 = vst [vmem:[#allocation2 + $0x60] sm:$0xf] %v18802_v1  ;;  %v13132_v3 = vadd.s32 128, %v227_v2  ;;  %v233_v4 = vand.u32 15, %v227_v2  ;;  %s13139_s24 = scalar_lea.vmem %s18796_s0, %s12176_s21 }
  0x10   : > { %273 = vst [vmem:[#allocation2 + $0x80] sm:$0xf] %v18802_v1  ;;  %274 = vst [vmem:[#allocation2 + $0x90] sm:$0xf] %v18802_v1  ;;  %v13142_v5 = vld [vmem:[%s13139_s24 + $0x70] sm:$0xff]  ;;  %v13145_v6 = vld [vmem:[%s13139_s24 + $0x78] sm:$0xff] }
  0x11   : > { %275 = vst [vmem:[#allocation2 + $0xa0] sm:$0xf] %v18802_v1  ;;  %276 = vst [vmem:[#allocation2 + $0xb0] sm:$0xf] %v18802_v1  ;;  %v13148_v7 = vld [vmem:[%s13139_s24 + $0x60] sm:$0xff]  ;;  %v240_v8 = vand.u32 15, %v13132_v3  ;;  %v13153_v9 = vpack.c.bf16 %v13145_v6, %v13142_v5 }
  0x12   : > { %277 = vst [vmem:[#allocation2 + $0xc0] sm:$0xf] %v18802_v1  ;;  %278 = vst [vmem:[#allocation2 + $0xd0] sm:$0xf] %v18802_v1  ;;  %vm253_vm0 = vcmp.ne.s32.totalorder %v233_v4, 15  ;;  %vm259_vm1 = vcmp.ne.s32.totalorder %v233_v4, 0 }
  0x13   : > { %279 = vst [vmem:[#allocation2 + $0xe0] sm:$0xf] %v18802_v1  ;;  %280 = vst [vmem:[#allocation2 + $0xf0] sm:$0xf] %v18802_v1  ;;  %v13156_v10 = vld [vmem:[%s13139_s24 + $0x68] sm:$0xff]  ;;  %v13159_v11 = vld [vmem:[%s13139_s24 + $0x40] sm:$0xff] }
  0x14   : > { %281 = vst [vmem:[#allocation2 + $0x100] sm:$0xf] %v18802_v1  ;;  %282 = vst [vmem:[#allocation2 + $0x110] sm:$0xf] %v18802_v1  ;;  %v13162_v12 = vld [vmem:[%s13139_s24 + $0x48] sm:$0xff]  ;;  %v13164_v14 = vsel %vm253_vm0, 1.0, %v13022_v13  ;;  %v13170_v16 = vpack.c.bf16 %v13156_v10, %v13148_v7 }
  0x15   : > { %283 = vst [vmem:[#allocation2 + $0x120] sm:$0xf] %v18802_v1  ;;  %284 = vst [vmem:[#allocation2 + $0x130] sm:$0xf] %v18802_v1  ;;  %v13166_v15 = vsel %vm259_vm1, 1.0, %v13022_v13  ;;  %v13174_v17 = vpack.c.bf16 %v13162_v12, %v13159_v11  ;;  %v13177_v18 = vld [vmem:[%s13139_s24 + $0x50] sm:$0xff]  ;;  %v397_v21 = vmul.f32 %v13164_v14, %v13148_v7  ;;  %v399_v27 = vmul.f32 %v13164_v14, %v13142_v5 }
  0x16   : > { %285 = vst [vmem:[#allocation2 + $0x140] sm:$0xf] %v18802_v1  ;;  %286 = vst [vmem:[#allocation2 + $0x150] sm:$0xf] %v18802_v1  ;;  %v13180_v19 = vld [vmem:[%s13139_s24 + $0x58] sm:$0xff]  ;;  %v13183_v20 = vld [vmem:[%s13139_s24 + $0x20] sm:$0xff]  ;;  %v393_v28 = vmul.f32 %v13164_v14, %v13159_v11  ;;  %v395_v39 = vmul.f32 %v13164_v14, %v13177_v18  ;;  %v470_v55 = vmul.f32 %v13166_v15, %v13148_v7 }
  0x17   : > { %287 = vst [vmem:[#allocation2 + $0x160] sm:$0xf] %v18802_v1  ;;  %288 = vst [vmem:[#allocation2 + $0x170] sm:$0xf] %v18802_v1  ;;  %vm254_vm2 = vcmp.ne.s32.totalorder %v240_v8, 15  ;;  %v13190_v22 = vpack.c.bf16 %v13180_v19, %v13177_v18  ;;  %v13193_v23 = vld [vmem:[%s13139_s24 + $0x28] sm:$0xff]  ;;  %v389_v44 = vmul.f32 %v13164_v14, %v13183_v20  ;;  %v472_v60 = vmul.f32 %v13166_v15, %v13142_v5 }
  0x18   : > { %289 = vst [vmem:[#allocation2 + $0xc] sm:$0xf] %v18802_v1  ;;  %290 = vst [vmem:[#allocation2 + $0x1c] sm:$0xf] %v18802_v1  ;;  %v13196_v24 = vld [vmem:[%s13139_s24 + $0x30] sm:$0xff]  ;;  %v13199_v25 = vld [vmem:[%s13139_s24 + $0x38] sm:$0xff]  ;;  %v13211_v29 = vpack.c.bf16 %v13193_v23, %v13183_v20  ;;  %v466_v2 = vmul.f32 %v13166_v15, %v13159_v11  ;;  %v468_v5 = vmul.f32 %v13166_v15, %v13177_v18 }
  0x19   : > { %291 = vst [vmem:[#allocation2 + $0x2c] sm:$0xf] %v18802_v1  ;;  %292 = vst [vmem:[#allocation2 + $0x3c] sm:$0xf] %v18802_v1  ;;  %v13201_v26 = vsel %vm254_vm2, 1.0, %v13022_v13  ;;  %v12181_v30 = vpack.c.bf16 %v13199_v25, %v13196_v24  ;;  %v13216_v31 = vld [vmem:[%s13139_s24] sm:$0xff]  ;;  %v391_v48 = vmul.f32 %v13164_v14, %v13196_v24 }
  0x1a   : > { %293 = vst [vmem:[#allocation2 + $0x4c] sm:$0xf] %v18802_v1  ;;  %294 = vst [vmem:[#allocation2 + $0x5c] sm:$0xf] %v18802_v1  ;;  %v13219_v32 = vld [vmem:[%s13139_s24 + $0x8] sm:$0xff]  ;;  %v13222_v33 = vld [vmem:[%s13139_s24 + $0x10] sm:$0xff]  ;;  %v398_v34 = vmul.f32 %v13201_v26, %v13156_v10  ;;  %v400_v35 = vmul.f32 %v13201_v26, %v13145_v6  ;;  %v394_v38 = vmul.f32 %v13201_v26, %v13162_v12 }
  0x1b   : > { %295 = vst [vmem:[#allocation2 + $0x6c] sm:$0xf] %v18802_v1  ;;  %296 = vst [vmem:[#allocation2 + $0x7c] sm:$0xf] %v18802_v1  ;;  %v13231_v36 = vpack.c.bf16 %v13219_v32, %v13216_v31  ;;  %v13234_v37 = vld [vmem:[%s13139_s24 + $0x18] sm:$0xff]  ;;  %v396_v40 = vmul.f32 %v13201_v26, %v13180_v19  ;;  %v390_v47 = vmul.f32 %v13201_v26, %v13193_v23  ;;  %vm260_vm3 = vcmp.ne.s32.totalorder %v240_v8, 0 }
  0x1c   : > { %297 = vst [vmem:[#allocation2 + $0x8c] sm:$0xf] %v18802_v1  ;;  %298 = vst [vmem:[#allocation2 + $0x9c] sm:$0xf] %v18802_v1  ;;  %v13245_v41 = vpack.c.bf16 %v13234_v37, %v13222_v33  ;;  %v12192_v42 = vpack.c.bf16 %v398_v34, %v397_v21  ;;  %v12193_v43 = vpack.c.bf16 %v400_v35, %v399_v27  ;;  %v13267_v59 = vsel %vm260_vm3, 1.0, %v13022_v13  ;;  %s13027_s29 = smov 127  }
  0x1d   : > { %299 = vst [vmem:[#allocation2 + $0xac] sm:$0xf] %v18802_v1  ;;  %300 = vst [vmem:[#allocation2 + $0xbc] sm:$0xf] %v18802_v1  ;;  %v12190_v45 = vpack.c.bf16 %v394_v38, %v393_v28  ;;  %v12191_v46 = vpack.c.bf16 %v396_v40, %v395_v39  ;;  %v392_v49 = vmul.f32 %v13201_v26, %v13199_v25  ;;  %vm734_vm5 = vcmask 130048   ;;  %s13028_s7 = smov 112  }
  0x1e   : > { %301 = vst [vmem:[#allocation2 + $0xcc] sm:$0xf] %v18802_v1  ;;  %302 = vst [vmem:[#allocation2 + $0xdc] sm:$0xf] %v18802_v1  ;;  %v385_v50 = vmul.f32 %v13164_v14, %v13216_v31  ;;  %v386_v51 = vmul.f32 %v13201_v26, %v13219_v32  ;;  %v387_v52 = vmul.f32 %v13164_v14, %v13222_v33  ;;  %vm621_vm6 = vcmask 138240   ;;  %s13029_s8 = smov 113  }
  0x1f   : > { %303 = vst [vmem:[#allocation2 + $0xec] sm:$0xf] %v18802_v1  ;;  %304 = vst [vmem:[#allocation2 + $0xfc] sm:$0xf] %v18802_v1  ;;  %v12188_v53 = vpack.c.bf16 %v390_v47, %v389_v44  ;;  %v388_v54 = vmul.f32 %v13201_v26, %v13234_v37  ;;  %v12189_v57 = vpack.c.bf16 %v392_v49, %v391_v48  ;;  %s13030_s9 = smov 111   ;;  %vm960_vm7 = vcmask 7168  }
  0x20   : > { %305 = vst [vmem:[#allocation2 + $0x10c] sm:$0xf] %v18802_v1  ;;  %306 = vst [vmem:[#allocation2 + $0x11c] sm:$0xf] %v18802_v1  ;;  %v12186_v58 = vpack.c.bf16 %v386_v51, %v385_v50  ;;  %v471_v63 = vmul.f32 %v13267_v59, %v13156_v10  ;;  %v473_v0 = vmul.f32 %v13267_v59, %v13145_v6  ;;  %vm847_vm8 = vcmask 121856  }
  0x21   : > { %307 = vst [vmem:[#allocation2 + $0x12c] sm:$0xf] %v18802_v1  ;;  %308 = vst [vmem:[#allocation2 + $0x13c] sm:$0xf] %v18802_v1  ;;  %v12187_v62 = vpack.c.bf16 %v388_v54, %v387_v52  ;;  %v467_v4 = vmul.f32 %v13267_v59, %v13162_v12  ;;  %v469_v7 = vmul.f32 %v13267_v59, %v13180_v19  ;;  %vm1073_vm9 = vcmask 1039360  }
  0x22   : > { %309 = vst [vmem:[#allocation2 + $0x14c] sm:$0xf] %v18802_v1  ;;  %310 = vst [vmem:[#allocation2 + $0x15c] sm:$0xf] %v18802_v1  ;;  %v462_v6 = vmul.f32 %v13166_v15, %v13183_v20  ;;  %v13287_v10 = vpack.c.bf16 %v471_v63, %v470_v55  ;;  %v13289_v11 = vpack.c.bf16 %v473_v0, %v472_v60  ;;  %vm1299_vm10 = vcmask 916480  }
  0x23   : > { %311 = vst [vmem:[#allocation2 + $0x16c] sm:$0xf] %v18802_v1  ;;  %312 = vst [vmem:[#allocation2 + $0x17c] sm:$0xf] %v18802_v1  ;;  %v463_v13 = vmul.f32 %v13267_v59, %v13193_v23  ;;  %v464_v12 = vmul.f32 %v13166_v15, %v13196_v24  ;;  %v13295_v21 = vpack.c.bf16 %v467_v4, %v466_v2  ;;  %vm1186_vm11 = vcmask 924672  }
  0x24   : > { %18919 = vst [vmem:[#allocation4_spill] sm:$0xff] %v13164_v14  ;;  %18920 = vst [vmem:[#allocation5_spill] sm:$0xff] %v13166_v15  ;;  %v13297_v18 = vpack.c.bf16 %v469_v7, %v468_v5  ;;  %v465_v19 = vmul.f32 %v13267_v59, %v13199_v25  ;;  %v458_v20 = vmul.f32 %v13166_v15, %v13216_v31  ;;  %vm1412_vm12 = vcmask 908288  }
  0x25   : > { %384 = vst [vmem:[#allocation2 + $0x74] sm:$0xff] %v13153_v9  ;;  %18921 = vst [vmem:[#allocation6_spill] sm:$0xff] %v13201_v26  ;;  %v13306_v23 = vpack.c.bf16 %v463_v13, %v462_v6  ;;  %v459_v24 = vmul.f32 %v13267_v59, %v13219_v32  ;;  %v460_v27 = vmul.f32 %v13166_v15, %v13222_v33  ;;  %vm2220_vm13 = vcmask 523264  }
  0x26   : > { %383 = vst [vmem:[#allocation2 + $0x64] sm:$0xff] %v13170_v16  ;;  %381 = vst [vmem:[#allocation2 + $0x44] sm:$0xff] %v13174_v17  ;;  %v13315_v28 = vpack.c.bf16 %v465_v19, %v464_v12 }
  0x27   : > { %382 = vst [vmem:[#allocation2 + $0x54] sm:$0xff] %v13190_v22  ;;  %379 = vst [vmem:[#allocation2 + $0x24] sm:$0xff] %v13211_v29  ;;  %v13320_v34 = vpack.c.bf16 %v459_v24, %v458_v20 }
  0x28   : > { %380 = vst [vmem:[#allocation2 + $0x34] sm:$0xff] %v12181_v30  ;;  %377 = vst [vmem:[#allocation2 + $0x4] sm:$0xff] %v13231_v36  ;;  %v461_v30 = vmul.f32 %v13267_v59, %v13234_v37 }
  0x29   : > { %378 = vst [vmem:[#allocation2 + $0x14] sm:$0xff] %v13245_v41  ;;  %456 = vst [vmem:[#allocation2 + $0xe4] sm:$0xff] %v12192_v42 }
  0x2a   : > { %457 = vst [vmem:[#allocation2 + $0xf4] sm:$0xff] %v12193_v43  ;;  %454 = vst [vmem:[#allocation2 + $0xc4] sm:$0xff] %v12190_v45  ;;  %v13323_v32 = vpack.c.bf16 %v461_v30, %v460_v27 }
  0x2b   : > { %455 = vst [vmem:[#allocation2 + $0xd4] sm:$0xff] %v12191_v46  ;;  %18922 = vst [vmem:[#allocation7_spill] sm:$0xff] %v13267_v59 }
  0x2c   : > { %v667_v56 = vld [vmem:[#allocation2 + $0x70] sm:$0xff]  ;;  %452 = vst [vmem:[#allocation2 + $0xa4] sm:$0xff] %v12188_v53  ;;  %v668_v3 = vld [vmem:[#allocation2 + $0x78] sm:$0xf]  ;;  %453 = vst [vmem:[#allocation2 + $0xb4] sm:$0xff] %v12189_v57 }
  0x2d   : > { %713 = vrot.lane.b32.xlu1 %v667_v56, %s13023_s25  ;;  %v665_v61 = vld [vmem:[#allocation2 + $0x60] sm:$0xff]  ;;  %450 = vst [vmem:[#allocation2 + $0x84] sm:$0xff] %v12186_v58  ;;  %v666_v8 = vld [vmem:[#allocation2 + $0x68] sm:$0xf]  ;;  %451 = vst [vmem:[#allocation2 + $0x94] sm:$0xff] %v12187_v62 }
  0x2e   : > { %709 = vrot.lane.b32.xlu0 %v665_v61, %s13023_s25  ;;  %529 = vst [vmem:[#allocation2 + $0x164] sm:$0xff] %v13287_v10  ;;  %530 = vst [vmem:[#allocation2 + $0x174] sm:$0xff] %v13289_v11  ;;  %v662_v25 = vld [vmem:[#allocation2 + $0x48] sm:$0xf]  ;;  %v661_v31 = vld [vmem:[#allocation2 + $0x40] sm:$0xff] }
  0x2f   : > { %527 = vst [vmem:[#allocation2 + $0x144] sm:$0xff] %v13295_v21  ;;  %528 = vst [vmem:[#allocation2 + $0x154] sm:$0xff] %v13297_v18  ;;  %v664_v33 = vld [vmem:[#allocation2 + $0x58] sm:$0xf]  ;;  %v663_v35 = vld [vmem:[#allocation2 + $0x50] sm:$0xff] }
  0x30   : > { %525 = vst [vmem:[#allocation2 + $0x124] sm:$0xff] %v13306_v23  ;;  %526 = vst [vmem:[#allocation2 + $0x134] sm:$0xff] %v13315_v28  ;;  %v658_v37 = vld [vmem:[#allocation2 + $0x28] sm:$0xf]  ;;  %v657_v38 = vld [vmem:[#allocation2 + $0x20] sm:$0xff] }
  0x31   : > { %715 = vrot.lane.b32.xlu1 %v668_v3, %s13023_s25  ;;  %523 = vst [vmem:[#allocation2 + $0x104] sm:$0xff] %v13320_v34  ;;  %524 = vst [vmem:[#allocation2 + $0x114] sm:$0xff] %v13323_v32  ;;  %v660_v39 = vld [vmem:[#allocation2 + $0x38] sm:$0xf]  ;;  %v659_v40 = vld [vmem:[#allocation2 + $0x30] sm:$0xff] }
  0x32   : > { %711 = vrot.lane.b32.xlu0 %v666_v8, %s13023_s25  ;;  %v654_v42 = vld [vmem:[#allocation2 + $0x8] sm:$0xf]  ;;  %v653_v43 = vld [vmem:[#allocation2] sm:$0xff]  ;;  %v656_v44 = vld [vmem:[#allocation2 + $0x18] sm:$0xf] }
  0x33   : > { %v655_v45 = vld [vmem:[#allocation2 + $0x10] sm:$0xff]  ;;  %v552_v46 = vld [vmem:[#allocation2 + $0xe8] sm:$0xf]  ;;  %v551_v47 = vld [vmem:[#allocation2 + $0xe0] sm:$0xff] }
  0x34   : > { %v554_v48 = vld [vmem:[#allocation2 + $0xf8] sm:$0xf]  ;;  %v553_v49 = vld [vmem:[#allocation2 + $0xf0] sm:$0xff]  ;;  %v548_v50 = vld [vmem:[#allocation2 + $0xc8] sm:$0xf] }
  0x35   : > { %703 = vrot.lane.b32.xlu1 %v662_v25, %s13023_s25  ;;  %v547_v51 = vld [vmem:[#allocation2 + $0xc0] sm:$0xff]  ;;  %v550_v52 = vld [vmem:[#allocation2 + $0xd8] sm:$0xf]  ;;  %v549_v53 = vld [vmem:[#allocation2 + $0xd0] sm:$0xff] }
  0x36   : > { %701 = vrot.lane.b32.xlu0 %v661_v31, %s13023_s25  ;;  %v544_v54 = vld [vmem:[#allocation2 + $0xa8] sm:$0xf]  ;;  %v543_v55 = vld [vmem:[#allocation2 + $0xa0] sm:$0xff]  ;;  %v546_v56 = vld [vmem:[#allocation2 + $0xb8] sm:$0xf] }
  0x37   : > { %v545_v57 = vld [vmem:[#allocation2 + $0xb0] sm:$0xff]  ;;  %v540_v58 = vld [vmem:[#allocation2 + $0x88] sm:$0xf]  ;;  %v539_v60 = vld [vmem:[#allocation2 + $0x80] sm:$0xff] }
  0x38   : > { %v542_v61 = vld [vmem:[#allocation2 + $0x98] sm:$0xf]  ;;  %v541_v62 = vld [vmem:[#allocation2 + $0x90] sm:$0xff]  ;;  %v892_v63 = vld [vmem:[#allocation2 + $0xe8] sm:$0xf] }
  0x39   : > { %707 = vrot.lane.b32.xlu1 %v664_v33, %s13023_s25  ;;  %v894_v0 = vld [vmem:[#allocation2 + $0xf8] sm:$0xf]  ;;  %v888_v2 = vld [vmem:[#allocation2 + $0xc8] sm:$0xf]  ;;  %v778_v13 = vld [vmem:[#allocation2 + $0x160] sm:$0xff] }
  0x3a   : > { %705 = vrot.lane.b32.xlu0 %v663_v35, %s13023_s25  ;;  %v890_v3 = vld [vmem:[#allocation2 + $0xd8] sm:$0xf]  ;;  %v884_v4 = vld [vmem:[#allocation2 + $0xa8] sm:$0xf]  ;;  %v780_v19 = vld [vmem:[#allocation2 + $0x170] sm:$0xff] }
  0x3b   : > { %v886_v5 = vld [vmem:[#allocation2 + $0xb8] sm:$0xf]  ;;  %v880_v7 = vld [vmem:[#allocation2 + $0x88] sm:$0xf]  ;;  %v774_v24 = vld [vmem:[#allocation2 + $0x140] sm:$0xff] }
  0x3c   : > { %v882_v6 = vld [vmem:[#allocation2 + $0x98] sm:$0xf]  ;;  %v779_v8 = vld [vmem:[#allocation2 + $0x168] sm:$0xf]  ;;  %v776_v25 = vld [vmem:[#allocation2 + $0x150] sm:$0xff] }
  0x3d   : > { %695 = vrot.lane.b32.xlu1 %v658_v37, %s13023_s25  ;;  %v781_v12 = vld [vmem:[#allocation2 + $0x178] sm:$0xf]  ;;  %v775_v20 = vld [vmem:[#allocation2 + $0x148] sm:$0xf]  ;;  %v770_v31 = vld [vmem:[#allocation2 + $0x120] sm:$0xff] }
  0x3e   : > { %693 = vrot.lane.b32.xlu0 %v657_v38, %s13023_s25  ;;  %v777_v27 = vld [vmem:[#allocation2 + $0x158] sm:$0xf]  ;;  %v771_v30 = vld [vmem:[#allocation2 + $0x128] sm:$0xf]  ;;  %v772_v37 = vld [vmem:[#allocation2 + $0x130] sm:$0xff] }
  0x3f   : > { %v773_v33 = vld [vmem:[#allocation2 + $0x138] sm:$0xf] }
  0x41   : > { %699 = vrot.lane.b32.xlu1 %v660_v39, %s13023_s25  ;;  %v767_v39 = vld [vmem:[#allocation2 + $0x108] sm:$0xf] }
  0x42   : > { %697 = vrot.lane.b32.xlu0 %v659_v40, %s13023_s25 }
  0x45   : > { %687 = vrot.lane.b32.xlu1 %v654_v42, %s13023_s25  ;;  %v766_v42 = vld [vmem:[#allocation2 + $0x100] sm:$0xff] }
  0x46   : > { %685 = vrot.lane.b32.xlu0 %v653_v43, %s13023_s25 }
  0x49   : > { %691 = vrot.lane.b32.xlu1 %v656_v44, %s13023_s25 }
  0x4a   : > { %689 = vrot.lane.b32.xlu0 %v655_v45, %s13023_s25 }
  0x4d   : > { %597 = vrot.lane.b32.xlu1 %v552_v46, %s13024_s26 }
  0x4e   : > { %595 = vrot.lane.b32.xlu0 %v551_v47, %s13024_s26 }
  0x51   : > { %601 = vrot.lane.b32.xlu1 %v554_v48, %s13024_s26  ;;  %v1005_v48 = vld [vmem:[#allocation2 + $0x16c] sm:$0xf] }
  0x52   : > { %599 = vrot.lane.b32.xlu0 %v553_v49, %s13024_s26 }
  0x55   : > { %589 = vrot.lane.b32.xlu1 %v548_v50, %s13024_s26  ;;  %v769_v50 = vld [vmem:[#allocation2 + $0x118] sm:$0xf] }
  0x56   : > { %587 = vrot.lane.b32.xlu0 %v547_v51, %s13024_s26 }
  0x59   : > { %593 = vrot.lane.b32.xlu1 %v550_v52, %s13024_s26 }
  0x5a   : > { %591 = vrot.lane.b32.xlu0 %v549_v53, %s13024_s26 }
  0x5d   : > { %581 = vrot.lane.b32.xlu1 %v544_v54, %s13024_s26 }
  0x5e   : > { %579 = vrot.lane.b32.xlu0 %v543_v55, %s13024_s26 }
  0x61   : > { %585 = vrot.lane.b32.xlu1 %v546_v56, %s13024_s26 }
  0x62   : > { %583 = vrot.lane.b32.xlu0 %v545_v57, %s13024_s26 }
  0x65   : > { %573 = vrot.lane.b32.xlu1 %v540_v58, %s13024_s26 }
  0x66   : > { %571 = vrot.lane.b32.xlu0 %v539_v60, %s13024_s26 }
  0x69   : > { %577 = vrot.lane.b32.xlu1 %v542_v61, %s13024_s26 }
  0x6a   : > { %575 = vrot.lane.b32.xlu0 %v541_v62, %s13024_s26 }
  0x6d   : > { %937 = vrot.lane.b32.xlu1 %v892_v63, %s13025_s27 }
  0x6e   : > { %935 = vrot.lane.b32.xlu0 %v551_v47, %s13025_s27 }
  0x71   : > { %941 = vrot.lane.b32.xlu1 %v894_v0, %s13025_s27 }
  0x72   : > { %939 = vrot.lane.b32.xlu0 %v553_v49, %s13025_s27  ;;  %v1007_v49 = vld [vmem:[#allocation2 + $0x17c] sm:$0xf] }
  0x73   : > { %v12356_v58 = vpack.i.bf16 %v1007_v49, %v1005_v48 }
  0x75   : > { %929 = vrot.lane.b32.xlu1 %v888_v2, %s13025_s27 }
  0x76   : > { %927 = vrot.lane.b32.xlu0 %v547_v51, %s13025_s27 }
  0x79   : > { %933 = vrot.lane.b32.xlu1 %v890_v3, %s13025_s27 }
  0x7a   : > { %931 = vrot.lane.b32.xlu0 %v549_v53, %s13025_s27  ;;  %v768_v53 = vld [vmem:[#allocation2 + $0x110] sm:$0xff] }
  0x7d   : > { %921 = vrot.lane.b32.xlu1 %v884_v4, %s13025_s27 }
  0x7e   : > { %919 = vrot.lane.b32.xlu0 %v543_v55, %s13025_s27 }
  0x81   : > { %925 = vrot.lane.b32.xlu1 %v886_v5, %s13025_s27 }
  0x82   : > { %923 = vrot.lane.b32.xlu0 %v545_v57, %s13025_s27 }
  0x85   : > { %913 = vrot.lane.b32.xlu1 %v880_v7, %s13025_s27 }
  0x86   : > { %911 = vrot.lane.b32.xlu0 %v539_v60, %s13025_s27 }
  0x89   : > { %917 = vrot.lane.b32.xlu1 %v882_v6, %s13025_s27 }
  0x8a   : > { %915 = vrot.lane.b32.xlu0 %v541_v62, %s13025_s27 }
  0x8d   : > { %824 = vrot.lane.b32.xlu1 %v779_v8, %s13026_s28  ;;  %v1001_v8 = vld [vmem:[#allocation2 + $0x14c] sm:$0xf] }
  0x8e   : > { %822 = vrot.lane.b32.xlu0 %v778_v13, %s13026_s28  ;;  %v1003_v13 = vld [vmem:[#allocation2 + $0x15c] sm:$0xf] }
  0x91   : > { %828 = vrot.lane.b32.xlu1 %v781_v12, %s13026_s28 }
  0x92   : > { %826 = vrot.lane.b32.xlu0 %v780_v19, %s13026_s28 }
  0x95   : > { %816 = vrot.lane.b32.xlu1 %v775_v20, %s13026_s28 }
  0x96   : > { %814 = vrot.lane.b32.xlu0 %v774_v24, %s13026_s28 }
  0x99   : > { %820 = vrot.lane.b32.xlu1 %v777_v27, %s13026_s28 }
  0x9a   : > { %818 = vrot.lane.b32.xlu0 %v776_v25, %s13026_s28 }
  0x9d   : > { %808 = vrot.lane.b32.xlu1 %v771_v30, %s13026_s28 }
  0x9e   : > { %806 = vrot.lane.b32.xlu0 %v770_v31, %s13026_s28  ;;  %v12361_v31 = vpack.i.bf16 %v1003_v13, %v1001_v8 }
  0x9f   : > { %v714_v35 = vpop.permute.xlu1 %713 }
  0xa0   : > { %v710_v38 = vpop.permute.xlu0 %709  ;;  %v731_v43 = vrot.slane %v714_v35, 4 }
  0xa1   : > { %812 = vrot.lane.b32.xlu1 %v773_v33, %s13026_s28  ;;  %v729_v46 = vrot.slane %v710_v38, 4  ;;  %v997_v33 = vld [vmem:[#allocation2 + $0x12c] sm:$0xf] }
  0xa2   : > { %810 = vrot.lane.b32.xlu0 %v772_v37, %s13026_s28 }
  0xa3   : > { %v716_v40 = vpop.permute.xlu1 %715 }
  0xa4   : > { %v732_v44 = vrot.slane %v716_v40, 4  ;;  %v712_v45 = vpop.permute.xlu0 %711 }
  0xa5   : > { %v730_v47 = vrot.slane %v712_v45, 4  ;;  %800 = vrot.lane.b32.xlu1 %v767_v39, %s13026_s28 }
  0xa6   : > { %798 = vrot.lane.b32.xlu0 %v766_v42, %s13026_s28  ;;  %v748_v51 = vsel %vm619_vm4, %v731_v43, %v732_v44 }
  0xa7   : > { %v704_v52 = vpop.permute.xlu1 %703  ;;  %v746_v54 = vsel %vm619_vm4, %v729_v46, %v730_v47  ;;  %v749_v55 = vsel %vm734_vm5, %v714_v35, %v748_v51  ;;  %v999_v35 = vld [vmem:[#allocation2 + $0x13c] sm:$0xf] }
  0xa8   : > { %v702_v56 = vpop.permute.xlu0 %701  ;;  %v747_v57 = vsel %vm734_vm5, %v710_v38, %v746_v54  ;;  %v726_v60 = vrot.slane %v704_v52, 4  ;;  %v993_v52 = vld [vmem:[#allocation2 + $0x10c] sm:$0xf] }
  0xa9   : > { %v725_v61 = vrot.slane %v702_v56, 4  ;;  %804 = vrot.lane.b32.xlu1 %v769_v50, %s13026_s28  ;;  %v11421_v62 = vcombine.high %v747_v57, %v749_v55  ;;  %v11420_v63 = vcombine.low %v747_v57, %v749_v55 }
  0xaa   : > { %802 = vrot.lane.b32.xlu0 %v768_v53, %s13026_s28  ;;  %v995_v53 = vld [vmem:[#allocation2 + $0x11c] sm:$0xf] }
  0xab   : > { %2245 = vmatprep.subr.bf16.mxu0 %v11421_v62  ;;  %v708_v0 = vpop.permute.xlu1 %707  ;;  %v742_v4 = vsel %vm619_vm4, %v725_v61, %v726_v60  ;;  %v1233_v60 = vld [vmem:[#allocation2 + $0x7c] sm:$0xf]  ;;  %v12371_v61 = vpack.i.bf16 %v995_v53, %v993_v52  ;;  %v1219_v53 = vld [vmem:[#allocation2 + $0xc] sm:$0xf] }
  0xac   : > { %2246 = vmatpush1.bf16.msra.mxu0 %v11420_v63  ;;  %v728_v2 = vrot.slane %v708_v0, 4  ;;  %v706_v3 = vpop.permute.xlu0 %705  ;;  %v743_v12 = vsel %vm734_vm5, %v702_v56, %v742_v4  ;;  %v12760_v4 = vld [vmem:[%s18797_s1 + $0x4] ss:$20 sps:$4 sm:$0xff]  }
  0xad   : > { %v727_v5 = vrot.slane %v706_v3, 4  ;;  %12357 = vrot.lane.b32.xlu1 %v12356_v58, %s13027_s29  ;;  %v1231_v58 = vld [vmem:[#allocation2 + $0x6c] sm:$0xf]  ;;  %2277 = vmatprep.mubr.bf16.mxu0 %v12760_v4 }
  0xae   : > { %1048 = vrot.lane.b32.xlu0 %v13287_v10, %s13027_s29 }
  0xaf   : > { %v744_v7 = vsel %vm619_vm4, %v727_v5, %v728_v2  ;;  %v696_v6 = vpop.permute.xlu1 %695 }
  0xb0   : > { %v745_v19 = vsel %vm734_vm5, %v706_v3, %v744_v7  ;;  %v694_v20 = vpop.permute.xlu0 %693  ;;  %v722_v24 = vrot.slane %v696_v6, 4  ;;  %v12376_v3 = vpack.i.bf16 %v1233_v60, %v1231_v58  ;;  %v1118_v60 = vld [vmem:[#allocation2 + $0xec] sm:$0xf] }
  0xb1   : > { %v721_v27 = vrot.slane %v694_v20, 4  ;;  %1040 = vrot.lane.b32.xlu1 %v13295_v21, %s13027_s29  ;;  %v11419_v25 = vcombine.high %v743_v12, %v745_v19  ;;  %v11418_v30 = vcombine.low %v743_v12, %v745_v19  ;;  %v12366_v21 = vpack.i.bf16 %v999_v35, %v997_v33 }
  0xb2   : > { %1052 = vrot.lane.b32.xlu0 %v13289_v11, %s13027_s29 }
  0xb3   : > { %2247 = vmatprep.subr.bf16.mxu0 %v11419_v25  ;;  %v700_v37 = vpop.permute.xlu1 %699  ;;  %v738_v40 = vsel %vm619_vm4, %v721_v27, %v722_v24  ;;  %v1227_v24 = vld [vmem:[#allocation2 + $0x4c] sm:$0xf]  ;;  %v1229_v27 = vld [vmem:[#allocation2 + $0x5c] sm:$0xf] }
  0xb4   : > { %2248 = vmatpush1.bf16.msra.mxu0 %v11418_v30  ;;  %v724_v38 = vrot.slane %v700_v37, 4  ;;  %v698_v39 = vpop.permute.xlu0 %697  ;;  %v739_v45 = vsel %vm734_vm5, %v694_v20, %v738_v40  ;;  %v1225_v40 = vld [vmem:[#allocation2 + $0x3c] sm:$0xf] }
  0xb5   : > { %v723_v42 = vrot.slane %v698_v39, 4  ;;  %1044 = vrot.lane.b32.xlu1 %v13297_v18, %s13027_s29 }
  0xb6   : > { %12362 = vrot.lane.b32.xlu0 %v12361_v31, %s13027_s29 }
  0xb7   : > { %v740_v43 = vsel %vm619_vm4, %v723_v42, %v724_v38  ;;  %v688_v44 = vpop.permute.xlu1 %687 }
  0xb8   : > { %v741_v46 = vsel %vm734_vm5, %v698_v39, %v740_v43  ;;  %v686_v47 = vpop.permute.xlu0 %685  ;;  %v718_v48 = vrot.slane %v688_v44, 4  ;;  %v1223_v39 = vld [vmem:[#allocation2 + $0x2c] sm:$0xf] }
  0xb9   : > { %v717_v49 = vrot.slane %v686_v47, 4  ;;  %12367 = vrot.lane.b32.xlu1 %v12366_v21, %s13027_s29  ;;  %v11417_v50 = vcombine.high %v739_v45, %v741_v46  ;;  %v11416_v51 = vcombine.low %v739_v45, %v741_v46 }
  0xba   : > { %1032 = vrot.lane.b32.xlu0 %v13306_v23, %s13027_s29 }
  0xbb   : > { %2249 = vmatprep.subr.bf16.mxu0 %v11417_v50  ;;  %v692_v18 = vpop.permute.xlu1 %691  ;;  %v733_v56 = vsel %vm619_vm4, %v717_v49, %v718_v48 }
  0xbc   : > { %2250 = vmatpush1.bf16.msra.mxu0 %v11416_v51  ;;  %v720_v54 = vrot.slane %v692_v18, 4  ;;  %v690_v55 = vpop.permute.xlu0 %689  ;;  %v735_v63 = vsel %vm734_vm5, %v686_v47, %v733_v56 }
  0xbd   : > { %v719_v57 = vrot.slane %v690_v55, 4  ;;  %1024 = vrot.lane.b32.xlu1 %v13320_v34, %s13027_s29 }
  0xbe   : > { %1036 = vrot.lane.b32.xlu0 %v13315_v28, %s13027_s29 }
  0xbf   : > { %v736_v23 = vsel %vm619_vm4, %v719_v57, %v720_v54  ;;  %v598_v62 = vpop.permute.xlu1 %597  ;;  %v1221_v54 = vld [vmem:[#allocation2 + $0x1c] sm:$0xf] }
  0xc0   : > { %v737_v0 = vsel %vm734_vm5, %v690_v55, %v736_v23  ;;  %v596_v2 = vpop.permute.xlu0 %595  ;;  %v616_v34 = vrot.slane %v598_v62, 4  ;;  %v12982_v23 = vld [vmem:[#allocation2 + $0x34] sm:$0xff]  ;;  %v12391_v62 = vpack.i.bf16 %v1221_v54, %v1219_v53  ;;  %v1342_v53 = vld [vmem:[#allocation2 + $0x15c] sm:$0xf] }
  0xc1   : > { %v615_v5 = vrot.slane %v596_v2, 4  ;;  %1028 = vrot.lane.b32.xlu1 %v13323_v32, %s13027_s29  ;;  %v11415_v28 = vcombine.high %v735_v63, %v737_v0  ;;  %v11414_v7 = vcombine.low %v735_v63, %v737_v0 }
  0xc2   : > { %12372 = vrot.lane.b32.xlu0 %v12371_v61, %s13027_s29  ;;  %v1120_v61 = vld [vmem:[#allocation2 + $0xfc] sm:$0xf] }
  0xc3   : > { %2251 = vmatprep.subr.bf16.mxu0 %v11415_v28  ;;  %v602_v6 = vpop.permute.xlu1 %601  ;;  %v633_v12 = vsel %vm619_vm4, %v615_v5, %v616_v34  ;;  %v12396_v4 = vpack.i.bf16 %v1120_v61, %v1118_v60  ;;  %v1110_v60 = vld [vmem:[#allocation2 + $0xac] sm:$0xf]  ;;  %v1112_v61 = vld [vmem:[#allocation2 + $0xbc] sm:$0xf] }
  0xc4   : > { %v618_v8 = vrot.slane %v602_v6, 4  ;;  %2252 = vmatpush1.bf16.msra.mxu0 %v11414_v7  ;;  %v600_v13 = vpop.permute.xlu0 %599  ;;  %v634_v25 = vsel %vm621_vm6, %v596_v2, %v633_v12 }
  0xc5   : > { %v617_v19 = vrot.slane %v600_v13, 4  ;;  %12377 = vrot.lane.b32.xlu1 %v12376_v3, %s13028_s7 }
  0xc6   : > { %1274 = vrot.lane.b32.xlu0 %v13170_v16, %s13028_s7  ;;  %v12381_v16 = vpack.i.bf16 %v1229_v27, %v1227_v24  ;;  %v1346_v24 = vld [vmem:[#allocation2 + $0x17c] sm:$0xf] }
  0xc7   : > { %v635_v32 = vsel %vm619_vm4, %v617_v19, %v618_v8  ;;  %v590_v20 = vpop.permute.xlu1 %589  ;;  %v12983_v19 = vld [vmem:[#allocation2 + $0xe4] sm:$0xff] }
  0xc8   : > { %v636_v30 = vsel %vm621_vm6, %v600_v13, %v635_v32  ;;  %v588_v31 = vpop.permute.xlu0 %587  ;;  %v612_v33 = vrot.slane %v590_v20, 4  ;;  %v1344_v20 = vld [vmem:[#allocation2 + $0x16c] sm:$0xf] }
  0xc9   : > { %v611_v35 = vrot.slane %v588_v31, 4  ;;  %1266 = vrot.lane.b32.xlu1 %v13174_v17, %s13028_s7  ;;  %v11413_v37 = vcombine.high %v634_v25, %v636_v30  ;;  %v11412_v38 = vcombine.low %v634_v25, %v636_v30  ;;  %v12386_v17 = vpack.i.bf16 %v1225_v40, %v1223_v39  ;;  %v1114_v39 = vld [vmem:[#allocation2 + $0xcc] sm:$0xf]  ;;  %v1116_v40 = vld [vmem:[#allocation2 + $0xdc] sm:$0xf] }
  0xca   : > { %1278 = vrot.lane.b32.xlu0 %v13153_v9, %s13028_s7 }
  0xcb   : > { %2253 = vmatprep.subr.bf16.mxu0 %v11413_v37  ;;  %v594_v42 = vpop.permute.xlu1 %593  ;;  %v629_v44 = vsel %vm619_vm4, %v611_v35, %v612_v33 }
  0xcc   : > { %v614_v21 = vrot.slane %v594_v42, 4  ;;  %2254 = vmatpush1.bf16.msra.mxu0 %v11412_v38  ;;  %v592_v43 = vpop.permute.xlu0 %591  ;;  %v630_v47 = vsel %vm621_vm6, %v588_v31, %v629_v44  ;;  %v12984_v38 = vld [vmem:[#allocation2 + $0xf4] sm:$0xff] }
  0xcd   : > { %v613_v45 = vrot.slane %v592_v43, 4  ;;  %1270 = vrot.lane.b32.xlu1 %v13190_v22, %s13028_s7 }
  0xce   : > { %12382 = vrot.lane.b32.xlu0 %v12381_v16, %s13028_s7  ;;  %v12401_v16 = vpack.i.bf16 %v1346_v24, %v1344_v20  ;;  %v1336_v24 = vld [vmem:[#allocation2 + $0x12c] sm:$0xf] }
  0xcf   : > { %v631_v46 = vsel %vm619_vm4, %v613_v45, %v614_v21  ;;  %v582_v9 = vpop.permute.xlu1 %581 }
  0xd0   : > { %v632_v48 = vsel %vm621_vm6, %v592_v43, %v631_v46  ;;  %v580_v49 = vpop.permute.xlu0 %579  ;;  %v608_v50 = vrot.slane %v582_v9, 4 }
  0xd1   : > { %v607_v51 = vrot.slane %v580_v49, 4  ;;  %12387 = vrot.lane.b32.xlu1 %v12386_v17, %s13028_s7  ;;  %v11411_v18 = vcombine.high %v630_v47, %v632_v48  ;;  %v11410_v52 = vcombine.low %v630_v47, %v632_v48 }
  0xd2   : > { %1258 = vrot.lane.b32.xlu0 %v13211_v29, %s13028_s7 }
  0xd3   : > { %2255 = vmatprep.subr.bf16.mxu0 %v11411_v18  ;;  %v586_v22 = vpop.permute.xlu1 %585  ;;  %v625_v57 = vsel %vm619_vm4, %v607_v51, %v608_v50 }
  0xd4   : > { %v610_v55 = vrot.slane %v586_v22, 4  ;;  %2256 = vmatpush1.bf16.msra.mxu0 %v11410_v52  ;;  %v584_v56 = vpop.permute.xlu0 %583  ;;  %v626_v0 = vsel %vm621_vm6, %v580_v49, %v625_v57  ;;  %v12985_v52 = vld [vmem:[#allocation2 + $0xc4] sm:$0xff]  ;;  %v1340_v22 = vld [vmem:[#allocation2 + $0x14c] sm:$0xf] }
  0xd5   : > { %v609_v58 = vrot.slane %v584_v56, 4  ;;  %1250 = vrot.lane.b32.xlu1 %v13231_v36, %s13028_s7 }
  0xd6   : > { %1262 = vrot.lane.b32.xlu0 %v12982_v23, %s13028_s7  ;;  %v12987_v23 = vld [vmem:[#allocation2 + $0xd4] sm:$0xff] }
  0xd7   : > { %v627_v29 = vsel %vm619_vm4, %v609_v58, %v610_v55  ;;  %v574_v63 = vpop.permute.xlu1 %573  ;;  %v12986_v58 = vld [vmem:[#allocation2 + $0x144] sm:$0xff] }
  0xd8   : > { %v628_v2 = vsel %vm621_vm6, %v584_v56, %v627_v29  ;;  %v572_v3 = vpop.permute.xlu0 %571  ;;  %v604_v34 = vrot.slane %v574_v63, 4 }
  0xd9   : > { %v603_v5 = vrot.slane %v572_v3, 4  ;;  %1254 = vrot.lane.b32.xlu1 %v13245_v41, %s13028_s7  ;;  %v11409_v36 = vcombine.high %v626_v0, %v628_v2  ;;  %v11408_v28 = vcombine.low %v626_v0, %v628_v2 }
  0xda   : > { %12392 = vrot.lane.b32.xlu0 %v12391_v62, %s13028_s7  ;;  %v12411_v62 = vpack.i.bf16 %v1342_v53, %v1340_v22 }
  0xdb   : > { %2257 = vmatprep.subr.bf16.mxu0 %v11409_v36  ;;  %v578_v7 = vpop.permute.xlu1 %577  ;;  %v620_v13 = vsel %vm619_vm4, %v603_v5, %v604_v34  ;;  %v12988_v36 = vld [vmem:[#allocation2 + $0x154] sm:$0xff] }
  0xdc   : > { %v606_v6 = vrot.slane %v578_v7, 4  ;;  %2258 = vmatpush1.bf16.msra.mxu0 %v11408_v28  ;;  %v576_v8 = vpop.permute.xlu0 %575  ;;  %v622_v27 = vsel %vm621_vm6, %v572_v3, %v620_v13 }
  0xdd   : > { %v605_v12 = vrot.slane %v576_v8, 4  ;;  %12397 = vrot.lane.b32.xlu1 %v12396_v4, %s13029_s8  ;;  %v12416_v4 = vpack.i.bf16 %v1112_v61, %v1110_v60 }
  0xde   : > { %1161 = vrot.lane.b32.xlu0 %v12983_v19, %s13029_s8 }
  0xdf   : > { %v623_v41 = vsel %vm619_vm4, %v605_v12, %v606_v6  ;;  %v938_v32 = vpop.permute.xlu1 %937 }
  0xe0   : > { %v624_v25 = vsel %vm621_vm6, %v576_v8, %v623_v41  ;;  %v936_v30 = vpop.permute.xlu0 %935  ;;  %v956_v31 = vrot.slane %v938_v32, 4  ;;  %v12989_v41 = vld [vmem:[#allocation2 + $0xa4] sm:$0xff] }
  0xe1   : > { %v955_v33 = vrot.slane %v936_v30, 4  ;;  %1387 = vrot.lane.b32.xlu1 %v13287_v10, %s13030_s9  ;;  %v11407_v35 = vcombine.high %v622_v27, %v624_v25  ;;  %v11406_v37 = vcombine.low %v622_v27, %v624_v25  ;;  %v12406_v10 = vpack.i.bf16 %v1116_v40, %v1114_v39  ;;  %v1338_v27 = vld [vmem:[#allocation2 + $0x13c] sm:$0xf]  ;;  %v12991_v39 = vld [vmem:[#allocation2 + $0xb4] sm:$0xff] }
  0xe2   : > { %1165 = vrot.lane.b32.xlu0 %v12984_v38, %s13029_s8  ;;  %v12421_v40 = vpack.i.bf16 %v1338_v27, %v1336_v24  ;;  %v1568_v24 = vld [vmem:[%s18798_s2 + $0x20] sm:$0xff] }
  0xe3   : > { %2259 = vmatprep.subr.bf16.mxu0 %v11407_v35  ;;  %v942_v42 = vpop.permute.xlu1 %941  ;;  %v972_v44 = vsel %vm619_vm4, %v955_v33, %v956_v31 }
  0xe4   : > { %v958_v21 = vrot.slane %v942_v42, 4  ;;  %2260 = vmatpush1.bf16.msra.mxu0 %v11406_v37  ;;  %v940_v43 = vpop.permute.xlu0 %939  ;;  %v973_v9 = vsel %vm960_vm7, %v936_v30, %v972_v44  ;;  %v12990_v37 = vld [vmem:[#allocation2 + $0x124] sm:$0xff]  ;;  %v1106_v42 = vld [vmem:[#allocation2 + $0x8c] sm:$0xf] }
  0xe5   : > { %v957_v45 = vrot.slane %v940_v43, 4  ;;  %1391 = vrot.lane.b32.xlu1 %v13289_v11, %s13030_s9 }
  0xe6   : > { %12402 = vrot.lane.b32.xlu0 %v12401_v16, %s13030_s9 }
  0xe7   : > { %v974_v17 = vsel %vm619_vm4, %v957_v45, %v958_v21  ;;  %v930_v46 = vpop.permute.xlu1 %929  ;;  %v1108_v21 = vld [vmem:[#allocation2 + $0x9c] sm:$0xf] }
  0xe8   : > { %v975_v47 = vsel %vm960_vm7, %v940_v43, %v974_v17  ;;  %v928_v48 = vpop.permute.xlu0 %927  ;;  %v952_v49 = vrot.slane %v930_v46, 4  ;;  %v12992_v46 = vld [vmem:[#allocation2 + $0x134] sm:$0xff] }
  0xe9   : > { %v951_v50 = vrot.slane %v928_v48, 4  ;;  %12407 = vrot.lane.b32.xlu1 %v12406_v10, %s13029_s8  ;;  %v11437_v51 = vcombine.high %v973_v9, %v975_v47  ;;  %v11436_v18 = vcombine.low %v973_v9, %v975_v47  ;;  %v12426_v9 = vpack.i.bf16 %v1108_v21, %v1106_v42  ;;  %v1567_v21 = vld [vmem:[%s18798_s2 + $0x18] sm:$0xff] }
  0xea   : > { %1153 = vrot.lane.b32.xlu0 %v12985_v52, %s13029_s8 }
  0xeb   : > { %2261 = vmatprep.subr.bf16.mxu0 %v11437_v51  ;;  %v934_v11 = vpop.permute.xlu1 %933  ;;  %v968_v56 = vsel %vm619_vm4, %v951_v50, %v952_v49 }
  0xec   : > { %v954_v54 = vrot.slane %v934_v11, 4  ;;  %2262 = vmatpush2.bf16.msra.mxu0 %v11436_v18  ;;  %v932_v55 = vpop.permute.xlu0 %931  ;;  %v969_v0 = vsel %vm960_vm7, %v928_v48, %v968_v56  ;;  %v12784_v18 = vld [vmem:[%s18797_s1 + $0xc] ss:$20 sps:$4 sm:$0xff]  }
  0xed   : > { %v953_v57 = vrot.slane %v932_v55, 4  ;;  %1379 = vrot.lane.b32.xlu1 %v12986_v58, %s13030_s9  ;;  %2390 = vmatprep.mubr.bf16.mxu1 %v12784_v18  ;;  %v1332_v56 = vld [vmem:[#allocation2 + $0x10c] sm:$0xf] }
  0xee   : > { %1157 = vrot.lane.b32.xlu0 %v12987_v23, %s13029_s8 }
  0xef   : > { %v970_v29 = vsel %vm619_vm4, %v953_v57, %v954_v54  ;;  %v922_v63 = vpop.permute.xlu1 %921  ;;  %v12993_v54 = vld [vmem:[#allocation2 + $0x84] sm:$0xff]  ;;  %v1334_v57 = vld [vmem:[#allocation2 + $0x11c] sm:$0xf] }
  0xf0   : > { %v971_v2 = vsel %vm960_vm7, %v932_v55, %v970_v29  ;;  %v920_v3 = vpop.permute.xlu0 %919  ;;  %v948_v34 = vrot.slane %v922_v63, 4  ;;  %v12995_v29 = vld [vmem:[#allocation2 + $0x94] sm:$0xff]  ;;  %v12431_v63 = vpack.i.bf16 %v1334_v57, %v1332_v56 }
  0xf1   : > { %v947_v5 = vrot.slane %v920_v3, 4  ;;  %1383 = vrot.lane.b32.xlu1 %v12988_v36, %s13030_s9  ;;  %v11435_v28 = vcombine.high %v969_v0, %v971_v2  ;;  %v11434_v7 = vcombine.low %v969_v0, %v971_v2 }
  0xf2   : > { %12412 = vrot.lane.b32.xlu0 %v12411_v62, %s13030_s9  ;;  %v12994_v62 = vld [vmem:[#allocation2 + $0x104] sm:$0xff] }
  0xf3   : > { %2263 = vmatprep.subr.bf16.mxu0 %v11435_v28  ;;  %v926_v6 = vpop.permute.xlu1 %925  ;;  %v964_v12 = vsel %vm619_vm4, %v947_v5, %v948_v34 }
  0xf4   : > { %v950_v8 = vrot.slane %v926_v6, 4  ;;  %2264 = vmatpush2.bf16.msra.mxu0 %v11434_v7  ;;  %v924_v13 = vpop.permute.xlu0 %923  ;;  %v965_v25 = vsel %vm960_vm7, %v920_v3, %v964_v12  ;;  %v12996_v7 = vld [vmem:[#allocation2 + $0x114] sm:$0xff] }
  0xf5   : > { %v949_v19 = vrot.slane %v924_v13, 4  ;;  %12417 = vrot.lane.b32.xlu1 %v12416_v4, %s13029_s8  ;;  %v1570_v12 = vld [vmem:[%s18798_s2 + $0x30] sm:$0xff] }
  0xf6   : > { %1145 = vrot.lane.b32.xlu0 %v12989_v41, %s13029_s8 }
  0xf7   : > { %v966_v32 = vsel %vm619_vm4, %v949_v19, %v950_v8  ;;  %v914_v20 = vpop.permute.xlu1 %913  ;;  %v1571_v8 = vld [vmem:[%s18798_s2 + $0x38] sm:$0xff] }
  0xf8   : > { %v967_v30 = vsel %vm960_vm7, %v924_v13, %v966_v32  ;;  %v912_v31 = vpop.permute.xlu0 %911  ;;  %v944_v33 = vrot.slane %v914_v20, 4 }
  0xf9   : > { %v943_v35 = vrot.slane %v912_v31, 4  ;;  %1371 = vrot.lane.b32.xlu1 %v12990_v37, %s13030_s9  ;;  %v11433_v38 = vcombine.high %v965_v25, %v967_v30  ;;  %v11432_v16 = vcombine.low %v965_v25, %v967_v30  ;;  %v1569_v30 = vld [vmem:[%s18798_s2 + $0x28] sm:$0xff] }
  0xfa   : > { %1149 = vrot.lane.b32.xlu0 %v12991_v39, %s13029_s8 }
  0xfb   : > { %2265 = vmatprep.subr.bf16.mxu0 %v11433_v38  ;;  %v918_v43 = vpop.permute.xlu1 %917  ;;  %v959_v10 = vsel %vm619_vm4, %v943_v35, %v944_v33 }
  0xfc   : > { %v946_v44 = vrot.slane %v918_v43, 4  ;;  %2266 = vmatpush2.bf16.msra.mxu0 %v11432_v16  ;;  %v916_v45 = vpop.permute.xlu0 %915  ;;  %v961_v49 = vsel %vm960_vm7, %v912_v31, %v959_v10 }
  0xfd   : > { %v945_v17 = vrot.slane %v916_v45, 4  ;;  %1375 = vrot.lane.b32.xlu1 %v12992_v46, %s13030_s9 }
  0xfe   : > { %12422 = vrot.lane.b32.xlu0 %v12421_v40, %s13030_s9  ;;  %v1566_v40 = vld [vmem:[%s18798_s2 + $0x10] sm:$0xff] }
  0xff   : > { %v962_v47 = vsel %vm619_vm4, %v945_v17, %v946_v44  ;;  %v825_v48 = vpop.permute.xlu1 %824  ;;  %v1564_v17 = vld [vmem:[%s18798_s2] sm:$0xff] }
 0x100   : > { %v963_v50 = vsel %vm960_vm7, %v916_v45, %v962_v47  ;;  %v823_v51 = vpop.permute.xlu0 %822  ;;  %v843_v52 = vrot.slane %v825_v48, 4  ;;  %v1565_v47 = vld [vmem:[%s18798_s2 + $0x8] sm:$0xff] }
 0x101   : > { %v842_v11 = vrot.slane %v823_v51, 4  ;;  %12427 = vrot.lane.b32.xlu1 %v12426_v9, %s13029_s8  ;;  %v11431_v22 = vcombine.high %v961_v49, %v963_v50  ;;  %v11430_v53 = vcombine.low %v961_v49, %v963_v50 }
 0x102   : > { %1137 = vrot.lane.b32.xlu0 %v12993_v54, %s13029_s8 }
 0x103   : > { %2267 = vmatprep.subr.bf16.mxu0 %v11431_v22  ;;  %v829_v55 = vpop.permute.xlu1 %828  ;;  %v859_v61 = vsel %vm619_vm4, %v842_v11, %v843_v52 }
 0x104   : > { %v845_v58 = vrot.slane %v829_v55, 4  ;;  %2268 = vmatpush2.bf16.msra.mxu0 %v11430_v53  ;;  %v827_v60 = vpop.permute.xlu0 %826  ;;  %v860_v3 = vsel %vm847_vm8, %v823_v51, %v859_v61 }
 0x105   : > { %v844_v23 = vrot.slane %v827_v60, 4  ;;  %1363 = vrot.lane.b32.xlu1 %v12994_v62, %s13030_s9 }
 0x106   : > { %1141 = vrot.lane.b32.xlu0 %v12995_v29, %s13029_s8 }
 0x107   : > { %v861_v0 = vsel %vm619_vm4, %v844_v23, %v845_v58  ;;  %v817_v2 = vpop.permute.xlu1 %816 }
 0x108   : > { %v862_v4 = vsel %vm847_vm8, %v827_v60, %v861_v0  ;;  %v815_v34 = vpop.permute.xlu0 %814  ;;  %v839_v5 = vrot.slane %v817_v2, 4 }
 0x109   : > { %v838_v36 = vrot.slane %v815_v34, 4  ;;  %v11429_v28 = vcombine.high %v860_v3, %v862_v4  ;;  %1367 = vrot.lane.b32.xlu1 %v12996_v7, %s13030_s9  ;;  %v11428_v6 = vcombine.low %v860_v3, %v862_v4 }
 0x10a   : > { %12432 = vrot.lane.b32.xlu0 %v12431_v63, %s13030_s9 }
 0x10b   : > { %2269 = vmatprep.subr.bf16.mxu0 %v11429_v28  ;;  %v821_v13 = vpop.permute.xlu1 %820  ;;  %v855_v32 = vsel %vm619_vm4, %v838_v36, %v839_v5  ;;  %v12758_v5 = vld [vmem:[%s18797_s1] ss:$20 sps:$4 sm:$0xff]  }
 0x10c   : > { %v841_v19 = vrot.slane %v821_v13, 4  ;;  %2270 = vmatpush2.bf16.msra.mxu0 %v11428_v6  ;;  %v819_v41 = vpop.permute.xlu0 %818  ;;  %v856_v31 = vsel %vm847_vm8, %v815_v34, %v855_v32  ;;  %v12761_v28 = vld [vmem:[%s18797_s1 + $0x2c] ss:$20 sps:$4 sm:$0xff]  }
 0x10d   : > { %v840_v20 = vrot.slane %v819_v41, 4  ;;  %1617 = vperm.xlu1 %12437, %v1571_v8  }
 0x10e   : > { %1612 = vperm.xlu0 %12436, %v1570_v12  }
 0x10f   : > { %v857_v27 = vsel %vm619_vm4, %v840_v20, %v841_v19  ;;  %v809_v25 = vpop.permute.xlu1 %808 }
 0x110   : > { %v858_v33 = vsel %vm847_vm8, %v819_v41, %v857_v27  ;;  %v807_v35 = vpop.permute.xlu0 %806  ;;  %v835_v37 = vrot.slane %v809_v25, 4 }
 0x111   : > { %v834_v38 = vrot.slane %v807_v35, 4  ;;  %v11427_v16 = vcombine.high %v856_v31, %v858_v33  ;;  %v11426_v39 = vcombine.low %v856_v31, %v858_v33  ;;  %1602 = vperm.xlu1 %12437, %v1568_v24  }
 0x112   : > { %1607 = vperm.xlu0 %12436, %v1569_v30  }
 0x113   : > { %2271 = vmatprep.subr.bf16.mxu0 %v11427_v16  ;;  %v813_v42 = vpop.permute.xlu1 %812  ;;  %v851_v45 = vsel %vm619_vm4, %v834_v38, %v835_v37  ;;  %v12763_v37 = vld [vmem:[%s18797_s1 + $0x28] ss:$20 sps:$4 sm:$0xff]  }
 0x114   : > { %v837_v43 = vrot.slane %v813_v42, 4  ;;  %2272 = vmatpush2.bf16.msra.mxu0 %v11426_v39  ;;  %v811_v44 = vpop.permute.xlu0 %810  ;;  %v852_v48 = vsel %vm847_vm8, %v807_v35, %v851_v45 }
 0x115   : > { %v836_v10 = vrot.slane %v811_v44, 4  ;;  %1592 = vperm.xlu1 %12437, %v1566_v40   ;;  %v12764_v40 = vld [vmem:[%s18797_s1 + $0x54] ss:$20 sps:$4 sm:$0xff]  }
 0x116   : > { %1597 = vperm.xlu0 %12436, %v1567_v21  }
 0x117   : > { %v853_v46 = vsel %vm619_vm4, %v836_v10, %v837_v43  ;;  %v801_v9 = vpop.permute.xlu1 %800 }
 0x118   : > { %v854_v49 = vsel %vm847_vm8, %v811_v44, %v853_v46  ;;  %v799_v50 = vpop.permute.xlu0 %798  ;;  %v831_v51 = vrot.slane %v801_v9, 4 }
 0x119   : > { %v830_v18 = vrot.slane %v799_v50, 4  ;;  %v11425_v52 = vcombine.high %v852_v48, %v854_v49  ;;  %v11424_v11 = vcombine.low %v852_v48, %v854_v49  ;;  %1582 = vperm.xlu1 %12437, %v1564_v17  }
 0x11a   : > { %1587 = vperm.xlu0 %12436, %v1565_v47  }
 0x11b   : > { %2273 = vmatprep.subr.bf16.mxu0 %v11425_v52  ;;  %v805_v22 = vpop.permute.xlu1 %804  ;;  %v846_v55 = vsel %vm619_vm4, %v830_v18, %v831_v51  ;;  %v12766_v52 = vld [vmem:[%s18797_s1 + $0x50] ss:$20 sps:$4 sm:$0xff]  }
 0x11c   : > { %v833_v53 = vrot.slane %v805_v22, 4  ;;  %2274 = vmatpush2.bf16.msra.mxu0 %v11424_v11  ;;  %v803_v54 = vpop.permute.xlu0 %802  ;;  %v848_v60 = vsel %vm847_vm8, %v799_v50, %v846_v55  ;;  %v12767_v55 = vld [vmem:[%s18797_s1 + $0x7c] ss:$20 sps:$4 sm:$0xff]  }
 0x11d   : > { %v832_v56 = vrot.slane %v803_v54, 4 }
 0x11f   : > { %v849_v57 = vsel %vm619_vm4, %v832_v56, %v833_v53  ;;  %v12358_v58 = vpop.permute.xlu1 %12357 }
 0x120   : > { %v850_v61 = vsel %vm847_vm8, %v803_v54, %v849_v57  ;;  %v12360_v23 = vunpack.i.h.bf16 %v12358_v58  ;;  %v12359_v62 = vunpack.i.l.bf16 %v12358_v58  ;;  %v1049_v29 = vpop.permute.xlu0 %1048 }
 0x121   : > { %v11423_v63 = vcombine.high %v848_v60, %v850_v61  ;;  %v11422_v0 = vcombine.low %v848_v60, %v850_v61  ;;  %v1068_v4 = vrot.slane %v1049_v29, 4 }
 0x122   : > { %v1069_v2 = vrot.slane %v12359_v62, 4  ;;  %v1071_v3 = vrot.slane %v12360_v23, 4 }
 0x123   : > { %2275 = vmatprep.subr.bf16.mxu0 %v11423_v63  ;;  %v1041_v34 = vpop.permute.xlu1 %1040 }
 0x124   : > { %2276 = vmatpush2.bf16.msra.mxu0 %v11422_v0  ;;  %v1053_v36 = vpop.permute.xlu0 %1052  ;;  %v1085_v6 = vsel %vm619_vm4, %v1068_v4, %v1069_v2  ;;  %v1064_v30 = vrot.slane %v1041_v34, 4 }
 0x125   : > { %v1070_v7 = vrot.slane %v1053_v36, 4  ;;  %v1086_v41 = vsel %vm1073_vm9, %v1049_v29, %v1085_v6 }
 0x127   : > { %v1045_v8 = vpop.permute.xlu1 %1044  ;;  %v1087_v13 = vsel %vm619_vm4, %v1070_v7, %v1071_v3  ;;  %2278 = vmatmul.mubr.bf16.vlgmr.msra.gmra.mxu0 %v12758_v5  ;;  %v12998_v7 = vld [vmem:[%s13139_s24 + $0x68] sm:$0xff] }
 0x128   : > { %v1066_v12 = vrot.slane %v1045_v8, 4  ;;  %v12363_v19 = vpop.permute.xlu0 %12362  ;;  %v1088_v32 = vsel %vm1073_vm9, %v1053_v36, %v1087_v13  ;;  %2287 = vmatprep.mubr.bf16.mxu0 %v12761_v28  ;;  %v12997_v28 = vld [vmem:[%s13139_s24 + $0x78] sm:$0xff] }
 0x129   : > { %v12365_v20 = vunpack.i.h.bf16 %v12363_v19  ;;  %v12364_v24 = vunpack.i.l.bf16 %v12363_v19  ;;  %v11453_v27 = vcombine.high %v1086_v41, %v1088_v32  ;;  %v11452_v25 = vcombine.low %v1086_v41, %v1088_v32  ;;  %v12999_v19 = vld [vmem:[%s13139_s24 + $0x70] sm:$0xff]  ;;  %v13000_v41 = vld [vmem:[%s13139_s24 + $0x60] sm:$0xff] }
 0x12a   : > { %v12305_v6 = vpack.c.bf16 %v12997_v28, %v12998_v7  ;;  %v12304_v32 = vpack.c.bf16 %v12999_v19, %v13000_v41  ;;  %v12775_v28 = vld [vmem:[%s18797_s1 + $0xc8] ss:$20 sps:$4 sm:$0xff]  }
 0x12b   : > { %v1067_v31 = vrot.slane %v12365_v20, 4  ;;  %v1065_v33 = vrot.slane %v12364_v24, 4  ;;  %2358 = vmatprep.subr.bf16.mxu1 %v11453_v27  ;;  %v12368_v35 = vpop.permute.xlu1 %12367  ;;  %v13001_v27 = vld [vmem:[%s13139_s24 + $0x48] sm:$0xff] }
 0x12c   : > { %v12370_v38 = vunpack.i.h.bf16 %v12368_v35  ;;  %v12369_v16 = vunpack.i.l.bf16 %v12368_v35  ;;  %2359 = vmatpush1.bf16.msra.mxu1 %v11452_v25  ;;  %v1033_v39 = vpop.permute.xlu0 %1032  ;;  %v13002_v25 = vld [vmem:[%s13139_s24 + $0x58] sm:$0xff]  ;;  %v13003_v35 = vld [vmem:[%s13139_s24 + $0x40] sm:$0xff] }
 0x12d   : > { %v1081_v42 = vsel %vm619_vm4, %v1064_v30, %v1065_v33  ;;  %v1083_v21 = vsel %vm619_vm4, %v1066_v12, %v1067_v31  ;;  %v1060_v17 = vrot.slane %v1033_v39, 4  ;;  %v12770_v12 = vld [vmem:[%s18797_s1 + $0xa4] ss:$20 sps:$4 sm:$0xff]   ;;  %v12303_v30 = vpack.c.bf16 %v13002_v25, %v13001_v27 }
 0x12e   : > { %v1061_v43 = vrot.slane %v12369_v16, 4  ;;  %v1082_v44 = vsel %vm1073_vm9, %v1041_v34, %v1081_v42  ;;  %v1084_v45 = vsel %vm1073_vm9, %v1045_v8, %v1083_v21  ;;  %v1063_v10 = vrot.slane %v12370_v38, 4  ;;  %v12769_v8 = vld [vmem:[%s18797_s1 + $0x78] ss:$20 sps:$4 sm:$0xff]  }
 0x12f   : > { %v1025_v46 = vpop.permute.xlu1 %1024  ;;  %v11451_v9 = vcombine.high %v1082_v44, %v1084_v45  ;;  %v11450_v47 = vcombine.low %v1082_v44, %v1084_v45  ;;  %2288 = vmatmul.mubr.bf16.gmra.mxu0 %v12763_v37  ;;  %v13004_v37 = vld [vmem:[%s13139_s24 + $0x50] sm:$0xff]  ;;  %v13005_v16 = vld [vmem:[%s13139_s24 + $0x28] sm:$0xff] }
 0x130   : > { %v1037_v48 = vpop.permute.xlu0 %1036  ;;  %2297 = vmatprep.mubr.bf16.mxu0 %v12764_v40  ;;  %v1077_v49 = vsel %vm619_vm4, %v1060_v17, %v1061_v43  ;;  %v1056_v61 = vrot.slane %v1025_v46, 4  ;;  %v12302_v38 = vpack.c.bf16 %v13004_v37, %v13003_v35 }
 0x131   : > { %v1062_v50 = vrot.slane %v1037_v48, 4  ;;  %2360 = vmatprep.subr.bf16.mxu1 %v11451_v9  ;;  %v1078_v11 = vsel %vm1073_vm9, %v1033_v39, %v1077_v49  ;;  %v13006_v39 = vld [vmem:[%s13139_s24 + $0x38] sm:$0xff]  ;;  %v13007_v49 = vld [vmem:[%s13139_s24 + $0x20] sm:$0xff] }
 0x132   : > { %2361 = vmatpush1.bf16.msra.mxu1 %v11450_v47  ;;  %v12301_v40 = vpack.c.bf16 %v13006_v39, %v13005_v16 }
 0x133   : > { %v1079_v51 = vsel %vm619_vm4, %v1062_v50, %v1063_v10  ;;  %v1029_v18 = vpop.permute.xlu1 %1028  ;;  %v12772_v10 = vld [vmem:[%s18797_s1 + $0xa0] ss:$20 sps:$4 sm:$0xff]  }
 0x134   : > { %v1080_v22 = vsel %vm1073_vm9, %v1037_v48, %v1079_v51  ;;  %v1058_v53 = vrot.slane %v1029_v18, 4  ;;  %v12373_v54 = vpop.permute.xlu0 %12372  ;;  %v13008_v50 = vld [vmem:[%s13139_s24 + $0x30] sm:$0xff] }
 0x135   : > { %v12375_v56 = vunpack.i.h.bf16 %v12373_v54  ;;  %v12374_v57 = vunpack.i.l.bf16 %v12373_v54  ;;  %v11449_v58 = vcombine.high %v1078_v11, %v1080_v22  ;;  %v11448_v60 = vcombine.low %v1078_v11, %v1080_v22 }
 0x136   : > { %v12300_v51 = vpack.c.bf16 %v13008_v50, %v13007_v49 }
 0x137   : > { %v1059_v23 = vrot.slane %v12375_v56, 4  ;;  %v1057_v62 = vrot.slane %v12374_v57, 4  ;;  %2362 = vmatprep.subr.bf16.mxu1 %v11449_v58  ;;  %v12378_v29 = vpop.permute.xlu1 %12377  ;;  %2298 = vmatmul.mubr.bf16.gmra.mxu0 %v12766_v52  ;;  %v13010_v52 = vld [vmem:[%s13139_s24 + $0x18] sm:$0xff] }
 0x138   : > { %v13576_v63 = vpop.permute.xlu0 %1274  ;;  %2363 = vmatpush1.bf16.msra.mxu1 %v11448_v60  ;;  %2307 = vmatprep.mubr.bf16.mxu0 %v12767_v55  ;;  %v12380_v20 = vunpack.i.h.bf16 %v12378_v29  ;;  %v12379_v33 = vunpack.i.l.bf16 %v12378_v29 }
 0x139   : > { %v1072_v0 = vsel %vm619_vm4, %v1056_v61, %v1057_v62  ;;  %v1075_v2 = vsel %vm619_vm4, %v1058_v53, %v1059_v23  ;;  %v1294_v47 = vrot.slane %v13576_v63, 4 }
 0x13a   : > { %v1074_v3 = vsel %vm1073_vm9, %v1025_v46, %v1072_v0  ;;  %v1076_v4 = vsel %vm1073_vm9, %v1029_v18, %v1075_v2  ;;  %v1297_v42 = vrot.slane %v12380_v20, 4  ;;  %v12773_v46 = vld [vmem:[%s18797_s1 + $0xcc] ss:$20 sps:$4 sm:$0xff]   ;;  %v1295_v9 = vrot.slane %v12379_v33, 4  ;;  %v13012_v2 = vld [vmem:[%s13139_s24 + $0x10] sm:$0xff] }
 0x13b   : > { %v13582_v34 = vpop.permute.xlu1 %1266  ;;  %v11447_v5 = vcombine.high %v1074_v3, %v1076_v4  ;;  %v11446_v36 = vcombine.low %v1074_v3, %v1076_v4  ;;  %v13009_v18 = vld [vmem:[%s13139_s24 + $0x8] sm:$0xff]  ;;  %v13011_v0 = vld [vmem:[%s13139_s24] sm:$0xff] }
 0x13c   : > { %v1279_v13 = vpop.permute.xlu0 %1278  ;;  %v12299_v11 = vpack.c.bf16 %v13010_v52, %v13009_v18  ;;  %v1311_v60 = vsel %vm619_vm4, %v1294_v47, %v1295_v9  ;;  %v1290_v61 = vrot.slane %v13582_v34, 4  ;;  %v12298_v3 = vpack.c.bf16 %v13012_v2, %v13011_v0  ;;  %v12781_v0 = vld [vmem:[%s18797_s1 + $0x118] ss:$20 sps:$4 sm:$0xff]  }
 0x13d   : > { %2364 = vmatprep.subr.bf16.mxu1 %v11447_v5  ;;  %v1296_v21 = vrot.slane %v1279_v13, 4  ;;  %v1312_v7 = vsel %vm1299_vm10, %v13576_v63, %v1311_v60 }
 0x13e   : > { %2365 = vmatpush1.bf16.msra.mxu1 %v11446_v36 }
 0x13f   : > { %v13594_v24 = vpop.permute.xlu1 %1270  ;;  %2366 = vmatprep.subr.bf16.mxu1 %v12305_v6  ;;  %2308 = vmatmul.mubr.bf16.gmra.mxu0 %v12769_v8  ;;  %v1313_v22 = vsel %vm619_vm4, %v1296_v21, %v1297_v42 }
 0x140   : > { %v12383_v31 = vpop.permute.xlu0 %12382  ;;  %2317 = vmatprep.mubr.bf16.mxu0 %v12770_v12  ;;  %v1292_v53 = vrot.slane %v13594_v24, 4  ;;  %v1314_v23 = vsel %vm1299_vm10, %v1279_v13, %v1313_v22  ;;  %v12776_v13 = vld [vmem:[%s18797_s1 + $0xf4] ss:$20 sps:$4 sm:$0xff]  }
 0x141   : > { %v12385_v43 = vunpack.i.h.bf16 %v12383_v31  ;;  %v12384_v44 = vunpack.i.l.bf16 %v12383_v31  ;;  %v11468_v39 = vcombine.low %v1312_v7, %v1314_v23 }
 0x142   : > { %2367 = vmatpush1.bf16.msra.mxu1 %v12304_v32  ;;  %v11469_v32 = vcombine.high %v1312_v7, %v1314_v23 }
 0x143   : > { %v12388_v45 = vpop.permute.xlu1 %12387  ;;  %2368 = vmatprep.subr.bf16.mxu1 %v12303_v30  ;;  %v1293_v54 = vrot.slane %v12385_v43, 4  ;;  %v1291_v55 = vrot.slane %v12384_v44, 4 }
 0x144   : > { %v13605_v17 = vpop.permute.xlu0 %1258  ;;  %v12390_v48 = vunpack.i.h.bf16 %v12388_v45  ;;  %v12389_v57 = vunpack.i.l.bf16 %v12388_v45 }
 0x145   : > { %v1307_v5 = vsel %vm619_vm4, %v1290_v61, %v1291_v55  ;;  %v1309_v36 = vsel %vm619_vm4, %v1292_v53, %v1293_v54  ;;  %v1286_v12 = vrot.slane %v13605_v17, 4 }
 0x146   : > { %2369 = vmatpush1.bf16.msra.mxu1 %v12302_v38  ;;  %v1289_v62 = vrot.slane %v12390_v48, 4  ;;  %v1287_v6 = vrot.slane %v12389_v57, 4  ;;  %v1308_v25 = vsel %vm1299_vm10, %v13582_v34, %v1307_v5  ;;  %v1310_v63 = vsel %vm1299_vm10, %v13594_v24, %v1309_v36  ;;  %v12779_v48 = vld [vmem:[%s18797_s1 + $0x11c] ss:$20 sps:$4 sm:$0xff]  }
 0x147   : > { %v13617_v56 = vpop.permute.xlu1 %1250  ;;  %2370 = vmatprep.subr.bf16.mxu1 %v12301_v40  ;;  %2318 = vmatmul.mubr.bf16.gmra.mxu0 %v12772_v10  ;;  %v11467_v34 = vcombine.high %v1308_v25, %v1310_v63  ;;  %v12778_v10 = vld [vmem:[%s18797_s1 + $0xf0] ss:$20 sps:$4 sm:$0xff]   ;;  %v11466_v9 = vcombine.low %v1308_v25, %v1310_v63 }
 0x148   : > { %v1263_v58 = vpop.permute.xlu0 %1262  ;;  %2327 = vmatprep.mubr.bf16.mxu0 %v12773_v46  ;;  %v1303_v35 = vsel %vm619_vm4, %v1286_v12, %v1287_v6  ;;  %v1282_v37 = vrot.slane %v13617_v56, 4 }
 0x149   : > { %v1288_v29 = vrot.slane %v1263_v58, 4  ;;  %v1304_v43 = vsel %vm1299_vm10, %v13605_v17, %v1303_v35 }
 0x14a   : > { %2371 = vmatpush1.bf16.msra.mxu1 %v12300_v51 }
 0x14b   : > { %v1255_v4 = vpop.permute.xlu1 %1254  ;;  %2372 = vmatprep.subr.bf16.mxu1 %v12299_v11  ;;  %v1305_v20 = vsel %vm619_vm4, %v1288_v29, %v1289_v62 }
 0x14c   : > { %v12393_v8 = vpop.permute.xlu0 %12392  ;;  %v1284_v27 = vrot.slane %v1255_v4, 4  ;;  %v1306_v40 = vsel %vm1299_vm10, %v1263_v58, %v1305_v20 }
 0x14d   : > { %v12395_v19 = vunpack.i.h.bf16 %v12393_v8  ;;  %v12394_v41 = vunpack.i.l.bf16 %v12393_v8  ;;  %v11465_v47 = vcombine.high %v1304_v43, %v1306_v40  ;;  %v11464_v53 = vcombine.low %v1304_v43, %v1306_v40 }
 0x14e   : > { %2373 = vmatpush1.bf16.msra.mxu1 %v12298_v3 }
 0x14f   : > { %v1285_v30 = vrot.slane %v12395_v19, 4  ;;  %v1283_v31 = vrot.slane %v12394_v41, 4  ;;  %2374 = vmatprep.subr.bf16.mxu1 %v11469_v32  ;;  %v12398_v33 = vpop.permute.xlu1 %12397  ;;  %2328 = vmatmul.mubr.bf16.gmra.mxu0 %v12775_v28 }
 0x150   : > { %v12400_v38 = vunpack.i.h.bf16 %v12398_v33  ;;  %v1162_v16 = vpop.permute.xlu0 %1161  ;;  %2337 = vmatprep.mubr.bf16.mxu0 %v12776_v13  ;;  %v12399_v42 = vunpack.i.l.bf16 %v12398_v33 }
 0x151   : > { %v1298_v24 = vsel %vm619_vm4, %v1282_v37, %v1283_v31  ;;  %v1301_v21 = vsel %vm619_vm4, %v1284_v27, %v1285_v30  ;;  %v1181_v18 = vrot.slane %v1162_v16, 4 }
 0x152   : > { %2375 = vmatpush2.bf16.msra.mxu1 %v11468_v39  ;;  %v1184_v44 = vrot.slane %v12400_v38, 4  ;;  %v1182_v49 = vrot.slane %v12399_v42, 4  ;;  %v1300_v51 = vsel %vm1299_vm10, %v13617_v56, %v1298_v24  ;;  %v1302_v17 = vsel %vm1299_vm10, %v1255_v4, %v1301_v21 }
 0x153   : > { %2376 = vmatprep.subr.bf16.mxu1 %v11467_v34  ;;  %v1388_v45 = vpop.permute.xlu1 %1387  ;;  %v11463_v54 = vcombine.high %v1300_v51, %v1302_v17  ;;  %v11462_v36 = vcombine.low %v1300_v51, %v1302_v17 }
 0x154   : > { %v1166_v46 = vpop.permute.xlu0 %1165  ;;  %v1198_v55 = vsel %vm619_vm4, %v1181_v18, %v1182_v49  ;;  %v1407_v61 = vrot.slane %v1388_v45, 4 }
 0x155   : > { %v1183_v50 = vrot.slane %v1166_v46, 4  ;;  %v1199_v2 = vsel %vm1186_vm11, %v1162_v16, %v1198_v55 }
 0x156   : > { %2377 = vmatpush2.bf16.msra.mxu1 %v11466_v9 }
 0x157   : > { %v1200_v52 = vsel %vm619_vm4, %v1183_v50, %v1184_v44  ;;  %2378 = vmatprep.subr.bf16.mxu1 %v11465_v47  ;;  %v1392_v11 = vpop.permute.xlu1 %1391  ;;  %2338 = vmatmul.mubr.bf16.gmra.mxu0 %v12778_v10 }
 0x158   : > { %v12403_v22 = vpop.permute.xlu0 %12402  ;;  %2347 = vmatprep.mubr.bf16.mxu0 %v12779_v48  ;;  %v1409_v57 = vrot.slane %v1392_v11, 4  ;;  %v1201_v56 = vsel %vm1186_vm11, %v1166_v46, %v1200_v52 }
 0x159   : > { %v12405_v58 = vunpack.i.h.bf16 %v12403_v22  ;;  %v12404_v60 = vunpack.i.l.bf16 %v12403_v22  ;;  %v11461_v28 = vcombine.high %v1199_v2, %v1201_v56  ;;  %v11460_v63 = vcombine.low %v1199_v2, %v1201_v56 }
 0x15a   : > { %2379 = vmatpush2.bf16.msra.mxu1 %v11464_v53 }
 0x15b   : > { %v1410_v23 = vrot.slane %v12405_v58, 4  ;;  %v1408_v62 = vrot.slane %v12404_v60, 4  ;;  %2380 = vmatprep.subr.bf16.mxu1 %v11463_v54  ;;  %v12408_v29 = vpop.permute.xlu1 %12407 }
 0x15c   : > { %v12410_v3 = vunpack.i.h.bf16 %v12408_v29  ;;  %v12409_v4 = vunpack.i.l.bf16 %v12408_v29  ;;  %v1154_v5 = vpop.permute.xlu0 %1153 }
 0x15d   : > { %v1424_v7 = vsel %vm619_vm4, %v1407_v61, %v1408_v62  ;;  %v1426_v6 = vsel %vm619_vm4, %v1409_v57, %v1410_v23  ;;  %v1177_v41 = vrot.slane %v1154_v5, 4 }
 0x15e   : > { %v1178_v8 = vrot.slane %v12409_v4, 4  ;;  %2381 = vmatpush2.bf16.msra.mxu1 %v11462_v36  ;;  %v1425_v13 = vsel %vm1412_vm12, %v1388_v45, %v1424_v7  ;;  %v1427_v12 = vsel %vm1412_vm12, %v1392_v11, %v1426_v6  ;;  %v1180_v19 = vrot.slane %v12410_v3, 4 }
 0x15f   : > { %2382 = vmatprep.subr.bf16.mxu1 %v11461_v28  ;;  %v1380_v32 = vpop.permute.xlu1 %1379  ;;  %v11476_v20 = vcombine.low %v1425_v13, %v1427_v12  ;;  %v11477_v27 = vcombine.high %v1425_v13, %v1427_v12  ;;  %2348 = vmatmul.mubr.bf16.gmra.mxu0 %v12781_v0 }
 0x160   : > { %v1158_v25 = vpop.permute.xlu0 %1157  ;;  %2503 = vmatprep.mubr.bf16.mxu0 %v18802_v1  ;;  %v1194_v30 = vsel %vm619_vm4, %v1177_v41, %v1178_v8  ;;  %v1403_v21 = vrot.slane %v1380_v32, 4 }
 0x161   : > { %v1179_v31 = vrot.slane %v1158_v25, 4  ;;  %2479 = vmatprep.subr.bf16.mxu0 %v11477_v27  ;;  %v1195_v37 = vsel %vm1186_vm11, %v1154_v5, %v1194_v30 }
 0x162   : > { %2383 = vmatpush2.bf16.msra.mxu1 %v11460_v63  ;;  %2480 = vmatpush1.bf16.msra.mxu0 %v11476_v20 }
 0x163   : > { %v1196_v33 = vsel %vm619_vm4, %v1179_v31, %v1180_v19  ;;  %v1384_v35 = vpop.permute.xlu1 %1383 }
 0x164   : > { %v1197_v38 = vsel %vm1186_vm11, %v1158_v25, %v1196_v33  ;;  %v1405_v16 = vrot.slane %v1384_v35, 4  ;;  %v12413_v39 = vpop.permute.xlu0 %12412 }
 0x165   : > { %v12415_v40 = vunpack.i.h.bf16 %v12413_v39  ;;  %v12414_v42 = vunpack.i.l.bf16 %v12413_v39  ;;  %v11459_v34 = vcombine.high %v1195_v37, %v1197_v38  ;;  %v11458_v24 = vcombine.low %v1195_v37, %v1197_v38 }
 0x167   : > { %v1406_v43 = vrot.slane %v12415_v40, 4  ;;  %v1404_v44 = vrot.slane %v12414_v42, 4  ;;  %2384 = vmatprep.subr.bf16.mxu1 %v11459_v34  ;;  %v12418_v45 = vpop.permute.xlu1 %12417 }
 0x168   : > { %v12420_v10 = vunpack.i.h.bf16 %v12418_v45  ;;  %v12419_v46 = vunpack.i.l.bf16 %v12418_v45  ;;  %v1146_v9 = vpop.permute.xlu0 %1145  ;;  %2385 = vmatpush2.bf16.msra.mxu1 %v11458_v24 }
 0x169   : > { %v1420_v47 = vsel %vm619_vm4, %v1403_v21, %v1404_v44  ;;  %v1422_v48 = vsel %vm619_vm4, %v1405_v16, %v1406_v43  ;;  %v1173_v18 = vrot.slane %v1146_v9, 4 }
 0x16a   : > { %v1174_v49 = vrot.slane %v12419_v46, 4  ;;  %v1421_v50 = vsel %vm1412_vm12, %v1380_v32, %v1420_v47  ;;  %v1423_v51 = vsel %vm1412_vm12, %v1384_v35, %v1422_v48  ;;  %v1176_v17 = vrot.slane %v12420_v10, 4  ;;  %v12782_v10 = vld [vmem:[%s18797_s1 + $0x8] ss:$20 sps:$4 sm:$0xff]  }
 0x16b   : > { %v1372_v52 = vpop.permute.xlu1 %1371  ;;  %v11474_v11 = vcombine.low %v1421_v50, %v1423_v51  ;;  %v11475_v22 = vcombine.high %v1421_v50, %v1423_v51  ;;  %v12786_v46 = vld [vmem:[%s18797_s1 + $0x34] ss:$20 sps:$4 sm:$0xff]  }
 0x16c   : > { %v1150_v53 = vpop.permute.xlu0 %1149  ;;  %v1190_v54 = vsel %vm619_vm4, %v1173_v18, %v1174_v49  ;;  %v1399_v3 = vrot.slane %v1372_v52, 4  ;;  %v12788_v18 = vld [vmem:[%s18797_s1 + $0x30] ss:$20 sps:$4 sm:$0xff]  }
 0x16d   : > { %v1175_v55 = vrot.slane %v1150_v53, 4  ;;  %2481 = vmatprep.subr.bf16.mxu0 %v11475_v22  ;;  %v1191_v60 = vsel %vm1186_vm11, %v1146_v9, %v1190_v54  ;;  %v12792_v22 = vld [vmem:[%s18797_s1 + $0x58] ss:$20 sps:$4 sm:$0xff]   ;;  %v12793_v54 = vld [vmem:[%s18797_s1 + $0x60] ss:$20 sps:$4 sm:$0xff]  }
 0x16e   : > { %2482 = vmatpush1.bf16.msra.mxu0 %v11474_v11  ;;  %v12789_v11 = vld [vmem:[%s18797_s1 + $0x38] ss:$20 sps:$4 sm:$0xff]  }
 0x16f   : > { %v1192_v57 = vsel %vm619_vm4, %v1175_v55, %v1176_v17  ;;  %v1376_v58 = vpop.permute.xlu1 %1375  ;;  %v12785_v17 = vld [vmem:[%s18797_s1 + $0x10] ss:$20 sps:$4 sm:$0xff]   ;;  %v12796_v55 = vld [vmem:[%s18797_s1 + $0x80] ss:$20 sps:$4 sm:$0xff]  }
 0x170   : > { %v1193_v56 = vsel %vm1186_vm11, %v1150_v53, %v1192_v57  ;;  %v1401_v61 = vrot.slane %v1376_v58, 4  ;;  %v12423_v23 = vpop.permute.xlu0 %12422  ;;  %v12794_v53 = vld [vmem:[%s18797_s1 + $0x84] ss:$20 sps:$4 sm:$0xff]   ;;  %v12797_v57 = vld [vmem:[%s18797_s1 + $0x88] ss:$20 sps:$4 sm:$0xff]  }
 0x171   : > { %v12425_v62 = vunpack.i.h.bf16 %v12423_v23  ;;  %v12424_v29 = vunpack.i.l.bf16 %v12423_v23  ;;  %v11457_v0 = vcombine.high %v1191_v60, %v1193_v56  ;;  %v11456_v2 = vcombine.low %v1191_v60, %v1193_v56 }
 0x173   : > { %v1402_v4 = vrot.slane %v12425_v62, 4  ;;  %v1400_v5 = vrot.slane %v12424_v29, 4  ;;  %2386 = vmatprep.subr.bf16.mxu1 %v11457_v0  ;;  %v12428_v36 = vpop.permute.xlu1 %12427 }
 0x174   : > { %v12430_v28 = vunpack.i.h.bf16 %v12428_v36  ;;  %v12429_v7 = vunpack.i.l.bf16 %v12428_v36  ;;  %v1138_v6 = vpop.permute.xlu0 %1137  ;;  %2387 = vmatpush2.bf16.msra.mxu1 %v11456_v2 }
 0x175   : > { %v1416_v8 = vsel %vm619_vm4, %v1399_v3, %v1400_v5  ;;  %v1418_v13 = vsel %vm619_vm4, %v1401_v61, %v1402_v4  ;;  %v1169_v20 = vrot.slane %v1138_v6, 4 }
 0x176   : > { %v1170_v12 = vrot.slane %v12429_v7, 4  ;;  %v1417_v19 = vsel %vm1412_vm12, %v1372_v52, %v1416_v8  ;;  %v1419_v41 = vsel %vm1412_vm12, %v1376_v58, %v1418_v13  ;;  %v1172_v32 = vrot.slane %v12430_v28, 4  ;;  %v12790_v52 = vld [vmem:[%s18797_s1 + $0x5c] ss:$20 sps:$4 sm:$0xff]  }
 0x177   : > { %v11472_v27 = vcombine.low %v1417_v19, %v1419_v41  ;;  %v11473_v25 = vcombine.high %v1417_v19, %v1419_v41  ;;  %v1364_v63 = vpop.permute.xlu1 %1363 }
 0x178   : > { %v1142_v30 = vpop.permute.xlu0 %1141  ;;  %v1185_v31 = vsel %vm619_vm4, %v1169_v20, %v1170_v12  ;;  %v1395_v43 = vrot.slane %v1364_v63, 4 }
 0x179   : > { %v1171_v33 = vrot.slane %v1142_v30, 4  ;;  %2483 = vmatprep.subr.bf16.mxu0 %v11473_v25  ;;  %v1187_v38 = vsel %vm1186_vm11, %v1138_v6, %v1185_v31 }
 0x17a   : > { %2484 = vmatpush1.bf16.msra.mxu0 %v11472_v27 }
 0x17b   : > { %v1188_v35 = vsel %vm619_vm4, %v1171_v33, %v1172_v32  ;;  %v1368_v37 = vpop.permute.xlu1 %1367 }
 0x17c   : > { %v1189_v16 = vsel %vm1186_vm11, %v1142_v30, %v1188_v35  ;;  %v12433_v39 = vpop.permute.xlu0 %12432  ;;  %v1397_v40 = vrot.slane %v1368_v37, 4 }
 0x17d   : > { %v12435_v42 = vunpack.i.h.bf16 %v12433_v39  ;;  %v12434_v34 = vunpack.i.l.bf16 %v12433_v39  ;;  %v11455_v24 = vcombine.high %v1187_v38, %v1189_v16  ;;  %v11454_v21 = vcombine.low %v1187_v38, %v1189_v16 }
 0x17f   : > { %v1398_v44 = vrot.slane %v12435_v42, 4  ;;  %v1396_v45 = vrot.slane %v12434_v34, 4  ;;  %2388 = vmatprep.subr.bf16.mxu1 %v11455_v24 }
 0x180   : > { %2389 = vmatpush2.bf16.msra.mxu1 %v11454_v21 }
 0x181   : > { %v1411_v9 = vsel %vm619_vm4, %v1395_v43, %v1396_v45  ;;  %v1414_v47 = vsel %vm619_vm4, %v1397_v40, %v1398_v44 }
 0x182   : > { %v1413_v48 = vsel %vm1412_vm12, %v1364_v63, %v1411_v9  ;;  %v1415_v49 = vsel %vm1412_vm12, %v1368_v37, %v1414_v47 }
 0x183   : > { %v11470_v50 = vcombine.low %v1413_v48, %v1415_v49  ;;  %2391 = vmatmul.mubr.bf16.vlgmr.msra.gmra.mxu1 %v12782_v10  ;;  %v11471_v51 = vcombine.high %v1413_v48, %v1415_v49 }
 0x184   : > { %2400 = vmatprep.mubr.bf16.mxu1 %v12786_v46 }
 0x185   : > { %2485 = vmatprep.subr.bf16.mxu0 %v11471_v51 }
 0x186   : > { %2486 = vmatpush1.bf16.msra.mxu0 %v11470_v50 }
 0x188   : > { %v13761_v30 = vpop.permute.xlu1 %1617 }
 0x189   : > { %11478 = vmatmul.mubr.msk.bf16.vlgmr.msra.gmra.mxu0 %vm2220_vm13, %v12785_v17  ;;  %v13765_v33 = vpop.permute.xlu0 %1612 }
 0x18a   : > { %2513 = vmatprep.mubr.bf16.mxu0 %v18802_v1 }
 0x18b   : > { %2401 = vmatmul.mubr.bf16.gmra.mxu1 %v12788_v18 }
 0x18c   : > { %2410 = vmatprep.mubr.bf16.mxu1 %v12790_v52  ;;  %v1603_v35 = vpop.permute.xlu1 %1602 }
 0x18d   : > { %v1608_v38 = vpop.permute.xlu0 %1607 }
 0x190   : > { %v1593_v39 = vpop.permute.xlu1 %1592 }
 0x191   : > { %11479 = vmatmul.mubr.msk.bf16.gmra.mxu0 %vm2220_vm13, %v12789_v11  ;;  %v1598_v42 = vpop.permute.xlu0 %1597 }
 0x192   : > { %2523 = vmatprep.mubr.bf16.mxu0 %v18802_v1 }
 0x193   : > { %2411 = vmatmul.mubr.bf16.gmra.mxu1 %v12792_v22 }
 0x194   : > { %2420 = vmatprep.mubr.bf16.mxu1 %v12794_v53  ;;  %v1583_v34 = vpop.permute.xlu1 %1582 }
 0x195   : > { %v1588_v44 = vpop.permute.xlu0 %1587 }
 0x199   : > { %11480 = vmatmul.mubr.msk.bf16.gmra.mxu0 %vm2220_vm13, %v12793_v54 }
 0x19a   : > { %2533 = vmatprep.mubr.bf16.mxu0 %v18802_v1 }
 0x19b   : > { %2421 = vmatmul.mubr.bf16.gmra.mxu1 %v12796_v55 }
 0x1a1   : > { %11481 = vmatmul.mubr.msk.bf16.gmra.mxu0 %vm2220_vm13, %v12797_v57 }
 0x1a2   : > { %2543 = vmatprep.mubr.bf16.mxu0 %v18802_v1 }
 0x1e7   : > { %v2279_v58 = vpop.f32.mrf.mxu0 }
 0x1e8   : > { %v2280_v45 = vadd.f32 %v2279_v58, %v1583_v34 }
 0x1e9   : > { %v2281_v60 = vpop.f32.mrf.mxu0 }
 0x1ea   : > { %v2282_v47 = vadd.f32 %v2281_v60, %v1583_v34 }
 0x1eb   : > { %v2283_v56 = vpop.f32.mrf.mxu0 }
 0x1ec   : > { %v2284_v51 = vadd.f32 %v2283_v56, %v1588_v44 }
 0x1ed   : > { %v2285_v61 = vpop.f32.mrf.mxu0 }
 0x1ee   : > { %v2286_v54 = vadd.f32 %v2285_v61, %v1588_v44 }
 0x1ef   : > { %v2289_v23 = vpop.f32.mrf.mxu0 }
 0x1f0   : > { %v2290_v55 = vadd.f32 %v2289_v23, %v1593_v39 }
 0x1f1   : > { %v2291_v62 = vpop.f32.mrf.mxu0 }
 0x1f2   : > { %v2292_v57 = vadd.f32 %v2291_v62, %v1593_v39 }
 0x1f3   : > { %v2293_v29 = vpop.f32.mrf.mxu0 }
 0x1f5   : > { %v2295_v0 = vpop.f32.mrf.mxu0 }
 0x1f6   : > { %v2296_v34 = vadd.f32 %v2295_v0, %v1598_v42 }
 0x1f7   : > { %v2299_v2 = vpop.f32.mrf.mxu0 }
 0x1f9   : > { %v2301_v3 = vpop.f32.mrf.mxu0 }
 0x1fb   : > { %v2303_v4 = vpop.f32.mrf.mxu0 }
 0x1fd   : > { %v2305_v5 = vpop.f32.mrf.mxu0 }
 0x1ff   : > { %v13733_v36 = vpop.f32.mrf.mxu0 }
 0x201   : > { %v13735_v28 = vpop.f32.mrf.mxu0 }
 0x203   : > { %v13737_v7 = vpop.f32.mrf.mxu0 }
 0x205   : > { %v13739_v6 = vpop.f32.mrf.mxu0 }
 0x207   : > { %v13741_v8 = vpop.f32.mrf.mxu0 }
 0x208   : > { %18923 = vst [vmem:[#allocation8_spill] sm:$0xff] %v13741_v8 }
 0x209   : > { %v13743_v13 = vpop.f32.mrf.mxu0 }
 0x20a   : > { %18924 = vst [vmem:[#allocation9_spill] sm:$0xff] %v13743_v13  ;;  %v12806_v13 = vld [vmem:[%s18797_s1 + $0xf8] ss:$20 sps:$4 sm:$0xff]  }
 0x20b   : > { %v13745_v12 = vpop.f32.mrf.mxu0 }
 0x20c   : > { %18925 = vst [vmem:[#allocation10_spill] sm:$0xff] %v13745_v12 }
 0x20d   : > { %v13747_v19 = vpop.f32.mrf.mxu0 }
 0x20e   : > { %18926 = vst [vmem:[#allocation11_spill] sm:$0xff] %v13747_v19 }
 0x20f   : > { %v13749_v41 = vpop.f32.mrf.mxu0 }
 0x210   : > { %18927 = vst [vmem:[#allocation12_spill] sm:$0xff] %v13749_v41 }
 0x211   : > { %v13751_v32 = vpop.f32.mrf.mxu0 }
 0x212   : > { %18928 = vst [vmem:[#allocation13_spill] sm:$0xff] %v13751_v32 }
 0x213   : > { %v13753_v20 = vpop.f32.mrf.mxu0 }
 0x214   : > { %18929 = vst [vmem:[#allocation14_spill] sm:$0xff] %v13753_v20 }
 0x215   : > { %v13755_v27 = vpop.f32.mrf.mxu0 }
 0x216   : > { %18930 = vst [vmem:[#allocation15_spill] sm:$0xff] %v13755_v27 }
 0x217   : > { %v13757_v25 = vpop.f32.mrf.mxu0 }
 0x218   : > { %18931 = vst [vmem:[#allocation16_spill] sm:$0xff] %v13757_v25  ;;  %v12798_v25 = vld [vmem:[%s18797_s1 + $0xac] ss:$20 sps:$4 sm:$0xff]  }
 0x219   : > { %v13759_v63 = vpop.f32.mrf.mxu0  ;;  %2430 = vmatprep.mubr.bf16.mxu1 %v12798_v25  ;;  %v12801_v25 = vld [vmem:[%s18797_s1 + $0xd4] ss:$20 sps:$4 sm:$0xff]  }
 0x21a   : > { %18932 = vst [vmem:[#allocation17_spill] sm:$0xff] %v13759_v63  ;;  %v3313_v63 = vld [vmem:[#allocation2 + $0x14c] sm:$0xf] }
 0x21b   : > { %v13763_v31 = vpop.f32.mrf.mxu0 }
 0x21c   : > { %18933 = vst [vmem:[#allocation18_spill] sm:$0xff] %v13763_v31  ;;  %v12800_v31 = vld [vmem:[%s18797_s1 + $0xa8] ss:$20 sps:$4 sm:$0xff]  }
 0x21d   : > { %v13767_v37 = vpop.f32.mrf.mxu0  ;;  %2431 = vmatmul.mubr.bf16.gmra.mxu1 %v12800_v31  ;;  %v3309_v31 = vld [vmem:[#allocation2 + $0x12c] sm:$0xf] }
 0x21e   : > { %18934 = vst [vmem:[#allocation19_spill] sm:$0xff] %v13767_v37  ;;  %2440 = vmatprep.mubr.bf16.mxu1 %v12801_v25  ;;  %v3307_v25 = vld [vmem:[#allocation2 + $0x11c] sm:$0xf] }
 0x21f   : > { %v13769_v16 = vpop.f32.mrf.mxu0 }
 0x220   : > { %18935 = vst [vmem:[#allocation20_spill] sm:$0xff] %v13769_v16 }
 0x221   : > { %v13771_v40 = vpop.f32.mrf.mxu0 }
 0x222   : > { %18936 = vst [vmem:[#allocation21_spill] sm:$0xff] %v13771_v40  ;;  %v2294_v40 = vadd.f32 %v2293_v29, %v1598_v42 }
 0x223   : > { %v13773_v24 = vpop.f32.mrf.mxu0 }
 0x224   : > { %18937 = vst [vmem:[#allocation22_spill] sm:$0xff] %v13773_v24 }
 0x225   : > { %v13775_v10 = vpop.f32.mrf.mxu0 }
 0x226   : > { %18938 = vst [vmem:[#allocation23_spill] sm:$0xff] %v13775_v10 }
 0x243   : > { %v2392_v21 = vpop.f32.mrf.mxu1 }
 0x244   : > { %v2393_v9 = vadd.f32 %v2392_v21, %v2280_v45  ;;  %v2300_v45 = vadd.f32 %v2299_v2, %v1603_v35 }
 0x245   : > { %v2394_v43 = vpop.f32.mrf.mxu1 }
 0x246   : > { %v2395_v50 = vadd.f32 %v2394_v43, %v2282_v47  ;;  %v2302_v43 = vadd.f32 %v2301_v3, %v1603_v35 }
 0x247   : > { %v2396_v46 = vpop.f32.mrf.mxu1 }
 0x248   : > { %v2397_v11 = vadd.f32 %v2396_v46, %v2284_v51  ;;  %v13779_v46 = vadd.f32 %v2305_v5, %v1608_v38 }
 0x249   : > { %v2398_v48 = vpop.f32.mrf.mxu1  ;;  %v2505_v49 = vpop.f32.mrf.mxu0 }
 0x24a   : > { %v2506_v17 = vadd.f32 %v2505_v49, %v2393_v9  ;;  %v2399_v56 = vadd.f32 %v2398_v48, %v2286_v54  ;;  %v2304_v49 = vadd.f32 %v2303_v4, %v1608_v38  ;;  %v13799_v38 = vadd.f32 %v13733_v36, %v13765_v33 }
 0x24b   : > { %v2402_v18 = vpop.f32.mrf.mxu1  ;;  %v2507_v52 = vpop.f32.mrf.mxu0 }
 0x24c   : > { %v2584_v22 = vmul.f32 0.2, %v2506_v17  ;;  %v2508_v53 = vadd.f32 %v2507_v52, %v2395_v50  ;;  %v2403_v29 = vadd.f32 %v2402_v18, %v2290_v55  ;;  %v13803_v18 = vadd.f32 %v13735_v28, %v13765_v33 }
 0x24d   : > { %v2404_v1 = vpop.f32.mrf.mxu1  ;;  %v2509_v58 = vpop.f32.mrf.mxu0 }
 0x24e   : > { %v13777_v16 = vmax.f32 %v2506_v17, %v2584_v22  ;;  %v2585_v21 = vmul.f32 0.2, %v2508_v53  ;;  %v2510_v60 = vadd.f32 %v2509_v58, %v2397_v11  ;;  %v2405_v42 = vadd.f32 %v2404_v1, %v2292_v57 }
 0x24f   : > { %v2406_v9 = vpop.f32.mrf.mxu1  ;;  %v2511_v47 = vpop.f32.mrf.mxu0 }
 0x250   : > { %18939 = vst [vmem:[#allocation24_spill] sm:$0xff] %v13777_v16  ;;  %v13781_v50 = vmax.f32 %v2508_v53, %v2585_v21  ;;  %v2586_v61 = vmul.f32 0.2, %v2510_v60  ;;  %v2704_v23 = vmul.f32 %v13164_v14, %v13777_v16  ;;  %v2776_v62 = vmul.f32 %v13166_v15, %v13777_v16 }
 0x251   : > { %v2512_v39 = vadd.f32 %v2511_v47, %v2399_v56  ;;  %v2408_v0 = vpop.f32.mrf.mxu1  ;;  %v2515_v2 = vpop.f32.mrf.mxu0  ;;  %v2407_v22 = vadd.f32 %v2406_v9, %v2294_v40 }
 0x252   : > { %18940 = vst [vmem:[#allocation25_spill] sm:$0xff] %v13781_v50  ;;  %v13789_v3 = vpack.c.bf16 %v13781_v50, %v13777_v16  ;;  %v2705_v4 = vmul.f32 %v13201_v26, %v13781_v50  ;;  %v2777_v5 = vmul.f32 %v13267_v59, %v13781_v50  ;;  %v13795_v35 = vmax.f32 %v2510_v60, %v2586_v61 }
 0x253   : > { %v2587_v44 = vmul.f32 0.2, %v2512_v39  ;;  %v2516_v48 = vadd.f32 %v2515_v2, %v2403_v29  ;;  %v2412_v51 = vpop.f32.mrf.mxu1  ;;  %v2517_v17 = vpop.f32.mrf.mxu0  ;;  %v2409_v54 = vadd.f32 %v2408_v0, %v2296_v34  ;;  %v2314_v61 = vadd.f32 %v13737_v7, %v13761_v30 }
 0x254   : > { %18941 = vst [vmem:[#allocation26_spill] sm:$0xff] %v13795_v35  ;;  %2696 = vst [vmem:[#allocation2 + $0x4] sm:$0xff] %v13789_v3  ;;  %v12210_v52 = vpack.c.bf16 %v2705_v4, %v2704_v23  ;;  %v13806_v11 = vpack.c.bf16 %v2777_v5, %v2776_v62  ;;  %v2518_v55 = vadd.f32 %v2517_v17, %v2405_v42 }
 0x255   : > { %v13808_v53 = vmax.f32 %v2512_v39, %v2587_v44  ;;  %v2588_v36 = vmul.f32 0.2, %v2516_v48  ;;  %v2414_v1 = vpop.f32.mrf.mxu1  ;;  %v2519_v57 = vpop.f32.mrf.mxu0  ;;  %v2706_v28 = vmul.f32 %v13164_v14, %v13795_v35  ;;  %v2778_v33 = vmul.f32 %v13166_v15, %v13795_v35 }
 0x256   : > { %2840 = vst [vmem:[#allocation2 + $0x104] sm:$0xff] %v13806_v11  ;;  %2768 = vst [vmem:[#allocation2 + $0x84] sm:$0xff] %v12210_v52  ;;  %v2520_v58 = vadd.f32 %v2519_v57, %v2407_v22  ;;  %v2589_v23 = vmul.f32 0.2, %v2518_v55  ;;  %v13831_v39 = vadd.f32 %v13739_v6, %v13761_v30  ;;  %v2413_v4 = vadd.f32 %v2412_v51, %v2300_v45 }
 0x257   : > { %18942 = vst [vmem:[#allocation27_spill] sm:$0xff] %v13808_v53  ;;  %v13819_v21 = vpack.c.bf16 %v13808_v53, %v13795_v35  ;;  %v2707_v60 = vmul.f32 %v13201_v26, %v13808_v53  ;;  %v2779_v34 = vmul.f32 %v13267_v59, %v13808_v53  ;;  %v13825_v56 = vmax.f32 %v2516_v48, %v2588_v36  ;;  %v2416_v9 = vpop.f32.mrf.mxu1  ;;  %v2521_v47 = vpop.f32.mrf.mxu0 }
 0x258   : > { %v2590_v62 = vmul.f32 0.2, %v2520_v58  ;;  %v2522_v29 = vadd.f32 %v2521_v47, %v2409_v54  ;;  %v13836_v44 = vmax.f32 %v2518_v55, %v2589_v23  ;;  %v2415_v48 = vadd.f32 %v2414_v1, %v2302_v43 }
 0x259   : > { %18943 = vst [vmem:[#allocation28_spill] sm:$0xff] %v13825_v56  ;;  %2697 = vst [vmem:[#allocation2 + $0x14] sm:$0xff] %v13819_v21  ;;  %v12211_v0 = vpack.c.bf16 %v2707_v60, %v2706_v28  ;;  %v13834_v2 = vpack.c.bf16 %v2779_v34, %v2778_v33  ;;  %v2418_v5 = vpop.f32.mrf.mxu1  ;;  %v2525_v42 = vpop.f32.mrf.mxu0  ;;  %v2708_v6 = vmul.f32 %v13164_v14, %v13825_v56 }
 0x25a   : > { %18944 = vst [vmem:[#allocation29_spill] sm:$0xff] %v13836_v44  ;;  %v13838_v17 = vmax.f32 %v2520_v58, %v2590_v62  ;;  %v2591_v7 = vmul.f32 0.2, %v2522_v29  ;;  %v2417_v30 = vadd.f32 %v2416_v9, %v2304_v49  ;;  %v2526_v52 = vadd.f32 %v2525_v42, %v2413_v4 }
 0x25b   : > { %2841 = vst [vmem:[#allocation2 + $0x114] sm:$0xff] %v13834_v2  ;;  %2769 = vst [vmem:[#allocation2 + $0x94] sm:$0xff] %v12211_v0  ;;  %v2422_v22 = vpop.f32.mrf.mxu1  ;;  %v2527_v54 = vpop.f32.mrf.mxu0  ;;  %v2969_v36 = vld [vmem:[#allocation2 + $0x8] sm:$0xf]  ;;  %v2968_v45 = vld [vmem:[#allocation2] sm:$0xff]  ;;  %v2780_v43 = vmul.f32 %v13166_v15, %v13825_v56  ;;  %v13849_v55 = vpack.c.bf16 %v13836_v44, %v13825_v56  ;;  %v2709_v1 = vmul.f32 %v13201_v26, %v13836_v44 }
 0x25c   : > { %18945 = vst [vmem:[#allocation30_spill] sm:$0xff] %v13838_v17  ;;  %v2781_v49 = vmul.f32 %v13267_v59, %v13836_v44  ;;  %3002 = vrot.lane.b32.xlu0 %v2969_v36, %s13023_s25  ;;  %v2710_v57 = vmul.f32 %v13164_v14, %v13838_v17  ;;  %v13858_v28 = vmax.f32 %v2522_v29, %v2591_v7  ;;  %v2592_v58 = vmul.f32 0.2, %v2526_v52  ;;  %v3653_v56 = vld [vmem:[#allocation2 + $0x16c] sm:$0xf] }
 0x25d   : > { %v2419_v33 = vadd.f32 %v2418_v5, %v13779_v46  ;;  %3000 = vrot.lane.b32.xlu1 %v2968_v45, %s13023_s25  ;;  %v2424_v60 = vpop.f32.mrf.mxu1  ;;  %v2529_v34 = vpop.f32.mrf.mxu0  ;;  %2698 = vst [vmem:[#allocation2 + $0x24] sm:$0xff] %v13849_v55  ;;  %v13863_v9 = vpack.c.bf16 %v2709_v1, %v2708_v6  ;;  %v2782_v23 = vmul.f32 %v13166_v15, %v13838_v17  ;;  %v2857_v7 = vld [vmem:[#allocation2 + $0x88] sm:$0xf]  ;;  %v2856_v45 = vld [vmem:[#allocation2 + $0x80] sm:$0xff] }
 0x25e   : > { %18946 = vst [vmem:[#allocation31_spill] sm:$0xff] %v13858_v28  ;;  %v13865_v47 = vpack.c.bf16 %v2781_v49, %v2780_v43  ;;  %v2528_v62 = vadd.f32 %v2527_v54, %v2415_v48  ;;  %v13871_v29 = vpack.c.bf16 %v13858_v28, %v13838_v17  ;;  %v2711_v46 = vmul.f32 %v13201_v26, %v13858_v28 }
 0x25f   : > { %v2783_v0 = vmul.f32 %v13267_v59, %v13858_v28  ;;  %v13877_v4 = vmax.f32 %v2526_v52, %v2592_v58  ;;  %v2426_v5 = vpop.f32.mrf.mxu1  ;;  %v2531_v42 = vpop.f32.mrf.mxu0  ;;  %2770 = vst [vmem:[#allocation2 + $0xa4] sm:$0xff] %v13863_v9  ;;  %v2423_v48 = vadd.f32 %v2422_v22, %v13799_v38  ;;  %v2530_v54 = vadd.f32 %v2529_v34, %v2417_v30 }
 0x260   : > { %2842 = vst [vmem:[#allocation2 + $0x124] sm:$0xff] %v13865_v47  ;;  %v2593_v6 = vmul.f32 0.2, %v2528_v62  ;;  %v2532_v36 = vadd.f32 %v2531_v42, %v2419_v33  ;;  %2890 = vrot.lane.b32.xlu0 %v2857_v7, %s13024_s26  ;;  %2699 = vst [vmem:[#allocation2 + $0x34] sm:$0xff] %v13871_v29  ;;  %v13884_v43 = vpack.c.bf16 %v2711_v46, %v2710_v57 }
 0x261   : > { %18947 = vst [vmem:[#allocation32_spill] sm:$0xff] %v13877_v4  ;;  %v13886_v52 = vpack.c.bf16 %v2783_v0, %v2782_v23  ;;  %v2425_v1 = vadd.f32 %v2424_v60, %v13803_v18  ;;  %v2427_v49 = vadd.f32 %v2426_v5, %v2314_v61  ;;  %2888 = vrot.lane.b32.xlu1 %v2856_v45, %s13024_s26  ;;  %v2535_v58 = vpop.f32.mrf.mxu0  ;;  %v2594_v22 = vmul.f32 0.2, %v2530_v54  ;;  %v2428_v34 = vpop.f32.mrf.mxu1  ;;  %v3193_v60 = vld [vmem:[#allocation2 + $0x88] sm:$0xf] }
 0x262   : > { %v2712_v38 = vmul.f32 %v13164_v14, %v13877_v4  ;;  %v13892_v30 = vmax.f32 %v2528_v62, %v2593_v6  ;;  %v2595_v33 = vmul.f32 0.2, %v2532_v36  ;;  %2771 = vst [vmem:[#allocation2 + $0xb4] sm:$0xff] %v13884_v43  ;;  %v2784_v57 = vmul.f32 %v13166_v15, %v13877_v4  ;;  %v3083_v24 = vld [vmem:[#allocation2 + $0x118] sm:$0xf] }
 0x263   : > { %2843 = vst [vmem:[#allocation2 + $0x134] sm:$0xff] %v13886_v52  ;;  %v2536_v18 = vadd.f32 %v2535_v58, %v2423_v48  ;;  %v2537_v61 = vpop.f32.mrf.mxu0  ;;  %v13910_v42 = vmax.f32 %v2530_v54, %v2594_v22  ;;  %v2429_v48 = vadd.f32 %v2428_v34, %v13831_v39 }
 0x264   : > { %18948 = vst [vmem:[#allocation33_spill] sm:$0xff] %v13892_v30  ;;  %v13904_v46 = vpack.c.bf16 %v13892_v30, %v13877_v4  ;;  %v2713_v0 = vmul.f32 %v13201_v26, %v13892_v30  ;;  %v2785_v5 = vmul.f32 %v13267_v59, %v13892_v30  ;;  %3226 = vrot.lane.b32.xlu0 %v3193_v60, %s13025_s27  ;;  %v2970_v60 = vld [vmem:[#allocation2 + $0x10] sm:$0xff]  ;;  %v2972_v10 = vld [vmem:[#allocation2 + $0x20] sm:$0xff]  ;;  %v12826_v4 = vld [vmem:[%s18797_s1 + $0xd8] ss:$20 sps:$4 sm:$0xff]  }
 0x265   : > { %18949 = vst [vmem:[#allocation34_spill] sm:$0xff] %v13910_v42  ;;  %v13913_v7 = vmax.f32 %v2532_v36, %v2595_v33  ;;  %v2596_v6 = vmul.f32 0.2, %v2536_v18  ;;  %v2538_v58 = vadd.f32 %v2537_v61, %v2425_v1  ;;  %3224 = vrot.lane.b32.xlu1 %v2856_v45, %s13025_s27  ;;  %v2539_v40 = vpop.f32.mrf.mxu0  ;;  %v2714_v54 = vmul.f32 %v13164_v14, %v13910_v42  ;;  %v2971_v33 = vld [vmem:[#allocation2 + $0x18] sm:$0xf] }
 0x266   : > { %2700 = vst [vmem:[#allocation2 + $0x44] sm:$0xff] %v13904_v46  ;;  %v13918_v51 = vpack.c.bf16 %v2713_v0, %v2712_v38  ;;  %v13920_v62 = vpack.c.bf16 %v2785_v5, %v2784_v57  ;;  %v2786_v36 = vmul.f32 %v13166_v15, %v13910_v42  ;;  %v2540_v57 = vadd.f32 %v2539_v40, %v2427_v49 }
 0x267   : > { %18950 = vst [vmem:[#allocation35_spill] sm:$0xff] %v13913_v7  ;;  %v13928_v39 = vpack.c.bf16 %v13913_v7, %v13910_v42  ;;  %v2715_v45 = vmul.f32 %v13201_v26, %v13913_v7  ;;  %v2787_v1 = vmul.f32 %v13267_v59, %v13913_v7  ;;  %v13934_v38 = vmax.f32 %v2536_v18, %v2596_v6  ;;  %v2541_v22 = vpop.f32.mrf.mxu0 }
 0x268   : > { %2844 = vst [vmem:[#allocation2 + $0x144] sm:$0xff] %v13920_v62  ;;  %2772 = vst [vmem:[#allocation2 + $0xc4] sm:$0xff] %v13918_v51  ;;  %v2597_v34 = vmul.f32 0.2, %v2538_v58  ;;  %v2542_v61 = vadd.f32 %v2541_v22, %v2429_v48  ;;  %3006 = vrot.lane.b32.xlu0 %v2971_v33, %s13023_s25  ;;  %v2598_v6 = vmul.f32 0.2, %v2540_v57 }
 0x269   : > { %18951 = vst [vmem:[#allocation36_spill] sm:$0xff] %v13934_v38  ;;  %2701 = vst [vmem:[#allocation2 + $0x54] sm:$0xff] %v13928_v39  ;;  %v13940_v0 = vpack.c.bf16 %v2715_v45, %v2714_v54  ;;  %v13942_v5 = vpack.c.bf16 %v2787_v1, %v2786_v36  ;;  %3004 = vrot.lane.b32.xlu1 %v2970_v60, %s13023_s25  ;;  %v2716_v40 = vmul.f32 %v13164_v14, %v13934_v38  ;;  %v2859_v48 = vld [vmem:[#allocation2 + $0x98] sm:$0xf]  ;;  %v2858_v33 = vld [vmem:[#allocation2 + $0x90] sm:$0xff] }
 0x26a   : > { %v13945_v18 = vmax.f32 %v2538_v58, %v2597_v34  ;;  %v2599_v23 = vmul.f32 0.2, %v2542_v61  ;;  %v2788_v49 = vmul.f32 %v13166_v15, %v13934_v38  ;;  %v13965_v22 = vmax.f32 %v2540_v57, %v2598_v6 }
 0x26b   : > { %2845 = vst [vmem:[#allocation2 + $0x154] sm:$0xff] %v13942_v5  ;;  %2773 = vst [vmem:[#allocation2 + $0xd4] sm:$0xff] %v13940_v0 }
 0x26c   : > { %18952 = vst [vmem:[#allocation37_spill] sm:$0xff] %v13945_v18  ;;  %v13959_v36 = vpack.c.bf16 %v13945_v18, %v13934_v38  ;;  %v2717_v45 = vmul.f32 %v13201_v26, %v13945_v18  ;;  %v2789_v1 = vmul.f32 %v13267_v59, %v13945_v18  ;;  %18953 = vst [vmem:[#allocation38_spill] sm:$0xff] %v13965_v22  ;;  %2894 = vrot.lane.b32.xlu0 %v2859_v48, %s13024_s26  ;;  %v2860_v48 = vld [vmem:[#allocation2 + $0xa0] sm:$0xff] }
 0x26d   : > { %v13968_v34 = vmax.f32 %v2542_v61, %v2599_v23  ;;  %2892 = vrot.lane.b32.xlu1 %v2858_v33, %s13024_s26  ;;  %v2718_v54 = vmul.f32 %v13164_v14, %v13965_v22  ;;  %v2790_v57 = vmul.f32 %v13166_v15, %v13965_v22  ;;  %v3416_v18 = vld [vmem:[#allocation2 + $0x84] sm:$0xff] }
 0x26e   : > { %2702 = vst [vmem:[#allocation2 + $0x64] sm:$0xff] %v13959_v36  ;;  %v13972_v60 = vpack.c.bf16 %v2717_v45, %v2716_v40  ;;  %v13974_v58 = vpack.c.bf16 %v2789_v1, %v2788_v49  ;;  %v3195_v40 = vld [vmem:[#allocation2 + $0x98] sm:$0xf]  ;;  %v2973_v49 = vld [vmem:[#allocation2 + $0x28] sm:$0xf] }
 0x26f   : > { %18954 = vst [vmem:[#allocation39_spill] sm:$0xff] %v13968_v34  ;;  %v13982_v6 = vpack.c.bf16 %v13968_v34, %v13965_v22  ;;  %v2719_v23 = vmul.f32 %v13201_v26, %v13968_v34  ;;  %v2791_v61 = vmul.f32 %v13267_v59, %v13968_v34 }
 0x270   : > { %2846 = vst [vmem:[#allocation2 + $0x164] sm:$0xff] %v13974_v58  ;;  %2774 = vst [vmem:[#allocation2 + $0xe4] sm:$0xff] %v13972_v60  ;;  %3230 = vrot.lane.b32.xlu0 %v3195_v40, %s13025_s27  ;;  %v2861_v40 = vld [vmem:[#allocation2 + $0xa8] sm:$0xf] }
 0x271   : > { %2703 = vst [vmem:[#allocation2 + $0x74] sm:$0xff] %v13982_v6  ;;  %v13996_v45 = vpack.c.bf16 %v2719_v23, %v2718_v54  ;;  %v13998_v1 = vpack.c.bf16 %v2791_v61, %v2790_v57  ;;  %3228 = vrot.lane.b32.xlu1 %v2858_v33, %s13025_s27  ;;  %v3197_v54 = vld [vmem:[#allocation2 + $0xa8] sm:$0xf]  ;;  %v2975_v33 = vld [vmem:[#allocation2 + $0x38] sm:$0xf]  ;;  %v2974_v57 = vld [vmem:[#allocation2 + $0x30] sm:$0xff] }
 0x272   : > { %v2863_v23 = vld [vmem:[#allocation2 + $0xb8] sm:$0xf] }
 0x273   : > { %2847 = vst [vmem:[#allocation2 + $0x174] sm:$0xff] %v13998_v1  ;;  %2775 = vst [vmem:[#allocation2 + $0xf4] sm:$0xff] %v13996_v45  ;;  %v3199_v61 = vld [vmem:[#allocation2 + $0xb8] sm:$0xf] }
 0x274   : > { %3010 = vrot.lane.b32.xlu0 %v2973_v49, %s13023_s25  ;;  %v2977_v49 = vld [vmem:[#allocation2 + $0x48] sm:$0xf] }
 0x275   : > { %3008 = vrot.lane.b32.xlu1 %v2972_v10, %s13023_s25  ;;  %v2862_v10 = vld [vmem:[#allocation2 + $0xb0] sm:$0xff] }
 0x278   : > { %2898 = vrot.lane.b32.xlu0 %v2861_v40, %s13024_s26  ;;  %v2865_v40 = vld [vmem:[#allocation2 + $0xc8] sm:$0xf] }
 0x279   : > { %2896 = vrot.lane.b32.xlu1 %v2860_v48, %s13024_s26 }
 0x27a   : > { %v3207_v32 = vld [vmem:[#allocation2 + $0xf8] sm:$0xf] }
 0x27b   : > { %v3095_v12 = vld [vmem:[#allocation2 + $0x178] sm:$0xf] }
 0x27c   : > { %3234 = vrot.lane.b32.xlu0 %v3197_v54, %s13025_s27  ;;  %v2864_v54 = vld [vmem:[#allocation2 + $0xc0] sm:$0xff] }
 0x27d   : > { %3232 = vrot.lane.b32.xlu1 %v2860_v48, %s13025_s27  ;;  %v2976_v48 = vld [vmem:[#allocation2 + $0x40] sm:$0xff] }
 0x280   : > { %3014 = vrot.lane.b32.xlu0 %v2975_v33, %s13023_s25  ;;  %v3201_v33 = vld [vmem:[#allocation2 + $0xc8] sm:$0xf] }
 0x281   : > { %3012 = vrot.lane.b32.xlu1 %v2974_v57, %s13023_s25  ;;  %v3089_v57 = vld [vmem:[#allocation2 + $0x148] sm:$0xf] }
 0x284   : > { %2902 = vrot.lane.b32.xlu0 %v2863_v23, %s13024_s26  ;;  %v3088_v23 = vld [vmem:[#allocation2 + $0x140] sm:$0xff] }
 0x285   : > { %2900 = vrot.lane.b32.xlu1 %v2862_v10, %s13024_s26 }
 0x288   : > { %3238 = vrot.lane.b32.xlu0 %v3199_v61, %s13025_s27  ;;  %v2978_v61 = vld [vmem:[#allocation2 + $0x50] sm:$0xff] }
 0x289   : > { %3236 = vrot.lane.b32.xlu1 %v2862_v10, %s13025_s27  ;;  %v2979_v10 = vld [vmem:[#allocation2 + $0x58] sm:$0xf] }
 0x28c   : > { %3018 = vrot.lane.b32.xlu0 %v2977_v49, %s13023_s25  ;;  %v2867_v49 = vld [vmem:[#allocation2 + $0xd8] sm:$0xf] }
 0x28d   : > { %3016 = vrot.lane.b32.xlu1 %v2976_v48, %s13023_s25  ;;  %v2866_v48 = vld [vmem:[#allocation2 + $0xd0] sm:$0xff] }
 0x290   : > { %2906 = vrot.lane.b32.xlu0 %v2865_v40, %s13024_s26  ;;  %v3203_v40 = vld [vmem:[#allocation2 + $0xd8] sm:$0xf] }
 0x291   : > { %2904 = vrot.lane.b32.xlu1 %v2864_v54, %s13024_s26 }
 0x294   : > { %3242 = vrot.lane.b32.xlu0 %v3201_v33, %s13025_s27  ;;  %v3090_v33 = vld [vmem:[#allocation2 + $0x150] sm:$0xff] }
 0x295   : > { %3240 = vrot.lane.b32.xlu1 %v2864_v54, %s13025_s27  ;;  %v3091_v54 = vld [vmem:[#allocation2 + $0x158] sm:$0xf] }
 0x298   : > { %3130 = vrot.lane.b32.xlu0 %v3089_v57, %s13026_s28  ;;  %v2981_v57 = vld [vmem:[#allocation2 + $0x68] sm:$0xf] }
 0x299   : > { %3128 = vrot.lane.b32.xlu1 %v3088_v23, %s13026_s28  ;;  %v2980_v23 = vld [vmem:[#allocation2 + $0x60] sm:$0xff] }
 0x29c   : > { %3022 = vrot.lane.b32.xlu0 %v2979_v10, %s13023_s25  ;;  %v2869_v10 = vld [vmem:[#allocation2 + $0xe8] sm:$0xf] }
 0x29d   : > { %3020 = vrot.lane.b32.xlu1 %v2978_v61, %s13023_s25  ;;  %v2868_v61 = vld [vmem:[#allocation2 + $0xe0] sm:$0xff] }
 0x2a0   : > { %2910 = vrot.lane.b32.xlu0 %v2867_v49, %s13024_s26  ;;  %v3205_v49 = vld [vmem:[#allocation2 + $0xe8] sm:$0xf] }
 0x2a1   : > { %2908 = vrot.lane.b32.xlu1 %v2866_v48, %s13024_s26 }
 0x2a4   : > { %3246 = vrot.lane.b32.xlu0 %v3203_v40, %s13025_s27  ;;  %v3092_v40 = vld [vmem:[#allocation2 + $0x160] sm:$0xff] }
 0x2a5   : > { %3244 = vrot.lane.b32.xlu1 %v2866_v48, %s13025_s27  ;;  %v3093_v48 = vld [vmem:[#allocation2 + $0x168] sm:$0xf] }
 0x2a8   : > { %3134 = vrot.lane.b32.xlu0 %v3091_v54, %s13026_s28  ;;  %v2983_v54 = vld [vmem:[#allocation2 + $0x78] sm:$0xf] }
 0x2a9   : > { %3132 = vrot.lane.b32.xlu1 %v3090_v33, %s13026_s28  ;;  %v2982_v33 = vld [vmem:[#allocation2 + $0x70] sm:$0xff] }
 0x2ac   : > { %3026 = vrot.lane.b32.xlu0 %v2981_v57, %s13023_s25  ;;  %v3085_v57 = vld [vmem:[#allocation2 + $0x128] sm:$0xf] }
 0x2ad   : > { %3024 = vrot.lane.b32.xlu1 %v2980_v23, %s13023_s25  ;;  %v3084_v23 = vld [vmem:[#allocation2 + $0x120] sm:$0xff] }
 0x2b0   : > { %2914 = vrot.lane.b32.xlu0 %v2869_v10, %s13024_s26  ;;  %v3087_v10 = vld [vmem:[#allocation2 + $0x138] sm:$0xf] }
 0x2b1   : > { %2912 = vrot.lane.b32.xlu1 %v2868_v61, %s13024_s26 }
 0x2b4   : > { %3250 = vrot.lane.b32.xlu0 %v3205_v49, %s13025_s27  ;;  %v3081_v49 = vld [vmem:[#allocation2 + $0x108] sm:$0xf] }
 0x2b5   : > { %3248 = vrot.lane.b32.xlu1 %v2868_v61, %s13025_s27  ;;  %v3086_v61 = vld [vmem:[#allocation2 + $0x130] sm:$0xff] }
 0x2b8   : > { %3138 = vrot.lane.b32.xlu0 %v3093_v48, %s13026_s28  ;;  %v3080_v48 = vld [vmem:[#allocation2 + $0x100] sm:$0xff] }
 0x2b9   : > { %3136 = vrot.lane.b32.xlu1 %v3092_v40, %s13026_s28  ;;  %v2871_v40 = vld [vmem:[#allocation2 + $0xf8] sm:$0xf] }
 0x2bc   : > { %3030 = vrot.lane.b32.xlu0 %v2983_v54, %s13023_s25  ;;  %v2870_v54 = vld [vmem:[#allocation2 + $0xf0] sm:$0xff] }
 0x2bd   : > { %3028 = vrot.lane.b32.xlu1 %v2982_v33, %s13023_s25  ;;  %v3317_v33 = vld [vmem:[#allocation2 + $0x16c] sm:$0xf] }
 0x2c0   : > { %3122 = vrot.lane.b32.xlu0 %v3085_v57, %s13026_s28  ;;  %v3319_v57 = vld [vmem:[#allocation2 + $0x17c] sm:$0xf] }
 0x2c1   : > { %3120 = vrot.lane.b32.xlu1 %v3084_v23, %s13026_s28 }
 0x2c4   : > { %3126 = vrot.lane.b32.xlu0 %v3087_v10, %s13026_s28 }
 0x2c5   : > { %3124 = vrot.lane.b32.xlu1 %v3086_v61, %s13026_s28  ;;  %v3082_v61 = vld [vmem:[#allocation2 + $0x110] sm:$0xff] }
 0x2c8   : > { %3114 = vrot.lane.b32.xlu0 %v3081_v49, %s13026_s28  ;;  %v12438_v49 = vpack.i.bf16 %v3319_v57, %v3317_v33 }
 0x2c9   : > { %3112 = vrot.lane.b32.xlu1 %v3080_v48, %s13026_s28 }
 0x2cc   : > { %2918 = vrot.lane.b32.xlu0 %v2871_v40, %s13024_s26  ;;  %v3315_v40 = vld [vmem:[#allocation2 + $0x15c] sm:$0xf] }
 0x2cd   : > { %2916 = vrot.lane.b32.xlu1 %v2870_v54, %s13024_s26 }
 0x2ce   : > { %v14049_v23 = vpop.permute.xlu0 %3002 }
 0x2cf   : > { %v14051_v10 = vpop.permute.xlu1 %3000 }
 0x2d0   : > { %3118 = vrot.lane.b32.xlu0 %v3083_v24, %s13026_s28  ;;  %v12443_v24 = vpack.i.bf16 %v3315_v40, %v3313_v63  ;;  %v12803_v63 = vld [vmem:[%s18797_s1 + $0xd0] ss:$20 sps:$4 sm:$0xff]   ;;  %v3311_v40 = vld [vmem:[#allocation2 + $0x13c] sm:$0xf] }
 0x2d1   : > { %3116 = vrot.lane.b32.xlu1 %v3082_v61, %s13026_s28  ;;  %2441 = vmatmul.mubr.bf16.gmra.mxu1 %v12803_v63  ;;  %v12448_v27 = vpack.i.bf16 %v3311_v40, %v3309_v31 }
 0x2d2   : > { %v14055_v48 = vpop.permute.xlu0 %2890 }
 0x2d3   : > { %v14060_v37 = vpop.permute.xlu1 %2888 }
 0x2d4   : > { %12439 = vrot.lane.b32.xlu0 %v12438_v49, %s13027_s29 }
 0x2d5   : > { %3360 = vrot.lane.b32.xlu1 %v13974_v58, %s13027_s29 }
 0x2d6   : > { %v14068_v33 = vpop.permute.xlu0 %3226 }
 0x2d7   : > { %v14070_v57 = vpop.permute.xlu1 %3224 }
 0x2d8   : > { %3352 = vrot.lane.b32.xlu0 %v13920_v62, %s13027_s29 }
 0x2d9   : > { %12444 = vrot.lane.b32.xlu1 %v12443_v24, %s13027_s29 }
 0x2da   : > { %v14075_v61 = vpop.permute.xlu0 %3006 }
 0x2db   : > { %v14080_v49 = vpop.permute.xlu1 %3004 }
 0x2dc   : > { %3254 = vrot.lane.b32.xlu0 %v3207_v32, %s13025_s27  ;;  %v3305_v32 = vld [vmem:[#allocation2 + $0x10c] sm:$0xf] }
 0x2dd   : > { %3252 = vrot.lane.b32.xlu1 %v2870_v54, %s13025_s27  ;;  %v12804_v54 = vld [vmem:[%s18797_s1 + $0xfc] ss:$20 sps:$4 sm:$0xff]   ;;  %v12453_v31 = vpack.i.bf16 %v3307_v25, %v3305_v32 }
 0x2de   : > { %v14087_v24 = vpop.permute.xlu0 %2894  ;;  %2450 = vmatprep.mubr.bf16.mxu1 %v12804_v54  ;;  %v3094_v32 = vld [vmem:[#allocation2 + $0x170] sm:$0xff]  ;;  %v3543_v25 = vld [vmem:[#allocation2 + $0x7c] sm:$0xf] }
 0x2df   : > { %v14089_v41 = vpop.permute.xlu1 %2892  ;;  %2451 = vmatmul.mubr.bf16.gmra.mxu1 %v12806_v13  ;;  %v12809_v13 = vld [vmem:[%s18797_s1 + $0x120] ss:$20 sps:$4 sm:$0xff]  }
 0x2e0   : > { %3356 = vrot.lane.b32.xlu0 %v13942_v5, %s13027_s29 }
 0x2e1   : > { %3344 = vrot.lane.b32.xlu1 %v13865_v47, %s13027_s29 }
 0x2e2   : > { %v14095_v20 = vpop.permute.xlu0 %3230 }
 0x2e3   : > { %v14100_v63 = vpop.permute.xlu1 %3228 }
 0x2e4   : > { %12449 = vrot.lane.b32.xlu0 %v12448_v27, %s13027_s29  ;;  %v12807_v27 = vld [vmem:[%s18797_s1 + $0x124] ss:$20 sps:$4 sm:$0xff]  }
 0x2e5   : > { %3348 = vrot.lane.b32.xlu1 %v13886_v52, %s13027_s29  ;;  %2460 = vmatprep.mubr.bf16.mxu1 %v12807_v27 }
 0x2e6   : > { %v14108_v40 = vpop.permute.xlu0 %3010 }
 0x2e7   : > { %v14110_v8 = vpop.permute.xlu1 %3008  ;;  %2461 = vmatmul.mubr.bf16.gmra.mxu1 %v12809_v13  ;;  %v3537_v13 = vld [vmem:[#allocation2 + $0x4c] sm:$0xf] }
 0x2e8   : > { %3336 = vrot.lane.b32.xlu0 %v13806_v11, %s13027_s29  ;;  %v3541_v11 = vld [vmem:[#allocation2 + $0x6c] sm:$0xf] }
 0x2e9   : > { %12454 = vrot.lane.b32.xlu1 %v12453_v31, %s13027_s29  ;;  %v12458_v26 = vpack.i.bf16 %v3543_v25, %v3541_v11 }
 0x2ea   : > { %v14115_v19 = vpop.permute.xlu0 %2898 }
 0x2eb   : > { %v14120_v54 = vpop.permute.xlu1 %2896 }
 0x2ec   : > { %3142 = vrot.lane.b32.xlu0 %v3095_v12, %s13026_s28 }
 0x2ed   : > { %3140 = vrot.lane.b32.xlu1 %v3094_v32, %s13026_s28  ;;  %v3539_v32 = vld [vmem:[#allocation2 + $0x5c] sm:$0xf] }
 0x2ee   : > { %v14127_v31 = vpop.permute.xlu0 %3234 }
 0x2ef   : > { %v14129_v59 = vpop.permute.xlu1 %3232 }
 0x2f0   : > { %3340 = vrot.lane.b32.xlu0 %v13834_v2, %s13027_s29  ;;  %v12812_v2 = vld [vmem:[%s18797_s1 + $0x144] ss:$20 sps:$4 sm:$0xff]  }
 0x2f1   : > { %3584 = vrot.lane.b32.xlu1 %v13959_v36, %s13028_s7  ;;  %4586 = vmatprep.mubr.bf16.mxu1 %v12812_v2  ;;  %v3533_v36 = vld [vmem:[#allocation2 + $0x2c] sm:$0xf]  ;;  %v3531_v2 = vld [vmem:[#allocation2 + $0x1c] sm:$0xf] }
 0x2f2   : > { %v14135_v15 = vpop.permute.xlu0 %3014 }
 0x2f3   : > { %v14137_v12 = vpop.permute.xlu1 %3012 }
 0x2f4   : > { %12459 = vrot.lane.b32.xlu0 %v12458_v26, %s13028_s7  ;;  %v12463_v26 = vpack.i.bf16 %v3539_v32, %v3537_v13  ;;  %v3529_v32 = vld [vmem:[#allocation2 + $0xc] sm:$0xf] }
 0x2f5   : > { %3588 = vrot.lane.b32.xlu1 %v13982_v6, %s13028_s7  ;;  %v3535_v6 = vld [vmem:[#allocation2 + $0x3c] sm:$0xf] }
 0x2f6   : > { %v14142_v27 = vpop.permute.xlu0 %2902  ;;  %v12468_v16 = vpack.i.bf16 %v3535_v6, %v3533_v36  ;;  %v3431_v36 = vld [vmem:[#allocation2 + $0xfc] sm:$0xf] }
 0x2f7   : > { %v14147_v11 = vpop.permute.xlu1 %2900 }
 0x2f8   : > { %3576 = vrot.lane.b32.xlu0 %v13904_v46, %s13028_s7 }
 0x2f9   : > { %3364 = vrot.lane.b32.xlu1 %v13998_v1, %s13027_s29 }
 0x2fa   : > { %v14153_v25 = vpop.permute.xlu0 %3238 }
 0x2fb   : > { %v14155_v14 = vpop.permute.xlu1 %3236 }
 0x2fc   : > { %3580 = vrot.lane.b32.xlu0 %v13928_v39, %s13028_s7  ;;  %v12473_v39 = vpack.i.bf16 %v3531_v2, %v3529_v32  ;;  %v3425_v32 = vld [vmem:[#allocation2 + $0xcc] sm:$0xf]  ;;  %v3427_v2 = vld [vmem:[#allocation2 + $0xdc] sm:$0xf] }
 0x2fd   : > { %12464 = vrot.lane.b32.xlu1 %v12463_v26, %s13028_s7  ;;  %v3429_v26 = vld [vmem:[#allocation2 + $0xec] sm:$0xf] }
 0x2fe   : > { %v14160_v35 = vpop.permute.xlu0 %3018 }
 0x2ff   : > { %v14162_v46 = vpop.permute.xlu1 %3016 }
 0x300   : > { %12469 = vrot.lane.b32.xlu0 %v12468_v16, %s13028_s7 }
 0x301   : > { %3568 = vrot.lane.b32.xlu1 %v13849_v55, %s13028_s7  ;;  %v12478_v55 = vpack.i.bf16 %v3431_v36, %v3429_v26  ;;  %v12822_v36 = vld [vmem:[%s18797_s1 + $0xb0] ss:$20 sps:$4 sm:$0xff]  }
 0x302   : > { %v14167_v13 = vpop.permute.xlu0 %2906  ;;  %11482 = vmatmul.mubr.msk.bf16.gmra.mxu0 %vm2220_vm13, %v12822_v36 }
 0x303   : > { %v14169_v50 = vpop.permute.xlu1 %2904 }
 0x304   : > { %3560 = vrot.lane.b32.xlu0 %v13789_v3, %s13028_s7  ;;  %v3655_v3 = vld [vmem:[#allocation2 + $0x17c] sm:$0xf] }
 0x305   : > { %3572 = vrot.lane.b32.xlu1 %v13871_v29, %s13028_s7  ;;  %v12483_v29 = vpack.i.bf16 %v3655_v3, %v3653_v56  ;;  %v18956_v56 = vmov 0   ;;  %v3651_v3 = vld [vmem:[#allocation2 + $0x15c] sm:$0xf] }
 0x306   : > { %v14175_v6 = vpop.permute.xlu0 %3242  ;;  %2553 = vmatprep.mubr.bf16.mxu0 %v18956_v56 }
 0x307   : > { %v14177_v16 = vpop.permute.xlu1 %3240 }
 0x308   : > { %3564 = vrot.lane.b32.xlu0 %v13819_v21, %s13028_s7 }
 0x309   : > { %12474 = vrot.lane.b32.xlu1 %v12473_v39, %s13028_s7  ;;  %v12488_v39 = vpack.i.bf16 %v3427_v2, %v3425_v32  ;;  %v3421_v2 = vld [vmem:[#allocation2 + $0xac] sm:$0xf] }
 0x30a   : > { %v14182_v53 = vpop.permute.xlu0 %3130  ;;  %11483 = vmatmul.mubr.msk.bf16.gmra.mxu0 %vm2220_vm13, %v12826_v4 }
 0x30b   : > { %v14184_v17 = vpop.permute.xlu1 %3128  ;;  %2563 = vmatprep.mubr.bf16.mxu0 %v18956_v56 }
 0x30c   : > { %18955 = vst [vmem:[#allocation40_spill] sm:$0xff] %v14184_v17  ;;  %12479 = vrot.lane.b32.xlu0 %v12478_v55, %s13029_s8  ;;  %v3649_v55 = vld [vmem:[#allocation2 + $0x14c] sm:$0xf] }
 0x30d   : > { %3472 = vrot.lane.b32.xlu1 %v13972_v60, %s13029_s8  ;;  %v12493_v32 = vpack.i.bf16 %v3651_v3, %v3649_v55  ;;  %v12830_v3 = vld [vmem:[%s18797_s1 + $0x100] ss:$20 sps:$4 sm:$0xff]  }
 0x30e   : > { %v14189_v44 = vpop.permute.xlu0 %3022 }
 0x30f   : > { %v14191_v21 = vpop.permute.xlu1 %3020 }
 0x310   : > { %3696 = vrot.lane.b32.xlu0 %v13974_v58, %s13030_s9  ;;  %v3042_v7 = vrot.slane %v14191_v21, 4 }
 0x311   : > { %12484 = vrot.lane.b32.xlu1 %v12483_v29, %s13030_s9 }
 0x312   : > { %v14196_v26 = vpop.permute.xlu0 %2910  ;;  %11484 = vmatmul.mubr.msk.bf16.gmra.mxu0 %vm2220_vm13, %v12830_v3  ;;  %v3043_v3 = vrot.slane %v14189_v44, 4  ;;  %v3039_v44 = vrot.slane %v14135_v15, 4  ;;  %v3037_v15 = vrot.slane %v14108_v40, 4 }
 0x313   : > { %v14201_v60 = vpop.permute.xlu1 %2908  ;;  %2573 = vmatprep.mubr.bf16.mxu0 %v18956_v56 }
 0x314   : > { %12489 = vrot.lane.b32.xlu0 %v12488_v39, %s13029_s8  ;;  %v3423_v39 = vld [vmem:[#allocation2 + $0xbc] sm:$0xf]  ;;  %v3058_v22 = vsel %vm619_vm4, %v3042_v7, %v3043_v3  ;;  %v3641_v7 = vld [vmem:[#allocation2 + $0x10c] sm:$0xf] }
 0x315   : > { %3464 = vrot.lane.b32.xlu1 %v13918_v51, %s13029_s8  ;;  %v12498_v28 = vpack.i.bf16 %v3423_v39, %v3421_v2  ;;  %v3417_v2 = vld [vmem:[#allocation2 + $0x8c] sm:$0xf]  ;;  %v3419_v39 = vld [vmem:[#allocation2 + $0x9c] sm:$0xf] }
 0x316   : > { %v14208_v58 = vpop.permute.xlu0 %3246  ;;  %v12508_v30 = vpack.i.bf16 %v3419_v39, %v3417_v2  ;;  %v3038_v39 = vrot.slane %v14137_v12, 4  ;;  %v3643_v3 = vld [vmem:[#allocation2 + $0x11c] sm:$0xf] }
 0x317   : > { %v14210_v29 = vpop.permute.xlu1 %3244 }
 0x318   : > { %3688 = vrot.lane.b32.xlu0 %v13920_v62, %s13030_s9 }
 0x319   : > { %3468 = vrot.lane.b32.xlu1 %v13940_v0, %s13029_s8 }
 0x31a   : > { %v14216_v36 = vpop.permute.xlu0 %3134 }
 0x31b   : > { %v14218_v51 = vpop.permute.xlu1 %3132 }
 0x31c   : > { %3692 = vrot.lane.b32.xlu0 %v13942_v5, %s13030_s9 }
 0x31d   : > { %12494 = vrot.lane.b32.xlu1 %v12493_v32, %s13030_s9  ;;  %v3647_v32 = vld [vmem:[#allocation2 + $0x13c] sm:$0xf] }
 0x31e   : > { %v3027_v62 = vpop.permute.xlu0 %3026 }
 0x31f   : > { %v3025_v0 = vpop.permute.xlu1 %3024  ;;  %v3045_v38 = vrot.slane %v3027_v62, 4 }
 0x320   : > { %12499 = vrot.lane.b32.xlu0 %v12498_v28, %s13029_s8  ;;  %v3645_v28 = vld [vmem:[#allocation2 + $0x12c] sm:$0xf]  ;;  %v3044_v56 = vrot.slane %v3025_v0, 4 }
 0x321   : > { %3456 = vrot.lane.b32.xlu1 %v13863_v9, %s13029_s8 }
 0x322   : > { %v14231_v55 = vpop.permute.xlu0 %2914 }
 0x323   : > { %v14233_v5 = vpop.permute.xlu1 %2912 }
 0x324   : > { %3680 = vrot.lane.b32.xlu0 %v13865_v47, %s13030_s9  ;;  %v12503_v47 = vpack.i.bf16 %v3647_v32, %v3645_v28  ;;  %v3040_v28 = vrot.slane %v14162_v46, 4 }
 0x325   : > { %3460 = vrot.lane.b32.xlu1 %v13884_v43, %s13029_s8 }
 0x326   : > { %v14242_v4 = vpop.permute.xlu0 %3250 }
 0x327   : > { %v14245_v9 = vpop.permute.xlu1 %3248 }
 0x328   : > { %3684 = vrot.lane.b32.xlu0 %v13886_v52, %s13030_s9  ;;  %v12834_v52 = vld [vmem:[%s18797_s1 + $0x128] ss:$20 sps:$4 sm:$0xff]  }
 0x329   : > { %3476 = vrot.lane.b32.xlu1 %v13996_v45, %s13029_s8  ;;  %v3041_v45 = vrot.slane %v14160_v35, 4  ;;  %11485 = vmatmul.mubr.msk.bf16.gmra.mxu0 %vm2220_vm13, %v12834_v52  ;;  %v3036_v52 = vrot.slane %v14110_v8, 4 }
 0x32a   : > { %v14252_v43 = vpop.permute.xlu0 %3138 }
 0x32b   : > { %v14254_v42 = vpop.permute.xlu1 %3136 }
 0x32c   : > { %3700 = vrot.lane.b32.xlu0 %v13998_v1, %s13030_s9  ;;  %v12840_v1 = vld [vmem:[%s18797_s1 + $0x14c] ss:$20 sps:$4 sm:$0xff]  }
 0x32d   : > { %12504 = vrot.lane.b32.xlu1 %v12503_v47, %s13030_s9  ;;  %v3060_v47 = vsel %vm619_vm4, %v3044_v56, %v3045_v38  ;;  %4699 = vmatprep.mubr.bf16.mxu0 %v12840_v1  ;;  %v3035_v38 = vrot.slane %v14075_v61, 4  ;;  %v3640_v1 = vld [vmem:[#allocation2 + $0x104] sm:$0xff] }
 0x32e   : > { %v3031_v32 = vpop.permute.xlu0 %3030 }
 0x32f   : > { %v3047_v62 = vrot.slane %v3031_v32, 4  ;;  %v3029_v2 = vpop.permute.xlu1 %3028  ;;  %v3056_v32 = vsel %vm619_vm4, %v3040_v28, %v3041_v45  ;;  %v3034_v45 = vrot.slane %v14080_v49, 4  ;;  %v3054_v28 = vsel %vm619_vm4, %v3038_v39, %v3039_v44 }
 0x330   : > { %v3046_v35 = vrot.slane %v3029_v2, 4  ;;  %12509 = vrot.lane.b32.xlu0 %v12508_v30, %s13029_s8  ;;  %v3059_v30 = vsel %vm734_vm5, %v14191_v21, %v3058_v22  ;;  %v3057_v61 = vsel %vm734_vm5, %v14162_v46, %v3056_v32  ;;  %v12513_v22 = vpack.i.bf16 %v3643_v3, %v3641_v7  ;;  %v3642_v46 = vld [vmem:[#allocation2 + $0x114] sm:$0xff] }
 0x331   : > { %3448 = vrot.lane.b32.xlu1 %v3416_v18, %s13029_s8  ;;  %v3061_v18 = vsel %vm734_vm5, %v3025_v0, %v3060_v47  ;;  %v3032_v21 = vrot.slane %v14051_v10, 4  ;;  %v3052_v0 = vsel %vm619_vm4, %v3036_v52, %v3037_v15  ;;  %v11627_v44 = vcombine.high %v3057_v61, %v3059_v30  ;;  %v11564_v3 = vld [vmem:[%s18798_s2 + $0xb0] sm:$0xff] }
 0x332   : > { %v3062_v34 = vsel %vm619_vm4, %v3046_v35, %v3047_v62  ;;  %v14280_v17 = vpop.permute.xlu0 %3122  ;;  %v3418_v35 = vld [vmem:[#allocation2 + $0x94] sm:$0xff]  ;;  %v3055_v39 = vsel %vm734_vm5, %v14137_v12, %v3054_v28  ;;  %v3050_v32 = vsel %vm619_vm4, %v3034_v45, %v3035_v38  ;;  %v11626_v15 = vcombine.low %v3057_v61, %v3059_v30 }
 0x333   : > { %18957 = vst [vmem:[#allocation41_spill] sm:$0xff] %v14280_v17  ;;  %v3063_v56 = vsel %vm734_vm5, %v3029_v2, %v3062_v34  ;;  %v14287_v40 = vpop.permute.xlu1 %3120  ;;  %v3033_v34 = vrot.slane %v14049_v23, 4  ;;  %v3053_v23 = vsel %vm734_vm5, %v14110_v8, %v3052_v0  ;;  %v3051_v38 = vsel %vm734_vm5, %v14080_v49, %v3050_v32  ;;  %v11563_v49 = vld [vmem:[%s18798_s2 + $0xa8] sm:$0xff] }
 0x334   : > { %v11628_v62 = vcombine.low %v3061_v18, %v3063_v56  ;;  %3672 = vrot.lane.b32.xlu0 %v3640_v1, %s13030_s9  ;;  %v11629_v17 = vcombine.high %v3061_v18, %v3063_v56  ;;  %v11625_v7 = vcombine.high %v3053_v23, %v3055_v39  ;;  %v2931_v30 = vrot.slane %v14196_v26, 4 }
 0x335   : > { %3452 = vrot.lane.b32.xlu1 %v3418_v35, %s13029_s8  ;;  %v3048_v12 = vsel %vm619_vm4, %v3032_v21, %v3033_v34  ;;  %v2930_v18 = vrot.slane %v14201_v60, 4  ;;  %v2933_v56 = vrot.slane %v14231_v55, 4  ;;  %v2932_v1 = vrot.slane %v14233_v5, 4  ;;  %v11562_v55 = vld [vmem:[%s18798_s2 + $0xa0] sm:$0xff] }
 0x336   : > { %4554 = vmatprep.subr.bf16.mxu1 %v11629_v17  ;;  %v14298_v2 = vpop.permute.xlu0 %3126  ;;  %v11565_v17 = vld [vmem:[%s18798_s2 + $0xb8] sm:$0xff]  ;;  %v3049_v45 = vsel %vm734_vm5, %v14051_v10, %v3048_v12  ;;  %v11624_v28 = vcombine.low %v3053_v23, %v3055_v39  ;;  %v2928_v26 = vrot.slane %v14169_v50, 4  ;;  %v2926_v21 = vrot.slane %v14147_v11, 4  ;;  %v11560_v12 = vld [vmem:[%s18798_s2 + $0x90] sm:$0xff] }
 0x337   : > { %4555 = vmatpush1.bf16.msra.mxu1 %v11628_v62  ;;  %v14302_v47 = vpop.permute.xlu1 %3124  ;;  %v2929_v62 = vrot.slane %v14167_v13, 4  ;;  %v11623_v61 = vcombine.high %v3049_v45, %v3051_v38  ;;  %v2946_v0 = vsel %vm619_vm4, %v2930_v18, %v2931_v30  ;;  %v11622_v39 = vcombine.low %v3049_v45, %v3051_v38 }
 0x338   : > { %4556 = vmatprep.subr.bf16.mxu1 %v11627_v44  ;;  %3676 = vrot.lane.b32.xlu0 %v3642_v46, %s13030_s9  ;;  %v2948_v44 = vsel %vm619_vm4, %v2932_v1, %v2933_v56  ;;  %v11561_v46 = vld [vmem:[%s18798_s2 + $0x98] sm:$0xff]  ;;  %v2924_v32 = vrot.slane %v14120_v54, 4  ;;  %v2922_v18 = vrot.slane %v14089_v41, 4 }
 0x339   : > { %12514 = vrot.lane.b32.xlu1 %v12513_v22, %s13030_s9  ;;  %v2927_v22 = vrot.slane %v14142_v27, 4  ;;  %v2925_v27 = vrot.slane %v14115_v19, 4  ;;  %v2944_v23 = vsel %vm619_vm4, %v2928_v26, %v2929_v62  ;;  %v2949_v19 = vsel %vm621_vm6, %v14233_v5, %v2948_v44 }
 0x33a   : > { %v14313_v52 = vpop.permute.xlu0 %3114  ;;  %v2921_v5 = vrot.slane %v14055_v48, 4  ;;  %v3267_v44 = vrot.slane %v14208_v58, 4  ;;  %v3262_v58 = vrot.slane %v14155_v14, 4 }
 0x33b   : > { %4557 = vmatpush1.bf16.msra.mxu1 %v11626_v15  ;;  %v14320_v8 = vpop.permute.xlu1 %3112  ;;  %v2942_v56 = vsel %vm619_vm4, %v2926_v21, %v2927_v22 }
 0x33c   : > { %4558 = vmatprep.subr.bf16.mxu1 %v11625_v7  ;;  %3927 = vperm.xlu0 %12436, %v11565_v17   ;;  %v2923_v7 = vrot.slane %v14087_v24, 4  ;;  %v2945_v24 = vsel %vm621_vm6, %v14169_v50, %v2944_v23  ;;  %v2943_v50 = vsel %vm621_vm6, %v14147_v11, %v2942_v56  ;;  %v3259_v56 = vrot.slane %v14095_v20, 4 }
 0x33d   : > { %3922 = vperm.xlu1 %12437, %v11564_v3   ;;  %v2947_v3 = vsel %vm621_vm6, %v14201_v60, %v2946_v0  ;;  %v11559_v60 = vld [vmem:[%s18798_s2 + $0x88] sm:$0xff] }
 0x33e   : > { %v2919_v35 = vpop.permute.xlu0 %2918  ;;  %v11619_v26 = vcombine.high %v2945_v24, %v2947_v3  ;;  %v2938_v48 = vsel %vm619_vm4, %v2922_v18, %v2923_v7  ;;  %v11618_v22 = vcombine.low %v2945_v24, %v2947_v3  ;;  %v3260_v18 = vrot.slane %v14129_v59, 4 }
 0x33f   : > { %v2935_v34 = vrot.slane %v2919_v35, 4  ;;  %4559 = vmatpush1.bf16.msra.mxu1 %v11624_v28  ;;  %v2917_v10 = vpop.permute.xlu1 %2916  ;;  %v2920_v28 = vrot.slane %v14060_v37, 4  ;;  %v11558_v35 = vld [vmem:[%s18798_s2 + $0x80] sm:$0xff]  ;;  %v2939_v11 = vsel %vm621_vm6, %v14089_v41, %v2938_v48  ;;  %v3264_v41 = vrot.slane %v14177_v16, 4 }
 0x340   : > { %v2934_v13 = vrot.slane %v2917_v10, 4  ;;  %4560 = vmatprep.subr.bf16.mxu1 %v11623_v61  ;;  %3917 = vperm.xlu0 %12436, %v11563_v49   ;;  %v2940_v49 = vsel %vm619_vm4, %v2924_v32, %v2925_v27  ;;  %v3265_v32 = vrot.slane %v14175_v6, 4  ;;  %v3261_v6 = vrot.slane %v14127_v31, 4 }
 0x341   : > { %3912 = vperm.xlu1 %12437, %v11562_v55   ;;  %v2941_v55 = vsel %vm621_vm6, %v14120_v54, %v2940_v49  ;;  %v3268_v54 = vrot.slane %v14245_v9, 4 }
 0x342   : > { %v2950_v15 = vsel %vm619_vm4, %v2934_v13, %v2935_v34  ;;  %v14347_v17 = vpop.permute.xlu0 %3118  ;;  %v2936_v34 = vsel %vm619_vm4, %v2920_v28, %v2921_v5  ;;  %v11617_v21 = vcombine.high %v2941_v55, %v2943_v50  ;;  %v3266_v13 = vrot.slane %v14210_v29, 4 }
 0x343   : > { %v2951_v38 = vsel %vm621_vm6, %v2917_v10, %v2950_v15  ;;  %4561 = vmatpush1.bf16.msra.mxu1 %v11622_v39  ;;  %v14358_v30 = vpop.permute.xlu1 %3116  ;;  %v3269_v39 = vrot.slane %v14242_v4, 4  ;;  %v11616_v27 = vcombine.low %v2941_v55, %v2943_v50  ;;  %v3256_v50 = vrot.slane %v14070_v57, 4 }
 0x344   : > { %v11620_v1 = vcombine.low %v2949_v19, %v2951_v38  ;;  %3907 = vperm.xlu0 %12436, %v11561_v46   ;;  %v11621_v45 = vcombine.high %v2949_v19, %v2951_v38  ;;  %v2937_v46 = vsel %vm621_vm6, %v14060_v37, %v2936_v34  ;;  %v3282_v3 = vsel %vm619_vm4, %v3266_v13, %v3267_v44 }
 0x345   : > { %3902 = vperm.xlu1 %12437, %v11560_v12   ;;  %v11615_v15 = vcombine.high %v2937_v46, %v2939_v11  ;;  %v3263_v12 = vrot.slane %v14153_v25, 4  ;;  %v3284_v19 = vsel %vm619_vm4, %v3268_v54, %v3269_v39  ;;  %v11614_v37 = vcombine.low %v2937_v46, %v2939_v11 }
 0x346   : > { %4562 = vmatprep.subr.bf16.mxu1 %v11621_v45  ;;  %v14370_v62 = vpop.permute.xlu0 %12439  ;;  %v3258_v25 = vrot.slane %v14100_v63, 4  ;;  %v3283_v5 = vsel %vm960_vm7, %v14210_v29, %v3282_v3  ;;  %v3285_v31 = vsel %vm960_vm7, %v14245_v9, %v3284_v19  ;;  %v3276_v48 = vsel %vm619_vm4, %v3260_v18, %v3261_v6  ;;  %v18959_v18 = vld [vmem:[#allocation41_spill] sm:$0xff] }
 0x347   : > { %4563 = vmatpush1.bf16.msra.mxu1 %v11620_v1  ;;  %v14377_v61 = vpop.permute.xlu1 %3360  ;;  %v3280_v1 = vsel %vm619_vm4, %v3264_v41, %v3265_v32  ;;  %v3154_v39 = vrot.slane %v14218_v51, 4  ;;  %v3157_v54 = vrot.slane %v14252_v43, 4  ;;  %v3156_v46 = vrot.slane %v14254_v42, 4 }
 0x348   : > { %4564 = vmatprep.subr.bf16.mxu1 %v11619_v26  ;;  %3897 = vperm.xlu0 %12436, %v11559_v60   ;;  %v3278_v60 = vsel %vm619_vm4, %v3262_v58, %v3263_v12  ;;  %v3281_v55 = vsel %vm960_vm7, %v14177_v16, %v3280_v1  ;;  %v3274_v29 = vsel %vm619_vm4, %v3258_v25, %v3259_v56  ;;  %v3153_v41 = vrot.slane %v14182_v53, 4 }
 0x349   : > { %3892 = vperm.xlu1 %12437, %v11558_v35   ;;  %v3257_v35 = vrot.slane %v14068_v33, 4  ;;  %v3279_v9 = vsel %vm960_vm7, %v14155_v14, %v3278_v60  ;;  %v11643_v34 = vcombine.high %v3281_v55, %v3283_v5  ;;  %v3277_v33 = vsel %vm960_vm7, %v14129_v59, %v3276_v48 }
 0x34a   : > { %v14383_v10 = vpop.permute.xlu0 %3352  ;;  %v3275_v16 = vsel %vm960_vm7, %v14100_v63, %v3274_v29  ;;  %v11642_v44 = vcombine.low %v3281_v55, %v3283_v5  ;;  %v11641_v13 = vcombine.high %v3277_v33, %v3279_v9  ;;  %v3155_v14 = vrot.slane %v14216_v36, 4 }
 0x34b   : > { %4565 = vmatpush1.bf16.msra.mxu1 %v11618_v22  ;;  %v14387_v0 = vpop.permute.xlu1 %12444  ;;  %v3272_v11 = vsel %vm619_vm4, %v3256_v50, %v3257_v35  ;;  %v11640_v63 = vcombine.low %v3277_v33, %v3279_v9  ;;  %v3172_v43 = vsel %vm619_vm4, %v3156_v46, %v3157_v54  ;;  %v3151_v58 = vrot.slane %v14298_v2, 4 }
 0x34c   : > { %4566 = vmatprep.subr.bf16.mxu1 %v11617_v21  ;;  %v3273_v32 = vsel %vm960_vm7, %v14070_v57, %v3272_v11  ;;  %v3170_v12 = vsel %vm619_vm4, %v3154_v39, %v3155_v14  ;;  %v3173_v6 = vsel %vm847_vm8, %v14254_v42, %v3172_v43  ;;  %v3149_v56 = vrot.slane %v18959_v18, 4 }
 0x34d   : > { %v3148_v2 = vrot.slane %v14287_v40, 4  ;;  %v3145_v60 = vrot.slane %v14313_v52, 4  ;;  %v3147_v5 = vrot.slane %v14347_v17, 4  ;;  %v12446_v52 = vunpack.i.l.bf16 %v14387_v0 }
 0x34e   : > { %v3255_v23 = vpop.permute.xlu0 %3254  ;;  %v12447_v48 = vunpack.i.h.bf16 %v14387_v0  ;;  %v12442_v33 = vunpack.i.h.bf16 %v14370_v62  ;;  %v3380_v46 = vrot.slane %v14377_v61, 4 }
 0x34f   : > { %v3271_v7 = vrot.slane %v3255_v23, 4  ;;  %4567 = vmatpush1.bf16.msra.mxu1 %v11616_v27  ;;  %v3253_v4 = vpop.permute.xlu1 %3252  ;;  %v18958_v23 = vld [vmem:[#allocation40_spill] sm:$0xff]  ;;  %v3164_v17 = vsel %vm619_vm4, %v3148_v2, %v3149_v56  ;;  %v3377_v54 = vrot.slane %v12446_v52, 4 }
 0x350   : > { %v3270_v38 = vrot.slane %v3253_v4, 4  ;;  %4568 = vmatprep.subr.bf16.mxu1 %v11615_v15  ;;  %v3152_v36 = vrot.slane %v18958_v23, 4  ;;  %v11639_v15 = vcombine.high %v3273_v32, %v3275_v16 }
 0x352   : > { %v3286_v45 = vsel %vm619_vm4, %v3270_v38, %v3271_v7  ;;  %v14407_v24 = vpop.permute.xlu0 %3356  ;;  %v3150_v7 = vrot.slane %v14302_v47, 4  ;;  %v11638_v38 = vcombine.low %v3273_v32, %v3275_v16  ;;  %v3168_v53 = vsel %vm619_vm4, %v3152_v36, %v3153_v41 }
 0x353   : > { %v3287_v28 = vsel %vm960_vm7, %v3253_v4, %v3286_v45  ;;  %4569 = vmatpush1.bf16.msra.mxu1 %v11614_v37  ;;  %v14415_v20 = vpop.permute.xlu1 %3344  ;;  %v3171_v37 = vsel %vm847_vm8, %v14218_v51, %v3170_v12  ;;  %v3169_v50 = vsel %vm847_vm8, %v18958_v23, %v3168_v53  ;;  %v3378_v0 = vrot.slane %v14407_v24, 4 }
 0x354   : > { %v11644_v49 = vcombine.low %v3285_v31, %v3287_v28  ;;  %v11645_v26 = vcombine.high %v3285_v31, %v3287_v28  ;;  %v3166_v25 = vsel %vm619_vm4, %v3150_v7, %v3151_v58  ;;  %v3146_v31 = vrot.slane %v14358_v30, 4 }
 0x355   : > { %v3144_v28 = vrot.slane %v14320_v8, 4  ;;  %v11635_v29 = vcombine.high %v3169_v50, %v3171_v37  ;;  %v3167_v9 = vsel %vm847_vm8, %v14302_v47, %v3166_v25  ;;  %v11634_v39 = vcombine.low %v3169_v50, %v3171_v37 }
 0x356   : > { %4570 = vmatprep.subr.bf16.mxu1 %v11645_v26  ;;  %v14425_v22 = vpop.permute.xlu0 %12449  ;;  %v3165_v47 = vsel %vm847_vm8, %v14287_v40, %v3164_v17  ;;  %v3379_v32 = vrot.slane %v12447_v48, 4  ;;  %v3383_v36 = vrot.slane %v12442_v33, 4 }
 0x357   : > { %4571 = vmatpush2.bf16.msra.mxu1 %v11644_v49  ;;  %v14427_v21 = vpop.permute.xlu1 %3348  ;;  %v12441_v49 = vunpack.i.l.bf16 %v14370_v62  ;;  %v12451_v11 = vunpack.i.l.bf16 %v14425_v22  ;;  %v12452_v14 = vunpack.i.h.bf16 %v14425_v22  ;;  %v11633_v41 = vcombine.high %v3165_v47, %v3167_v9 }
 0x358   : > { %4572 = vmatprep.subr.bf16.mxu1 %v11643_v34  ;;  %v3162_v34 = vsel %vm619_vm4, %v3146_v31, %v3147_v5  ;;  %v3376_v22 = vrot.slane %v14383_v10, 4  ;;  %v3394_v43 = vsel %vm619_vm4, %v3378_v0, %v3379_v32  ;;  %v11632_v7 = vcombine.low %v3165_v47, %v3167_v9  ;;  %v18960_v32 = vld [vmem:[#allocation39_spill] sm:$0xff] }
 0x359   : > { %v3163_v62 = vsel %vm847_vm8, %v14358_v30, %v3162_v34  ;;  %v3375_v30 = vrot.slane %v12452_v14, 4  ;;  %v3395_v18 = vsel %vm1073_vm9, %v14407_v24, %v3394_v43  ;;  %v12815_v14 = vld [vmem:[%s18797_s1 + $0x168] ss:$20 sps:$4 sm:$0xff]  }
 0x35a   : > { %v14438_v27 = vpop.permute.xlu0 %3336 }
 0x35b   : > { %4573 = vmatpush2.bf16.msra.mxu1 %v11642_v44  ;;  %v14440_v59 = vpop.permute.xlu1 %12454  ;;  %v3160_v44 = vsel %vm619_vm4, %v3144_v28, %v3145_v60  ;;  %v3368_v17 = vrot.slane %v14438_v27, 4 }
 0x35c   : > { %4574 = vmatprep.subr.bf16.mxu1 %v11641_v13  ;;  %v3381_v13 = vrot.slane %v12441_v49, 4  ;;  %v3161_v23 = vsel %vm847_vm8, %v14320_v8, %v3160_v44  ;;  %v3374_v8 = vrot.slane %v14427_v21, 4 }
 0x35d   : > { %v11630_v31 = vcombine.low %v3161_v23, %v3163_v62 }
 0x35e   : > { %v3143_v4 = vpop.permute.xlu0 %3142  ;;  %v3396_v40 = vsel %vm619_vm4, %v3380_v46, %v3381_v13 }
 0x35f   : > { %v3159_v3 = vrot.slane %v3143_v4, 4  ;;  %4575 = vmatpush2.bf16.msra.mxu1 %v11640_v63  ;;  %v3141_v19 = vpop.permute.xlu1 %3140  ;;  %v3392_v4 = vsel %vm619_vm4, %v3376_v22, %v3377_v54  ;;  %v12818_v22 = vld [vmem:[%s18797_s1 + $0x190] ss:$20 sps:$4 sm:$0xff]  }
 0x360   : > { %v3158_v57 = vrot.slane %v3141_v19, 4  ;;  %4576 = vmatprep.subr.bf16.mxu1 %v11639_v15  ;;  %v3373_v15 = vrot.slane %v12451_v11, 4 }
 0x362   : > { %v3174_v1 = vsel %vm619_vm4, %v3158_v57, %v3159_v3  ;;  %v14459_v45 = vpop.permute.xlu0 %3340  ;;  %v3372_v3 = vrot.slane %v14415_v20, 4  ;;  %v12457_v57 = vunpack.i.h.bf16 %v14440_v59 }
 0x363   : > { %v3175_v51 = vsel %vm847_vm8, %v3141_v19, %v3174_v1  ;;  %4577 = vmatpush2.bf16.msra.mxu1 %v11638_v38  ;;  %v14465_v42 = vpop.permute.xlu1 %3584  ;;  %v11631_v19 = vcombine.high %v3161_v23, %v3163_v62  ;;  %v12456_v38 = vunpack.i.l.bf16 %v14440_v59  ;;  %v3390_v1 = vsel %vm619_vm4, %v3374_v8, %v3375_v30  ;;  %v18963_v30 = vld [vmem:[#allocation38_spill] sm:$0xff] }
 0x364   : > { %v11636_v26 = vcombine.low %v3173_v6, %v3175_v51  ;;  %v11637_v35 = vcombine.high %v3173_v6, %v3175_v51  ;;  %v3397_v6 = vsel %vm1073_vm9, %v14377_v61, %v3396_v40  ;;  %v3388_v56 = vsel %vm619_vm4, %v3372_v3, %v3373_v15  ;;  %v18966_v3 = vld [vmem:[#allocation35_spill] sm:$0xff] }
 0x365   : > { %v3370_v59 = vrot.slane %v14459_v45, 4  ;;  %v3393_v61 = vsel %vm1073_vm9, %v14383_v10, %v3392_v4  ;;  %v3371_v51 = vrot.slane %v12457_v57, 4  ;;  %v3369_v24 = vrot.slane %v12456_v38, 4  ;;  %v12813_v10 = vld [vmem:[%s18797_s1 + $0x16c] ss:$20 sps:$4 sm:$0xff]  }
 0x366   : > { %4578 = vmatprep.subr.bf16.mxu1 %v11637_v35  ;;  %v14474_v55 = vpop.permute.xlu0 %12459  ;;  %v11659_v49 = vcombine.high %v3393_v61, %v3395_v18  ;;  %v3389_v35 = vsel %vm1073_vm9, %v14415_v20, %v3388_v56  ;;  %v3391_v50 = vsel %vm1073_vm9, %v14427_v21, %v3390_v1  ;;  %v3604_v57 = vrot.slane %v14465_v42, 4  ;;  %v18970_v1 = vld [vmem:[#allocation32_spill] sm:$0xff] }
 0x367   : > { %4579 = vmatpush2.bf16.msra.mxu1 %v11636_v26  ;;  %v14481_v16 = vpop.permute.xlu1 %3588  ;;  %v12810_v26 = vld [vmem:[%s18797_s1 + $0x140] ss:$20 sps:$4 sm:$0xff]   ;;  %v3386_v48 = vsel %vm619_vm4, %v3370_v59, %v3371_v51  ;;  %v3384_v9 = vsel %vm619_vm4, %v3368_v17, %v3369_v24  ;;  %v11657_v21 = vcombine.high %v3389_v35, %v3391_v50  ;;  %v11656_v11 = vcombine.low %v3389_v35, %v3391_v50  ;;  %v18972_v51 = vld [vmem:[#allocation31_spill] sm:$0xff]  ;;  %v18973_v24 = vld [vmem:[#allocation29_spill] sm:$0xff] }
 0x368   : > { %4580 = vmatprep.subr.bf16.mxu1 %v11635_v29  ;;  %v11658_v29 = vcombine.low %v3393_v61, %v3395_v18  ;;  %v3387_v34 = vsel %vm1073_vm9, %v14459_v45, %v3386_v48  ;;  %v3385_v44 = vsel %vm1073_vm9, %v14438_v27, %v3384_v9  ;;  %v12816_v45 = vld [vmem:[%s18797_s1 + $0x194] ss:$20 sps:$4 sm:$0xff]   ;;  %v12461_v27 = vunpack.i.l.bf16 %v14474_v55  ;;  %v12821_v17 = vld [vmem:[%s18797_s1 + $0x1b8] ss:$20 sps:$4 sm:$0xff]  }
 0x369   : > { %v11655_v0 = vcombine.high %v3385_v44, %v3387_v34  ;;  %v11654_v47 = vcombine.low %v3385_v44, %v3387_v34  ;;  %v12462_v46 = vunpack.i.h.bf16 %v14474_v55  ;;  %v3606_v38 = vrot.slane %v14481_v16, 4  ;;  %v18976_v34 = vld [vmem:[#allocation28_spill] sm:$0xff] }
 0x36a   : > { %v14491_v63 = vpop.permute.xlu0 %3576  ;;  %v3605_v15 = vrot.slane %v12461_v27, 4 }
 0x36b   : > { %4581 = vmatpush2.bf16.msra.mxu1 %v11634_v39  ;;  %v3365_v12 = vpop.permute.xlu1 %3364  ;;  %v3607_v4 = vrot.slane %v12462_v46, 4 }
 0x36c   : > { %v3382_v58 = vrot.slane %v3365_v12, 4  ;;  %4582 = vmatprep.subr.bf16.mxu1 %v11633_v41  ;;  %v18961_v41 = vld [vmem:[#allocation37_spill] sm:$0xff] }
 0x36d   : > { %v18962_v23 = vpack.c.bf16 %v18960_v32, %v18961_v41 }
 0x36e   : > { %v3398_v53 = vsel %vm619_vm4, %v3382_v58, %v3383_v36  ;;  %v14504_v37 = vpop.permute.xlu0 %3580  ;;  %v18964_v58 = vld [vmem:[#allocation36_spill] sm:$0xff] }
 0x36f   : > { %v3399_v2 = vsel %vm1073_vm9, %v3365_v12, %v3398_v53  ;;  %4583 = vmatpush2.bf16.msra.mxu1 %v11632_v7  ;;  %v14512_v25 = vpop.permute.xlu1 %12464  ;;  %v18965_v55 = vpack.c.bf16 %v18963_v30, %v18964_v58  ;;  %v12819_v7 = vld [vmem:[%s18797_s1 + $0x1bc] ss:$20 sps:$4 sm:$0xff]   ;;  %v3602_v35 = vrot.slane %v14504_v37, 4  ;;  %v18982_v58 = vld [vmem:[#allocation24_spill] sm:$0xff] }
 0x370   : > { %v11660_v60 = vcombine.low %v3397_v6, %v3399_v2  ;;  %4584 = vmatprep.subr.bf16.mxu1 %v11631_v19  ;;  %v11661_v5 = vcombine.high %v3397_v6, %v3399_v2  ;;  %v12467_v12 = vunpack.i.h.bf16 %v14512_v25  ;;  %v12466_v40 = vunpack.i.l.bf16 %v14512_v25  ;;  %v18967_v19 = vld [vmem:[#allocation33_spill] sm:$0xff]  ;;  %v18969_v25 = vld [vmem:[#allocation34_spill] sm:$0xff] }
 0x371   : > { %v18968_v8 = vpack.c.bf16 %v18966_v3, %v18967_v19  ;;  %v3620_v6 = vsel %vm619_vm4, %v3604_v57, %v3605_v15  ;;  %v18971_v59 = vpack.c.bf16 %v18969_v25, %v18970_v1  ;;  %v18981_v30 = vld [vmem:[#allocation26_spill] sm:$0xff] }
 0x372   : > { %4667 = vmatprep.subr.bf16.mxu0 %v11661_v5  ;;  %v14518_v28 = vpop.permute.xlu0 %12469  ;;  %v3603_v18 = vrot.slane %v12467_v12, 4  ;;  %v3601_v56 = vrot.slane %v12466_v40, 4  ;;  %v3621_v48 = vsel %vm1299_vm10, %v14465_v42, %v3620_v6 }
 0x373   : > { %4585 = vmatpush2.bf16.msra.mxu1 %v11630_v31  ;;  %4668 = vmatpush1.bf16.msra.mxu0 %v11660_v60  ;;  %v14527_v52 = vpop.permute.xlu1 %3568  ;;  %v3622_v60 = vsel %vm619_vm4, %v3606_v38, %v3607_v4  ;;  %v12472_v5 = vunpack.i.h.bf16 %v14518_v28  ;;  %v12471_v50 = vunpack.i.l.bf16 %v14518_v28 }
 0x374   : > { %4669 = vmatprep.subr.bf16.mxu0 %v11659_v49  ;;  %v18974_v49 = vpack.c.bf16 %v18972_v51, %v18973_v24  ;;  %v3618_v44 = vsel %vm619_vm4, %v3602_v35, %v3603_v18  ;;  %v3596_v15 = vrot.slane %v14527_v52, 4 }
 0x375   : > { %v3597_v46 = vrot.slane %v12471_v50, 4  ;;  %v3619_v4 = vsel %vm1299_vm10, %v14504_v37, %v3618_v44  ;;  %v12825_v37 = vld [vmem:[%s18797_s1 + $0x1e0] ss:$20 sps:$4 sm:$0xff]  }
 0x376   : > { %4587 = vmatmul.mubr.bf16.vlgmr.msra.gmra.mxu1 %v12810_v26  ;;  %v14535_v20 = vpop.permute.xlu0 %3560  ;;  %v3600_v26 = vrot.slane %v14491_v63, 4 }
 0x377   : > { %v14539_v33 = vpop.permute.xlu1 %3572  ;;  %4670 = vmatpush1.bf16.msra.mxu0 %v11658_v29  ;;  %4596 = vmatprep.mubr.bf16.mxu1 %v12813_v10  ;;  %v3623_v29 = vsel %vm1299_vm10, %v14481_v16, %v3622_v60  ;;  %v18978_v16 = vld [vmem:[#allocation27_spill] sm:$0xff]  ;;  %v3592_v32 = vrot.slane %v14535_v20, 4 }
 0x378   : > { %4671 = vmatprep.subr.bf16.mxu0 %v11657_v21  ;;  %v18975_v21 = vld [vmem:[#allocation30_spill] sm:$0xff]  ;;  %v3616_v28 = vsel %vm619_vm4, %v3600_v26, %v3601_v56  ;;  %v3598_v42 = vrot.slane %v14539_v33, 4  ;;  %v11676_v38 = vcombine.low %v3621_v48, %v3623_v29 }
 0x37a   : > { %v14543_v13 = vpop.permute.xlu0 %3564 }
 0x37b   : > { %v12475_v39 = vpop.permute.xlu1 %12474  ;;  %4672 = vmatpush1.bf16.msra.mxu0 %v11656_v11  ;;  %v18977_v11 = vpack.c.bf16 %v18975_v21, %v18976_v34  ;;  %v3594_v41 = vrot.slane %v14543_v13, 4 }
 0x37c   : > { %4673 = vmatprep.subr.bf16.mxu0 %v11655_v0  ;;  %v12477_v31 = vunpack.i.h.bf16 %v12475_v39  ;;  %v12476_v61 = vunpack.i.l.bf16 %v12475_v39  ;;  %v12823_v0 = vld [vmem:[%s18797_s1 + $0x1e4] ss:$20 sps:$4 sm:$0xff]  }
 0x37e   : > { %4597 = vmatmul.mubr.bf16.gmra.mxu1 %v12815_v14  ;;  %v14551_v54 = vpop.permute.xlu0 %12479  ;;  %v3599_v14 = vrot.slane %v12472_v5, 4  ;;  %v3595_v39 = vrot.slane %v12477_v31, 4  ;;  %v12827_v31 = vld [vmem:[%s18797_s1 + $0x20c] ss:$20 sps:$4 sm:$0xff]  }
 0x37f   : > { %v14554_v62 = vpop.permute.xlu1 %3472  ;;  %4674 = vmatpush1.bf16.msra.mxu0 %v11654_v47  ;;  %4606 = vmatprep.mubr.bf16.mxu1 %v12816_v45  ;;  %v3593_v45 = vrot.slane %v12476_v61, 4  ;;  %v18979_v47 = vld [vmem:[#allocation25_spill] sm:$0xff]  ;;  %v12481_v12 = vunpack.i.l.bf16 %v14551_v54  ;;  %v12482_v21 = vunpack.i.h.bf16 %v14551_v54 }
 0x380   : > { %4675 = vmatprep.subr.bf16.mxu0 %v18962_v23  ;;  %v18980_v27 = vpack.c.bf16 %v18978_v16, %v18979_v47  ;;  %v3614_v3 = vsel %vm619_vm4, %v3598_v42, %v3599_v14  ;;  %v3610_v57 = vsel %vm619_vm4, %v3594_v41, %v3595_v39 }
 0x381   : > { %v3615_v1 = vsel %vm1299_vm10, %v14539_v33, %v3614_v3 }
 0x382   : > { %v14560_v36 = vpop.permute.xlu0 %3696 }
 0x383   : > { %v14567_v43 = vpop.permute.xlu1 %12484  ;;  %4676 = vmatpush1.bf16.msra.mxu0 %v18965_v55  ;;  %v18983_v55 = vpack.c.bf16 %v18981_v30, %v18982_v58  ;;  %v3716_v34 = vrot.slane %v14560_v36, 4  ;;  %v12831_v30 = vld [vmem:[%s18797_s1 + $0x234] ss:$20 sps:$4 sm:$0xff]  }
 0x384   : > { %4677 = vmatprep.subr.bf16.mxu0 %v18968_v8  ;;  %v3608_v8 = vsel %vm619_vm4, %v3592_v32, %v3593_v45  ;;  %v12486_v6 = vunpack.i.l.bf16 %v14567_v43  ;;  %v12487_v39 = vunpack.i.h.bf16 %v14567_v43 }
 0x385   : > { %v14648_v5 = vsel %vm1299_vm10, %v14535_v20, %v3608_v8 }
 0x386   : > { %4607 = vmatmul.mubr.bf16.gmra.mxu1 %v12818_v22  ;;  %v14580_v53 = vpop.permute.xlu0 %12489  ;;  %v11677_v22 = vcombine.high %v3621_v48, %v3623_v29  ;;  %v3717_v26 = vrot.slane %v12486_v6, 4 }
 0x387   : > { %v14583_v2 = vpop.permute.xlu1 %3464  ;;  %4678 = vmatpush1.bf16.msra.mxu0 %v18971_v59  ;;  %4616 = vmatprep.mubr.bf16.mxu1 %v12819_v7  ;;  %v3617_v7 = vsel %vm1299_vm10, %v14491_v63, %v3616_v28  ;;  %v12492_v19 = vunpack.i.h.bf16 %v14580_v53  ;;  %v12491_v18 = vunpack.i.l.bf16 %v14580_v53  ;;  %v3612_v63 = vsel %vm619_vm4, %v3596_v15, %v3597_v46 }
 0x388   : > { %4679 = vmatprep.subr.bf16.mxu0 %v18974_v49  ;;  %v11675_v25 = vcombine.high %v3617_v7, %v3619_v4  ;;  %v3493_v59 = vrot.slane %v12481_v12, 4  ;;  %v14652_v53 = vsel %vm1299_vm10, %v14543_v13, %v3610_v57  ;;  %v3613_v49 = vsel %vm1299_vm10, %v14527_v52, %v3612_v63 }
 0x389   : > { %v3491_v61 = vrot.slane %v12492_v19, 4  ;;  %v3489_v20 = vrot.slane %v12491_v18, 4  ;;  %v11674_v35 = vcombine.low %v3617_v7, %v3619_v4  ;;  %v11672_v50 = vcombine.low %v3613_v49, %v3615_v1 }
 0x38a   : > { %v14596_v10 = vpop.permute.xlu0 %3688  ;;  %v3492_v13 = vrot.slane %v14554_v62, 4  ;;  %v11673_v29 = vcombine.high %v3613_v49, %v3615_v1  ;;  %v11671_v52 = vcombine.high %v14648_v5, %v14652_v53  ;;  %v3732_v16 = vsel %vm619_vm4, %v3716_v34, %v3717_v26  ;;  %v12833_v26 = vld [vmem:[%s18797_s1 + $0x230] ss:$20 sps:$4 sm:$0xff]  }
 0x38b   : > { %v14605_v9 = vpop.permute.xlu1 %3468  ;;  %4680 = vmatpush1.bf16.msra.mxu0 %v18977_v11  ;;  %v3488_v11 = vrot.slane %v14583_v2, 4  ;;  %v3712_v47 = vrot.slane %v14596_v10, 4  ;;  %v3495_v15 = vrot.slane %v12482_v21, 4  ;;  %v3733_v8 = vsel %vm1412_vm12, %v14560_v36, %v3732_v16 }
 0x38c   : > { %4681 = vmatprep.subr.bf16.mxu0 %v18980_v27  ;;  %v3490_v51 = vrot.slane %v14605_v9, 4  ;;  %v3508_v44 = vsel %vm619_vm4, %v3492_v13, %v3493_v59 }
 0x38d   : > { %v3504_v54 = vsel %vm619_vm4, %v3488_v11, %v3489_v20  ;;  %v3509_v58 = vsel %vm1186_vm11, %v14554_v62, %v3508_v44 }
 0x38e   : > { %4617 = vmatmul.mubr.bf16.gmra.mxu1 %v12821_v17  ;;  %v14621_v23 = vpop.permute.xlu0 %3692  ;;  %v3505_v3 = vsel %vm1186_vm11, %v14583_v2, %v3504_v54 }
 0x38f   : > { %v12495_v40 = vpop.permute.xlu1 %12494  ;;  %4682 = vmatpush1.bf16.msra.mxu0 %v18983_v55  ;;  %4626 = vmatprep.mubr.bf16.mxu1 %v12823_v0  ;;  %v3506_v0 = vsel %vm619_vm4, %v3490_v51, %v3491_v61  ;;  %v3714_v27 = vrot.slane %v14621_v23, 4 }
 0x390   : > { %4683 = vmatprep.subr.bf16.mxu0 %v11677_v22  ;;  %v12497_v33 = vunpack.i.h.bf16 %v12495_v40  ;;  %v12496_v24 = vunpack.i.l.bf16 %v12495_v40  ;;  %v12829_v22 = vld [vmem:[%s18797_s1 + $0x208] ss:$20 sps:$4 sm:$0xff]   ;;  %v14682_v43 = vsel %vm1186_vm11, %v14605_v9, %v3506_v0  ;;  %v11670_v40 = vcombine.low %v14648_v5, %v14652_v53 }
 0x391   : > { %v3719_v9 = vrot.slane %v12487_v39, 4  ;;  %v11667_v18 = vcombine.high %v3505_v3, %v14682_v43  ;;  %v11666_v34 = vcombine.low %v3505_v3, %v14682_v43 }
 0x392   : > { %v12500_v56 = vpop.permute.xlu0 %12499  ;;  %v3715_v14 = vrot.slane %v12497_v33, 4  ;;  %v3713_v42 = vrot.slane %v12496_v24, 4 }
 0x393   : > { %v14644_v60 = vpop.permute.xlu1 %3456  ;;  %4684 = vmatpush2.bf16.msra.mxu0 %v11676_v38  ;;  %v12502_v17 = vunpack.i.h.bf16 %v12500_v56  ;;  %v12501_v45 = vunpack.i.l.bf16 %v12500_v56 }
 0x394   : > { %4685 = vmatprep.subr.bf16.mxu0 %v11675_v25  ;;  %v3728_v7 = vsel %vm619_vm4, %v3712_v47, %v3713_v42  ;;  %v3730_v4 = vsel %vm619_vm4, %v3714_v27, %v3715_v14  ;;  %v3484_v57 = vrot.slane %v14644_v60, 4 }
 0x395   : > { %v3487_v46 = vrot.slane %v12502_v17, 4  ;;  %v3485_v19 = vrot.slane %v12501_v45, 4  ;;  %v3729_v2 = vsel %vm1412_vm12, %v14596_v10, %v3728_v7  ;;  %v3731_v36 = vsel %vm1412_vm12, %v14621_v23, %v3730_v4 }
 0x396   : > { %4627 = vmatmul.mubr.bf16.gmra.mxu1 %v12825_v37  ;;  %v14661_v48 = vpop.permute.xlu0 %3680  ;;  %v11683_v39 = vcombine.high %v3729_v2, %v3731_v36 }
 0x397   : > { %v3461_v28 = vpop.permute.xlu1 %3460  ;;  %4686 = vmatpush2.bf16.msra.mxu0 %v11674_v35  ;;  %4636 = vmatprep.mubr.bf16.mxu1 %v12827_v31  ;;  %v3500_v53 = vsel %vm619_vm4, %v3484_v57, %v3485_v19  ;;  %v3708_v31 = vrot.slane %v14661_v48, 4  ;;  %v12842_v57 = vld [vmem:[%s18797_s1 + $0x174] ss:$20 sps:$4 sm:$0xff]  }
 0x398   : > { %4687 = vmatprep.subr.bf16.mxu0 %v11673_v29  ;;  %v3486_v32 = vrot.slane %v3461_v28, 4  ;;  %v3501_v11 = vsel %vm1186_vm11, %v14644_v60, %v3500_v53  ;;  %v12849_v53 = vld [vmem:[%s18797_s1 + $0x1a0] ss:$20 sps:$4 sm:$0xff]  }
 0x39a   : > { %v14675_v41 = vpop.permute.xlu0 %3684  ;;  %v3502_v38 = vsel %vm619_vm4, %v3486_v32, %v3487_v46  ;;  %v11682_v46 = vcombine.low %v3729_v2, %v3731_v36  ;;  %v12841_v2 = vld [vmem:[%s18797_s1 + $0x150] ss:$20 sps:$4 sm:$0xff]  }
 0x39b   : > { %v3477_v12 = vpop.permute.xlu1 %3476  ;;  %4688 = vmatpush2.bf16.msra.mxu0 %v11672_v50  ;;  %v3503_v61 = vsel %vm1186_vm11, %v3461_v28, %v3502_v38  ;;  %v3710_v33 = vrot.slane %v14675_v41, 4  ;;  %v12844_v36 = vld [vmem:[%s18797_s1 + $0x170] ss:$20 sps:$4 sm:$0xff]  }
 0x39c   : > { %v3494_v55 = vrot.slane %v3477_v12, 4  ;;  %4689 = vmatprep.subr.bf16.mxu0 %v11671_v52  ;;  %v12835_v52 = vld [vmem:[%s18797_s1 + $0x25c] ss:$20 sps:$4 sm:$0xff]   ;;  %v11665_v42 = vcombine.high %v3501_v11, %v3503_v61  ;;  %v11664_v27 = vcombine.low %v3501_v11, %v3503_v61 }
 0x39d   : > { %v12853_v61 = vld [vmem:[%s18797_s1 + $0x1c8] ss:$20 sps:$4 sm:$0xff]  }
 0x39e   : > { %v3510_v62 = vsel %vm619_vm4, %v3494_v55, %v3495_v15  ;;  %4637 = vmatmul.mubr.bf16.gmra.mxu1 %v12829_v22  ;;  %v3701_v6 = vpop.permute.xlu0 %3700  ;;  %v12837_v15 = vld [vmem:[%s18797_s1 + $0x258] ss:$20 sps:$4 sm:$0xff]  }
 0x39f   : > { %v3511_v63 = vsel %vm1186_vm11, %v3477_v12, %v3510_v62  ;;  %v3718_v56 = vrot.slane %v3701_v6, 4  ;;  %v12505_v25 = vpop.permute.xlu1 %12504  ;;  %4690 = vmatpush2.bf16.msra.mxu0 %v11670_v40  ;;  %4646 = vmatprep.mubr.bf16.mxu1 %v12831_v30 }
 0x3a0   : > { %v11668_v37 = vcombine.low %v3509_v58, %v3511_v63  ;;  %v12507_v1 = vunpack.i.h.bf16 %v12505_v25  ;;  %v12506_v59 = vunpack.i.l.bf16 %v12505_v25  ;;  %v11669_v5 = vcombine.high %v3509_v58, %v3511_v63 }
 0x3a1   : > { %v3734_v51 = vsel %vm619_vm4, %v3718_v56, %v3719_v9 }
 0x3a2   : > { %v3735_v24 = vsel %vm1412_vm12, %v3701_v6, %v3734_v51  ;;  %v3711_v10 = vrot.slane %v12507_v1, 4  ;;  %v3709_v49 = vrot.slane %v12506_v59, 4  ;;  %4691 = vmatprep.subr.bf16.mxu0 %v11669_v5  ;;  %v12510_v23 = vpop.permute.xlu0 %12509  ;;  %v18984_v6 = vmov 0   ;;  %v12845_v1 = vld [vmem:[%s18797_s1 + $0x178] ss:$20 sps:$4 sm:$0xff]   ;;  %v14780_v51 = vpop.f32.mrf.mxu1 }
 0x3a3   : > { %v11684_v20 = vcombine.low %v3733_v8, %v3735_v24  ;;  %v12512_v35 = vunpack.i.h.bf16 %v12510_v23  ;;  %v12511_v50 = vunpack.i.l.bf16 %v12510_v23  ;;  %v3449_v13 = vpop.permute.xlu1 %3448  ;;  %4692 = vmatpush2.bf16.msra.mxu0 %v11668_v37  ;;  %v11685_v17 = vcombine.high %v3733_v8, %v3735_v24  ;;  %v12838_v8 = vld [vmem:[%s18797_s1 + $0x148] ss:$20 sps:$4 sm:$0xff]   ;;  %v12848_v59 = vld [vmem:[%s18797_s1 + $0x198] ss:$20 sps:$4 sm:$0xff]   ;;  %18985 = vst [vmem:[#allocation40_spill] sm:$0xff] %v14780_v51 }
 0x3a4   : > { %4693 = vmatprep.subr.bf16.mxu0 %v11667_v18  ;;  %v3724_v29 = vsel %vm619_vm4, %v3708_v31, %v3709_v49  ;;  %v3726_v21 = vsel %vm619_vm4, %v3710_v33, %v3711_v10  ;;  %v3480_v0 = vrot.slane %v3449_v13, 4  ;;  %v12846_v37 = vld [vmem:[%s18797_s1 + $0x19c] ss:$20 sps:$4 sm:$0xff]   ;;  %v12850_v5 = vld [vmem:[%s18797_s1 + $0x1c4] ss:$20 sps:$4 sm:$0xff]   ;;  %v14782_v33 = vpop.f32.mrf.mxu1 }
 0x3a5   : > { %v3481_v28 = vrot.slane %v12511_v50, 4  ;;  %4788 = vmatprep.subr.bf16.mxu1 %v11685_v17  ;;  %v3483_v44 = vrot.slane %v12512_v35, 4  ;;  %v3725_v45 = vsel %vm1412_vm12, %v14661_v48, %v3724_v29  ;;  %v3727_v60 = vsel %vm1412_vm12, %v14675_v41, %v3726_v21  ;;  %v12852_v31 = vld [vmem:[%s18797_s1 + $0x1c0] ss:$20 sps:$4 sm:$0xff]   ;;  %18986 = vst [vmem:[#allocation41_spill] sm:$0xff] %v14782_v33 }
 0x3a6   : > { %4647 = vmatmul.mubr.bf16.gmra.mxu1 %v12833_v26  ;;  %v3673_v14 = vpop.permute.xlu0 %3672  ;;  %v11681_v22 = vcombine.high %v3725_v45, %v3727_v60  ;;  %v11680_v7 = vcombine.low %v3725_v45, %v3727_v60  ;;  %v14784_v24 = vpop.f32.mrf.mxu1 }
 0x3a7   : > { %v3453_v54 = vpop.permute.xlu1 %3452  ;;  %4694 = vmatpush2.bf16.msra.mxu0 %v11666_v34  ;;  %4789 = vmatpush1.bf16.msra.mxu1 %v11684_v20  ;;  %v3496_v16 = vsel %vm619_vm4, %v3480_v0, %v3481_v28  ;;  %v3704_v4 = vrot.slane %v3673_v14, 4  ;;  %18987 = vst [vmem:[#allocation39_spill] sm:$0xff] %v14784_v24 }
 0x3a8   : > { %v3482_v47 = vrot.slane %v3453_v54, 4  ;;  %4695 = vmatprep.subr.bf16.mxu0 %v11665_v42  ;;  %4790 = vmatprep.subr.bf16.mxu1 %v11683_v39  ;;  %v3497_v48 = vsel %vm1186_vm11, %v3449_v13, %v3496_v16  ;;  %v14786_v10 = vpop.f32.mrf.mxu1 }
 0x3a9   : > { %4656 = vmatprep.mubr.bf16.mxu1 %v12835_v52  ;;  %18988 = vst [vmem:[#allocation37_spill] sm:$0xff] %v14786_v10 }
 0x3aa   : > { %v3498_v32 = vsel %vm619_vm4, %v3482_v47, %v3483_v44  ;;  %v3677_v41 = vpop.permute.xlu0 %3676  ;;  %v14788_v49 = vpop.f32.mrf.mxu1 }
 0x3ab   : > { %v3499_v43 = vsel %vm1186_vm11, %v3453_v54, %v3498_v32  ;;  %v12515_v12 = vpop.permute.xlu1 %12514  ;;  %4696 = vmatpush2.bf16.msra.mxu0 %v11664_v27  ;;  %4791 = vmatpush1.bf16.msra.mxu1 %v11682_v46  ;;  %v3706_v9 = vrot.slane %v3677_v41, 4  ;;  %18989 = vst [vmem:[#allocation38_spill] sm:$0xff] %v14788_v49 }
 0x3ac   : > { %v11662_v40 = vcombine.low %v3497_v48, %v3499_v43  ;;  %v12517_v30 = vunpack.i.h.bf16 %v12515_v12  ;;  %v12516_v58 = vunpack.i.l.bf16 %v12515_v12  ;;  %4792 = vmatprep.subr.bf16.mxu1 %v11681_v22  ;;  %v11663_v55 = vcombine.high %v3497_v48, %v3499_v43  ;;  %v14790_v23 = vpop.f32.mrf.mxu1 }
 0x3ad   : > { %18990 = vst [vmem:[#allocation36_spill] sm:$0xff] %v14790_v23 }
 0x3ae   : > { %v3707_v3 = vrot.slane %v12517_v30, 4  ;;  %v3705_v19 = vrot.slane %v12516_v58, 4  ;;  %4657 = vmatmul.mubr.bf16.gmra.mxu1 %v12837_v15  ;;  %4697 = vmatprep.subr.bf16.mxu0 %v11663_v55  ;;  %v14792_v26 = vpop.f32.mrf.mxu1 }
 0x3af   : > { %4698 = vmatpush2.bf16.msra.mxu0 %v11662_v40  ;;  %4793 = vmatpush1.bf16.msra.mxu1 %v11680_v7  ;;  %18991 = vst [vmem:[#allocation35_spill] sm:$0xff] %v14792_v26 }
 0x3b0   : > { %v3720_v38 = vsel %vm619_vm4, %v3704_v4, %v3705_v19  ;;  %v3722_v62 = vsel %vm619_vm4, %v3706_v9, %v3707_v3  ;;  %4812 = vmatprep.mubr.bf16.mxu1 %v18984_v6  ;;  %v14794_v20 = vpop.f32.mrf.mxu1 }
 0x3b1   : > { %v3721_v18 = vsel %vm1412_vm12, %v3673_v14, %v3720_v38  ;;  %v3723_v63 = vsel %vm1412_vm12, %v3677_v41, %v3722_v62  ;;  %18992 = vst [vmem:[#allocation33_spill] sm:$0xff] %v14794_v20 }
 0x3b2   : > { %4700 = vmatmul.mubr.bf16.vlgmr.msra.gmra.mxu0 %v12838_v8  ;;  %v11678_v56 = vcombine.low %v3721_v18, %v3723_v63  ;;  %v11679_v25 = vcombine.high %v3721_v18, %v3723_v63  ;;  %v14796_v35 = vpop.f32.mrf.mxu1 }
 0x3b3   : > { %4709 = vmatprep.mubr.bf16.mxu0 %v12842_v57  ;;  %18993 = vst [vmem:[#allocation34_spill] sm:$0xff] %v14796_v35 }
 0x3b4   : > { %4794 = vmatprep.subr.bf16.mxu1 %v11679_v25  ;;  %v14798_v50 = vpop.f32.mrf.mxu1 }
 0x3b5   : > { %4795 = vmatpush1.bf16.msra.mxu1 %v11678_v56  ;;  %18994 = vst [vmem:[#allocation32_spill] sm:$0xff] %v14798_v50 }
 0x3b6   : > { %v14800_v13 = vpop.f32.mrf.mxu1 }
 0x3b7   : > { %18995 = vst [vmem:[#allocation31_spill] sm:$0xff] %v14800_v13 }
 0x3b8   : > { %11686 = vmatmul.mubr.msk.bf16.vlgmr.msra.gmra.mxu1 %vm2220_vm13, %v12841_v2  ;;  %v14802_v17 = vpop.f32.mrf.mxu1  ;;  %v14874_v18 = vpop.permute.xlu1 %3922 }
 0x3b9   : > { %4822 = vmatprep.mubr.bf16.mxu1 %v18984_v6  ;;  %18996 = vst [vmem:[#allocation29_spill] sm:$0xff] %v14802_v17  ;;  %v14882_v2 = vpop.permute.xlu0 %3927 }
 0x3ba   : > { %4710 = vmatmul.mubr.bf16.gmra.mxu0 %v12844_v36  ;;  %v14804_v29 = vpop.f32.mrf.mxu1 }
 0x3bb   : > { %4719 = vmatprep.mubr.bf16.mxu0 %v12846_v37  ;;  %18997 = vst [vmem:[#allocation30_spill] sm:$0xff] %v14804_v29 }
 0x3bc   : > { %v14806_v21 = vpop.f32.mrf.mxu1  ;;  %v3913_v37 = vpop.permute.xlu1 %3912 }
 0x3bd   : > { %18998 = vst [vmem:[#allocation28_spill] sm:$0xff] %v14806_v21 }
 0x3be   : > { %v14808_v34 = vpop.f32.mrf.mxu1 }
 0x3bf   : > { %18999 = vst [vmem:[#allocation27_spill] sm:$0xff] %v14808_v34 }
 0x3c0   : > { %11687 = vmatmul.mubr.msk.bf16.gmra.mxu1 %vm2220_vm13, %v12845_v1  ;;  %v14810_v11 = vpop.f32.mrf.mxu1  ;;  %v3903_v21 = vpop.permute.xlu1 %3902 }
 0x3c1   : > { %4832 = vmatprep.mubr.bf16.mxu1 %v18984_v6  ;;  %19000 = vst [vmem:[#allocation25_spill] sm:$0xff] %v14810_v11 }
 0x3c2   : > { %4720 = vmatmul.mubr.bf16.gmra.mxu0 %v12848_v59  ;;  %v14812_v28 = vpop.f32.mrf.mxu0 }
 0x3c3   : > { %4729 = vmatprep.mubr.bf16.mxu0 %v12850_v5  ;;  %19001 = vst [vmem:[#allocation26_spill] sm:$0xff] %v14812_v28 }
 0x3c4   : > { %v14814_v0 = vpop.f32.mrf.mxu0 }
 0x3c5   : > { %19002 = vst [vmem:[#allocation24_spill] sm:$0xff] %v14814_v0 }
 0x3c6   : > { %v14818_v39 = vpop.f32.mrf.mxu0 }
 0x3c7   : > { %19003 = vst [vmem:[#allocation42_spill] sm:$0xff] %v14818_v39 }
 0x3c8   : > { %11688 = vmatmul.mubr.msk.bf16.gmra.mxu1 %vm2220_vm13, %v12849_v53  ;;  %v14824_v60 = vpop.f32.mrf.mxu0  ;;  %v3918_v53 = vpop.permute.xlu0 %3917 }
 0x3c9   : > { %4842 = vmatprep.mubr.bf16.mxu1 %v18984_v6  ;;  %19004 = vst [vmem:[#allocation43_spill] sm:$0xff] %v14824_v60 }
 0x3ca   : > { %4730 = vmatmul.mubr.bf16.gmra.mxu0 %v12852_v31  ;;  %v14830_v27 = vpop.f32.mrf.mxu0 }
 0x3cb   : > { %19005 = vst [vmem:[#allocation44_spill] sm:$0xff] %v14830_v27 }
 0x3cc   : > { %v14836_v22 = vpop.f32.mrf.mxu0  ;;  %v3908_v34 = vpop.permute.xlu0 %3907 }
 0x3cd   : > { %19006 = vst [vmem:[#allocation45_spill] sm:$0xff] %v14836_v22 }
 0x3ce   : > { %v14842_v43 = vpop.f32.mrf.mxu0 }
 0x3cf   : > { %19007 = vst [vmem:[#allocation46_spill] sm:$0xff] %v14842_v43 }
 0x3d0   : > { %11689 = vmatmul.mubr.msk.bf16.gmra.mxu1 %vm2220_vm13, %v12853_v61  ;;  %v14848_v40 = vpop.f32.mrf.mxu0 }
 0x3d1   : > { %4852 = vmatprep.mubr.bf16.mxu1 %v18984_v6  ;;  %19008 = vst [vmem:[#allocation47_spill] sm:$0xff] %v14848_v40 }
 0x3d2   : > { %v14854_v55 = vpop.f32.mrf.mxu0 }
 0x3d3   : > { %19009 = vst [vmem:[#allocation48_spill] sm:$0xff] %v14854_v55 }
 0x3d4   : > { %v14860_v9 = vpop.f32.mrf.mxu0 }
 0x3d5   : > { %19012 = vst [vmem:[#allocation51_spill] sm:$0xff] %v14860_v9 }
 0x3d6   : > { %v14866_v8 = vpop.f32.mrf.mxu0 }
 0x3d7   : > { %19015 = vst [vmem:[#allocation54_spill] sm:$0xff] %v14866_v8 }
 0x3d8   : > { %v14872_v62 = vpop.f32.mrf.mxu0 }
 0x3d9   : > { %19018 = vst [vmem:[#allocation57_spill] sm:$0xff] %v14872_v62  ;;  %v3893_v62 = vpop.permute.xlu1 %3892 }
 0x3e9   : > { %v14880_v25 = vpop.f32.mrf.mxu0 }
 0x3ea   : > { %19021 = vst [vmem:[#allocation60_spill] sm:$0xff] %v14880_v25 }
 0x3eb   : > { %v14888_v59 = vpop.f32.mrf.mxu0 }
 0x3ec   : > { %19024 = vst [vmem:[#allocation63_spill] sm:$0xff] %v14888_v59 }
 0x3ed   : > { %v14892_v31 = vpop.f32.mrf.mxu0 }
 0x3ee   : > { %19026 = vst [vmem:[#allocation65_spill] sm:$0xff] %v14892_v31  ;;  %v3898_v31 = vpop.permute.xlu0 %3897 }
 0x3ef   : > { %v14898_v25 = vpop.f32.mrf.mxu0 }
 0x3f0   : > { %19029 = vst [vmem:[#allocation68_spill] sm:$0xff] %v14898_v25 }
 0x436   : > { %v4588_v52 = vpop.f32.mrf.mxu1 }
 0x437   : > { %v4589_v8 = vadd.f32 %v4588_v52, %v3893_v62 }
 0x438   : > { %v4590_v44 = vpop.f32.mrf.mxu1 }
 0x439   : > { %v4591_v17 = vadd.f32 %v4590_v44, %v3893_v62 }
 0x43a   : > { %v4592_v14 = vpop.f32.mrf.mxu1 }
 0x43b   : > { %v4593_v40 = vadd.f32 %v4592_v14, %v3898_v31 }
 0x43c   : > { %v14816_v42 = vpop.f32.mrf.mxu1 }
 0x43d   : > { %v4595_v49 = vadd.f32 %v14816_v42, %v3898_v31 }
 0x43e   : > { %v14820_v54 = vpop.f32.mrf.mxu1 }
 0x43f   : > { %v4599_v52 = vadd.f32 %v14820_v54, %v3903_v21 }
 0x440   : > { %v14822_v45 = vpop.f32.mrf.mxu1 }
 0x441   : > { %v4601_v20 = vadd.f32 %v14822_v45, %v3903_v21 }
 0x442   : > { %v14826_v16 = vpop.f32.mrf.mxu1 }
 0x443   : > { %v4603_v44 = vadd.f32 %v14826_v16, %v3908_v34  ;;  %v19035_v16 = vld [vmem:[#allocation4_spill] sm:$0xff] }
 0x444   : > { %v14828_v47 = vpop.f32.mrf.mxu1 }
 0x446   : > { %v14832_v46 = vpop.f32.mrf.mxu1 }
 0x448   : > { %v14834_v32 = vpop.f32.mrf.mxu1 }
 0x44a   : > { %v14838_v15 = vpop.f32.mrf.mxu1 }
 0x44b   : > { %v4613_v54 = vadd.f32 %v14838_v15, %v3918_v53  ;;  %v19037_v15 = vld [vmem:[#allocation6_spill] sm:$0xff] }
 0x44c   : > { %v14840_v48 = vpop.f32.mrf.mxu1 }
 0x44d   : > { %v14917_v21 = vadd.f32 %v14840_v48, %v3918_v53 }
 0x44e   : > { %v14844_v41 = vpop.f32.mrf.mxu1 }
 0x44f   : > { %v14937_v62 = vadd.f32 %v14844_v41, %v14874_v18 }
 0x450   : > { %v14846_v12 = vpop.f32.mrf.mxu1 }
 0x451   : > { %v14941_v31 = vadd.f32 %v14846_v12, %v14874_v18 }
 0x452   : > { %v14850_v30 = vpop.f32.mrf.mxu1 }
 0x454   : > { %v14852_v58 = vpop.f32.mrf.mxu1 }
 0x456   : > { %v14856_v7 = vpop.f32.mrf.mxu1 }
 0x457   : > { %19010 = vst [vmem:[#allocation49_spill] sm:$0xff] %v14856_v7 }
 0x458   : > { %v14858_v4 = vpop.f32.mrf.mxu1 }
 0x459   : > { %19011 = vst [vmem:[#allocation50_spill] sm:$0xff] %v14858_v4 }
 0x45a   : > { %v14862_v3 = vpop.f32.mrf.mxu1 }
 0x45b   : > { %19013 = vst [vmem:[#allocation52_spill] sm:$0xff] %v14862_v3 }
 0x45c   : > { %v14864_v19 = vpop.f32.mrf.mxu1 }
 0x45d   : > { %19014 = vst [vmem:[#allocation53_spill] sm:$0xff] %v14864_v19 }
 0x45e   : > { %v14868_v57 = vpop.f32.mrf.mxu1 }
 0x45f   : > { %19016 = vst [vmem:[#allocation55_spill] sm:$0xff] %v14868_v57  ;;  %v5622_v57 = vld [vmem:[#allocation2 + $0x14c] sm:$0xf] }
 0x460   : > { %v14870_v38 = vpop.f32.mrf.mxu1 }
 0x461   : > { %19017 = vst [vmem:[#allocation56_spill] sm:$0xff] %v14870_v38 }
 0x462   : > { %v14876_v63 = vpop.f32.mrf.mxu1 }
 0x463   : > { %19019 = vst [vmem:[#allocation58_spill] sm:$0xff] %v14876_v63  ;;  %v12854_v63 = vld [vmem:[%s18797_s1 + $0x1ec] ss:$20 sps:$4 sm:$0xff]  }
 0x464   : > { %v14878_v56 = vpop.f32.mrf.mxu1  ;;  %4739 = vmatprep.mubr.bf16.mxu0 %v12854_v63  ;;  %v5618_v63 = vld [vmem:[#allocation2 + $0x12c] sm:$0xf] }
 0x465   : > { %19020 = vst [vmem:[#allocation59_spill] sm:$0xff] %v14878_v56 }
 0x466   : > { %v14884_v36 = vpop.f32.mrf.mxu1 }
 0x467   : > { %19022 = vst [vmem:[#allocation61_spill] sm:$0xff] %v14884_v36  ;;  %v12859_v36 = vld [vmem:[%s18797_s1 + $0x210] ss:$20 sps:$4 sm:$0xff]  }
 0x468   : > { %v14886_v1 = vpop.f32.mrf.mxu1 }
 0x469   : > { %19023 = vst [vmem:[#allocation62_spill] sm:$0xff] %v14886_v1 }
 0x46a   : > { %v14890_v5 = vpop.f32.mrf.mxu1 }
 0x46b   : > { %19025 = vst [vmem:[#allocation64_spill] sm:$0xff] %v14890_v5  ;;  %v5616_v5 = vld [vmem:[#allocation2 + $0x11c] sm:$0xf] }
 0x46c   : > { %v14894_v61 = vpop.f32.mrf.mxu1 }
 0x46d   : > { %19027 = vst [vmem:[#allocation66_spill] sm:$0xff] %v14894_v61 }
 0x46e   : > { %v14896_v29 = vpop.f32.mrf.mxu1 }
 0x46f   : > { %19028 = vst [vmem:[#allocation67_spill] sm:$0xff] %v14896_v29 }
 0x470   : > { %v14900_v11 = vpop.f32.mrf.mxu1 }
 0x471   : > { %19030 = vst [vmem:[#allocation69_spill] sm:$0xff] %v14900_v11  ;;  %v5614_v11 = vld [vmem:[#allocation2 + $0x10c] sm:$0xf] }
 0x472   : > { %v14902_v9 = vpop.f32.mrf.mxu1  ;;  %v4701_v55 = vpop.f32.mrf.mxu0 }
 0x473   : > { %19031 = vst [vmem:[#allocation70_spill] sm:$0xff] %v14902_v9  ;;  %v4702_v13 = vadd.f32 %v4701_v55, %v4589_v8 }
 0x474   : > { %v4703_v59 = vpop.f32.mrf.mxu0  ;;  %v14904_v50 = vpop.f32.mrf.mxu1 }
 0x475   : > { %19032 = vst [vmem:[#allocation71_spill] sm:$0xff] %v14904_v50  ;;  %v4704_v43 = vadd.f32 %v4703_v59, %v4591_v17 }
 0x476   : > { %v4705_v35 = vpop.f32.mrf.mxu0 }
 0x477   : > { %v4706_v60 = vadd.f32 %v4705_v35, %v4593_v40  ;;  %v4609_v35 = vadd.f32 %v14832_v46, %v3913_v37 }
 0x478   : > { %v4707_v22 = vpop.f32.mrf.mxu0  ;;  %v4814_v27 = vpop.f32.mrf.mxu1 }
 0x479   : > { %v4815_v25 = vadd.f32 %v4814_v27, %v4702_v13  ;;  %v4605_v13 = vadd.f32 %v14828_v47, %v3908_v34  ;;  %v4708_v27 = vadd.f32 %v4707_v22, %v4595_v49  ;;  %v19036_v34 = vld [vmem:[#allocation5_spill] sm:$0xff] }
 0x47a   : > { %v4711_v0 = vpop.f32.mrf.mxu0  ;;  %v4816_v28 = vpop.f32.mrf.mxu1 }
 0x47b   : > { %v4893_v39 = vmul.f32 0.2, %v4815_v25  ;;  %v4817_v23 = vadd.f32 %v4816_v28, %v4704_v43  ;;  %v4611_v28 = vadd.f32 %v14834_v32, %v3913_v37  ;;  %v4712_v47 = vadd.f32 %v4711_v0, %v4599_v52 }
 0x47c   : > { %v4713_v26 = vpop.f32.mrf.mxu0  ;;  %v4818_v33 = vpop.f32.mrf.mxu1 }
 0x47d   : > { %v14910_v55 = vmax.f32 %v4815_v25, %v4893_v39  ;;  %v4894_v14 = vmul.f32 0.2, %v4817_v23  ;;  %v4819_v17 = vadd.f32 %v4818_v33, %v4706_v60  ;;  %v4714_v0 = vadd.f32 %v4713_v26, %v4601_v20 }
 0x47e   : > { %v4715_v42 = vpop.f32.mrf.mxu0  ;;  %v4820_v43 = vpop.f32.mrf.mxu1 }
 0x47f   : > { %19033 = vst [vmem:[#allocation72_spill] sm:$0xff] %v14910_v55  ;;  %v14919_v45 = vmax.f32 %v4817_v23, %v4894_v14  ;;  %v4895_v39 = vmul.f32 0.2, %v4819_v17  ;;  %v5013_v33 = vmul.f32 %v19035_v16, %v14910_v55  ;;  %v5085_v60 = vmul.f32 %v19036_v34, %v14910_v55  ;;  %v19038_v23 = vld [vmem:[#allocation7_spill] sm:$0xff] }
 0x480   : > { %v4821_v46 = vadd.f32 %v4820_v43, %v4708_v27  ;;  %v4717_v32 = vpop.f32.mrf.mxu0  ;;  %v4824_v49 = vpop.f32.mrf.mxu1 }
 0x481   : > { %19034 = vst [vmem:[#allocation73_spill] sm:$0xff] %v14919_v45  ;;  %v14927_v22 = vpack.c.bf16 %v14919_v45, %v14910_v55  ;;  %v5014_v48 = vmul.f32 %v19037_v15, %v14919_v45  ;;  %v5086_v40 = vmul.f32 %v19038_v23, %v14919_v45  ;;  %v14933_v8 = vmax.f32 %v4819_v17, %v4895_v39 }
 0x482   : > { %v4896_v25 = vmul.f32 0.2, %v4821_v46  ;;  %v4825_v37 = vadd.f32 %v4824_v49, %v4712_v47  ;;  %v4721_v59 = vpop.f32.mrf.mxu0  ;;  %v4826_v53 = vpop.f32.mrf.mxu1  ;;  %v4716_v17 = vadd.f32 %v4715_v42, %v4603_v44  ;;  %v4718_v43 = vadd.f32 %v4717_v32, %v4605_v13 }
 0x483   : > { %19039 = vst [vmem:[#allocation74_spill] sm:$0xff] %v14933_v8  ;;  %5005 = vst [vmem:[#allocation2 + $0x4] sm:$0xff] %v14927_v22  ;;  %v12234_v52 = vpack.c.bf16 %v5014_v48, %v5013_v33  ;;  %v14944_v14 = vpack.c.bf16 %v5086_v40, %v5085_v60  ;;  %v4827_v39 = vadd.f32 %v4826_v53, %v4714_v0 }
 0x484   : > { %v14946_v27 = vmax.f32 %v4821_v46, %v4896_v25  ;;  %v4897_v41 = vmul.f32 0.2, %v4825_v37  ;;  %v4723_v26 = vpop.f32.mrf.mxu0  ;;  %v4828_v20 = vpop.f32.mrf.mxu1  ;;  %v5015_v12 = vmul.f32 %v19035_v16, %v14933_v8  ;;  %v5087_v18 = vmul.f32 %v19036_v34, %v14933_v8 }
 0x485   : > { %5077 = vst [vmem:[#allocation2 + $0x84] sm:$0xff] %v12234_v52  ;;  %5149 = vst [vmem:[#allocation2 + $0x104] sm:$0xff] %v14944_v14  ;;  %v4829_v33 = vadd.f32 %v4828_v20, %v4716_v17  ;;  %v4623_v49 = vadd.f32 %v14850_v30, %v14882_v2  ;;  %v4898_v48 = vmul.f32 0.2, %v4827_v39  ;;  %v14969_v25 = vadd.f32 %v14852_v58, %v14882_v2 }
 0x486   : > { %19040 = vst [vmem:[#allocation75_spill] sm:$0xff] %v14946_v27  ;;  %v14957_v13 = vpack.c.bf16 %v14946_v27, %v14933_v8  ;;  %v5016_v42 = vmul.f32 %v19037_v15, %v14946_v27  ;;  %v5088_v60 = vmul.f32 %v19038_v23, %v14946_v27  ;;  %v14963_v47 = vmax.f32 %v4825_v37, %v4897_v41  ;;  %v4725_v46 = vpop.f32.mrf.mxu0  ;;  %v4830_v32 = vpop.f32.mrf.mxu1 }
 0x487   : > { %v4899_v40 = vmul.f32 0.2, %v4829_v33  ;;  %v4831_v0 = vadd.f32 %v4830_v32, %v4718_v43  ;;  %v4722_v17 = vadd.f32 %v4721_v59, %v4609_v35  ;;  %v14974_v20 = vmax.f32 %v4827_v39, %v4898_v48 }
 0x488   : > { %19041 = vst [vmem:[#allocation76_spill] sm:$0xff] %v14963_v47  ;;  %v12235_v53 = vpack.c.bf16 %v5016_v42, %v5015_v12  ;;  %v14971_v52 = vpack.c.bf16 %v5088_v60, %v5087_v18  ;;  %5006 = vst [vmem:[#allocation2 + $0x14] sm:$0xff] %v14957_v13  ;;  %v4727_v37 = vpop.f32.mrf.mxu0  ;;  %v4834_v41 = vpop.f32.mrf.mxu1  ;;  %v4724_v44 = vadd.f32 %v4723_v26, %v4611_v28 }
 0x489   : > { %19042 = vst [vmem:[#allocation77_spill] sm:$0xff] %v14974_v20  ;;  %v14976_v51 = vmax.f32 %v4829_v33, %v4899_v40  ;;  %v4900_v30 = vmul.f32 0.2, %v4831_v0  ;;  %v5017_v58 = vmul.f32 %v19035_v16, %v14963_v47  ;;  %v4726_v2 = vadd.f32 %v4725_v46, %v4613_v54 }
 0x48a   : > { %5078 = vst [vmem:[#allocation2 + $0x94] sm:$0xff] %v12235_v53  ;;  %5150 = vst [vmem:[#allocation2 + $0x114] sm:$0xff] %v14971_v52  ;;  %v4835_v43 = vadd.f32 %v4834_v41, %v4722_v17  ;;  %v4731_v12 = vpop.f32.mrf.mxu0  ;;  %v4836_v18 = vpop.f32.mrf.mxu1  ;;  %v5278_v42 = vld [vmem:[#allocation2 + $0x8] sm:$0xf]  ;;  %v5277_v35 = vld [vmem:[#allocation2] sm:$0xff]  ;;  %v5089_v28 = vmul.f32 %v19036_v34, %v14963_v47  ;;  %v14987_v39 = vpack.c.bf16 %v14974_v20, %v14963_v47 }
 0x48b   : > { %19043 = vst [vmem:[#allocation78_spill] sm:$0xff] %v14976_v51  ;;  %v5018_v26 = vmul.f32 %v19037_v15, %v14974_v20  ;;  %v5090_v54 = vmul.f32 %v19038_v23, %v14974_v20  ;;  %5311 = vrot.lane.b32.xlu0 %v5278_v42, %s13023_s25  ;;  %v5019_v33 = vmul.f32 %v19035_v16, %v14976_v51 }
 0x48c   : > { %v14996_v60 = vmax.f32 %v4831_v0, %v4900_v30  ;;  %v4728_v46 = vadd.f32 %v4727_v37, %v14917_v21  ;;  %v4901_v32 = vmul.f32 0.2, %v4835_v43  ;;  %5309 = vrot.lane.b32.xlu1 %v5277_v35, %s13023_s25  ;;  %v4733_v48 = vpop.f32.mrf.mxu0  ;;  %v4838_v40 = vpop.f32.mrf.mxu1  ;;  %5007 = vst [vmem:[#allocation2 + $0x24] sm:$0xff] %v14987_v39  ;;  %v5091_v41 = vmul.f32 %v19036_v34, %v14976_v51  ;;  %v5165_v59 = vld [vmem:[#allocation2 + $0x80] sm:$0xff] }
 0x48d   : > { %v15001_v53 = vpack.c.bf16 %v5018_v26, %v5017_v58  ;;  %v15003_v17 = vpack.c.bf16 %v5090_v54, %v5089_v28  ;;  %v4837_v42 = vadd.f32 %v4836_v18, %v4724_v44  ;;  %v5166_v28 = vld [vmem:[#allocation2 + $0x88] sm:$0xf]  ;;  %v4732_v44 = vadd.f32 %v4731_v12, %v14937_v62 }
 0x48e   : > { %19044 = vst [vmem:[#allocation79_spill] sm:$0xff] %v14996_v60  ;;  %v15009_v0 = vpack.c.bf16 %v14996_v60, %v14976_v51  ;;  %v5020_v21 = vmul.f32 %v19037_v15, %v14996_v60  ;;  %v5092_v37 = vmul.f32 %v19038_v23, %v14996_v60  ;;  %v15015_v30 = vmax.f32 %v4835_v43, %v4901_v32  ;;  %v4735_v58 = vpop.f32.mrf.mxu0  ;;  %v4840_v35 = vpop.f32.mrf.mxu1  ;;  %v5962_v51 = vld [vmem:[#allocation2 + $0x16c] sm:$0xf] }
 0x48f   : > { %5079 = vst [vmem:[#allocation2 + $0xa4] sm:$0xff] %v15001_v53  ;;  %5151 = vst [vmem:[#allocation2 + $0x124] sm:$0xff] %v15003_v17  ;;  %v4902_v18 = vmul.f32 0.2, %v4837_v42  ;;  %v4839_v26 = vadd.f32 %v4838_v40, %v4726_v2  ;;  %v4841_v54 = vadd.f32 %v4840_v35, %v4728_v46  ;;  %5199 = vrot.lane.b32.xlu0 %v5166_v28, %s13024_s26 }
 0x490   : > { %19045 = vst [vmem:[#allocation80_spill] sm:$0xff] %v15015_v30  ;;  %v15021_v10 = vpack.c.bf16 %v5020_v21, %v5019_v33  ;;  %v15023_v24 = vpack.c.bf16 %v5092_v37, %v5091_v41  ;;  %5008 = vst [vmem:[#allocation2 + $0x34] sm:$0xff] %v15009_v0  ;;  %v4734_v43 = vadd.f32 %v4733_v48, %v14941_v31  ;;  %5197 = vrot.lane.b32.xlu1 %v5165_v59, %s13024_s26  ;;  %v4844_v4 = vpop.f32.mrf.mxu1  ;;  %v4737_v40 = vpop.f32.mrf.mxu0  ;;  %v5502_v48 = vld [vmem:[#allocation2 + $0x88] sm:$0xf] }
 0x491   : > { %v4736_v32 = vadd.f32 %v4735_v58, %v4623_v49  ;;  %v5021_v62 = vmul.f32 %v19035_v16, %v15015_v30  ;;  %v15030_v2 = vmax.f32 %v4837_v42, %v4902_v18  ;;  %v4903_v12 = vmul.f32 0.2, %v4839_v26  ;;  %v5392_v38 = vld [vmem:[#allocation2 + $0x118] sm:$0xf] }
 0x492   : > { %v4904_v46 = vmul.f32 0.2, %v4841_v54  ;;  %5080 = vst [vmem:[#allocation2 + $0xb4] sm:$0xff] %v15021_v10  ;;  %5152 = vst [vmem:[#allocation2 + $0x134] sm:$0xff] %v15023_v24  ;;  %v5093_v33 = vmul.f32 %v19036_v34, %v15015_v30  ;;  %v4845_v31 = vadd.f32 %v4844_v4, %v4732_v44  ;;  %v4846_v49 = vpop.f32.mrf.mxu1  ;;  %v4738_v28 = vadd.f32 %v4737_v40, %v14969_v25 }
 0x493   : > { %19046 = vst [vmem:[#allocation81_spill] sm:$0xff] %v15030_v2  ;;  %v15042_v21 = vpack.c.bf16 %v15030_v2, %v15015_v30  ;;  %v5022_v37 = vmul.f32 %v19037_v15, %v15030_v2  ;;  %v5094_v58 = vmul.f32 %v19038_v23, %v15030_v2  ;;  %v15048_v35 = vmax.f32 %v4839_v26, %v4903_v12  ;;  %v12882_v30 = vld [vmem:[%s18797_s1 + $0x218] ss:$20 sps:$4 sm:$0xff]  }
 0x494   : > { %5535 = vrot.lane.b32.xlu0 %v5502_v48, %s13025_s27  ;;  %v15051_v4 = vmax.f32 %v4841_v54, %v4904_v46  ;;  %v4905_v44 = vmul.f32 0.2, %v4845_v31  ;;  %v4847_v18 = vadd.f32 %v4846_v49, %v4734_v43  ;;  %5533 = vrot.lane.b32.xlu1 %v5165_v59, %s13025_s27  ;;  %v4848_v42 = vpop.f32.mrf.mxu1  ;;  %v5280_v46 = vld [vmem:[#allocation2 + $0x18] sm:$0xf]  ;;  %v5279_v48 = vld [vmem:[#allocation2 + $0x10] sm:$0xff] }
 0x495   : > { %19047 = vst [vmem:[#allocation82_spill] sm:$0xff] %v15048_v35  ;;  %5009 = vst [vmem:[#allocation2 + $0x44] sm:$0xff] %v15042_v21  ;;  %v15056_v41 = vpack.c.bf16 %v5022_v37, %v5021_v62  ;;  %v15058_v7 = vpack.c.bf16 %v5094_v58, %v5093_v33  ;;  %v5023_v26 = vmul.f32 %v19035_v16, %v15048_v35  ;;  %v5282_v37 = vld [vmem:[#allocation2 + $0x28] sm:$0xf] }
 0x496   : > { %19048 = vst [vmem:[#allocation83_spill] sm:$0xff] %v15051_v4  ;;  %v5095_v54 = vmul.f32 %v19036_v34, %v15048_v35  ;;  %v15066_v25 = vpack.c.bf16 %v15051_v4, %v15048_v35  ;;  %v5024_v59 = vmul.f32 %v19037_v15, %v15051_v4  ;;  %v5096_v43 = vmul.f32 %v19038_v23, %v15051_v4  ;;  %v4850_v12 = vpop.f32.mrf.mxu1 }
 0x497   : > { %v15072_v62 = vmax.f32 %v4845_v31, %v4905_v44  ;;  %5081 = vst [vmem:[#allocation2 + $0xc4] sm:$0xff] %v15056_v41  ;;  %5153 = vst [vmem:[#allocation2 + $0x144] sm:$0xff] %v15058_v7  ;;  %v4906_v40 = vmul.f32 0.2, %v4847_v18  ;;  %v4849_v33 = vadd.f32 %v4848_v42, %v4736_v32  ;;  %v4851_v49 = vadd.f32 %v4850_v12, %v4738_v28  ;;  %v5168_v28 = vld [vmem:[#allocation2 + $0x98] sm:$0xf] }
 0x498   : > { %5315 = vrot.lane.b32.xlu0 %v5280_v46, %s13023_s25  ;;  %v15079_v58 = vpack.c.bf16 %v5024_v59, %v5023_v26  ;;  %v15081_v19 = vpack.c.bf16 %v5096_v43, %v5095_v54  ;;  %5010 = vst [vmem:[#allocation2 + $0x54] sm:$0xff] %v15066_v25  ;;  %5313 = vrot.lane.b32.xlu1 %v5279_v48, %s13023_s25  ;;  %v5167_v12 = vld [vmem:[#allocation2 + $0x90] sm:$0xff] }
 0x499   : > { %19049 = vst [vmem:[#allocation84_spill] sm:$0xff] %v15072_v62  ;;  %v15085_v31 = vmax.f32 %v4847_v18, %v4906_v40  ;;  %v4907_v44 = vmul.f32 0.2, %v4849_v33  ;;  %v4908_v3 = vmul.f32 0.2, %v4851_v49  ;;  %v5025_v32 = vmul.f32 %v19035_v16, %v15072_v62 }
 0x49a   : > { %5082 = vst [vmem:[#allocation2 + $0xd4] sm:$0xff] %v15079_v58  ;;  %5154 = vst [vmem:[#allocation2 + $0x154] sm:$0xff] %v15081_v19  ;;  %v5097_v42 = vmul.f32 %v19036_v34, %v15072_v62 }
 0x49b   : > { %19050 = vst [vmem:[#allocation85_spill] sm:$0xff] %v15085_v31  ;;  %v15097_v18 = vpack.c.bf16 %v15085_v31, %v15072_v62  ;;  %v5026_v54 = vmul.f32 %v19037_v15, %v15085_v31  ;;  %v5098_v59 = vmul.f32 %v19038_v23, %v15085_v31  ;;  %v15103_v43 = vmax.f32 %v4849_v33, %v4907_v44  ;;  %v5725_v31 = vld [vmem:[#allocation2 + $0x84] sm:$0xff] }
 0x49c   : > { %5203 = vrot.lane.b32.xlu0 %v5168_v28, %s13024_s26  ;;  %v15106_v46 = vmax.f32 %v4851_v49, %v4908_v3  ;;  %5201 = vrot.lane.b32.xlu1 %v5167_v12, %s13024_s26 }
 0x49d   : > { %19051 = vst [vmem:[#allocation86_spill] sm:$0xff] %v15103_v43  ;;  %5011 = vst [vmem:[#allocation2 + $0x64] sm:$0xff] %v15097_v18  ;;  %v15110_v40 = vpack.c.bf16 %v5026_v54, %v5025_v32  ;;  %v15112_v48 = vpack.c.bf16 %v5098_v59, %v5097_v42  ;;  %v5027_v26 = vmul.f32 %v19035_v16, %v15103_v43  ;;  %v5504_v32 = vld [vmem:[#allocation2 + $0x98] sm:$0xf]  ;;  %v5281_v42 = vld [vmem:[#allocation2 + $0x20] sm:$0xff] }
 0x49e   : > { %19052 = vst [vmem:[#allocation87_spill] sm:$0xff] %v15106_v46  ;;  %v5099_v33 = vmul.f32 %v19036_v34, %v15103_v43  ;;  %v15120_v44 = vpack.c.bf16 %v15106_v46, %v15103_v43  ;;  %v5028_v3 = vmul.f32 %v19037_v15, %v15106_v46  ;;  %v5100_v49 = vmul.f32 %v19038_v23, %v15106_v46  ;;  %v5852_v23 = vld [vmem:[#allocation2 + $0x7c] sm:$0xf]  ;;  %v5846_v16 = vld [vmem:[#allocation2 + $0x4c] sm:$0xf] }
 0x49f   : > { %5083 = vst [vmem:[#allocation2 + $0xe4] sm:$0xff] %v15110_v40  ;;  %5155 = vst [vmem:[#allocation2 + $0x164] sm:$0xff] %v15112_v48 }
 0x4a0   : > { %5539 = vrot.lane.b32.xlu0 %v5504_v32, %s13025_s27  ;;  %v15133_v54 = vpack.c.bf16 %v5028_v3, %v5027_v26  ;;  %v15135_v59 = vpack.c.bf16 %v5100_v49, %v5099_v33  ;;  %5012 = vst [vmem:[#allocation2 + $0x74] sm:$0xff] %v15120_v44  ;;  %5537 = vrot.lane.b32.xlu1 %v5167_v12, %s13025_s27  ;;  %v5170_v32 = vld [vmem:[#allocation2 + $0xa8] sm:$0xf]  ;;  %v5169_v26 = vld [vmem:[#allocation2 + $0xa0] sm:$0xff]  ;;  %v5284_v12 = vld [vmem:[#allocation2 + $0x38] sm:$0xf] }
 0x4a1   : > { %v5506_v33 = vld [vmem:[#allocation2 + $0xa8] sm:$0xf]  ;;  %v5283_v3 = vld [vmem:[#allocation2 + $0x30] sm:$0xff] }
 0x4a2   : > { %5084 = vst [vmem:[#allocation2 + $0xf4] sm:$0xff] %v15133_v54  ;;  %5156 = vst [vmem:[#allocation2 + $0x174] sm:$0xff] %v15135_v59  ;;  %v5171_v49 = vld [vmem:[#allocation2 + $0xb0] sm:$0xff] }
 0x4a4   : > { %5319 = vrot.lane.b32.xlu0 %v5282_v37, %s13023_s25  ;;  %5317 = vrot.lane.b32.xlu1 %v5281_v42, %s13023_s25  ;;  %v5172_v37 = vld [vmem:[#allocation2 + $0xb8] sm:$0xf] }
 0x4a5   : > { %v5508_v42 = vld [vmem:[#allocation2 + $0xb8] sm:$0xf] }
 0x4a8   : > { %5207 = vrot.lane.b32.xlu0 %v5170_v32, %s13024_s26  ;;  %5205 = vrot.lane.b32.xlu1 %v5169_v26, %s13024_s26  ;;  %v5286_v32 = vld [vmem:[#allocation2 + $0x48] sm:$0xf] }
 0x4ac   : > { %5543 = vrot.lane.b32.xlu0 %v5506_v33, %s13025_s27  ;;  %5541 = vrot.lane.b32.xlu1 %v5169_v26, %s13025_s27  ;;  %v5285_v26 = vld [vmem:[#allocation2 + $0x40] sm:$0xff]  ;;  %v5174_v33 = vld [vmem:[#allocation2 + $0xc8] sm:$0xf] }
 0x4b0   : > { %5323 = vrot.lane.b32.xlu0 %v5284_v12, %s13023_s25  ;;  %5321 = vrot.lane.b32.xlu1 %v5283_v3, %s13023_s25  ;;  %v5173_v12 = vld [vmem:[#allocation2 + $0xc0] sm:$0xff]  ;;  %v5510_v3 = vld [vmem:[#allocation2 + $0xc8] sm:$0xf] }
 0x4b4   : > { %5211 = vrot.lane.b32.xlu0 %v5172_v37, %s13024_s26  ;;  %5209 = vrot.lane.b32.xlu1 %v5171_v49, %s13024_s26  ;;  %v5398_v37 = vld [vmem:[#allocation2 + $0x148] sm:$0xf] }
 0x4b8   : > { %5547 = vrot.lane.b32.xlu0 %v5508_v42, %s13025_s27  ;;  %5545 = vrot.lane.b32.xlu1 %v5171_v49, %s13025_s27  ;;  %v5397_v49 = vld [vmem:[#allocation2 + $0x140] sm:$0xff]  ;;  %v5288_v42 = vld [vmem:[#allocation2 + $0x58] sm:$0xf] }
 0x4bc   : > { %5327 = vrot.lane.b32.xlu0 %v5286_v32, %s13023_s25  ;;  %5325 = vrot.lane.b32.xlu1 %v5285_v26, %s13023_s25  ;;  %v5287_v32 = vld [vmem:[#allocation2 + $0x50] sm:$0xff]  ;;  %v5176_v26 = vld [vmem:[#allocation2 + $0xd8] sm:$0xf] }
 0x4c0   : > { %5215 = vrot.lane.b32.xlu0 %v5174_v33, %s13024_s26  ;;  %5213 = vrot.lane.b32.xlu1 %v5173_v12, %s13024_s26  ;;  %v5175_v33 = vld [vmem:[#allocation2 + $0xd0] sm:$0xff] }
 0x4c4   : > { %5551 = vrot.lane.b32.xlu0 %v5510_v3, %s13025_s27  ;;  %5549 = vrot.lane.b32.xlu1 %v5173_v12, %s13025_s27  ;;  %v5512_v3 = vld [vmem:[#allocation2 + $0xd8] sm:$0xf] }
 0x4c5   : > { %v5400_v12 = vld [vmem:[#allocation2 + $0x158] sm:$0xf] }
 0x4c8   : > { %5439 = vrot.lane.b32.xlu0 %v5398_v37, %s13026_s28  ;;  %5437 = vrot.lane.b32.xlu1 %v5397_v49, %s13026_s28  ;;  %v5399_v37 = vld [vmem:[#allocation2 + $0x150] sm:$0xff]  ;;  %v5290_v49 = vld [vmem:[#allocation2 + $0x68] sm:$0xf] }
 0x4cc   : > { %5331 = vrot.lane.b32.xlu0 %v5288_v42, %s13023_s25  ;;  %5329 = vrot.lane.b32.xlu1 %v5287_v32, %s13023_s25  ;;  %v5289_v42 = vld [vmem:[#allocation2 + $0x60] sm:$0xff]  ;;  %v5178_v32 = vld [vmem:[#allocation2 + $0xe8] sm:$0xf] }
 0x4d0   : > { %5219 = vrot.lane.b32.xlu0 %v5176_v26, %s13024_s26  ;;  %5217 = vrot.lane.b32.xlu1 %v5175_v33, %s13024_s26  ;;  %v5177_v26 = vld [vmem:[#allocation2 + $0xe0] sm:$0xff] }
 0x4d4   : > { %5555 = vrot.lane.b32.xlu0 %v5512_v3, %s13025_s27  ;;  %5553 = vrot.lane.b32.xlu1 %v5175_v33, %s13025_s27  ;;  %v5514_v3 = vld [vmem:[#allocation2 + $0xe8] sm:$0xf] }
 0x4d5   : > { %v5402_v33 = vld [vmem:[#allocation2 + $0x168] sm:$0xf] }
 0x4d8   : > { %5443 = vrot.lane.b32.xlu0 %v5400_v12, %s13026_s28  ;;  %5441 = vrot.lane.b32.xlu1 %v5399_v37, %s13026_s28  ;;  %v5401_v12 = vld [vmem:[#allocation2 + $0x160] sm:$0xff]  ;;  %v5292_v37 = vld [vmem:[#allocation2 + $0x78] sm:$0xf] }
 0x4dc   : > { %5335 = vrot.lane.b32.xlu0 %v5290_v49, %s13023_s25  ;;  %5333 = vrot.lane.b32.xlu1 %v5289_v42, %s13023_s25  ;;  %v5291_v49 = vld [vmem:[#allocation2 + $0x70] sm:$0xff]  ;;  %v5394_v42 = vld [vmem:[#allocation2 + $0x128] sm:$0xf] }
 0x4e0   : > { %5223 = vrot.lane.b32.xlu0 %v5178_v32, %s13024_s26  ;;  %5221 = vrot.lane.b32.xlu1 %v5177_v26, %s13024_s26  ;;  %v5393_v32 = vld [vmem:[#allocation2 + $0x120] sm:$0xff] }
 0x4e4   : > { %5559 = vrot.lane.b32.xlu0 %v5514_v3, %s13025_s27  ;;  %5557 = vrot.lane.b32.xlu1 %v5177_v26, %s13025_s27  ;;  %v5396_v3 = vld [vmem:[#allocation2 + $0x138] sm:$0xf]  ;;  %v5395_v26 = vld [vmem:[#allocation2 + $0x130] sm:$0xff] }
 0x4e8   : > { %5447 = vrot.lane.b32.xlu0 %v5402_v33, %s13026_s28  ;;  %5445 = vrot.lane.b32.xlu1 %v5401_v12, %s13026_s28  ;;  %v5390_v33 = vld [vmem:[#allocation2 + $0x108] sm:$0xf]  ;;  %v5389_v12 = vld [vmem:[#allocation2 + $0x100] sm:$0xff] }
 0x4ec   : > { %5339 = vrot.lane.b32.xlu0 %v5292_v37, %s13023_s25  ;;  %5337 = vrot.lane.b32.xlu1 %v5291_v49, %s13023_s25  ;;  %v5180_v37 = vld [vmem:[#allocation2 + $0xf8] sm:$0xf]  ;;  %v5179_v49 = vld [vmem:[#allocation2 + $0xf0] sm:$0xff] }
 0x4f0   : > { %5431 = vrot.lane.b32.xlu0 %v5394_v42, %s13026_s28  ;;  %5429 = vrot.lane.b32.xlu1 %v5393_v32, %s13026_s28  ;;  %v5626_v42 = vld [vmem:[#allocation2 + $0x16c] sm:$0xf]  ;;  %v5628_v32 = vld [vmem:[#allocation2 + $0x17c] sm:$0xf] }
 0x4f4   : > { %5435 = vrot.lane.b32.xlu0 %v5396_v3, %s13026_s28  ;;  %5433 = vrot.lane.b32.xlu1 %v5395_v26, %s13026_s28  ;;  %v5391_v26 = vld [vmem:[#allocation2 + $0x110] sm:$0xff] }
 0x4f8   : > { %5423 = vrot.lane.b32.xlu0 %v5390_v33, %s13026_s28  ;;  %5421 = vrot.lane.b32.xlu1 %v5389_v12, %s13026_s28  ;;  %v12518_v33 = vpack.i.bf16 %v5628_v32, %v5626_v42  ;;  %v12856_v42 = vld [vmem:[%s18797_s1 + $0x1e8] ss:$20 sps:$4 sm:$0xff]  }
 0x4f9   : > { %4740 = vmatmul.mubr.bf16.gmra.mxu0 %v12856_v42  ;;  %v5620_v42 = vld [vmem:[#allocation2 + $0x13c] sm:$0xf] }
 0x4fc   : > { %5227 = vrot.lane.b32.xlu0 %v5180_v37, %s13024_s26  ;;  %5225 = vrot.lane.b32.xlu1 %v5179_v49, %s13024_s26  ;;  %v5624_v37 = vld [vmem:[#allocation2 + $0x15c] sm:$0xf] }
 0x4fd   : > { %v15187_v28 = vpop.permute.xlu0 %5311 }
 0x4fe   : > { %v15189_v3 = vpop.permute.xlu1 %5309 }
 0x500   : > { %5427 = vrot.lane.b32.xlu0 %v5392_v38, %s13026_s28  ;;  %5425 = vrot.lane.b32.xlu1 %v5391_v26, %s13026_s28  ;;  %v12523_v38 = vpack.i.bf16 %v5624_v37, %v5622_v57  ;;  %v5516_v57 = vld [vmem:[#allocation2 + $0xf8] sm:$0xf]  ;;  %v12857_v37 = vld [vmem:[%s18797_s1 + $0x214] ss:$20 sps:$4 sm:$0xff]  }
 0x501   : > { %v15193_v12 = vpop.permute.xlu0 %5199  ;;  %4749 = vmatprep.mubr.bf16.mxu0 %v12857_v37  ;;  %v12860_v37 = vld [vmem:[%s18797_s1 + $0x23c] ss:$20 sps:$4 sm:$0xff]  }
 0x502   : > { %v15195_v56 = vpop.permute.xlu1 %5197  ;;  %4750 = vmatmul.mubr.bf16.gmra.mxu0 %v12859_v36  ;;  %v12533_v36 = vpack.i.bf16 %v5616_v5, %v5614_v11  ;;  %v5404_v11 = vld [vmem:[#allocation2 + $0x178] sm:$0xf]  ;;  %v5403_v5 = vld [vmem:[#allocation2 + $0x170] sm:$0xff] }
 0x503   : > { %4759 = vmatprep.mubr.bf16.mxu0 %v12860_v37  ;;  %v12863_v37 = vld [vmem:[%s18797_s1 + $0x264] ss:$20 sps:$4 sm:$0xff]  }
 0x504   : > { %12519 = vrot.lane.b32.xlu0 %v12518_v33, %s13027_s29  ;;  %5669 = vrot.lane.b32.xlu1 %v15112_v48, %s13027_s29 }
 0x506   : > { %v15206_v32 = vpop.permute.xlu0 %5535  ;;  %v15208_v26 = vpop.permute.xlu1 %5533 }
 0x508   : > { %5661 = vrot.lane.b32.xlu0 %v15058_v7, %s13027_s29  ;;  %12524 = vrot.lane.b32.xlu1 %v12523_v38, %s13027_s29 }
 0x50a   : > { %v15213_v33 = vpop.permute.xlu0 %5315  ;;  %v15215_v1 = vpop.permute.xlu1 %5313 }
 0x50c   : > { %5563 = vrot.lane.b32.xlu0 %v5516_v57, %s13025_s27  ;;  %5561 = vrot.lane.b32.xlu1 %v5179_v49, %s13025_s27  ;;  %v12528_v57 = vpack.i.bf16 %v5620_v42, %v5618_v63  ;;  %v12862_v63 = vld [vmem:[%s18797_s1 + $0x238] ss:$20 sps:$4 sm:$0xff]  }
 0x50d   : > { %4760 = vmatmul.mubr.bf16.gmra.mxu0 %v12862_v63  ;;  %v5850_v63 = vld [vmem:[#allocation2 + $0x6c] sm:$0xf] }
 0x50e   : > { %v15225_v38 = vpop.permute.xlu0 %5203  ;;  %v15227_v61 = vpop.permute.xlu1 %5201  ;;  %4769 = vmatprep.mubr.bf16.mxu0 %v12863_v37 }
 0x510   : > { %5665 = vrot.lane.b32.xlu0 %v15081_v19, %s13027_s29  ;;  %5653 = vrot.lane.b32.xlu1 %v15003_v17, %s13027_s29 }
 0x512   : > { %v15233_v49 = vpop.permute.xlu0 %5539  ;;  %v15235_v29 = vpop.permute.xlu1 %5537 }
 0x514   : > { %12529 = vrot.lane.b32.xlu0 %v12528_v57, %s13027_s29  ;;  %5657 = vrot.lane.b32.xlu1 %v15023_v24, %s13027_s29 }
 0x516   : > { %v15246_v42 = vpop.permute.xlu0 %5319  ;;  %v15248_v50 = vpop.permute.xlu1 %5317 }
 0x518   : > { %5645 = vrot.lane.b32.xlu0 %v14944_v14, %s13027_s29  ;;  %12534 = vrot.lane.b32.xlu1 %v12533_v36, %s13027_s29  ;;  %v12865_v14 = vld [vmem:[%s18797_s1 + $0x260] ss:$20 sps:$4 sm:$0xff]  }
 0x519   : > { %4770 = vmatmul.mubr.bf16.gmra.mxu0 %v12865_v14  ;;  %v5848_v14 = vld [vmem:[#allocation2 + $0x5c] sm:$0xf] }
 0x51a   : > { %v15253_v57 = vpop.permute.xlu0 %5207  ;;  %v15255_v9 = vpop.permute.xlu1 %5205 }
 0x51c   : > { %5451 = vrot.lane.b32.xlu0 %v5404_v11, %s13026_s28  ;;  %5449 = vrot.lane.b32.xlu1 %v5403_v5, %s13026_s28  ;;  %v12538_v11 = vpack.i.bf16 %v5852_v23, %v5850_v63  ;;  %v12868_v23 = vld [vmem:[%s18797_s1 + $0x284] ss:$20 sps:$4 sm:$0xff]   ;;  %v5844_v63 = vld [vmem:[#allocation2 + $0x3c] sm:$0xf] }
 0x51d   : > { %6895 = vmatprep.mubr.bf16.mxu0 %v12868_v23  ;;  %v5840_v23 = vld [vmem:[#allocation2 + $0x1c] sm:$0xf] }
 0x51e   : > { %v15265_v36 = vpop.permute.xlu0 %5543  ;;  %v15267_v15 = vpop.permute.xlu1 %5541 }
 0x520   : > { %5649 = vrot.lane.b32.xlu0 %v14971_v52, %s13027_s29  ;;  %5893 = vrot.lane.b32.xlu1 %v15097_v18, %s13028_s7  ;;  %v12543_v52 = vpack.i.bf16 %v5848_v14, %v5846_v16  ;;  %v5842_v18 = vld [vmem:[#allocation2 + $0x2c] sm:$0xf] }
 0x521   : > { %v12548_v8 = vpack.i.bf16 %v5844_v63, %v5842_v18  ;;  %v5838_v14 = vld [vmem:[#allocation2 + $0xc] sm:$0xf]  ;;  %v5740_v18 = vld [vmem:[#allocation2 + $0xfc] sm:$0xf] }
 0x522   : > { %v15273_v5 = vpop.permute.xlu0 %5323  ;;  %v15275_v34 = vpop.permute.xlu1 %5321 }
 0x524   : > { %12539 = vrot.lane.b32.xlu0 %v12538_v11, %s13028_s7  ;;  %5897 = vrot.lane.b32.xlu1 %v15120_v44, %s13028_s7 }
 0x526   : > { %v15280_v37 = vpop.permute.xlu0 %5211  ;;  %v15282_v55 = vpop.permute.xlu1 %5209 }
 0x528   : > { %5885 = vrot.lane.b32.xlu0 %v15042_v21, %s13028_s7  ;;  %5673 = vrot.lane.b32.xlu1 %v15135_v59, %s13027_s29 }
 0x52a   : > { %v15291_v44 = vpop.permute.xlu0 %5547  ;;  %v15293_v11 = vpop.permute.xlu1 %5545 }
 0x52c   : > { %5889 = vrot.lane.b32.xlu0 %v15066_v25, %s13028_s7  ;;  %12544 = vrot.lane.b32.xlu1 %v12543_v52, %s13028_s7  ;;  %v12553_v25 = vpack.i.bf16 %v5840_v23, %v5838_v14  ;;  %v5738_v52 = vld [vmem:[#allocation2 + $0xec] sm:$0xf]  ;;  %v5736_v23 = vld [vmem:[#allocation2 + $0xdc] sm:$0xf] }
 0x52d   : > { %v5734_v14 = vld [vmem:[#allocation2 + $0xcc] sm:$0xf] }
 0x52e   : > { %v15298_v21 = vpop.permute.xlu0 %5327  ;;  %v15300_v45 = vpop.permute.xlu1 %5325 }
 0x530   : > { %12549 = vrot.lane.b32.xlu0 %v12548_v8, %s13028_s7  ;;  %5877 = vrot.lane.b32.xlu1 %v14987_v39, %s13028_s7  ;;  %v12558_v39 = vpack.i.bf16 %v5740_v18, %v5738_v52  ;;  %v12878_v18 = vld [vmem:[%s18797_s1 + $0x1f0] ss:$20 sps:$4 sm:$0xff]  }
 0x531   : > { %11690 = vmatmul.mubr.msk.bf16.gmra.mxu1 %vm2220_vm13, %v12878_v18 }
 0x532   : > { %v15305_v16 = vpop.permute.xlu0 %5215  ;;  %v15307_v27 = vpop.permute.xlu1 %5213  ;;  %4862 = vmatprep.mubr.bf16.mxu1 %v18984_v6 }
 0x534   : > { %5869 = vrot.lane.b32.xlu0 %v14927_v22, %s13028_s7  ;;  %5881 = vrot.lane.b32.xlu1 %v15009_v0, %s13028_s7  ;;  %v5964_v22 = vld [vmem:[#allocation2 + $0x17c] sm:$0xf] }
 0x535   : > { %v12563_v0 = vpack.i.bf16 %v5964_v22, %v5962_v51 }
 0x536   : > { %v15313_v63 = vpop.permute.xlu0 %5551  ;;  %v15315_v8 = vpop.permute.xlu1 %5549 }
 0x538   : > { %5873 = vrot.lane.b32.xlu0 %v14957_v13, %s13028_s7  ;;  %12554 = vrot.lane.b32.xlu1 %v12553_v25, %s13028_s7  ;;  %v12568_v25 = vpack.i.bf16 %v5736_v23, %v5734_v14  ;;  %v5730_v14 = vld [vmem:[#allocation2 + $0xac] sm:$0xf]  ;;  %v5732_v23 = vld [vmem:[#allocation2 + $0xbc] sm:$0xf] }
 0x539   : > { %v12578_v18 = vpack.i.bf16 %v5732_v23, %v5730_v14  ;;  %11691 = vmatmul.mubr.msk.bf16.gmra.mxu1 %vm2220_vm13, %v12882_v30  ;;  %v5956_v14 = vld [vmem:[#allocation2 + $0x13c] sm:$0xf]  ;;  %v5726_v23 = vld [vmem:[#allocation2 + $0x8c] sm:$0xf] }
 0x53a   : > { %v15320_v47 = vpop.permute.xlu0 %5439  ;;  %v15322_v20 = vpop.permute.xlu1 %5437  ;;  %4872 = vmatprep.mubr.bf16.mxu1 %v18984_v6 }
 0x53b   : > { %19053 = vst [vmem:[#allocation88_spill] sm:$0xff] %v15322_v20 }
 0x53c   : > { %12559 = vrot.lane.b32.xlu0 %v12558_v39, %s13029_s8  ;;  %5781 = vrot.lane.b32.xlu1 %v15110_v40, %s13029_s8  ;;  %v5960_v39 = vld [vmem:[#allocation2 + $0x15c] sm:$0xf] }
 0x53e   : > { %v15327_v60 = vpop.permute.xlu0 %5331  ;;  %v15329_v13 = vpop.permute.xlu1 %5329 }
 0x53f   : > { %v5351_v4 = vrot.slane %v15329_v13, 4 }
 0x540   : > { %6005 = vrot.lane.b32.xlu0 %v15112_v48, %s13030_s9  ;;  %12564 = vrot.lane.b32.xlu1 %v12563_v0, %s13030_s9  ;;  %v5958_v48 = vld [vmem:[#allocation2 + $0x14c] sm:$0xf] }
 0x541   : > { %v12573_v0 = vpack.i.bf16 %v5960_v39, %v5958_v48  ;;  %v12886_v39 = vld [vmem:[%s18797_s1 + $0x240] ss:$20 sps:$4 sm:$0xff]  }
 0x542   : > { %v15334_v52 = vpop.permute.xlu0 %5219  ;;  %v15339_v40 = vpop.permute.xlu1 %5217  ;;  %11692 = vmatmul.mubr.msk.bf16.gmra.mxu1 %vm2220_vm13, %v12886_v39  ;;  %v5352_v39 = vrot.slane %v15327_v60, 4  ;;  %v5348_v60 = vrot.slane %v15273_v5, 4  ;;  %v5346_v5 = vrot.slane %v15246_v42, 4 }
 0x543   : > { %4882 = vmatprep.mubr.bf16.mxu1 %v18984_v6 }
 0x544   : > { %12569 = vrot.lane.b32.xlu0 %v12568_v25, %s13029_s8  ;;  %5773 = vrot.lane.b32.xlu1 %v15056_v41, %s13029_s8  ;;  %v5367_v43 = vsel %vm619_vm4, %v5351_v4, %v5352_v39  ;;  %v5950_v4 = vld [vmem:[#allocation2 + $0x10c] sm:$0xf]  ;;  %v5952_v39 = vld [vmem:[#allocation2 + $0x11c] sm:$0xf] }
 0x546   : > { %v15346_v51 = vpop.permute.xlu0 %5555  ;;  %v15348_v22 = vpop.permute.xlu1 %5553 }
 0x548   : > { %5997 = vrot.lane.b32.xlu0 %v15058_v7, %s13030_s9  ;;  %5777 = vrot.lane.b32.xlu1 %v15079_v58, %s13029_s8 }
 0x54a   : > { %v15354_v25 = vpop.permute.xlu0 %5443  ;;  %v15356_v41 = vpop.permute.xlu1 %5441 }
 0x54c   : > { %6001 = vrot.lane.b32.xlu0 %v15081_v19, %s13030_s9  ;;  %12574 = vrot.lane.b32.xlu1 %v12573_v0, %s13030_s9  ;;  %v5954_v0 = vld [vmem:[#allocation2 + $0x12c] sm:$0xf] }
 0x54e   : > { %v5336_v7 = vpop.permute.xlu0 %5335  ;;  %v5334_v58 = vpop.permute.xlu1 %5333 }
 0x54f   : > { %v5354_v62 = vrot.slane %v5336_v7, 4  ;;  %v5353_v6 = vrot.slane %v5334_v58, 4 }
 0x550   : > { %12579 = vrot.lane.b32.xlu0 %v12578_v18, %s13029_s8  ;;  %5765 = vrot.lane.b32.xlu1 %v15001_v53, %s13029_s8  ;;  %v5728_v18 = vld [vmem:[#allocation2 + $0x9c] sm:$0xf] }
 0x551   : > { %v12588_v2 = vpack.i.bf16 %v5728_v18, %v5726_v23  ;;  %v5347_v18 = vrot.slane %v15275_v34, 4 }
 0x552   : > { %v15369_v48 = vpop.permute.xlu0 %5223  ;;  %v15371_v19 = vpop.permute.xlu1 %5221 }
 0x554   : > { %5989 = vrot.lane.b32.xlu0 %v15003_v17, %s13030_s9  ;;  %5769 = vrot.lane.b32.xlu1 %v15021_v10, %s13029_s8  ;;  %v12583_v17 = vpack.i.bf16 %v5956_v14, %v5954_v0  ;;  %v5349_v0 = vrot.slane %v15300_v45, 4 }
 0x556   : > { %v15380_v30 = vpop.permute.xlu0 %5559  ;;  %v15383_v53 = vpop.permute.xlu1 %5557 }
 0x558   : > { %5993 = vrot.lane.b32.xlu0 %v15023_v24, %s13030_s9  ;;  %5785 = vrot.lane.b32.xlu1 %v15133_v54, %s13029_s8  ;;  %v12890_v24 = vld [vmem:[%s18797_s1 + $0x268] ss:$20 sps:$4 sm:$0xff]   ;;  %v5350_v54 = vrot.slane %v15298_v21, 4 }
 0x559   : > { %11693 = vmatmul.mubr.msk.bf16.gmra.mxu1 %vm2220_vm13, %v12890_v24  ;;  %v5345_v24 = vrot.slane %v15248_v50, 4 }
 0x55a   : > { %v15390_v10 = vpop.permute.xlu0 %5447  ;;  %v15392_v35 = vpop.permute.xlu1 %5445 }
 0x55c   : > { %6009 = vrot.lane.b32.xlu0 %v15135_v59, %s13030_s9  ;;  %12584 = vrot.lane.b32.xlu1 %v12583_v17, %s13030_s9  ;;  %v12896_v59 = vld [vmem:[%s18797_s1 + $0x28c] ss:$20 sps:$4 sm:$0xff]   ;;  %v5369_v17 = vsel %vm619_vm4, %v5353_v6, %v5354_v62  ;;  %v5344_v6 = vrot.slane %v15213_v33, 4 }
 0x55d   : > { %7008 = vmatprep.mubr.bf16.mxu1 %v12896_v59  ;;  %v5370_v62 = vsel %vm734_vm5, %v5334_v58, %v5369_v17  ;;  %v5949_v59 = vld [vmem:[#allocation2 + $0x104] sm:$0xff]  ;;  %v5361_v58 = vsel %vm619_vm4, %v5345_v24, %v5346_v5 }
 0x55e   : > { %v5340_v14 = vpop.permute.xlu0 %5339  ;;  %v5338_v23 = vpop.permute.xlu1 %5337 }
 0x55f   : > { %v5356_v7 = vrot.slane %v5340_v14, 4  ;;  %v5355_v21 = vrot.slane %v5338_v23, 4  ;;  %v5365_v14 = vsel %vm619_vm4, %v5349_v0, %v5350_v54  ;;  %v5343_v54 = vrot.slane %v15215_v1, 4 }
 0x560   : > { %12589 = vrot.lane.b32.xlu0 %v12588_v2, %s13029_s8  ;;  %5757 = vrot.lane.b32.xlu1 %v5725_v31, %s13029_s8  ;;  %v5368_v2 = vsel %vm734_vm5, %v15329_v13, %v5367_v43  ;;  %v5363_v0 = vsel %vm619_vm4, %v5347_v18, %v5348_v60  ;;  %v5366_v33 = vsel %vm734_vm5, %v15300_v45, %v5365_v14  ;;  %v5341_v13 = vrot.slane %v15189_v3, 4  ;;  %v5951_v45 = vld [vmem:[#allocation2 + $0x114] sm:$0xff] }
 0x561   : > { %v5371_v46 = vsel %vm619_vm4, %v5355_v21, %v5356_v7  ;;  %v5727_v21 = vld [vmem:[#allocation2 + $0x94] sm:$0xff]  ;;  %v12593_v43 = vpack.i.bf16 %v5952_v39, %v5950_v4  ;;  %v11835_v60 = vcombine.high %v5366_v33, %v5368_v2  ;;  %v5364_v18 = vsel %vm734_vm5, %v15275_v34, %v5363_v0 }
 0x562   : > { %v15418_v20 = vpop.permute.xlu0 %5431  ;;  %v5372_v31 = vsel %vm734_vm5, %v5338_v23, %v5371_v46  ;;  %v15425_v42 = vpop.permute.xlu1 %5429  ;;  %v5342_v46 = vrot.slane %v15187_v28, 4  ;;  %v5359_v14 = vsel %vm619_vm4, %v5343_v54, %v5344_v6  ;;  %v5362_v28 = vsel %vm734_vm5, %v15248_v50, %v5361_v58  ;;  %v11772_v39 = vld [vmem:[%s18798_s2 + $0x130] sm:$0xff] }
 0x563   : > { %19054 = vst [vmem:[#allocation89_spill] sm:$0xff] %v15418_v20  ;;  %v11836_v7 = vcombine.low %v5370_v62, %v5372_v31  ;;  %v11837_v20 = vcombine.high %v5370_v62, %v5372_v31  ;;  %v11834_v5 = vcombine.low %v5366_v33, %v5368_v2  ;;  %v11833_v4 = vcombine.high %v5362_v28, %v5364_v18 }
 0x564   : > { %5981 = vrot.lane.b32.xlu0 %v5949_v59, %s13030_s9  ;;  %5761 = vrot.lane.b32.xlu1 %v5727_v21, %s13029_s8  ;;  %v5357_v34 = vsel %vm619_vm4, %v5341_v13, %v5342_v46  ;;  %v5360_v6 = vsel %vm734_vm5, %v15215_v1, %v5359_v14  ;;  %v5240_v2 = vrot.slane %v15334_v52, 4  ;;  %v5239_v62 = vrot.slane %v15339_v40, 4  ;;  %v11781_v1 = vld [vmem:[%s18798_s2 + $0x178] sm:$0xff] }
 0x565   : > { %6863 = vmatprep.subr.bf16.mxu0 %v11837_v20  ;;  %v11773_v20 = vld [vmem:[%s18798_s2 + $0x138] sm:$0xff]  ;;  %v5242_v31 = vrot.slane %v15369_v48, 4  ;;  %v5241_v59 = vrot.slane %v15371_v19, 4  ;;  %v5358_v54 = vsel %vm734_vm5, %v15189_v3, %v5357_v34  ;;  %v11832_v0 = vcombine.low %v5362_v28, %v5364_v18  ;;  %v11780_v48 = vld [vmem:[%s18798_s2 + $0x170] sm:$0xff]  ;;  %v11770_v34 = vld [vmem:[%s18798_s2 + $0x120] sm:$0xff] }
 0x566   : > { %v15436_v23 = vpop.permute.xlu0 %5435  ;;  %6864 = vmatpush1.bf16.msra.mxu0 %v11836_v7  ;;  %v15440_v17 = vpop.permute.xlu1 %5433  ;;  %v5238_v7 = vrot.slane %v15305_v16, 4  ;;  %v5237_v52 = vrot.slane %v15307_v27, 4  ;;  %v11831_v33 = vcombine.high %v5358_v54, %v5360_v6  ;;  %v5235_v13 = vrot.slane %v15282_v55, 4 }
 0x567   : > { %6865 = vmatprep.subr.bf16.mxu0 %v11835_v60  ;;  %v5255_v58 = vsel %vm619_vm4, %v5239_v62, %v5240_v2  ;;  %v5257_v60 = vsel %vm619_vm4, %v5241_v59, %v5242_v31  ;;  %v11830_v18 = vcombine.low %v5358_v54, %v5360_v6  ;;  %v5233_v14 = vrot.slane %v15255_v9, 4 }
 0x568   : > { %5985 = vrot.lane.b32.xlu0 %v5951_v45, %s13030_s9  ;;  %12594 = vrot.lane.b32.xlu1 %v12593_v43, %s13030_s9  ;;  %v5236_v43 = vrot.slane %v15280_v37, 4  ;;  %v11771_v45 = vld [vmem:[%s18798_s2 + $0x128] sm:$0xff]  ;;  %v5234_v37 = vrot.slane %v15253_v57, 4  ;;  %v5253_v28 = vsel %vm619_vm4, %v5237_v52, %v5238_v7  ;;  %v5258_v57 = vsel %vm621_vm6, %v15371_v19, %v5257_v60 }
 0x569   : > { %v5231_v62 = vrot.slane %v15227_v61, 4  ;;  %v5230_v19 = vrot.slane %v15193_v12, 4 }
 0x56a   : > { %v15451_v24 = vpop.permute.xlu0 %5423  ;;  %6866 = vmatpush1.bf16.msra.mxu0 %v11834_v5  ;;  %v15458_v50 = vpop.permute.xlu1 %5421  ;;  %v5251_v31 = vsel %vm619_vm4, %v5235_v13, %v5236_v43 }
 0x56b   : > { %6867 = vmatprep.subr.bf16.mxu0 %v11833_v4  ;;  %v5232_v4 = vrot.slane %v15225_v38, 4  ;;  %v5254_v38 = vsel %vm621_vm6, %v15307_v27, %v5253_v28  ;;  %v5252_v27 = vsel %vm621_vm6, %v15282_v55, %v5251_v31 }
 0x56c   : > { %6236 = vperm.xlu0 %12436, %v11773_v20   ;;  %6231 = vperm.xlu1 %12437, %v11772_v39   ;;  %v5256_v39 = vsel %vm621_vm6, %v15339_v40, %v5255_v58  ;;  %v11779_v40 = vld [vmem:[%s18798_s2 + $0x168] sm:$0xff]  ;;  %v11768_v58 = vld [vmem:[%s18798_s2 + $0x110] sm:$0xff] }
 0x56d   : > { %v11827_v52 = vcombine.high %v5254_v38, %v5256_v39  ;;  %v5247_v12 = vsel %vm619_vm4, %v5231_v62, %v5232_v4  ;;  %v11826_v43 = vcombine.low %v5254_v38, %v5256_v39  ;;  %v5572_v39 = vrot.slane %v15291_v44, 4  ;;  %v11767_v44 = vld [vmem:[%s18798_s2 + $0x108] sm:$0xff] }
 0x56e   : > { %v5228_v21 = vpop.permute.xlu0 %5227  ;;  %6868 = vmatpush1.bf16.msra.mxu0 %v11832_v0  ;;  %v5226_v3 = vpop.permute.xlu1 %5225  ;;  %v5229_v0 = vrot.slane %v15195_v56, 4  ;;  %v5248_v60 = vsel %vm621_vm6, %v15227_v61, %v5247_v12  ;;  %v11777_v61 = vld [vmem:[%s18798_s2 + $0x158] sm:$0xff]  ;;  %v5569_v38 = vrot.slane %v15267_v15, 4 }
 0x56f   : > { %v5244_v46 = vrot.slane %v5228_v21, 4  ;;  %v5243_v16 = vrot.slane %v5226_v3, 4  ;;  %6869 = vmatprep.subr.bf16.mxu0 %v11831_v33  ;;  %v11778_v21 = vld [vmem:[%s18798_s2 + $0x160] sm:$0xff] }
 0x570   : > { %6276 = vperm.xlu0 %12436, %v11781_v1   ;;  %6271 = vperm.xlu1 %12437, %v11780_v48   ;;  %v5249_v1 = vsel %vm619_vm4, %v5233_v14, %v5234_v37  ;;  %v5577_v37 = vrot.slane %v15383_v53, 4 }
 0x571   : > { %v5259_v5 = vsel %vm619_vm4, %v5243_v16, %v5244_v46  ;;  %v5250_v48 = vsel %vm621_vm6, %v15255_v9, %v5249_v1  ;;  %v11769_v46 = vld [vmem:[%s18798_s2 + $0x118] sm:$0xff]  ;;  %v5576_v16 = vrot.slane %v15346_v51, 4  ;;  %v5573_v51 = vrot.slane %v15315_v8, 4 }
 0x572   : > { %v15485_v20 = vpop.permute.xlu0 %5427  ;;  %v5260_v6 = vsel %vm621_vm6, %v5226_v3, %v5259_v5  ;;  %6870 = vmatpush1.bf16.msra.mxu0 %v11830_v18  ;;  %v15496_v2 = vpop.permute.xlu1 %5425  ;;  %v5245_v3 = vsel %vm619_vm4, %v5229_v0, %v5230_v19  ;;  %v11825_v55 = vcombine.high %v5250_v48, %v5252_v27  ;;  %v5575_v18 = vrot.slane %v15348_v22, 4 }
 0x573   : > { %v11828_v59 = vcombine.low %v5258_v57, %v5260_v6  ;;  %v11829_v54 = vcombine.high %v5258_v57, %v5260_v6  ;;  %v5246_v14 = vsel %vm621_vm6, %v15195_v56, %v5245_v3  ;;  %v11824_v28 = vcombine.low %v5250_v48, %v5252_v27 }
 0x574   : > { %6226 = vperm.xlu0 %12436, %v11771_v45   ;;  %6221 = vperm.xlu1 %12437, %v11770_v34   ;;  %v5578_v45 = vrot.slane %v15380_v30, 4  ;;  %v5574_v5 = vrot.slane %v15313_v63, 4  ;;  %v11823_v4 = vcombine.high %v5246_v14, %v5248_v60  ;;  %v11776_v30 = vld [vmem:[%s18798_s2 + $0x150] sm:$0xff]  ;;  %v5571_v56 = vrot.slane %v15293_v11, 4 }
 0x575   : > { %6871 = vmatprep.subr.bf16.mxu0 %v11829_v54  ;;  %v5591_v62 = vsel %vm619_vm4, %v5575_v18, %v5576_v16  ;;  %v5570_v54 = vrot.slane %v15265_v36, 4  ;;  %v5567_v19 = vrot.slane %v15235_v29, 4  ;;  %v11766_v36 = vld [vmem:[%s18798_s2 + $0x100] sm:$0xff]  ;;  %v5566_v3 = vrot.slane %v15206_v32, 4 }
 0x576   : > { %v15508_v7 = vpop.permute.xlu0 %12519  ;;  %6872 = vmatpush1.bf16.msra.mxu0 %v11828_v59  ;;  %v15515_v33 = vpop.permute.xlu1 %5669  ;;  %v5593_v31 = vsel %vm619_vm4, %v5577_v37, %v5578_v45  ;;  %v11822_v59 = vcombine.low %v5246_v14, %v5248_v60  ;;  %v5589_v0 = vsel %vm619_vm4, %v5573_v51, %v5574_v5  ;;  %v5592_v27 = vsel %vm960_vm7, %v15348_v22, %v5591_v62  ;;  %v11774_v45 = vld [vmem:[%s18798_s2 + $0x140] sm:$0xff] }
 0x577   : > { %6873 = vmatprep.subr.bf16.mxu0 %v11827_v52  ;;  %v5590_v22 = vsel %vm960_vm7, %v15315_v8, %v5589_v0  ;;  %v5464_v5 = vrot.slane %v15354_v25, 4  ;;  %v5463_v51 = vrot.slane %v15356_v41, 4  ;;  %v19056_v0 = vld [vmem:[#allocation89_spill] sm:$0xff] }
 0x578   : > { %6266 = vperm.xlu0 %12436, %v11779_v40   ;;  %6261 = vperm.xlu1 %12437, %v11778_v21   ;;  %v5568_v40 = vrot.slane %v15233_v49, 4  ;;  %v5587_v21 = vsel %vm619_vm4, %v5571_v56, %v5572_v39  ;;  %v5594_v49 = vsel %vm960_vm7, %v15383_v53, %v5593_v31  ;;  %v11775_v53 = vld [vmem:[%s18798_s2 + $0x148] sm:$0xff]  ;;  %v11851_v32 = vcombine.high %v5590_v22, %v5592_v27 }
 0x579   : > { %v5588_v16 = vsel %vm960_vm7, %v15293_v11, %v5587_v21  ;;  %v5462_v56 = vrot.slane %v15320_v47, 4  ;;  %v5479_v62 = vsel %vm619_vm4, %v5463_v51, %v5464_v5  ;;  %v5460_v31 = vrot.slane %v15436_v23, 4 }
 0x57a   : > { %v15524_v13 = vpop.permute.xlu0 %5661  ;;  %6874 = vmatpush1.bf16.msra.mxu0 %v11826_v43  ;;  %v15531_v9 = vpop.permute.xlu1 %12524  ;;  %v5583_v60 = vsel %vm619_vm4, %v5567_v19, %v5568_v40  ;;  %v5480_v40 = vsel %vm847_vm8, %v15356_v41, %v5479_v62  ;;  %v5457_v23 = vrot.slane %v15425_v42, 4 }
 0x57b   : > { %6875 = vmatprep.subr.bf16.mxu0 %v11825_v55  ;;  %v5565_v55 = vrot.slane %v15208_v26, 4  ;;  %v5584_v11 = vsel %vm960_vm7, %v15235_v29, %v5583_v60 }
 0x57c   : > { %6216 = vperm.xlu0 %12436, %v11769_v46   ;;  %6211 = vperm.xlu1 %12437, %v11768_v58   ;;  %v5585_v58 = vsel %vm619_vm4, %v5569_v38, %v5570_v54 }
 0x57d   : > { %v5586_v37 = vsel %vm960_vm7, %v15267_v15, %v5585_v58  ;;  %v5581_v14 = vsel %vm619_vm4, %v5565_v55, %v5566_v3  ;;  %v12521_v3 = vunpack.i.l.bf16 %v15508_v7 }
 0x57e   : > { %v5564_v34 = vpop.permute.xlu0 %5563  ;;  %6876 = vmatpush1.bf16.msra.mxu0 %v11824_v28  ;;  %v5562_v6 = vpop.permute.xlu1 %5561  ;;  %v11850_v28 = vcombine.low %v5590_v22, %v5592_v27  ;;  %v5582_v39 = vsel %vm960_vm7, %v15208_v26, %v5581_v14  ;;  %v11848_v29 = vcombine.low %v5586_v37, %v5588_v16 }
 0x57f   : > { %v5580_v57 = vrot.slane %v5564_v34, 4  ;;  %v5579_v63 = vrot.slane %v5562_v6, 4  ;;  %6877 = vmatprep.subr.bf16.mxu0 %v11823_v4  ;;  %v5466_v34 = vrot.slane %v15390_v10, 4  ;;  %v5465_v4 = vrot.slane %v15392_v35, 4 }
 0x580   : > { %6256 = vperm.xlu0 %12436, %v11777_v61   ;;  %6251 = vperm.xlu1 %12437, %v11776_v30   ;;  %v11849_v61 = vcombine.high %v5586_v37, %v5588_v16  ;;  %v12522_v37 = vunpack.i.h.bf16 %v15508_v7 }
 0x581   : > { %v5595_v1 = vsel %vm619_vm4, %v5579_v63, %v5580_v57  ;;  %v19055_v57 = vld [vmem:[#allocation88_spill] sm:$0xff]  ;;  %v5481_v10 = vsel %vm619_vm4, %v5465_v4, %v5466_v34  ;;  %v5459_v63 = vrot.slane %v15440_v17, 4  ;;  %v5689_v4 = vrot.slane %v15515_v33, 4 }
 0x582   : > { %v15560_v52 = vpop.permute.xlu0 %5665  ;;  %v5596_v12 = vsel %vm960_vm7, %v5562_v6, %v5595_v1  ;;  %6878 = vmatpush1.bf16.msra.mxu0 %v11822_v59  ;;  %v15571_v48 = vpop.permute.xlu1 %5653  ;;  %v5461_v25 = vrot.slane %v19055_v57, 4  ;;  %v11847_v6 = vcombine.high %v5582_v39, %v5584_v11  ;;  %v5482_v19 = vsel %vm847_vm8, %v15392_v35, %v5481_v10 }
 0x583   : > { %v11852_v43 = vcombine.low %v5594_v49, %v5596_v12  ;;  %v11853_v46 = vcombine.high %v5594_v49, %v5596_v12  ;;  %v5458_v1 = vrot.slane %v19056_v0, 4  ;;  %v5454_v49 = vrot.slane %v15451_v24, 4 }
 0x584   : > { %6206 = vperm.xlu0 %12436, %v11767_v44   ;;  %6201 = vperm.xlu1 %12437, %v11766_v36   ;;  %v11846_v44 = vcombine.low %v5582_v39, %v5584_v11  ;;  %v5477_v47 = vsel %vm619_vm4, %v5461_v25, %v5462_v56  ;;  %v5475_v36 = vsel %vm619_vm4, %v5459_v63, %v5460_v31  ;;  %v5456_v12 = vrot.slane %v15485_v20, 4 }
 0x585   : > { %6879 = vmatprep.subr.bf16.mxu0 %v11853_v46  ;;  %v5453_v46 = vrot.slane %v15458_v50, 4  ;;  %v5478_v22 = vsel %vm847_vm8, %v19055_v57, %v5477_v47  ;;  %v12526_v24 = vunpack.i.l.bf16 %v15531_v9  ;;  %v5473_v20 = vsel %vm619_vm4, %v5457_v23, %v5458_v1 }
 0x586   : > { %v15584_v18 = vpop.permute.xlu0 %12529  ;;  %6880 = vmatpush2.bf16.msra.mxu0 %v11852_v43  ;;  %v15589_v8 = vpop.permute.xlu1 %5657  ;;  %v5455_v43 = vrot.slane %v15496_v2, 4  ;;  %v11843_v16 = vcombine.high %v5478_v22, %v5480_v40  ;;  %v11842_v51 = vcombine.low %v5478_v22, %v5480_v40  ;;  %v5692_v25 = vrot.slane %v12522_v37, 4 }
 0x587   : > { %6881 = vmatprep.subr.bf16.mxu0 %v11851_v32  ;;  %v5476_v32 = vsel %vm847_vm8, %v15440_v17, %v5475_v36  ;;  %v12531_v14 = vunpack.i.l.bf16 %v15584_v18  ;;  %v12532_v5 = vunpack.i.h.bf16 %v15584_v18  ;;  %v5474_v17 = vsel %vm847_vm8, %v15425_v42, %v5473_v20 }
 0x588   : > { %6246 = vperm.xlu0 %12436, %v11775_v53   ;;  %6241 = vperm.xlu1 %12437, %v11774_v45   ;;  %v12527_v53 = vunpack.i.h.bf16 %v15531_v9  ;;  %v5471_v45 = vsel %vm619_vm4, %v5455_v43, %v5456_v12  ;;  %v5687_v9 = vrot.slane %v15560_v52, 4  ;;  %v5686_v34 = vrot.slane %v12526_v24, 4 }
 0x589   : > { %v5472_v7 = vsel %vm847_vm8, %v15496_v2, %v5471_v45  ;;  %v11841_v56 = vcombine.high %v5474_v17, %v5476_v32  ;;  %v5685_v18 = vrot.slane %v15524_v13, 4  ;;  %v5684_v2 = vrot.slane %v12532_v5, 4  ;;  %v12871_v5 = vld [vmem:[%s18797_s1 + $0x2a8] ss:$20 sps:$4 sm:$0xff]  }
 0x58a   : > { %v15600_v30 = vpop.permute.xlu0 %5645  ;;  %6882 = vmatpush2.bf16.msra.mxu0 %v11850_v28  ;;  %v15602_v15 = vpop.permute.xlu1 %12534  ;;  %v5469_v28 = vsel %vm619_vm4, %v5453_v46, %v5454_v49  ;;  %v5688_v39 = vrot.slane %v12527_v53, 4  ;;  %v11840_v63 = vcombine.low %v5474_v17, %v5476_v32 }
 0x58b   : > { %6883 = vmatprep.subr.bf16.mxu0 %v11849_v61  ;;  %v5690_v61 = vrot.slane %v12521_v3, 4  ;;  %v5470_v57 = vsel %vm847_vm8, %v15458_v50, %v5469_v28  ;;  %v5683_v50 = vrot.slane %v15589_v8, 4  ;;  %v5677_v20 = vrot.slane %v15600_v30, 4 }
 0x58c   : > { %v5703_v10 = vsel %vm619_vm4, %v5687_v9, %v5688_v39  ;;  %v11838_v43 = vcombine.low %v5470_v57, %v5472_v7  ;;  %v19057_v39 = vld [vmem:[#allocation87_spill] sm:$0xff] }
 0x58d   : > { %v5705_v42 = vsel %vm619_vm4, %v5689_v4, %v5690_v61  ;;  %v5704_v0 = vsel %vm1073_vm9, %v15560_v52, %v5703_v10 }
 0x58e   : > { %v5452_v59 = vpop.permute.xlu0 %5451  ;;  %6884 = vmatpush2.bf16.msra.mxu0 %v11848_v29  ;;  %v5450_v38 = vpop.permute.xlu1 %5449 }
 0x58f   : > { %v5468_v54 = vrot.slane %v5452_v59, 4  ;;  %v5467_v26 = vrot.slane %v5450_v38, 4  ;;  %6885 = vmatprep.subr.bf16.mxu0 %v11847_v6  ;;  %v5682_v6 = vrot.slane %v12531_v14, 4  ;;  %v5701_v59 = vsel %vm619_vm4, %v5685_v18, %v5686_v34  ;;  %v12874_v18 = vld [vmem:[%s18797_s1 + $0x2d0] ss:$20 sps:$4 sm:$0xff]  }
 0x591   : > { %v5483_v21 = vsel %vm619_vm4, %v5467_v26, %v5468_v54  ;;  %v5681_v54 = vrot.slane %v15571_v48, 4  ;;  %v12537_v26 = vunpack.i.h.bf16 %v15602_v15 }
 0x592   : > { %v15621_v27 = vpop.permute.xlu0 %5649  ;;  %v5484_v41 = vsel %vm847_vm8, %v5450_v38, %v5483_v21  ;;  %6886 = vmatpush2.bf16.msra.mxu0 %v11846_v44  ;;  %v15627_v35 = vpop.permute.xlu1 %5893  ;;  %v11839_v38 = vcombine.high %v5470_v57, %v5472_v7  ;;  %v12536_v44 = vunpack.i.l.bf16 %v15602_v15  ;;  %v5699_v21 = vsel %vm619_vm4, %v5683_v50, %v5684_v2  ;;  %v19060_v2 = vld [vmem:[#allocation86_spill] sm:$0xff] }
 0x593   : > { %v11844_v55 = vcombine.low %v5482_v19, %v5484_v41  ;;  %v11845_v58 = vcombine.high %v5482_v19, %v5484_v41  ;;  %v5706_v19 = vsel %vm1073_vm9, %v15515_v33, %v5705_v42  ;;  %v5697_v1 = vsel %vm619_vm4, %v5681_v54, %v5682_v6  ;;  %v19063_v54 = vld [vmem:[#allocation83_spill] sm:$0xff] }
 0x594   : > { %v5679_v15 = vrot.slane %v15621_v27, 4  ;;  %v5702_v33 = vsel %vm1073_vm9, %v15524_v13, %v5701_v59  ;;  %v5680_v41 = vrot.slane %v12537_v26, 4  ;;  %v5678_v52 = vrot.slane %v12536_v44, 4  ;;  %v12869_v13 = vld [vmem:[%s18797_s1 + $0x2ac] ss:$20 sps:$4 sm:$0xff]  }
 0x595   : > { %6887 = vmatprep.subr.bf16.mxu0 %v11845_v58  ;;  %v11867_v3 = vcombine.high %v5702_v33, %v5704_v0  ;;  %v5698_v58 = vsel %vm1073_vm9, %v15571_v48, %v5697_v1  ;;  %v5700_v22 = vsel %vm1073_vm9, %v15589_v8, %v5699_v21  ;;  %v5913_v26 = vrot.slane %v15627_v35, 4  ;;  %v19067_v21 = vld [vmem:[#allocation80_spill] sm:$0xff] }
 0x596   : > { %v15636_v60 = vpop.permute.xlu0 %12539  ;;  %6888 = vmatpush2.bf16.msra.mxu0 %v11844_v55  ;;  %v15643_v11 = vpop.permute.xlu1 %5897  ;;  %v12866_v55 = vld [vmem:[%s18797_s1 + $0x280] ss:$20 sps:$4 sm:$0xff]   ;;  %v5695_v53 = vsel %vm619_vm4, %v5679_v15, %v5680_v41  ;;  %v5693_v32 = vsel %vm619_vm4, %v5677_v20, %v5678_v52  ;;  %v11865_v8 = vcombine.high %v5698_v58, %v5700_v22  ;;  %v11864_v14 = vcombine.low %v5698_v58, %v5700_v22  ;;  %v19069_v41 = vld [vmem:[#allocation79_spill] sm:$0xff]  ;;  %v19070_v52 = vld [vmem:[#allocation77_spill] sm:$0xff] }
 0x597   : > { %6889 = vmatprep.subr.bf16.mxu0 %v11843_v16  ;;  %v11866_v16 = vcombine.low %v5702_v33, %v5704_v0  ;;  %v5696_v45 = vsel %vm1073_vm9, %v15621_v27, %v5695_v53  ;;  %v5694_v28 = vsel %vm1073_vm9, %v15600_v30, %v5693_v32  ;;  %v12872_v27 = vld [vmem:[%s18797_s1 + $0x2d4] ss:$20 sps:$4 sm:$0xff]   ;;  %v12541_v30 = vunpack.i.l.bf16 %v15636_v60  ;;  %v12877_v20 = vld [vmem:[%s18797_s1 + $0x2f8] ss:$20 sps:$4 sm:$0xff]  }
 0x598   : > { %v11863_v9 = vcombine.high %v5694_v28, %v5696_v45  ;;  %v11862_v17 = vcombine.low %v5694_v28, %v5696_v45  ;;  %v12542_v4 = vunpack.i.h.bf16 %v15636_v60  ;;  %v5915_v44 = vrot.slane %v15643_v11, 4  ;;  %v19073_v45 = vld [vmem:[#allocation76_spill] sm:$0xff] }
 0x599   : > { %v5914_v6 = vrot.slane %v12541_v30, 4 }
 0x59a   : > { %v15653_v29 = vpop.permute.xlu0 %5885  ;;  %6890 = vmatpush2.bf16.msra.mxu0 %v11842_v51  ;;  %v5674_v62 = vpop.permute.xlu1 %5673  ;;  %v5916_v59 = vrot.slane %v12542_v4, 4 }
 0x59b   : > { %v5691_v31 = vrot.slane %v5674_v62, 4  ;;  %6891 = vmatprep.subr.bf16.mxu0 %v11841_v56  ;;  %v19058_v56 = vld [vmem:[#allocation85_spill] sm:$0xff] }
 0x59c   : > { %v19059_v57 = vpack.c.bf16 %v19057_v39, %v19058_v56 }
 0x59d   : > { %v5707_v47 = vsel %vm619_vm4, %v5691_v31, %v5692_v25  ;;  %v19061_v31 = vld [vmem:[#allocation84_spill] sm:$0xff] }
 0x59e   : > { %v15666_v40 = vpop.permute.xlu0 %5889  ;;  %v5708_v23 = vsel %vm1073_vm9, %v5674_v62, %v5707_v47  ;;  %6892 = vmatpush2.bf16.msra.mxu0 %v11840_v63  ;;  %v15674_v36 = vpop.permute.xlu1 %12544  ;;  %v19062_v60 = vpack.c.bf16 %v19060_v2, %v19061_v31  ;;  %v12875_v63 = vld [vmem:[%s18797_s1 + $0x2fc] ss:$20 sps:$4 sm:$0xff]   ;;  %v19079_v31 = vld [vmem:[#allocation72_spill] sm:$0xff] }
 0x59f   : > { %v11868_v49 = vcombine.low %v5706_v19, %v5708_v23  ;;  %6893 = vmatprep.subr.bf16.mxu0 %v11839_v38  ;;  %v11869_v12 = vcombine.high %v5706_v19, %v5708_v23  ;;  %v12547_v62 = vunpack.i.h.bf16 %v15674_v36  ;;  %v12546_v42 = vunpack.i.l.bf16 %v15674_v36  ;;  %v19064_v38 = vld [vmem:[#allocation81_spill] sm:$0xff]  ;;  %v19066_v36 = vld [vmem:[#allocation82_spill] sm:$0xff] }
 0x5a0   : > { %v19065_v50 = vpack.c.bf16 %v19063_v54, %v19064_v38  ;;  %v5929_v19 = vsel %vm619_vm4, %v5913_v26, %v5914_v6  ;;  %v19068_v15 = vpack.c.bf16 %v19066_v36, %v19067_v21  ;;  %v5911_v58 = vrot.slane %v15666_v40, 4  ;;  %v19078_v2 = vld [vmem:[#allocation74_spill] sm:$0xff] }
 0x5a1   : > { %6976 = vmatprep.subr.bf16.mxu1 %v11869_v12  ;;  %v5912_v0 = vrot.slane %v12547_v62, 4  ;;  %v5910_v1 = vrot.slane %v12546_v42, 4  ;;  %v5930_v53 = vsel %vm1299_vm10, %v15627_v35, %v5929_v19 }
 0x5a2   : > { %v15680_v46 = vpop.permute.xlu0 %12549  ;;  %6894 = vmatpush2.bf16.msra.mxu0 %v11838_v43  ;;  %6977 = vmatpush1.bf16.msra.mxu1 %v11868_v49  ;;  %v15689_v24 = vpop.permute.xlu1 %5877  ;;  %v5931_v49 = vsel %vm619_vm4, %v5915_v44, %v5916_v59 }
 0x5a3   : > { %6978 = vmatprep.subr.bf16.mxu1 %v11867_v3  ;;  %v12552_v12 = vunpack.i.h.bf16 %v15680_v46  ;;  %v19071_v3 = vpack.c.bf16 %v19069_v41, %v19070_v52  ;;  %v12551_v22 = vunpack.i.l.bf16 %v15680_v46  ;;  %v5927_v28 = vsel %vm619_vm4, %v5911_v58, %v5912_v0 }
 0x5a4   : > { %v5905_v6 = vrot.slane %v15689_v24, 4  ;;  %v5928_v59 = vsel %vm1299_vm10, %v15666_v40, %v5927_v28  ;;  %v12879_v40 = vld [vmem:[%s18797_s1 + $0x320] ss:$20 sps:$4 sm:$0xff]  }
 0x5a5   : > { %6896 = vmatmul.mubr.bf16.vlgmr.msra.gmra.mxu0 %v12866_v55  ;;  %v5909_v55 = vrot.slane %v15653_v29, 4  ;;  %v5906_v4 = vrot.slane %v12551_v22, 4 }
 0x5a6   : > { %v15697_v48 = vpop.permute.xlu0 %5869  ;;  %v15701_v37 = vpop.permute.xlu1 %5881  ;;  %6979 = vmatpush1.bf16.msra.mxu1 %v11866_v16  ;;  %6905 = vmatprep.mubr.bf16.mxu0 %v12869_v13  ;;  %v5932_v16 = vsel %vm1299_vm10, %v15643_v11, %v5931_v49  ;;  %v19075_v11 = vld [vmem:[#allocation75_spill] sm:$0xff] }
 0x5a7   : > { %6980 = vmatprep.subr.bf16.mxu1 %v11865_v8  ;;  %v19072_v8 = vld [vmem:[#allocation78_spill] sm:$0xff]  ;;  %v5925_v46 = vsel %vm619_vm4, %v5909_v55, %v5910_v1  ;;  %v5907_v35 = vrot.slane %v15701_v37, 4  ;;  %v5901_v39 = vrot.slane %v15697_v48, 4  ;;  %v11884_v44 = vcombine.low %v5930_v53, %v5932_v16 }
 0x5aa   : > { %v15705_v61 = vpop.permute.xlu0 %5873  ;;  %v12555_v51 = vpop.permute.xlu1 %12554  ;;  %6981 = vmatpush1.bf16.msra.mxu1 %v11864_v14  ;;  %v19074_v14 = vpack.c.bf16 %v19072_v8, %v19073_v45 }
 0x5ab   : > { %6982 = vmatprep.subr.bf16.mxu1 %v11863_v9  ;;  %v12557_v43 = vunpack.i.h.bf16 %v12555_v51  ;;  %v12556_v33 = vunpack.i.l.bf16 %v12555_v51  ;;  %v12881_v9 = vld [vmem:[%s18797_s1 + $0x324] ss:$20 sps:$4 sm:$0xff]   ;;  %v5903_v56 = vrot.slane %v15705_v61, 4 }
 0x5ad   : > { %6906 = vmatmul.mubr.bf16.gmra.mxu0 %v12871_v5  ;;  %v5908_v5 = vrot.slane %v12552_v12, 4  ;;  %v5904_v51 = vrot.slane %v12557_v43, 4  ;;  %v12885_v43 = vld [vmem:[%s18797_s1 + $0x34c] ss:$20 sps:$4 sm:$0xff]  }
 0x5ae   : > { %v15713_v34 = vpop.permute.xlu0 %12559  ;;  %v15716_v7 = vpop.permute.xlu1 %5781  ;;  %6983 = vmatpush1.bf16.msra.mxu1 %v11862_v17  ;;  %6915 = vmatprep.mubr.bf16.mxu0 %v12872_v27  ;;  %v5902_v27 = vrot.slane %v12556_v33, 4  ;;  %v19076_v17 = vld [vmem:[#allocation73_spill] sm:$0xff] }
 0x5af   : > { %6984 = vmatprep.subr.bf16.mxu1 %v19059_v57  ;;  %v19077_v30 = vpack.c.bf16 %v19075_v11, %v19076_v17  ;;  %v12561_v62 = vunpack.i.l.bf16 %v15713_v34  ;;  %v5923_v54 = vsel %vm619_vm4, %v5907_v35, %v5908_v5  ;;  %v5919_v26 = vsel %vm619_vm4, %v5903_v56, %v5904_v51 }
 0x5b0   : > { %v5924_v21 = vsel %vm1299_vm10, %v15701_v37, %v5923_v54  ;;  %v12562_v8 = vunpack.i.h.bf16 %v15713_v34 }
 0x5b2   : > { %v15722_v25 = vpop.permute.xlu0 %6005  ;;  %v15729_v10 = vpop.permute.xlu1 %12564  ;;  %6985 = vmatpush1.bf16.msra.mxu1 %v19062_v60  ;;  %v19080_v60 = vpack.c.bf16 %v19078_v2, %v19079_v31  ;;  %v12889_v2 = vld [vmem:[%s18797_s1 + $0x374] ss:$20 sps:$4 sm:$0xff]  }
 0x5b3   : > { %6986 = vmatprep.subr.bf16.mxu1 %v19065_v50  ;;  %v5917_v50 = vsel %vm619_vm4, %v5901_v39, %v5902_v27  ;;  %v12566_v19 = vunpack.i.l.bf16 %v15729_v10  ;;  %v6025_v45 = vrot.slane %v15722_v25, 4  ;;  %v12567_v51 = vunpack.i.h.bf16 %v15729_v10 }
 0x5b4   : > { %v15810_v12 = vsel %vm1299_vm10, %v15697_v48, %v5917_v50 }
 0x5b5   : > { %6916 = vmatmul.mubr.bf16.gmra.mxu0 %v12874_v18  ;;  %v11885_v18 = vcombine.high %v5930_v53, %v5932_v16  ;;  %v6026_v55 = vrot.slane %v12566_v19, 4 }
 0x5b6   : > { %v15742_v47 = vpop.permute.xlu0 %12569  ;;  %v15745_v23 = vpop.permute.xlu1 %5773  ;;  %6987 = vmatpush1.bf16.msra.mxu1 %v19068_v15  ;;  %6925 = vmatprep.mubr.bf16.mxu0 %v12875_v63  ;;  %v5926_v63 = vsel %vm1299_vm10, %v15653_v29, %v5925_v46  ;;  %v5921_v29 = vsel %vm619_vm4, %v5905_v6, %v5906_v4  ;;  %v5802_v15 = vrot.slane %v12561_v62, 4  ;;  %v5804_v6 = vrot.slane %v12562_v8, 4 }
 0x5b7   : > { %6988 = vmatprep.subr.bf16.mxu1 %v19071_v3  ;;  %v12572_v38 = vunpack.i.h.bf16 %v15742_v47  ;;  %v12571_v0 = vunpack.i.l.bf16 %v15742_v47  ;;  %v11883_v36 = vcombine.high %v5926_v63, %v5928_v59  ;;  %v15814_v47 = vsel %vm1299_vm10, %v15705_v61, %v5919_v26 }
 0x5b8   : > { %v5922_v3 = vsel %vm1299_vm10, %v15689_v24, %v5921_v29  ;;  %v11882_v58 = vcombine.low %v5926_v63, %v5928_v59  ;;  %v5801_v61 = vrot.slane %v15716_v7, 4  ;;  %v11879_v24 = vcombine.high %v15810_v12, %v15814_v47 }
 0x5b9   : > { %v5800_v33 = vrot.slane %v12572_v38, 4  ;;  %v5798_v48 = vrot.slane %v12571_v0, 4  ;;  %v11880_v22 = vcombine.low %v5922_v3, %v5924_v21  ;;  %v11881_v16 = vcombine.high %v5922_v3, %v5924_v21 }
 0x5ba   : > { %v15758_v13 = vpop.permute.xlu0 %5997  ;;  %v15767_v32 = vpop.permute.xlu1 %5777  ;;  %6989 = vmatpush1.bf16.msra.mxu1 %v19074_v14  ;;  %v5797_v14 = vrot.slane %v15745_v23, 4  ;;  %v5817_v28 = vsel %vm619_vm4, %v5801_v61, %v5802_v15  ;;  %v6041_v11 = vsel %vm619_vm4, %v6025_v45, %v6026_v55  ;;  %v12887_v55 = vld [vmem:[%s18797_s1 + $0x370] ss:$20 sps:$4 sm:$0xff]  }
 0x5bb   : > { %6990 = vmatprep.subr.bf16.mxu1 %v19077_v30  ;;  %v5799_v41 = vrot.slane %v15767_v32, 4  ;;  %v6021_v17 = vrot.slane %v15758_v13, 4  ;;  %v5818_v31 = vsel %vm1186_vm11, %v15716_v7, %v5817_v28  ;;  %v6042_v50 = vsel %vm1412_vm12, %v15722_v25, %v6041_v11 }
 0x5bc   : > { %v5813_v34 = vsel %vm619_vm4, %v5797_v14, %v5798_v48 }
 0x5bd   : > { %6926 = vmatmul.mubr.bf16.gmra.mxu0 %v12877_v20  ;;  %v5814_v54 = vsel %vm1186_vm11, %v15745_v23, %v5813_v34 }
 0x5be   : > { %v15783_v57 = vpop.permute.xlu0 %6001  ;;  %v12575_v42 = vpop.permute.xlu1 %12574  ;;  %6991 = vmatpush1.bf16.msra.mxu1 %v19080_v60  ;;  %6935 = vmatprep.mubr.bf16.mxu0 %v12881_v9  ;;  %v5815_v9 = vsel %vm619_vm4, %v5799_v41, %v5800_v33 }
 0x5bf   : > { %6992 = vmatprep.subr.bf16.mxu1 %v11885_v18  ;;  %v12577_v37 = vunpack.i.h.bf16 %v12575_v42  ;;  %v12576_v52 = vunpack.i.l.bf16 %v12575_v42  ;;  %v6023_v30 = vrot.slane %v15783_v57, 4  ;;  %v12883_v18 = vld [vmem:[%s18797_s1 + $0x348] ss:$20 sps:$4 sm:$0xff]   ;;  %v15844_v10 = vsel %vm1186_vm11, %v15767_v32, %v5815_v9 }
 0x5c0   : > { %v11878_v42 = vcombine.low %v15810_v12, %v15814_v47  ;;  %v6028_v32 = vrot.slane %v12567_v51, 4  ;;  %v11875_v0 = vcombine.high %v5814_v54, %v15844_v10  ;;  %v11874_v45 = vcombine.low %v5814_v54, %v15844_v10 }
 0x5c1   : > { %v6024_v5 = vrot.slane %v12577_v37, 4  ;;  %v6022_v35 = vrot.slane %v12576_v52, 4 }
 0x5c2   : > { %v12580_v1 = vpop.permute.xlu0 %12579  ;;  %v15806_v49 = vpop.permute.xlu1 %5765  ;;  %6993 = vmatpush2.bf16.msra.mxu1 %v11884_v44 }
 0x5c3   : > { %6994 = vmatprep.subr.bf16.mxu1 %v11883_v36  ;;  %v12582_v20 = vunpack.i.h.bf16 %v12580_v1  ;;  %v12581_v27 = vunpack.i.l.bf16 %v12580_v1  ;;  %v6037_v63 = vsel %vm619_vm4, %v6021_v17, %v6022_v35  ;;  %v6039_v59 = vsel %vm619_vm4, %v6023_v30, %v6024_v5 }
 0x5c4   : > { %v5793_v26 = vrot.slane %v15806_v49, 4  ;;  %v6038_v23 = vsel %vm1412_vm12, %v15758_v13, %v6037_v63  ;;  %v6040_v25 = vsel %vm1412_vm12, %v15783_v57, %v6039_v59 }
 0x5c5   : > { %6936 = vmatmul.mubr.bf16.gmra.mxu0 %v12879_v40  ;;  %v5796_v4 = vrot.slane %v12582_v20, 4  ;;  %v5794_v38 = vrot.slane %v12581_v27, 4  ;;  %v11891_v51 = vcombine.high %v6038_v23, %v6040_v25 }
 0x5c6   : > { %v15823_v53 = vpop.permute.xlu0 %5989  ;;  %v5770_v46 = vpop.permute.xlu1 %5769  ;;  %6995 = vmatpush2.bf16.msra.mxu1 %v11882_v58  ;;  %6945 = vmatprep.mubr.bf16.mxu0 %v12885_v43 }
 0x5c7   : > { %6996 = vmatprep.subr.bf16.mxu1 %v11881_v16  ;;  %v5795_v39 = vrot.slane %v5770_v46, 4  ;;  %v5809_v47 = vsel %vm619_vm4, %v5793_v26, %v5794_v38  ;;  %v6017_v43 = vrot.slane %v15823_v53, 4  ;;  %v12898_v26 = vld [vmem:[%s18797_s1 + $0x2b4] ss:$20 sps:$4 sm:$0xff]  }
 0x5c8   : > { %v5810_v14 = vsel %vm1186_vm11, %v15806_v49, %v5809_v47  ;;  %v12905_v47 = vld [vmem:[%s18797_s1 + $0x2e0] ss:$20 sps:$4 sm:$0xff]  }
 0x5c9   : > { %v5811_v44 = vsel %vm619_vm4, %v5795_v39, %v5796_v4  ;;  %v11890_v4 = vcombine.low %v6038_v23, %v6040_v25  ;;  %v12897_v23 = vld [vmem:[%s18797_s1 + $0x290] ss:$20 sps:$4 sm:$0xff]  }
 0x5ca   : > { %v15837_v56 = vpop.permute.xlu0 %5993  ;;  %v5786_v62 = vpop.permute.xlu1 %5785  ;;  %6997 = vmatpush2.bf16.msra.mxu1 %v11880_v22  ;;  %v5812_v33 = vsel %vm1186_vm11, %v5770_v46, %v5811_v44  ;;  %v12900_v25 = vld [vmem:[%s18797_s1 + $0x2b0] ss:$20 sps:$4 sm:$0xff]  }
 0x5cb   : > { %v5803_v60 = vrot.slane %v5786_v62, 4  ;;  %6998 = vmatprep.subr.bf16.mxu1 %v11879_v24  ;;  %v6019_v37 = vrot.slane %v15837_v56, 4  ;;  %v12893_v24 = vld [vmem:[%s18797_s1 + $0x39c] ss:$20 sps:$4 sm:$0xff]   ;;  %v11873_v35 = vcombine.high %v5810_v14, %v5812_v33  ;;  %v11872_v30 = vcombine.low %v5810_v14, %v5812_v33  ;;  %v12912_v33 = vld [vmem:[%s18797_s1 + $0x32c] ss:$20 sps:$4 sm:$0xff]  }
 0x5cd   : > { %v5819_v7 = vsel %vm619_vm4, %v5803_v60, %v5804_v6  ;;  %6946 = vmatmul.mubr.bf16.gmra.mxu0 %v12883_v18  ;;  %v12891_v6 = vld [vmem:[%s18797_s1 + $0x398] ss:$20 sps:$4 sm:$0xff]  }
 0x5ce   : > { %v6010_v19 = vpop.permute.xlu0 %6009  ;;  %v5820_v29 = vsel %vm1186_vm11, %v5786_v62, %v5819_v7  ;;  %v12585_v36 = vpop.permute.xlu1 %12584  ;;  %6999 = vmatpush2.bf16.msra.mxu1 %v11878_v42  ;;  %6955 = vmatprep.mubr.bf16.mxu0 %v12889_v2 }
 0x5cf   : > { %v6027_v1 = vrot.slane %v6010_v19, 4  ;;  %v11876_v40 = vcombine.low %v5818_v31, %v5820_v29  ;;  %v12587_v21 = vunpack.i.h.bf16 %v12585_v36  ;;  %v12586_v15 = vunpack.i.l.bf16 %v12585_v36 }
 0x5d0   : > { %v11877_v12 = vcombine.high %v5818_v31, %v5820_v29 }
 0x5d1   : > { %v6043_v41 = vsel %vm619_vm4, %v6027_v1, %v6028_v32  ;;  %v6020_v13 = vrot.slane %v12587_v21, 4  ;;  %v6018_v3 = vrot.slane %v12586_v15, 4  ;;  %v12901_v21 = vld [vmem:[%s18797_s1 + $0x2b8] ss:$20 sps:$4 sm:$0xff]  }
 0x5d2   : > { %v6044_v52 = vsel %vm1412_vm12, %v6010_v19, %v6043_v41  ;;  %7000 = vmatprep.subr.bf16.mxu1 %v11877_v12  ;;  %v12590_v57 = vpop.permute.xlu0 %12589  ;;  %v5758_v61 = vpop.permute.xlu1 %5757  ;;  %v19081_v19 = vmov 0   ;;  %v12904_v15 = vld [vmem:[%s18797_s1 + $0x2d8] ss:$20 sps:$4 sm:$0xff]   ;;  %v12909_v41 = vld [vmem:[%s18797_s1 + $0x308] ss:$20 sps:$4 sm:$0xff]  }
 0x5d3   : > { %v11892_v48 = vcombine.low %v6042_v50, %v6044_v52  ;;  %v12592_v58 = vunpack.i.h.bf16 %v12590_v57  ;;  %v12591_v22 = vunpack.i.l.bf16 %v12590_v57  ;;  %7001 = vmatpush2.bf16.msra.mxu1 %v11876_v40  ;;  %v11893_v20 = vcombine.high %v6042_v50, %v6044_v52  ;;  %v12894_v50 = vld [vmem:[%s18797_s1 + $0x288] ss:$20 sps:$4 sm:$0xff]   ;;  %v12906_v12 = vld [vmem:[%s18797_s1 + $0x304] ss:$20 sps:$4 sm:$0xff]  }
 0x5d4   : > { %7002 = vmatprep.subr.bf16.mxu1 %v11875_v0  ;;  %v6033_v16 = vsel %vm619_vm4, %v6017_v43, %v6018_v3  ;;  %v6035_v8 = vsel %vm619_vm4, %v6019_v37, %v6020_v13  ;;  %v5789_v9 = vrot.slane %v5758_v61, 4  ;;  %v12902_v40 = vld [vmem:[%s18797_s1 + $0x2dc] ss:$20 sps:$4 sm:$0xff]   ;;  %v12908_v43 = vld [vmem:[%s18797_s1 + $0x300] ss:$20 sps:$4 sm:$0xff]  }
 0x5d5   : > { %v5790_v46 = vrot.slane %v12591_v22, 4  ;;  %7097 = vmatprep.subr.bf16.mxu0 %v11893_v20  ;;  %v5792_v28 = vrot.slane %v12592_v58, 4  ;;  %6956 = vmatmul.mubr.bf16.gmra.mxu0 %v12887_v55  ;;  %v6034_v27 = vsel %vm1412_vm12, %v15823_v53, %v6033_v16  ;;  %v6036_v49 = vsel %vm1412_vm12, %v15837_v56, %v6035_v8  ;;  %v12910_v37 = vld [vmem:[%s18797_s1 + $0x328] ss:$20 sps:$4 sm:$0xff]   ;;  %v12913_v13 = vld [vmem:[%s18797_s1 + $0x330] ss:$20 sps:$4 sm:$0xff]   ;;  %v15985_v16 = vpop.f32.mrf.mxu0 }
 0x5d6   : > { %v5982_v5 = vpop.permute.xlu0 %5981  ;;  %v5762_v34 = vpop.permute.xlu1 %5761  ;;  %7098 = vmatpush1.bf16.msra.mxu0 %v11892_v48  ;;  %6965 = vmatprep.mubr.bf16.mxu0 %v12893_v24  ;;  %v11889_v18 = vcombine.high %v6034_v27, %v6036_v49  ;;  %v11888_v63 = vcombine.low %v6034_v27, %v6036_v49  ;;  %v12916_v52 = vld [vmem:[%s18797_s1 + $0x354] ss:$20 sps:$4 sm:$0xff]   ;;  %v12914_v3 = vld [vmem:[%s18797_s1 + $0x350] ss:$20 sps:$4 sm:$0xff]   ;;  %v12917_v55 = vld [vmem:[%s18797_s1 + $0x358] ss:$20 sps:$4 sm:$0xff]  }
 0x5d7   : > { %7003 = vmatpush2.bf16.msra.mxu1 %v11874_v45  ;;  %v5805_v11 = vsel %vm619_vm4, %v5789_v9, %v5790_v46  ;;  %v5791_v17 = vrot.slane %v5762_v34, 4  ;;  %7099 = vmatprep.subr.bf16.mxu0 %v11891_v51  ;;  %v6013_v59 = vrot.slane %v5982_v5, 4  ;;  %v12920_v57 = vld [vmem:[%s18797_s1 + $0x37c] ss:$20 sps:$4 sm:$0xff]   ;;  %v12918_v48 = vld [vmem:[%s18797_s1 + $0x378] ss:$20 sps:$4 sm:$0xff]   ;;  %v15987_v8 = vpop.f32.mrf.mxu0 }
 0x5d8   : > { %7004 = vmatprep.subr.bf16.mxu1 %v11873_v35  ;;  %v5806_v53 = vsel %vm1186_vm11, %v5758_v61, %v5805_v11  ;;  %v12924_v58 = vld [vmem:[%s18797_s1 + $0x3a4] ss:$20 sps:$4 sm:$0xff]   ;;  %v12921_v22 = vld [vmem:[%s18797_s1 + $0x380] ss:$20 sps:$4 sm:$0xff]   ;;  %v12925_v20 = vld [vmem:[%s18797_s1 + $0x3a8] ss:$20 sps:$4 sm:$0xff]  }
 0x5d9   : > { %v5807_v39 = vsel %vm619_vm4, %v5791_v17, %v5792_v28  ;;  %v12922_v61 = vld [vmem:[%s18797_s1 + $0x3a0] ss:$20 sps:$4 sm:$0xff]   ;;  %19082 = vst [vmem:[#allocation88_spill] sm:$0xff] %v15985_v16  ;;  %19083 = vst [vmem:[#allocation89_spill] sm:$0xff] %v15987_v8  ;;  %v15989_v45 = vpop.f32.mrf.mxu0  ;;  %v7951_v49 = vld [vmem:[#allocation2 + $0x16c] sm:$0xf] }
 0x5da   : > { %v5808_v10 = vsel %vm1186_vm11, %v5762_v34, %v5807_v39  ;;  %v5986_v56 = vpop.permute.xlu0 %5985  ;;  %v12595_v62 = vpop.permute.xlu1 %12594  ;;  %7100 = vmatpush1.bf16.msra.mxu0 %v11890_v4  ;;  %19084 = vst [vmem:[#allocation87_spill] sm:$0xff] %v15989_v45  ;;  %v7953_v11 = vld [vmem:[#allocation2 + $0x17c] sm:$0xf]  ;;  %v7947_v17 = vld [vmem:[#allocation2 + $0x14c] sm:$0xf] }
 0x5db   : > { %7005 = vmatpush2.bf16.msra.mxu1 %v11872_v30  ;;  %v11870_v42 = vcombine.low %v5806_v53, %v5808_v10  ;;  %v12597_v2 = vunpack.i.h.bf16 %v12595_v62  ;;  %v12596_v31 = vunpack.i.l.bf16 %v12595_v62  ;;  %7101 = vmatprep.subr.bf16.mxu0 %v11889_v18  ;;  %v11871_v60 = vcombine.high %v5806_v53, %v5808_v10  ;;  %v15991_v14 = vpop.f32.mrf.mxu0  ;;  %v7949_v4 = vld [vmem:[#allocation2 + $0x15c] sm:$0xf]  ;;  %v7939_v10 = vld [vmem:[#allocation2 + $0x10c] sm:$0xf] }
 0x5dc   : > { %v6015_v32 = vrot.slane %v5986_v56, 4  ;;  %19085 = vst [vmem:[#allocation85_spill] sm:$0xff] %v15991_v14  ;;  %v12598_v30 = vpack.i.bf16 %v7953_v11, %v7951_v49  ;;  %v12603_v39 = vpack.i.bf16 %v7949_v4, %v7947_v17  ;;  %v7945_v53 = vld [vmem:[#allocation2 + $0x13c] sm:$0xf] }
 0x5dd   : > { %v6016_v54 = vrot.slane %v12597_v2, 4  ;;  %v6014_v38 = vrot.slane %v12596_v31, 4  ;;  %6966 = vmatmul.mubr.bf16.gmra.mxu0 %v12891_v6  ;;  %7006 = vmatprep.subr.bf16.mxu1 %v11871_v60  ;;  %v15993_v46 = vpop.f32.mrf.mxu0  ;;  %v7943_v6 = vld [vmem:[#allocation2 + $0x12c] sm:$0xf]  ;;  %v7941_v62 = vld [vmem:[#allocation2 + $0x11c] sm:$0xf] }
 0x5de   : > { %7102 = vmatpush1.bf16.msra.mxu0 %v11888_v63  ;;  %7121 = vmatprep.mubr.bf16.mxu0 %v19081_v19  ;;  %19086 = vst [vmem:[#allocation86_spill] sm:$0xff] %v15993_v46 }
 0x5df   : > { %7007 = vmatpush2.bf16.msra.mxu1 %v11870_v42  ;;  %v6029_v44 = vsel %vm619_vm4, %v6013_v59, %v6014_v38  ;;  %v6031_v7 = vsel %vm619_vm4, %v6015_v32, %v6016_v54  ;;  %v15995_v24 = vpop.f32.mrf.mxu0  ;;  %12599 = vrot.lane.b32.xlu0 %v12598_v30, %s13027_s29  ;;  %v12613_v42 = vpack.i.bf16 %v7941_v62, %v7939_v10 }
 0x5e0   : > { %v6030_v0 = vsel %vm1412_vm12, %v5982_v5, %v6029_v44  ;;  %v6032_v29 = vsel %vm1412_vm12, %v5986_v56, %v6031_v7  ;;  %19087 = vst [vmem:[#allocation84_spill] sm:$0xff] %v15995_v24  ;;  %12604 = vrot.lane.b32.xlu1 %v12603_v39, %s13027_s29  ;;  %v12608_v56 = vpack.i.bf16 %v7945_v53, %v7943_v6 }
 0x5e1   : > { %v11886_v1 = vcombine.low %v6030_v0, %v6032_v29  ;;  %v11887_v36 = vcombine.high %v6030_v0, %v6032_v29  ;;  %v15997_v28 = vpop.f32.mrf.mxu0 }
 0x5e2   : > { %7009 = vmatmul.mubr.bf16.vlgmr.msra.gmra.mxu1 %v12894_v50  ;;  %19088 = vst [vmem:[#allocation83_spill] sm:$0xff] %v15997_v28 }
 0x5e3   : > { %7018 = vmatprep.mubr.bf16.mxu1 %v12898_v26  ;;  %7103 = vmatprep.subr.bf16.mxu0 %v11887_v36  ;;  %v15999_v9 = vpop.f32.mrf.mxu0 }
 0x5e4   : > { %7104 = vmatpush1.bf16.msra.mxu0 %v11886_v1  ;;  %19089 = vst [vmem:[#allocation81_spill] sm:$0xff] %v15999_v9  ;;  %12609 = vrot.lane.b32.xlu0 %v12608_v56, %s13027_s29 }
 0x5e5   : > { %v16001_v5 = vpop.f32.mrf.mxu0  ;;  %12614 = vrot.lane.b32.xlu1 %v12613_v42, %s13027_s29 }
 0x5e6   : > { %19090 = vst [vmem:[#allocation82_spill] sm:$0xff] %v16001_v5 }
 0x5e7   : > { %11894 = vmatmul.mubr.msk.bf16.vlgmr.msra.gmra.mxu0 %vm2220_vm13, %v12897_v23  ;;  %v16003_v35 = vpop.f32.mrf.mxu0 }
 0x5e8   : > { %7131 = vmatprep.mubr.bf16.mxu0 %v19081_v19  ;;  %19091 = vst [vmem:[#allocation80_spill] sm:$0xff] %v16003_v35 }
 0x5e9   : > { %v16005_v51 = vpop.f32.mrf.mxu0 }
 0x5ea   : > { %7019 = vmatmul.mubr.bf16.gmra.mxu1 %v12900_v25  ;;  %19092 = vst [vmem:[#allocation79_spill] sm:$0xff] %v16005_v51 }
 0x5eb   : > { %7028 = vmatprep.mubr.bf16.mxu1 %v12902_v40  ;;  %v16007_v34 = vpop.f32.mrf.mxu0 }
 0x5ec   : > { %19093 = vst [vmem:[#allocation77_spill] sm:$0xff] %v16007_v34 }
 0x5ed   : > { %v16009_v27 = vpop.f32.mrf.mxu0 }
 0x5ee   : > { %19094 = vst [vmem:[#allocation78_spill] sm:$0xff] %v16009_v27 }
 0x5ef   : > { %11895 = vmatmul.mubr.msk.bf16.gmra.mxu0 %vm2220_vm13, %v12901_v21  ;;  %v16012_v18 = vpop.f32.mrf.mxu0 }
 0x5f0   : > { %7141 = vmatprep.mubr.bf16.mxu0 %v19081_v19  ;;  %19095 = vst [vmem:[#allocation76_spill] sm:$0xff] %v16012_v18 }
 0x5f1   : > { %v16016_v2 = vpop.f32.mrf.mxu0  ;;  %v16021_v60 = vpop.f32.mrf.mxu1 }
 0x5f2   : > { %7029 = vmatmul.mubr.bf16.gmra.mxu1 %v12904_v15  ;;  %19096 = vst [vmem:[#allocation75_spill] sm:$0xff] %v16016_v2  ;;  %19098 = vst [vmem:[#allocation74_spill] sm:$0xff] %v16021_v60 }
 0x5f3   : > { %7038 = vmatprep.mubr.bf16.mxu1 %v12906_v12  ;;  %v16019_v31 = vpop.f32.mrf.mxu0  ;;  %v16027_v32 = vpop.f32.mrf.mxu1 }
 0x5f4   : > { %19097 = vst [vmem:[#allocation73_spill] sm:$0xff] %v16019_v31  ;;  %19099 = vst [vmem:[#allocation72_spill] sm:$0xff] %v16027_v32 }
 0x5f5   : > { %v16033_v50 = vpop.f32.mrf.mxu1 }
 0x5f6   : > { %19100 = vst [vmem:[#allocation90_spill] sm:$0xff] %v16033_v50 }
 0x5f7   : > { %11896 = vmatmul.mubr.msk.bf16.gmra.mxu0 %vm2220_vm13, %v12905_v47  ;;  %v16039_v7 = vpop.f32.mrf.mxu1 }
 0x5f8   : > { %7151 = vmatprep.mubr.bf16.mxu0 %v19081_v19  ;;  %19101 = vst [vmem:[#allocation91_spill] sm:$0xff] %v16039_v7 }
 0x5f9   : > { %v16045_v1 = vpop.f32.mrf.mxu1 }
 0x5fa   : > { %7039 = vmatmul.mubr.bf16.gmra.mxu1 %v12908_v43  ;;  %19102 = vst [vmem:[#allocation92_spill] sm:$0xff] %v16045_v1 }
 0x5fb   : > { %7048 = vmatprep.mubr.bf16.mxu1 %v12912_v33  ;;  %v16051_v25 = vpop.f32.mrf.mxu1 }
 0x5fc   : > { %19103 = vst [vmem:[#allocation93_spill] sm:$0xff] %v16051_v25 }
 0x5fd   : > { %v16057_v15 = vpop.f32.mrf.mxu1 }
 0x5fe   : > { %19104 = vst [vmem:[#allocation94_spill] sm:$0xff] %v16057_v15 }
 0x5ff   : > { %11897 = vmatmul.mubr.msk.bf16.gmra.mxu0 %vm2220_vm13, %v12909_v41  ;;  %v16063_v43 = vpop.f32.mrf.mxu1 }
 0x600   : > { %7161 = vmatprep.mubr.bf16.mxu0 %v19081_v19  ;;  %19105 = vst [vmem:[#allocation95_spill] sm:$0xff] %v16063_v43 }
 0x602   : > { %7049 = vmatmul.mubr.bf16.gmra.mxu1 %v12910_v37  ;;  %v16069_v37 = vpop.f32.mrf.mxu1 }
 0x603   : > { %7058 = vmatprep.mubr.bf16.mxu1 %v12916_v52  ;;  %19106 = vst [vmem:[#allocation96_spill] sm:$0xff] %v16069_v37 }
 0x607   : > { %11898 = vmatmul.mubr.msk.bf16.gmra.mxu0 %vm2220_vm13, %v12913_v13 }
 0x608   : > { %7171 = vmatprep.mubr.bf16.mxu0 %v19081_v19 }
 0x60a   : > { %7059 = vmatmul.mubr.bf16.gmra.mxu1 %v12914_v3  ;;  %v16075_v3 = vpop.f32.mrf.mxu1 }
 0x60b   : > { %7068 = vmatprep.mubr.bf16.mxu1 %v12920_v57  ;;  %19107 = vst [vmem:[#allocation97_spill] sm:$0xff] %v16075_v3 }
 0x60f   : > { %11899 = vmatmul.mubr.msk.bf16.gmra.mxu0 %vm2220_vm13, %v12917_v55 }
 0x610   : > { %7181 = vmatprep.mubr.bf16.mxu0 %v19081_v19 }
 0x612   : > { %7069 = vmatmul.mubr.bf16.gmra.mxu1 %v12918_v48  ;;  %v16081_v48 = vpop.f32.mrf.mxu1 }
 0x613   : > { %7078 = vmatprep.mubr.bf16.mxu1 %v12924_v58  ;;  %19108 = vst [vmem:[#allocation98_spill] sm:$0xff] %v16081_v48 }
 0x614   : > { %v16091_v49 = vpop.f32.mrf.mxu1 }
 0x615   : > { %19109 = vst [vmem:[#allocation99_spill] sm:$0xff] %v16091_v49 }
 0x617   : > { %11900 = vmatmul.mubr.msk.bf16.gmra.mxu0 %vm2220_vm13, %v12921_v22  ;;  %v16085_v22 = vpop.permute.xlu0 %6236 }
 0x618   : > { %7191 = vmatprep.mubr.bf16.mxu0 %v19081_v19 }
 0x619   : > { %v16097_v30 = vpop.f32.mrf.mxu1 }
 0x61a   : > { %7079 = vmatmul.mubr.bf16.gmra.mxu1 %v12922_v61  ;;  %v16087_v61 = vpop.permute.xlu1 %6231  ;;  %19110 = vst [vmem:[#allocation100_spill] sm:$0xff] %v16097_v30 }
 0x61b   : > { %v16099_v4 = vpop.permute.xlu0 %6276  ;;  %v16107_v10 = vpop.f32.mrf.mxu1 }
 0x61c   : > { %19111 = vst [vmem:[#allocation101_spill] sm:$0xff] %v16099_v4  ;;  %19112 = vst [vmem:[#allocation102_spill] sm:$0xff] %v16107_v10 }
 0x61d   : > { %v16113_v60 = vpop.f32.mrf.mxu1 }
 0x61e   : > { %v16101_v39 = vpop.permute.xlu1 %6271  ;;  %19113 = vst [vmem:[#allocation103_spill] sm:$0xff] %v16113_v60 }
 0x61f   : > { %11901 = vmatmul.mubr.msk.bf16.gmra.mxu0 %vm2220_vm13, %v12925_v20  ;;  %v6227_v62 = vpop.permute.xlu0 %6226  ;;  %v16117_v50 = vpop.f32.mrf.mxu1 }
 0x620   : > { %19114 = vst [vmem:[#allocation104_spill] sm:$0xff] %v16117_v50 }
 0x622   : > { %v6222_v42 = vpop.permute.xlu1 %6221 }
 0x623   : > { %v16121_v1 = vpop.permute.xlu0 %6266 }
 0x626   : > { %v16123_v43 = vpop.permute.xlu1 %6261 }
 0x627   : > { %v6217_v10 = vpop.permute.xlu0 %6216 }
 0x62a   : > { %v6212_v16 = vpop.permute.xlu1 %6211 }
 0x62b   : > { %v6257_v50 = vpop.permute.xlu0 %6256 }
 0x62e   : > { %v6252_v9 = vpop.permute.xlu1 %6251 }
 0x62f   : > { %v6207_v51 = vpop.permute.xlu0 %6206 }
 0x632   : > { %v6202_v27 = vpop.permute.xlu1 %6201 }
 0x636   : > { %v6242_v4 = vpop.permute.xlu1 %6241 }
 0x665   : > { %v16023_v63 = vpop.f32.mrf.mxu0 }
 0x666   : > { %v6898_v19 = vadd.f32 %v16023_v63, %v6202_v27 }
 0x667   : > { %v16025_v59 = vpop.f32.mrf.mxu0 }
 0x669   : > { %v16029_v54 = vpop.f32.mrf.mxu0 }
 0x66b   : > { %v16031_v38 = vpop.f32.mrf.mxu0 }
 0x66d   : > { %v16035_v26 = vpop.f32.mrf.mxu0 }
 0x66f   : > { %v16037_v44 = vpop.f32.mrf.mxu0 }
 0x671   : > { %v16041_v0 = vpop.f32.mrf.mxu0 }
 0x673   : > { %v16043_v29 = vpop.f32.mrf.mxu0 }
 0x675   : > { %v16047_v36 = vpop.f32.mrf.mxu0 }
 0x676   : > { %v6918_v63 = vadd.f32 %v16047_v36, %v6222_v42 }
 0x677   : > { %v16049_v23 = vpop.f32.mrf.mxu0 }
 0x679   : > { %v16053_v40 = vpop.f32.mrf.mxu0 }
 0x67b   : > { %v16055_v21 = vpop.f32.mrf.mxu0 }
 0x67d   : > { %v16059_v12 = vpop.f32.mrf.mxu0 }
 0x67f   : > { %v16061_v47 = vpop.f32.mrf.mxu0 }
 0x681   : > { %v16065_v33 = vpop.f32.mrf.mxu0 }
 0x683   : > { %v16067_v41 = vpop.f32.mrf.mxu0 }
 0x685   : > { %v16071_v52 = vpop.f32.mrf.mxu0 }
 0x686   : > { %v16176_v36 = vadd.f32 %v16071_v52, %v6242_v4 }
 0x687   : > { %v16073_v13 = vpop.f32.mrf.mxu0 }
 0x689   : > { %v16077_v57 = vpop.f32.mrf.mxu0 }
 0x68b   : > { %v16079_v55 = vpop.f32.mrf.mxu0 }
 0x68d   : > { %v16083_v58 = vpop.f32.mrf.mxu0 }
 0x68f   : > { %v16089_v20 = vpop.f32.mrf.mxu0 }
 0x691   : > { %v16093_v11 = vpop.f32.mrf.mxu0 }
 0x693   : > { %v16095_v17 = vpop.f32.mrf.mxu0 }
 0x695   : > { %v16103_v6 = vpop.f32.mrf.mxu0 }
 0x696   : > { %v16201_v52 = vadd.f32 %v16103_v6, %v16123_v43 }
 0x697   : > { %v16105_v53 = vpop.f32.mrf.mxu0 }
 0x699   : > { %v16109_v56 = vpop.f32.mrf.mxu0 }
 0x69b   : > { %v16111_v32 = vpop.f32.mrf.mxu0 }
 0x69d   : > { %v16115_v7 = vpop.f32.mrf.mxu0 }
 0x69f   : > { %v16119_v25 = vpop.f32.mrf.mxu0 }
 0x6a1   : > { %v16125_v15 = vpop.f32.mrf.mxu0 }
 0x6a2   : > { %19115 = vst [vmem:[#allocation105_spill] sm:$0xff] %v16125_v15  ;;  %v7010_v3 = vpop.f32.mrf.mxu1 }
 0x6a3   : > { %v16127_v37 = vpop.f32.mrf.mxu0  ;;  %v7011_v15 = vadd.f32 %v7010_v3, %v6898_v19  ;;  %v16171_v19 = vadd.f32 %v16067_v41, %v16085_v22 }
 0x6a4   : > { %v7012_v8 = vpop.f32.mrf.mxu1  ;;  %19116 = vst [vmem:[#allocation106_spill] sm:$0xff] %v16127_v37  ;;  %v6900_v37 = vadd.f32 %v16025_v59, %v6202_v27 }
 0x6a6   : > { %v7014_v49 = vpop.f32.mrf.mxu1 }
 0x6a7   : > { %v7123_v45 = vpop.f32.mrf.mxu0 }
 0x6a8   : > { %v7016_v14 = vpop.f32.mrf.mxu1 }
 0x6a9   : > { %v7125_v24 = vpop.f32.mrf.mxu0 }
 0x6aa   : > { %v7020_v48 = vpop.f32.mrf.mxu1 }
 0x6ab   : > { %v7127_v30 = vpop.f32.mrf.mxu0 }
 0x6ac   : > { %v7022_v46 = vpop.f32.mrf.mxu1 }
 0x6ad   : > { %v16131_v35 = vpop.f32.mrf.mxu0 }
 0x6ae   : > { %v16129_v28 = vpop.f32.mrf.mxu1  ;;  %19118 = vst [vmem:[#allocation108_spill] sm:$0xff] %v16131_v35 }
 0x6af   : > { %19117 = vst [vmem:[#allocation107_spill] sm:$0xff] %v16129_v28  ;;  %v16135_v5 = vpop.f32.mrf.mxu0 }
 0x6b0   : > { %v16133_v60 = vpop.f32.mrf.mxu1  ;;  %19120 = vst [vmem:[#allocation110_spill] sm:$0xff] %v16135_v5  ;;  %v6910_v5 = vadd.f32 %v16037_v44, %v6212_v16  ;;  %v16173_v44 = vadd.f32 %v7123_v45, %v7011_v15  ;;  %v16191_v45 = vadd.f32 %v16089_v20, %v6252_v9  ;;  %v16194_v15 = vadd.f32 %v16093_v11, %v6257_v50 }
 0x6b1   : > { %19119 = vst [vmem:[#allocation109_spill] sm:$0xff] %v16133_v60  ;;  %v16139_v18 = vpop.f32.mrf.mxu0  ;;  %v6902_v60 = vadd.f32 %v16029_v54, %v6207_v51  ;;  %v6922_v54 = vadd.f32 %v16053_v40, %v6227_v62 }
 0x6b2   : > { %v16137_v34 = vpop.f32.mrf.mxu1  ;;  %19122 = vst [vmem:[#allocation112_spill] sm:$0xff] %v16139_v18  ;;  %v6908_v18 = vadd.f32 %v16035_v26, %v6212_v16  ;;  %v6928_v16 = vadd.f32 %v16059_v12, %v16087_v61  ;;  %v16167_v26 = vadd.f32 %v16065_v33, %v16085_v22  ;;  %v16188_v12 = vadd.f32 %v16083_v58, %v6252_v9 }
 0x6b3   : > { %19121 = vst [vmem:[#allocation111_spill] sm:$0xff] %v16137_v34  ;;  %v16143_v2 = vpop.f32.mrf.mxu0  ;;  %v6904_v34 = vadd.f32 %v16031_v38, %v6207_v51  ;;  %v6924_v51 = vadd.f32 %v16055_v21, %v6227_v62  ;;  %v6930_v38 = vadd.f32 %v16061_v47, %v16087_v61  ;;  %v16197_v47 = vadd.f32 %v16095_v17, %v6257_v50 }
 0x6b4   : > { %v16141_v31 = vpop.f32.mrf.mxu1  ;;  %19124 = vst [vmem:[#allocation114_spill] sm:$0xff] %v16143_v2  ;;  %v6914_v2 = vadd.f32 %v16043_v29, %v6217_v10  ;;  %v7015_v3 = vadd.f32 %v7014_v49, %v6902_v60  ;;  %v16209_v9 = vadd.f32 %v16109_v56, %v16121_v1  ;;  %v16213_v50 = vadd.f32 %v16111_v32, %v16121_v1 }
 0x6b5   : > { %19123 = vst [vmem:[#allocation113_spill] sm:$0xff] %v16141_v31  ;;  %v16149_v35 = vpop.f32.mrf.mxu0  ;;  %v6912_v31 = vadd.f32 %v16041_v0, %v6217_v10  ;;  %v7021_v61 = vadd.f32 %v7020_v48, %v6908_v18  ;;  %v16230_v32 = vadd.f32 %v16119_v25, %v16101_v39  ;;  %v19131_v48 = vld [vmem:[#allocation108_spill] sm:$0xff] }
 0x6b6   : > { %v16147_v28 = vpop.f32.mrf.mxu1  ;;  %19126 = vst [vmem:[#allocation116_spill] sm:$0xff] %v16149_v35  ;;  %v6920_v35 = vadd.f32 %v16049_v23, %v6222_v42  ;;  %v16179_v23 = vadd.f32 %v16073_v13, %v6242_v4  ;;  %v7013_v13 = vadd.f32 %v7012_v8, %v6900_v37  ;;  %v7023_v8 = vadd.f32 %v7022_v46, %v6910_v5  ;;  %v19129_v20 = vld [vmem:[#allocation107_spill] sm:$0xff]  ;;  %v19130_v46 = vld [vmem:[#allocation106_spill] sm:$0xff] }
 0x6b7   : > { %19125 = vst [vmem:[#allocation115_spill] sm:$0xff] %v16147_v28  ;;  %v7143_v59 = vpop.f32.mrf.mxu0  ;;  %v6247_v28 = vpop.permute.xlu0 %6246  ;;  %v16222_v60 = vadd.f32 %v7127_v30, %v7015_v3  ;;  %v16226_v37 = vadd.f32 %v16115_v7, %v16101_v39  ;;  %v7025_v49 = vadd.f32 %v19129_v20, %v6912_v31  ;;  %v19132_v11 = vld [vmem:[#allocation110_spill] sm:$0xff] }
 0x6b8   : > { %v7036_v27 = vpop.f32.mrf.mxu1  ;;  %v16182_v40 = vadd.f32 %v16077_v57, %v6247_v28  ;;  %v16185_v21 = vadd.f32 %v16079_v55, %v6247_v28  ;;  %v16205_v28 = vadd.f32 %v16105_v53, %v16123_v43  ;;  %v7017_v57 = vadd.f32 %v7016_v14, %v6904_v34  ;;  %v19127_v14 = vld [vmem:[#allocation101_spill] sm:$0xff] }
 0x6b9   : > { %v7145_v29 = vpop.f32.mrf.mxu0  ;;  %v16216_v55 = vmul.f32 0.2, %v16173_v44  ;;  %v16220_v43 = vadd.f32 %v7125_v24, %v7013_v13  ;;  %v19128_v34 = vld [vmem:[#allocation105_spill] sm:$0xff]  ;;  %v16241_v5 = vadd.f32 %v19130_v46, %v19127_v14  ;;  %v16247_v17 = vadd.f32 %v19132_v11, %v7021_v61  ;;  %v19133_v25 = vld [vmem:[#allocation112_spill] sm:$0xff] }
 0x6ba   : > { %v7040_v0 = vpop.f32.mrf.mxu1  ;;  %v16234_v1 = vadd.f32 %v19128_v34, %v19127_v14  ;;  %v16244_v7 = vadd.f32 %v19131_v48, %v7017_v57  ;;  %v16250_v30 = vadd.f32 %v19133_v25, %v7023_v8  ;;  %v19134_v4 = vld [vmem:[#allocation109_spill] sm:$0xff]  ;;  %v19135_v6 = vld [vmem:[#allocation111_spill] sm:$0xff]  ;;  %v16264_v61 = vmul.f32 0.2, %v16222_v60 }
 0x6bb   : > { %v7147_v41 = vpop.f32.mrf.mxu0  ;;  %v7027_v39 = vadd.f32 %v19134_v4, %v6914_v2  ;;  %v7031_v31 = vadd.f32 %v19135_v6, %v6918_v63  ;;  %v19137_v56 = vld [vmem:[#allocation114_spill] sm:$0xff]  ;;  %v7234_v3 = vmax.f32 %v16173_v44, %v16216_v55  ;;  %v16261_v57 = vmul.f32 0.2, %v16220_v43 }
 0x6bc   : > { %v7042_v33 = vpop.f32.mrf.mxu1  ;;  %v19136_v53 = vld [vmem:[#allocation113_spill] sm:$0xff]  ;;  %v16256_v62 = vadd.f32 %v19137_v56, %v7025_v49  ;;  %v16275_v44 = vmul.f32 0.2, %v16244_v7  ;;  %v16278_v55 = vmul.f32 0.2, %v16247_v17 }
 0x6bd   : > { %v7149_v22 = vpop.f32.mrf.mxu0  ;;  %v7033_v10 = vadd.f32 %v19136_v53, %v6920_v35  ;;  %v19139_v14 = vld [vmem:[#allocation116_spill] sm:$0xff]  ;;  %v7037_v35 = vadd.f32 %v7036_v27, %v6924_v51  ;;  %v16270_v34 = vadd.f32 %v7143_v59, %v7031_v31  ;;  %v16281_v48 = vmul.f32 0.2, %v16250_v30 }
 0x6be   : > { %v16218_v58 = vpop.f32.mrf.mxu1  ;;  %v19138_v8 = vld [vmem:[#allocation115_spill] sm:$0xff]  ;;  %v16268_v63 = vadd.f32 %v19139_v14, %v7027_v39  ;;  %v16284_v11 = vmul.f32 0.2, %v16256_v62  ;;  %v7043_v27 = vadd.f32 %v7042_v33, %v6930_v38  ;;  %v7235_v4 = vmax.f32 %v16220_v43, %v16261_v57 }
 0x6bf   : > { %v7153_v24 = vpop.f32.mrf.mxu0  ;;  %v7035_v2 = vadd.f32 %v19138_v8, %v6922_v54  ;;  %v16272_v20 = vadd.f32 %v7145_v29, %v7033_v10  ;;  %v7041_v54 = vadd.f32 %v7040_v0, %v6928_v16  ;;  %v16288_v51 = vadd.f32 %v7149_v22, %v7037_v35 }
 0x6c0   : > { %v16237_v18 = vpop.f32.mrf.mxu1  ;;  %v7236_v39 = vmax.f32 %v16222_v60, %v16264_v61  ;;  %v16298_v0 = vmul.f32 0.2, %v16268_v63  ;;  %v16301_v38 = vmul.f32 0.2, %v16270_v34 }
 0x6c1   : > { %v7155_v13 = vpop.f32.mrf.mxu0  ;;  %v16286_v59 = vadd.f32 %v7147_v41, %v7035_v2  ;;  %v16294_v6 = vadd.f32 %v7153_v24, %v7041_v54  ;;  %v16304_v33 = vmul.f32 0.2, %v16272_v20 }
 0x6c2   : > { %v7050_v42 = vpop.f32.mrf.mxu1  ;;  %v16306_v41 = vadd.f32 %v7155_v13, %v7043_v27 }
 0x6c3   : > { %v7157_v46 = vpop.f32.mrf.mxu0  ;;  %v7051_v16 = vadd.f32 %v7050_v42, %v16176_v36  ;;  %v16318_v56 = vmul.f32 0.2, %v16286_v59  ;;  %v16321_v42 = vmul.f32 0.2, %v16288_v51  ;;  %v16324_v61 = vmul.f32 0.2, %v16294_v6 }
 0x6c4   : > { %v7052_v49 = vpop.f32.mrf.mxu1  ;;  %v16334_v54 = vmul.f32 0.2, %v16306_v41 }
 0x6c5   : > { %v7159_v25 = vpop.f32.mrf.mxu0  ;;  %v7053_v36 = vadd.f32 %v7052_v49, %v16179_v23  ;;  %v7047_v49 = vadd.f32 %v16237_v18, %v16171_v19 }
 0x6c6   : > { %v7054_v29 = vpop.f32.mrf.mxu1  ;;  %19140 = vst [vmem:[#allocation101_spill] sm:$0xff] %v16334_v54 }
 0x6c7   : > { %v7163_v43 = vpop.f32.mrf.mxu0  ;;  %v7055_v23 = vadd.f32 %v7054_v29, %v16182_v40 }
 0x6c8   : > { %v7056_v22 = vpop.f32.mrf.mxu1  ;;  %v7164_v31 = vadd.f32 %v7163_v43, %v7051_v16  ;;  %v7045_v43 = vadd.f32 %v16218_v58, %v16167_v26 }
 0x6c9   : > { %v7165_v57 = vpop.f32.mrf.mxu0  ;;  %v7057_v14 = vadd.f32 %v7056_v22, %v16185_v21  ;;  %v16354_v21 = vadd.f32 %v7159_v25, %v7047_v49  ;;  %v19146_v25 = vld [vmem:[#allocation6_spill] sm:$0xff] }
 0x6ca   : > { %v7060_v13 = vpop.f32.mrf.mxu1  ;;  %v7218_v8 = vmul.f32 0.2, %v7164_v31  ;;  %v7166_v2 = vadd.f32 %v7165_v57, %v7053_v36 }
 0x6cb   : > { %v7167_v16 = vpop.f32.mrf.mxu0 }
 0x6cc   : > { %v7062_v27 = vpop.f32.mrf.mxu1  ;;  %v7250_v40 = vmax.f32 %v7164_v31, %v7218_v8  ;;  %v7219_v29 = vmul.f32 0.2, %v7166_v2  ;;  %v7168_v36 = vadd.f32 %v7167_v16, %v7055_v23  ;;  %v16351_v8 = vadd.f32 %v7157_v46, %v7045_v43 }
 0x6cd   : > { %v7169_v53 = vpop.f32.mrf.mxu0  ;;  %v7061_v16 = vadd.f32 %v7060_v13, %v16188_v12  ;;  %v7063_v24 = vadd.f32 %v7062_v27, %v16191_v45  ;;  %v19147_v45 = vld [vmem:[#allocation7_spill] sm:$0xff] }
 0x6ce   : > { %v7064_v10 = vpop.f32.mrf.mxu1  ;;  %v16347_v26 = vadd.f32 %v7250_v40, %v7234_v3  ;;  %v7251_v58 = vmax.f32 %v7166_v2, %v7219_v29  ;;  %v7220_v31 = vmul.f32 0.2, %v7168_v36  ;;  %v7170_v35 = vadd.f32 %v7169_v53, %v7057_v14  ;;  %v19143_v2 = vld [vmem:[#allocation4_spill] sm:$0xff]  ;;  %v19144_v29 = vld [vmem:[#allocation5_spill] sm:$0xff] }
 0x6cf   : > { %v7173_v18 = vpop.f32.mrf.mxu0  ;;  %v16374_v49 = vmul.f32 0.2, %v16351_v8 }
 0x6d0   : > { %19141 = vst [vmem:[#allocation105_spill] sm:$0xff] %v16347_v26  ;;  %v7066_v19 = vpop.f32.mrf.mxu1  ;;  %v16356_v22 = vadd.f32 %v7251_v58, %v7235_v4  ;;  %v7252_v3 = vmax.f32 %v7168_v36, %v7220_v31  ;;  %v7338_v40 = vmul.f32 %v19143_v2, %v16347_v26  ;;  %v7410_v23 = vmul.f32 %v19144_v29, %v16347_v26 }
 0x6d1   : > { %v7221_v46 = vmul.f32 0.2, %v7170_v35  ;;  %v7174_v43 = vadd.f32 %v7173_v18, %v7061_v16  ;;  %v7175_v12 = vpop.f32.mrf.mxu0  ;;  %v7067_v54 = vadd.f32 %v7066_v19, %v16197_v47 }
 0x6d2   : > { %19142 = vst [vmem:[#allocation107_spill] sm:$0xff] %v16356_v22  ;;  %v7070_v57 = vpop.f32.mrf.mxu1  ;;  %v16365_v53 = vpack.c.bf16 %v16356_v22, %v16347_v26  ;;  %v7339_v4 = vmul.f32 %v19146_v25, %v16356_v22  ;;  %v7411_v13 = vmul.f32 %v19147_v45, %v16356_v22  ;;  %v16371_v14 = vadd.f32 %v7252_v3, %v7236_v39 }
 0x6d3   : > { %v7253_v27 = vmax.f32 %v7170_v35, %v7221_v46  ;;  %v7222_v36 = vmul.f32 0.2, %v7174_v43  ;;  %v7176_v58 = vadd.f32 %v7175_v12, %v7063_v24  ;;  %v7177_v16 = vpop.f32.mrf.mxu0  ;;  %v7065_v26 = vadd.f32 %v7064_v10, %v16194_v15 }
 0x6d4   : > { %19145 = vst [vmem:[#allocation106_spill] sm:$0xff] %v16365_v53  ;;  %19148 = vst [vmem:[#allocation108_spill] sm:$0xff] %v16371_v14  ;;  %v7072_v31 = vpop.f32.mrf.mxu1  ;;  %v12258_v18 = vpack.c.bf16 %v7339_v4, %v7338_v40  ;;  %v16376_v60 = vpack.c.bf16 %v7411_v13, %v7410_v23  ;;  %v16382_v39 = vmul.f32 0.2, %v16354_v21  ;;  %v19149_v3 = vmax.f32 %v16244_v7, %v16275_v44 }
 0x6d5   : > { %7330 = vst [vmem:[#allocation2 + $0x4] sm:$0xff] %v16365_v53  ;;  %v7254_v24 = vmax.f32 %v7174_v43, %v7222_v36  ;;  %v7223_v46 = vmul.f32 0.2, %v7176_v58  ;;  %v7179_v40 = vpop.f32.mrf.mxu0  ;;  %v7340_v15 = vmul.f32 %v19143_v2, %v16371_v14  ;;  %v7412_v47 = vmul.f32 %v19144_v29, %v16371_v14 }
 0x6d6   : > { %v16387_v35 = vadd.f32 %v7253_v27, %v19149_v3  ;;  %v7074_v12 = vpop.f32.mrf.mxu1  ;;  %7402 = vst [vmem:[#allocation2 + $0x84] sm:$0xff] %v12258_v18  ;;  %7474 = vst [vmem:[#allocation2 + $0x104] sm:$0xff] %v16376_v60  ;;  %v7178_v10 = vadd.f32 %v7177_v16, %v7065_v26  ;;  %v7180_v23 = vadd.f32 %v7179_v40, %v7067_v54 }
 0x6d7   : > { %v19151_v43 = vmax.f32 %v16247_v17, %v16278_v55  ;;  %v7183_v27 = vpop.f32.mrf.mxu0  ;;  %v7071_v26 = vadd.f32 %v7070_v57, %v16201_v52  ;;  %v7255_v54 = vmax.f32 %v7176_v58, %v7223_v46  ;;  %v7073_v40 = vadd.f32 %v7072_v31, %v16205_v28 }
 0x6d8   : > { %19150 = vst [vmem:[#allocation110_spill] sm:$0xff] %v16387_v35  ;;  %v16396_v7 = vpack.c.bf16 %v16387_v35, %v16371_v14  ;;  %v7341_v44 = vmul.f32 %v19146_v25, %v16387_v35  ;;  %v7413_v19 = vmul.f32 %v19147_v45, %v16387_v35  ;;  %v7076_v13 = vpop.f32.mrf.mxu1  ;;  %v7224_v36 = vmul.f32 0.2, %v7178_v10 }
 0x6d9   : > { %v16405_v4 = vadd.f32 %v7254_v24, %v19151_v43  ;;  %v7225_v16 = vmul.f32 0.2, %v7180_v23  ;;  %v7075_v53 = vadd.f32 %v7074_v12, %v16209_v9  ;;  %v7185_v17 = vpop.f32.mrf.mxu0  ;;  %v19153_v55 = vmax.f32 %v16250_v30, %v16281_v48 }
 0x6da   : > { %v12259_v18 = vpack.c.bf16 %v7341_v44, %v7340_v15  ;;  %v16408_v3 = vpack.c.bf16 %v7413_v19, %v7412_v47  ;;  %7331 = vst [vmem:[#allocation2 + $0x14] sm:$0xff] %v16396_v7  ;;  %v7080_v14 = vpop.f32.mrf.mxu1  ;;  %v7256_v52 = vmax.f32 %v7178_v10, %v7224_v36  ;;  %v7184_v58 = vadd.f32 %v7183_v27, %v7071_v26 }
 0x6db   : > { %19152 = vst [vmem:[#allocation112_spill] sm:$0xff] %v16405_v4  ;;  %v16416_v24 = vadd.f32 %v7255_v54, %v19153_v55  ;;  %v7257_v57 = vmax.f32 %v7180_v23, %v7225_v16  ;;  %v7342_v46 = vmul.f32 %v19143_v2, %v16405_v4  ;;  %v7414_v28 = vmul.f32 %v19144_v29, %v16405_v4  ;;  %v7187_v15 = vpop.f32.mrf.mxu0 }
 0x6dc   : > { %7403 = vst [vmem:[#allocation2 + $0x94] sm:$0xff] %v12259_v18  ;;  %7475 = vst [vmem:[#allocation2 + $0x114] sm:$0xff] %v16408_v3  ;;  %v7077_v9 = vadd.f32 %v7076_v13, %v16213_v50  ;;  %v7186_v31 = vadd.f32 %v7185_v17, %v7073_v40  ;;  %v7082_v12 = vpop.f32.mrf.mxu1  ;;  %v7603_v30 = vld [vmem:[#allocation2 + $0x8] sm:$0xf]  ;;  %v7602_v48 = vld [vmem:[#allocation2] sm:$0xff]  ;;  %v19155_v44 = vmax.f32 %v16256_v62, %v16284_v11 }
 0x6dd   : > { %19154 = vst [vmem:[#allocation109_spill] sm:$0xff] %v16416_v24  ;;  %v16426_v47 = vpack.c.bf16 %v16416_v24, %v16405_v4  ;;  %v7343_v10 = vmul.f32 %v19146_v25, %v16416_v24  ;;  %v7415_v23 = vmul.f32 %v19147_v45, %v16416_v24  ;;  %7636 = vrot.lane.b32.xlu0 %v7603_v30, %s13023_s25  ;;  %v7226_v13 = vmul.f32 0.2, %v7184_v58  ;;  %v7189_v36 = vpop.f32.mrf.mxu0  ;;  %v7491_v17 = vld [vmem:[#allocation2 + $0x88] sm:$0xf]  ;;  %v7490_v30 = vld [vmem:[#allocation2 + $0x80] sm:$0xff] }
 0x6de   : > { %v16435_v19 = vadd.f32 %v7256_v52, %v19155_v44  ;;  %v19157_v50 = vmax.f32 %v16268_v63, %v16298_v0  ;;  %v7081_v27 = vadd.f32 %v7080_v14, %v16226_v37  ;;  %v7227_v26 = vmul.f32 0.2, %v7186_v31  ;;  %7634 = vrot.lane.b32.xlu1 %v7602_v48, %s13023_s25  ;;  %v7084_v54 = vpop.f32.mrf.mxu1 }
 0x6df   : > { %v16445_v16 = vpack.c.bf16 %v7343_v10, %v7342_v46  ;;  %v16447_v62 = vpack.c.bf16 %v7415_v23, %v7414_v28  ;;  %7332 = vst [vmem:[#allocation2 + $0x24] sm:$0xff] %v16426_v47  ;;  %v7258_v18 = vmax.f32 %v7184_v58, %v7226_v13  ;;  %v7193_v40 = vpop.f32.mrf.mxu0  ;;  %v7083_v52 = vadd.f32 %v7082_v12, %v16230_v32 }
 0x6e0   : > { %19156 = vst [vmem:[#allocation111_spill] sm:$0xff] %v16435_v19  ;;  %v16441_v43 = vadd.f32 %v7257_v57, %v19157_v50  ;;  %v7344_v11 = vmul.f32 %v19143_v2, %v16435_v19  ;;  %v7416_v63 = vmul.f32 %v19144_v29, %v16435_v19  ;;  %v7259_v55 = vmax.f32 %v7186_v31, %v7227_v26  ;;  %v7086_v28 = vpop.f32.mrf.mxu1 }
 0x6e1   : > { %7404 = vst [vmem:[#allocation2 + $0xa4] sm:$0xff] %v16445_v16  ;;  %7476 = vst [vmem:[#allocation2 + $0x124] sm:$0xff] %v16447_v62  ;;  %v7188_v57 = vadd.f32 %v7187_v15, %v7075_v53  ;;  %v7190_v46 = vadd.f32 %v7189_v36, %v7077_v9  ;;  %7524 = vrot.lane.b32.xlu0 %v7491_v17, %s13024_s26  ;;  %v19159_v58 = vmax.f32 %v16270_v34, %v16301_v38  ;;  %v7195_v32 = vpop.f32.mrf.mxu0 }
 0x6e2   : > { %19158 = vst [vmem:[#allocation113_spill] sm:$0xff] %v16441_v43  ;;  %v16456_v37 = vpack.c.bf16 %v16441_v43, %v16435_v19  ;;  %v7345_v0 = vmul.f32 %v19146_v25, %v16441_v43  ;;  %v7417_v14 = vmul.f32 %v19147_v45, %v16441_v43  ;;  %v7085_v31 = vadd.f32 %v7084_v54, %v16234_v1 }
 0x6e3   : > { %v16474_v23 = vadd.f32 %v7258_v18, %v19159_v58  ;;  %7522 = vrot.lane.b32.xlu1 %v7490_v30, %s13024_s26  ;;  %v19161_v53 = vmax.f32 %v16272_v20, %v16304_v33  ;;  %v7228_v12 = vmul.f32 0.2, %v7188_v57  ;;  %v7229_v15 = vmul.f32 0.2, %v7190_v46  ;;  %v7197_v13 = vpop.f32.mrf.mxu0 }
 0x6e4   : > { %v16466_v48 = vpack.c.bf16 %v7345_v0, %v7344_v11  ;;  %v16468_v10 = vpack.c.bf16 %v7417_v14, %v7416_v63  ;;  %7333 = vst [vmem:[#allocation2 + $0x34] sm:$0xff] %v16456_v37  ;;  %v7194_v44 = vadd.f32 %v7193_v40, %v7081_v27  ;;  %v7087_v38 = vadd.f32 %v7086_v28, %v16241_v5  ;;  %v7827_v28 = vld [vmem:[#allocation2 + $0x88] sm:$0xf] }
 0x6e5   : > { %19160 = vst [vmem:[#allocation114_spill] sm:$0xff] %v16474_v23  ;;  %v16481_v9 = vadd.f32 %v7259_v55, %v19161_v53  ;;  %v7346_v34 = vmul.f32 %v19143_v2, %v16474_v23  ;;  %v7418_v1 = vmul.f32 %v19144_v29, %v16474_v23  ;;  %v7196_v50 = vadd.f32 %v7195_v32, %v7083_v52  ;;  %v7199_v63 = vpop.f32.mrf.mxu0 }
 0x6e6   : > { %7405 = vst [vmem:[#allocation2 + $0xb4] sm:$0xff] %v16466_v48  ;;  %7477 = vst [vmem:[#allocation2 + $0x134] sm:$0xff] %v16468_v10  ;;  %v7260_v26 = vmax.f32 %v7188_v57, %v7228_v12  ;;  %7970 = vrot.lane.b32.xlu0 %v16376_v60, %s13027_s29  ;;  %v7261_v54 = vmax.f32 %v7190_v46, %v7229_v15  ;;  %v7230_v36 = vmul.f32 0.2, %v7194_v44  ;;  %v19169_v12 = vld [vmem:[#allocation101_spill] sm:$0xff] }
 0x6e7   : > { %19162 = vst [vmem:[#allocation115_spill] sm:$0xff] %v16481_v9  ;;  %v16492_v20 = vpack.c.bf16 %v16481_v9, %v16474_v23  ;;  %v7347_v33 = vmul.f32 %v19146_v25, %v16481_v9  ;;  %v7419_v27 = vmul.f32 %v19147_v45, %v16481_v9  ;;  %v7231_v11 = vmul.f32 0.2, %v7196_v50  ;;  %7858 = vrot.lane.b32.xlu1 %v7490_v30, %s13025_s27 }
 0x6e8   : > { %v7198_v5 = vadd.f32 %v7197_v13, %v7085_v31  ;;  %v19163_v18 = vmax.f32 %v16286_v59, %v16318_v56  ;;  %v7200_v17 = vadd.f32 %v7199_v63, %v7087_v38  ;;  %v19165_v60 = vmax.f32 %v16288_v51, %v16321_v42  ;;  %v7714_v42 = vld [vmem:[#allocation2 + $0x100] sm:$0xff] }
 0x6e9   : > { %v16501_v0 = vpack.c.bf16 %v7347_v33, %v7346_v34  ;;  %v16503_v14 = vpack.c.bf16 %v7419_v27, %v7418_v1  ;;  %7334 = vst [vmem:[#allocation2 + $0x44] sm:$0xff] %v16492_v20  ;;  %v7262_v52 = vmax.f32 %v7194_v44, %v7230_v36  ;;  %v7263_v57 = vmax.f32 %v7196_v50, %v7231_v11  ;;  %v7604_v27 = vld [vmem:[#allocation2 + $0x10] sm:$0xff] }
 0x6ea   : > { %v16509_v40 = vadd.f32 %v7260_v26, %v19163_v18  ;;  %v16514_v55 = vadd.f32 %v7261_v54, %v19165_v60  ;;  %v7232_v46 = vmul.f32 0.2, %v7198_v5  ;;  %v7248_v30 = vmax.f32 %v16351_v8, %v16374_v49  ;;  %7860 = vrot.lane.b32.xlu0 %v7827_v28, %s13025_s27  ;;  %v7493_v60 = vld [vmem:[#allocation2 + $0x98] sm:$0xf] }
 0x6eb   : > { %7406 = vst [vmem:[#allocation2 + $0xc4] sm:$0xff] %v16501_v0  ;;  %7478 = vst [vmem:[#allocation2 + $0x144] sm:$0xff] %v16503_v14  ;;  %v7233_v51 = vmul.f32 0.2, %v7200_v17  ;;  %v19167_v31 = vmax.f32 %v16294_v6, %v16324_v61  ;;  %7746 = vrot.lane.b32.xlu1 %v7714_v42, %s13026_s28  ;;  %v7249_v53 = vmax.f32 %v16354_v21, %v16382_v39  ;;  %v7605_v21 = vld [vmem:[#allocation2 + $0x18] sm:$0xf] }
 0x6ec   : > { %19164 = vst [vmem:[#allocation116_spill] sm:$0xff] %v16509_v40  ;;  %19166 = vst [vmem:[#allocation117_spill] sm:$0xff] %v16514_v55  ;;  %v7348_v59 = vmul.f32 %v19143_v2, %v16509_v40  ;;  %v7420_v56 = vmul.f32 %v19144_v29, %v16509_v40  ;;  %v16527_v58 = vpack.c.bf16 %v16514_v55, %v16509_v40 }
 0x6ed   : > { %v7349_v8 = vmul.f32 %v19146_v25, %v16514_v55  ;;  %v7421_v49 = vmul.f32 %v19147_v45, %v16514_v55  ;;  %v16536_v32 = vadd.f32 %v7262_v52, %v19167_v31  ;;  %v19170_v15 = vmax.f32 %v16306_v41, %v19169_v12  ;;  %v7492_v52 = vld [vmem:[#allocation2 + $0x90] sm:$0xff]  ;;  %v7829_v12 = vld [vmem:[#allocation2 + $0x98] sm:$0xf] }
 0x6ee   : > { %v7264_v34 = vmax.f32 %v7198_v5, %v7232_v46  ;;  %v7265_v1 = vmax.f32 %v7200_v17, %v7233_v51  ;;  %7335 = vst [vmem:[#allocation2 + $0x54] sm:$0xff] %v16527_v58  ;;  %7640 = vrot.lane.b32.xlu0 %v7605_v21, %s13023_s25  ;;  %v7718_v21 = vld [vmem:[#allocation2 + $0x120] sm:$0xff]  ;;  %v8173_v51 = vld [vmem:[#allocation2 + $0x5c] sm:$0xf] }
 0x6ef   : > { %19168 = vst [vmem:[#allocation118_spill] sm:$0xff] %v16536_v32  ;;  %v16544_v44 = vadd.f32 %v7263_v57, %v19170_v15  ;;  %v16546_v38 = vpack.c.bf16 %v7349_v8, %v7348_v59  ;;  %v16548_v50 = vpack.c.bf16 %v7421_v49, %v7420_v56  ;;  %v7350_v6 = vmul.f32 %v19143_v2, %v16536_v32  ;;  %v7606_v15 = vld [vmem:[#allocation2 + $0x20] sm:$0xff] }
 0x6f0   : > { %v7422_v61 = vmul.f32 %v19144_v29, %v16536_v32  ;;  %v16563_v33 = vadd.f32 %v7264_v34, %v7248_v30  ;;  %v16568_v26 = vadd.f32 %v7265_v1, %v7249_v53  ;;  %7638 = vrot.lane.b32.xlu1 %v7604_v27, %s13023_s25  ;;  %v7607_v34 = vld [vmem:[#allocation2 + $0x28] sm:$0xf]  ;;  %v7494_v1 = vld [vmem:[#allocation2 + $0xa0] sm:$0xff]  ;;  %v7497_v27 = vld [vmem:[#allocation2 + $0xb8] sm:$0xf] }
 0x6f1   : > { %19171 = vst [vmem:[#allocation101_spill] sm:$0xff] %v16544_v44  ;;  %v16557_v41 = vpack.c.bf16 %v16544_v44, %v16536_v32  ;;  %v7351_v39 = vmul.f32 %v19146_v25, %v16544_v44  ;;  %v7423_v13 = vmul.f32 %v19147_v45, %v16544_v44  ;;  %7407 = vst [vmem:[#allocation2 + $0xd4] sm:$0xff] %v16546_v38  ;;  %v11571_v44 = vld [vmem:[%s18798_s2 + $0xe8] sm:$0xff] }
 0x6f2   : > { %19172 = vst [vmem:[#allocation119_spill] sm:$0xff] %v16563_v33  ;;  %7479 = vst [vmem:[#allocation2 + $0x154] sm:$0xff] %v16548_v50  ;;  %v7352_v11 = vmul.f32 %v19143_v2, %v16563_v33  ;;  %v7424_v5 = vmul.f32 %v19144_v29, %v16563_v33  ;;  %v16582_v63 = vpack.c.bf16 %v16568_v26, %v16563_v33  ;;  %7528 = vrot.lane.b32.xlu0 %v7493_v60, %s13024_s26  ;;  %v7720_v60 = vld [vmem:[#allocation2 + $0x130] sm:$0xff]  ;;  %v8063_v29 = vld [vmem:[#allocation2 + $0xec] sm:$0xf] }
 0x6f3   : > { %19173 = vst [vmem:[#allocation120_spill] sm:$0xff] %v16568_v26  ;;  %v16571_v54 = vpack.c.bf16 %v7351_v39, %v7350_v6  ;;  %v16573_v36 = vpack.c.bf16 %v7423_v13, %v7422_v61  ;;  %7336 = vst [vmem:[#allocation2 + $0x64] sm:$0xff] %v16557_v41  ;;  %v7353_v18 = vmul.f32 %v19146_v25, %v16568_v26  ;;  %v7495_v6 = vld [vmem:[#allocation2 + $0xa8] sm:$0xf]  ;;  %v7609_v39 = vld [vmem:[#allocation2 + $0x38] sm:$0xf] }
 0x6f4   : > { %v7425_v17 = vmul.f32 %v19147_v45, %v16568_v26  ;;  %7337 = vst [vmem:[#allocation2 + $0x74] sm:$0xff] %v16582_v63  ;;  %7526 = vrot.lane.b32.xlu1 %v7492_v52, %s13024_s26  ;;  %v7719_v61 = vld [vmem:[#allocation2 + $0x128] sm:$0xf]  ;;  %v7608_v13 = vld [vmem:[#allocation2 + $0x30] sm:$0xff]  ;;  %v8065_v2 = vld [vmem:[#allocation2 + $0xfc] sm:$0xf] }
 0x6f5   : > { %7408 = vst [vmem:[#allocation2 + $0xe4] sm:$0xff] %v16571_v54  ;;  %7480 = vst [vmem:[#allocation2 + $0x164] sm:$0xff] %v16573_v36  ;;  %v16595_v28 = vpack.c.bf16 %v7353_v18, %v7352_v11  ;;  %v7496_v11 = vld [vmem:[#allocation2 + $0xb0] sm:$0xff]  ;;  %v7833_v18 = vld [vmem:[#allocation2 + $0xb8] sm:$0xf] }
 0x6f6   : > { %v16597_v30 = vpack.c.bf16 %v7425_v17, %v7424_v5  ;;  %7974 = vrot.lane.b32.xlu0 %v16408_v3, %s13027_s29  ;;  %v7831_v3 = vld [vmem:[#allocation2 + $0xa8] sm:$0xf]  ;;  %v7721_v5 = vld [vmem:[#allocation2 + $0x138] sm:$0xf] }
 0x6f7   : > { %7409 = vst [vmem:[#allocation2 + $0xf4] sm:$0xff] %v16595_v28  ;;  %v7611_v17 = vld [vmem:[#allocation2 + $0x48] sm:$0xf]  ;;  %v8276_v33 = vld [vmem:[#allocation2 + $0x114] sm:$0xff] }
 0x6f8   : > { %7481 = vst [vmem:[#allocation2 + $0x174] sm:$0xff] %v16597_v30  ;;  %7862 = vrot.lane.b32.xlu1 %v7492_v52, %s13025_s27  ;;  %v7499_v52 = vld [vmem:[#allocation2 + $0xc8] sm:$0xf] }
 0x6fa   : > { %7864 = vrot.lane.b32.xlu0 %v7829_v12, %s13025_s27  ;;  %v7610_v12 = vld [vmem:[#allocation2 + $0x40] sm:$0xff] }
 0x6fc   : > { %7642 = vrot.lane.b32.xlu1 %v7606_v15, %s13023_s25  ;;  %v7498_v15 = vld [vmem:[#allocation2 + $0xc0] sm:$0xff] }
 0x6fe   : > { %7644 = vrot.lane.b32.xlu0 %v7607_v34, %s13023_s25  ;;  %v7835_v34 = vld [vmem:[#allocation2 + $0xc8] sm:$0xf] }
 0x6ff   : > { %v7729_v35 = vld [vmem:[#allocation2 + $0x178] sm:$0xf] }
 0x700   : > { %7530 = vrot.lane.b32.xlu1 %v7494_v1, %s13024_s26 }
 0x702   : > { %7532 = vrot.lane.b32.xlu0 %v7495_v6, %s13024_s26  ;;  %v7722_v6 = vld [vmem:[#allocation2 + $0x140] sm:$0xff] }
 0x704   : > { %7978 = vrot.lane.b32.xlu1 %v16447_v62, %s13027_s29 }
 0x706   : > { %7866 = vrot.lane.b32.xlu0 %v7494_v1, %s13025_s27  ;;  %v7723_v1 = vld [vmem:[#allocation2 + $0x148] sm:$0xf] }
 0x708   : > { %7868 = vrot.lane.b32.xlu1 %v7831_v3, %s13025_s27  ;;  %v7613_v3 = vld [vmem:[#allocation2 + $0x58] sm:$0xf] }
 0x70a   : > { %7756 = vrot.lane.b32.xlu0 %v7719_v61, %s13026_s28  ;;  %v7612_v61 = vld [vmem:[#allocation2 + $0x50] sm:$0xff] }
 0x70c   : > { %7754 = vrot.lane.b32.xlu1 %v7718_v21, %s13026_s28  ;;  %v7501_v21 = vld [vmem:[#allocation2 + $0xd8] sm:$0xf] }
 0x70e   : > { %7648 = vrot.lane.b32.xlu0 %v7609_v39, %s13023_s25  ;;  %v7500_v39 = vld [vmem:[#allocation2 + $0xd0] sm:$0xff] }
 0x710   : > { %7646 = vrot.lane.b32.xlu1 %v7608_v13, %s13023_s25  ;;  %v7837_v13 = vld [vmem:[#allocation2 + $0xd8] sm:$0xf] }
 0x712   : > { %7536 = vrot.lane.b32.xlu0 %v7497_v27, %s13024_s26  ;;  %v7724_v27 = vld [vmem:[#allocation2 + $0x150] sm:$0xff] }
 0x714   : > { %7534 = vrot.lane.b32.xlu1 %v7496_v11, %s13024_s26 }
 0x716   : > { %7870 = vrot.lane.b32.xlu0 %v7496_v11, %s13025_s27  ;;  %v7725_v11 = vld [vmem:[#allocation2 + $0x158] sm:$0xf] }
 0x718   : > { %7982 = vrot.lane.b32.xlu1 %v16468_v10, %s13027_s29 }
 0x71a   : > { %7760 = vrot.lane.b32.xlu0 %v7721_v5, %s13026_s28  ;;  %v7614_v5 = vld [vmem:[#allocation2 + $0x60] sm:$0xff] }
 0x71c   : > { %7872 = vrot.lane.b32.xlu1 %v7833_v18, %s13025_s27  ;;  %v16660_v18 = vpop.permute.xlu0 %12599 }
 0x71e   : > { %7652 = vrot.lane.b32.xlu0 %v7611_v17, %s13023_s25  ;;  %v7615_v17 = vld [vmem:[#allocation2 + $0x68] sm:$0xf] }
 0x720   : > { %7758 = vrot.lane.b32.xlu1 %v7720_v60, %s13026_s28  ;;  %v16662_v60 = vpop.permute.xlu1 %12604 }
 0x722   : > { %7540 = vrot.lane.b32.xlu0 %v7499_v52, %s13024_s26  ;;  %v7502_v52 = vld [vmem:[#allocation2 + $0xe0] sm:$0xff] }
 0x724   : > { %7650 = vrot.lane.b32.xlu1 %v7610_v12, %s13023_s25  ;;  %v7503_v12 = vld [vmem:[#allocation2 + $0xe8] sm:$0xf] }
 0x726   : > { %7986 = vrot.lane.b32.xlu0 %v16503_v14, %s13027_s29 }
 0x728   : > { %7538 = vrot.lane.b32.xlu1 %v7498_v15, %s13024_s26 }
 0x72a   : > { %7876 = vrot.lane.b32.xlu0 %v7835_v34, %s13025_s27  ;;  %v16671_v34 = vpop.permute.xlu1 %12614 }
 0x72c   : > { %7874 = vrot.lane.b32.xlu1 %v7498_v15, %s13025_s27  ;;  %v16667_v15 = vpop.permute.xlu0 %12609 }
 0x72e   : > { %7764 = vrot.lane.b32.xlu0 %v7723_v1, %s13026_s28  ;;  %v7839_v1 = vld [vmem:[#allocation2 + $0xe8] sm:$0xf] }
 0x730   : > { %7762 = vrot.lane.b32.xlu1 %v7722_v6, %s13026_s28 }
 0x732   : > { %7656 = vrot.lane.b32.xlu0 %v7613_v3, %s13023_s25 }
 0x734   : > { %7654 = vrot.lane.b32.xlu1 %v7612_v61, %s13023_s25  ;;  %v7727_v61 = vld [vmem:[#allocation2 + $0x168] sm:$0xf] }
 0x736   : > { %7544 = vrot.lane.b32.xlu0 %v7501_v21, %s13024_s26  ;;  %v7726_v21 = vld [vmem:[#allocation2 + $0x160] sm:$0xff] }
 0x738   : > { %7542 = vrot.lane.b32.xlu1 %v7500_v39, %s13024_s26 }
 0x73a   : > { %7990 = vrot.lane.b32.xlu0 %v16548_v50, %s13027_s29 }
 0x73c   : > { %7878 = vrot.lane.b32.xlu1 %v7500_v39, %s13025_s27 }
 0x73e   : > { %7880 = vrot.lane.b32.xlu0 %v7837_v13, %s13025_s27 }
 0x740   : > { %7766 = vrot.lane.b32.xlu1 %v7724_v27, %s13026_s28  ;;  %v7617_v27 = vld [vmem:[#allocation2 + $0x78] sm:$0xf] }
 0x742   : > { %7768 = vrot.lane.b32.xlu0 %v7725_v11, %s13026_s28  ;;  %v7616_v11 = vld [vmem:[#allocation2 + $0x70] sm:$0xff] }
 0x744   : > { %7658 = vrot.lane.b32.xlu1 %v7614_v5, %s13023_s25 }
 0x746   : > { %7660 = vrot.lane.b32.xlu0 %v7615_v17, %s13023_s25 }
 0x748   : > { %7546 = vrot.lane.b32.xlu1 %v7502_v52, %s13024_s26 }
 0x74a   : > { %7548 = vrot.lane.b32.xlu0 %v7503_v12, %s13024_s26  ;;  %v7716_v12 = vld [vmem:[#allocation2 + $0x110] sm:$0xff] }
 0x74c   : > { %7994 = vrot.lane.b32.xlu1 %v16573_v36, %s13027_s29 }
 0x74e   : > { %7882 = vrot.lane.b32.xlu0 %v7502_v52, %s13025_s27  ;;  %v7715_v52 = vld [vmem:[#allocation2 + $0x108] sm:$0xf] }
 0x74f   : > { %v16675_v6 = vpop.permute.xlu0 %7636 }
 0x750   : > { %7884 = vrot.lane.b32.xlu1 %v7839_v1, %s13025_s27  ;;  %v16677_v3 = vpop.permute.xlu1 %7634  ;;  %v8175_v1 = vld [vmem:[#allocation2 + $0x6c] sm:$0xf] }
 0x752   : > { %7772 = vrot.lane.b32.xlu0 %v7727_v61, %s13026_s28  ;;  %v8177_v61 = vld [vmem:[#allocation2 + $0x7c] sm:$0xf] }
 0x753   : > { %v16681_v39 = vpop.permute.xlu0 %7524 }
 0x754   : > { %7770 = vrot.lane.b32.xlu1 %v7726_v21, %s13026_s28 }
 0x755   : > { %v16683_v13 = vpop.permute.xlu1 %7522 }
 0x756   : > { %7664 = vrot.lane.b32.xlu0 %v7617_v27, %s13023_s25  ;;  %v7717_v27 = vld [vmem:[#allocation2 + $0x118] sm:$0xf] }
 0x758   : > { %7662 = vrot.lane.b32.xlu1 %v7616_v11, %s13023_s25  ;;  %v16687_v5 = vpop.permute.xlu0 %7970  ;;  %v12618_v11 = vpack.i.bf16 %v8177_v61, %v8175_v1  ;;  %v7504_v1 = vld [vmem:[#allocation2 + $0xf0] sm:$0xff] }
 0x759   : > { %v16689_v17 = vpop.permute.xlu1 %7858 }
 0x75a   : > { %7748 = vrot.lane.b32.xlu0 %v7715_v52, %s13026_s28 }
 0x75c   : > { %7750 = vrot.lane.b32.xlu1 %v7716_v12, %s13026_s28  ;;  %v16693_v21 = vpop.permute.xlu0 %7860  ;;  %v8171_v12 = vld [vmem:[#allocation2 + $0x4c] sm:$0xf] }
 0x75d   : > { %19176 = vst [vmem:[#allocation121_spill] sm:$0xff] %v16693_v21  ;;  %v16695_v53 = vpop.permute.xlu1 %7746 }
 0x75e   : > { %19177 = vst [vmem:[#allocation122_spill] sm:$0xff] %v16695_v53  ;;  %7752 = vrot.lane.b32.xlu0 %v7717_v27, %s13026_s28  ;;  %v7505_v27 = vld [vmem:[#allocation2 + $0xf8] sm:$0xf]  ;;  %v8487_v53 = vld [vmem:[%s18800_s4 + $0x28] sm:$0xff] }
 0x760   : > { %8218 = vrot.lane.b32.xlu1 %v16557_v41, %s13028_s7  ;;  %v16700_v8 = vpop.permute.xlu0 %7640  ;;  %v12623_v41 = vpack.i.bf16 %v8173_v51, %v8171_v12 }
 0x762   : > { %v16702_v42 = vpop.permute.xlu1 %7638  ;;  %12619 = vrot.lane.b32.xlu0 %v12618_v11, %s13028_s7  ;;  %v8169_v11 = vld [vmem:[#allocation2 + $0x3c] sm:$0xf] }
 0x764   : > { %8222 = vrot.lane.b32.xlu1 %v16582_v63, %s13028_s7  ;;  %v16707_v52 = vpop.permute.xlu0 %7528  ;;  %v8167_v63 = vld [vmem:[#allocation2 + $0x2c] sm:$0xf] }
 0x766   : > { %v16709_v56 = vpop.permute.xlu1 %7526  ;;  %7552 = vrot.lane.b32.xlu0 %v7505_v27, %s13024_s26  ;;  %v12628_v27 = vpack.i.bf16 %v8169_v11, %v8167_v63  ;;  %v8165_v11 = vld [vmem:[#allocation2 + $0x1c] sm:$0xf] }
 0x768   : > { %7550 = vrot.lane.b32.xlu1 %v7504_v1, %s13024_s26  ;;  %v16713_v61 = vpop.permute.xlu0 %7974 }
 0x76a   : > { %v16715_v59 = vpop.permute.xlu1 %7862  ;;  %8210 = vrot.lane.b32.xlu0 %v16492_v20, %s13028_s7 }
 0x76b   : > { %19178 = vst [vmem:[#allocation123_spill] sm:$0xff] %v16715_v59 }
 0x76c   : > { %12624 = vrot.lane.b32.xlu1 %v12623_v41, %s13028_s7  ;;  %v16720_v46 = vpop.permute.xlu0 %7864 }
 0x76d   : > { %19179 = vst [vmem:[#allocation124_spill] sm:$0xff] %v16720_v46 }
 0x76e   : > { %v16722_v57 = vpop.permute.xlu1 %7642  ;;  %8214 = vrot.lane.b32.xlu0 %v16527_v58, %s13028_s7  ;;  %v7841_v58 = vld [vmem:[#allocation2 + $0xf8] sm:$0xf] }
 0x770   : > { %8202 = vrot.lane.b32.xlu1 %v16426_v47, %s13028_s7  ;;  %v16728_v51 = vpop.permute.xlu0 %7644  ;;  %v8163_v47 = vld [vmem:[#allocation2 + $0xc] sm:$0xf] }
 0x771   : > { %v12633_v25 = vpack.i.bf16 %v8165_v11, %v8163_v47  ;;  %v8287_v47 = vld [vmem:[#allocation2 + $0x16c] sm:$0xf]  ;;  %v8289_v11 = vld [vmem:[#allocation2 + $0x17c] sm:$0xf] }
 0x772   : > { %v16730_v12 = vpop.permute.xlu1 %7530  ;;  %12629 = vrot.lane.b32.xlu0 %v12628_v27, %s13028_s7  ;;  %v19182_v27 = vld [vmem:[#allocation106_spill] sm:$0xff] }
 0x774   : > { %7998 = vrot.lane.b32.xlu1 %v16597_v30, %s13027_s29  ;;  %v16735_v20 = vpop.permute.xlu0 %7532 }
 0x776   : > { %v16737_v41 = vpop.permute.xlu1 %7978  ;;  %7886 = vrot.lane.b32.xlu0 %v7504_v1, %s13025_s27 }
 0x778   : > { %7888 = vrot.lane.b32.xlu1 %v7841_v58, %s13025_s27  ;;  %v16741_v63 = vpop.permute.xlu0 %7866  ;;  %v12638_v58 = vpack.i.bf16 %v8065_v2, %v8063_v29  ;;  %v7728_v2 = vld [vmem:[#allocation2 + $0x170] sm:$0xff]  ;;  %v12643_v29 = vpack.i.bf16 %v8289_v11, %v8287_v47  ;;  %v8283_v47 = vld [vmem:[#allocation2 + $0x14c] sm:$0xf]  ;;  %v8285_v11 = vld [vmem:[#allocation2 + $0x15c] sm:$0xf] }
 0x779   : > { %19180 = vst [vmem:[#allocation125_spill] sm:$0xff] %v16741_v63 }
 0x77a   : > { %v16743_v45 = vpop.permute.xlu1 %7868  ;;  %8194 = vrot.lane.b32.xlu0 %v19182_v27, %s13028_s7 }
 0x77b   : > { %19181 = vst [vmem:[#allocation126_spill] sm:$0xff] %v16743_v45  ;;  %v7669_v45 = vrot.slane %v16700_v8, 4 }
 0x77c   : > { %8206 = vrot.lane.b32.xlu1 %v16456_v37, %s13028_s7  ;;  %v16749_v49 = vpop.permute.xlu0 %7756 }
 0x77d   : > { %19183 = vst [vmem:[#allocation106_spill] sm:$0xff] %v16749_v49 }
 0x77e   : > { %v16751_v1 = vpop.permute.xlu1 %7754  ;;  %8198 = vrot.lane.b32.xlu0 %v16396_v7, %s13028_s7  ;;  %v8061_v7 = vld [vmem:[#allocation2 + $0xdc] sm:$0xf] }
 0x77f   : > { %19184 = vst [vmem:[#allocation127_spill] sm:$0xff] %v16751_v1 }
 0x780   : > { %12634 = vrot.lane.b32.xlu1 %v12633_v25, %s13028_s7  ;;  %v16756_v31 = vpop.permute.xlu0 %7648  ;;  %v8059_v25 = vld [vmem:[#allocation2 + $0xcc] sm:$0xf] }
 0x782   : > { %v16758_v22 = vpop.permute.xlu1 %7646  ;;  %12639 = vrot.lane.b32.xlu0 %v12638_v58, %s13029_s8 }
 0x784   : > { %8106 = vrot.lane.b32.xlu1 %v16571_v54, %s13029_s8  ;;  %v16763_v37 = vpop.permute.xlu0 %7536  ;;  %v12648_v54 = vpack.i.bf16 %v8061_v7, %v8059_v25  ;;  %v8055_v25 = vld [vmem:[#allocation2 + $0xac] sm:$0xf]  ;;  %v8057_v7 = vld [vmem:[#allocation2 + $0xbc] sm:$0xf] }
 0x785   : > { %v12658_v43 = vpack.i.bf16 %v8057_v7, %v8055_v25  ;;  %v8053_v25 = vld [vmem:[#allocation2 + $0x9c] sm:$0xf] }
 0x786   : > { %v16765_v27 = vpop.permute.xlu1 %7534  ;;  %7776 = vrot.lane.b32.xlu0 %v7729_v35, %s13026_s28 }
 0x788   : > { %7774 = vrot.lane.b32.xlu1 %v7728_v2, %s13026_s28  ;;  %v16769_v4 = vpop.permute.xlu0 %7870 }
 0x789   : > { %19185 = vst [vmem:[#allocation128_spill] sm:$0xff] %v16769_v4  ;;  %v11567_v4 = vld [vmem:[%s18798_s2 + $0xc8] sm:$0xff] }
 0x78a   : > { %v16771_v58 = vpop.permute.xlu1 %7982  ;;  %8330 = vrot.lane.b32.xlu0 %v16573_v36, %s13030_s9  ;;  %v12928_v36 = vld [vmem:[%s18799_s3 + $0x4] ss:$20 sps:$4 sm:$0xff]  }
 0x78b   : > { %9034 = vmatprep.mubr.bf16.mxu1 %v12928_v36  ;;  %v8281_v36 = vld [vmem:[#allocation2 + $0x13c] sm:$0xf] }
 0x78c   : > { %12644 = vrot.lane.b32.xlu1 %v12643_v29, %s13030_s9  ;;  %v16776_v19 = vpop.permute.xlu0 %7760  ;;  %v12653_v29 = vpack.i.bf16 %v8285_v11, %v8283_v47  ;;  %v8279_v11 = vld [vmem:[#allocation2 + $0x12c] sm:$0xf] }
 0x78d   : > { %19186 = vst [vmem:[#allocation129_spill] sm:$0xff] %v16776_v19 }
 0x78e   : > { %v16778_v24 = vpop.permute.xlu1 %7872  ;;  %12649 = vrot.lane.b32.xlu0 %v12648_v54, %s13029_s8 }
 0x790   : > { %8098 = vrot.lane.b32.xlu1 %v16501_v0, %s13029_s8  ;;  %v16783_v35 = vpop.permute.xlu0 %7652 }
 0x792   : > { %v16785_v2 = vpop.permute.xlu1 %7758  ;;  %8322 = vrot.lane.b32.xlu0 %v16503_v14, %s13030_s9 }
 0x793   : > { %19187 = vst [vmem:[#allocation130_spill] sm:$0xff] %v16785_v2  ;;  %v8484_v2 = vld [vmem:[%s18800_s4 + $0x10] sm:$0xff] }
 0x794   : > { %8102 = vrot.lane.b32.xlu1 %v16546_v38, %s13029_s8  ;;  %v16794_v0 = vpop.permute.xlu0 %7540 }
 0x796   : > { %v16796_v54 = vpop.permute.xlu1 %7650  ;;  %8326 = vrot.lane.b32.xlu0 %v16548_v50, %s13030_s9 }
 0x798   : > { %12654 = vrot.lane.b32.xlu1 %v12653_v29, %s13030_s9  ;;  %v16801_v14 = vpop.permute.xlu0 %7986 }
 0x79a   : > { %v16803_v23 = vpop.permute.xlu1 %7538  ;;  %12659 = vrot.lane.b32.xlu0 %v12658_v43, %s13029_s8  ;;  %v12663_v43 = vpack.i.bf16 %v8281_v36, %v8279_v11  ;;  %v8277_v36 = vld [vmem:[#allocation2 + $0x11c] sm:$0xf] }
 0x79c   : > { %8090 = vrot.lane.b32.xlu1 %v16445_v16, %s13029_s8  ;;  %v16808_v38 = vpop.permute.xlu0 %7876  ;;  %v8051_v16 = vld [vmem:[#allocation2 + $0x8c] sm:$0xf] }
 0x79e   : > { %v16810_v47 = vpop.permute.xlu1 %7874  ;;  %8314 = vrot.lane.b32.xlu0 %v16447_v62, %s13030_s9 }
 0x7a0   : > { %8094 = vrot.lane.b32.xlu1 %v16466_v48, %s13029_s8  ;;  %v16816_v50 = vpop.permute.xlu0 %7764  ;;  %v12668_v48 = vpack.i.bf16 %v8053_v25, %v8051_v16  ;;  %v8052_v25 = vld [vmem:[#allocation2 + $0x94] sm:$0xff] }
 0x7a1   : > { %19188 = vst [vmem:[#allocation131_spill] sm:$0xff] %v16816_v50 }
 0x7a2   : > { %v16818_v29 = vpop.permute.xlu1 %7762  ;;  %8318 = vrot.lane.b32.xlu0 %v16468_v10, %s13030_s9  ;;  %v12940_v10 = vld [vmem:[%s18799_s3 + $0xc] ss:$20 sps:$4 sm:$0xff]  }
 0x7a3   : > { %19189 = vst [vmem:[#allocation132_spill] sm:$0xff] %v16818_v29  ;;  %9107 = vmatprep.mubr.bf16.mxu0 %v12940_v10  ;;  %v11573_v10 = vld [vmem:[%s18798_s2 + $0xf8] sm:$0xff] }
 0x7a4   : > { %8110 = vrot.lane.b32.xlu1 %v16595_v28, %s13029_s8  ;;  %v16824_v7 = vpop.permute.xlu0 %7656  ;;  %v8050_v28 = vld [vmem:[#allocation2 + $0x84] sm:$0xff]  ;;  %v11569_v29 = vld [vmem:[%s18798_s2 + $0xd8] sm:$0xff] }
 0x7a5   : > { %v7677_v19 = vrot.slane %v16824_v7, 4  ;;  %v7672_v7 = vrot.slane %v16758_v22, 4 }
 0x7a6   : > { %v16826_v62 = vpop.permute.xlu1 %7654  ;;  %8334 = vrot.lane.b32.xlu0 %v16597_v30, %s13030_s9  ;;  %v8275_v30 = vld [vmem:[#allocation2 + $0x10c] sm:$0xf] }
 0x7a7   : > { %v12673_v55 = vpack.i.bf16 %v8277_v36, %v8275_v30  ;;  %v8489_v36 = vld [vmem:[%s18800_s4 + $0x38] sm:$0xff]  ;;  %v7676_v1 = vrot.slane %v16826_v62, 4 }
 0x7a8   : > { %12664 = vrot.lane.b32.xlu1 %v12663_v43, %s13030_s9  ;;  %v16831_v40 = vpop.permute.xlu0 %7544  ;;  %v8274_v43 = vld [vmem:[#allocation2 + $0x104] sm:$0xff] }
 0x7aa   : > { %v16833_v9 = vpop.permute.xlu1 %7542  ;;  %12669 = vrot.lane.b32.xlu0 %v12668_v48, %s13029_s8 }
 0x7ac   : > { %8082 = vrot.lane.b32.xlu1 %v8050_v28, %s13029_s8  ;;  %v16840_v11 = vpop.permute.xlu0 %7990 }
 0x7ae   : > { %v16842_v16 = vpop.permute.xlu1 %7878  ;;  %8306 = vrot.lane.b32.xlu0 %v8274_v43, %s13030_s9  ;;  %v11572_v43 = vld [vmem:[%s18798_s2 + $0xf0] sm:$0xff] }
 0x7b0   : > { %8086 = vrot.lane.b32.xlu1 %v8052_v25, %s13029_s8  ;;  %v16846_v32 = vpop.permute.xlu0 %7880 }
 0x7b2   : > { %v16848_v48 = vpop.permute.xlu1 %7766  ;;  %8310 = vrot.lane.b32.xlu0 %v8276_v33, %s13030_s9 }
 0x7b3   : > { %19190 = vst [vmem:[#allocation133_spill] sm:$0xff] %v16848_v48 }
 0x7b4   : > { %12674 = vrot.lane.b32.xlu1 %v12673_v55, %s13030_s9  ;;  %v16855_v28 = vpop.permute.xlu0 %7768  ;;  %v8488_v55 = vld [vmem:[%s18800_s4 + $0x30] sm:$0xff] }
 0x7b5   : > { %19191 = vst [vmem:[#allocation134_spill] sm:$0xff] %v16855_v28 }
 0x7b6   : > { %v7659_v30 = vpop.permute.xlu1 %7658  ;;  %3967 = vperm.xlu0 %12436, %v11573_v10   ;;  %v11570_v10 = vld [vmem:[%s18798_s2 + $0xe0] sm:$0xff] }
 0x7b8   : > { %3962 = vperm.xlu1 %12437, %v11572_v43   ;;  %v7661_v33 = vpop.permute.xlu0 %7660 }
 0x7b9   : > { %v7679_v28 = vrot.slane %v7661_v33, 4 }
 0x7ba   : > { %v16866_v25 = vpop.permute.xlu1 %7546  ;;  %8527 = vperm.xlu0 %12436, %v8489_v36  }
 0x7bc   : > { %8522 = vperm.xlu1 %12437, %v8488_v55   ;;  %v16871_v26 = vpop.permute.xlu0 %7548  ;;  %v8486_v55 = vld [vmem:[%s18800_s4 + $0x20] sm:$0xff] }
 0x7be   : > { %v16876_v43 = vpop.permute.xlu1 %7994  ;;  %3957 = vperm.xlu0 %12436, %v11571_v44  }
 0x7c0   : > { %3952 = vperm.xlu1 %12437, %v11570_v10   ;;  %v16881_v36 = vpop.permute.xlu0 %7882  ;;  %v11568_v10 = vld [vmem:[%s18798_s2 + $0xd0] sm:$0xff] }
 0x7c2   : > { %v16886_v48 = vpop.permute.xlu1 %7884  ;;  %8517 = vperm.xlu0 %12436, %v8487_v53   ;;  %v8485_v53 = vld [vmem:[%s18800_s4 + $0x18] sm:$0xff] }
 0x7c4   : > { %8512 = vperm.xlu1 %12437, %v8486_v55   ;;  %v16891_v44 = vpop.permute.xlu0 %7772  ;;  %v7674_v55 = vrot.slane %v16796_v54, 4 }
 0x7c5   : > { %19192 = vst [vmem:[#allocation135_spill] sm:$0xff] %v16891_v44  ;;  %v7678_v44 = vrot.slane %v7659_v30, 4 }
 0x7c6   : > { %v16896_v50 = vpop.permute.xlu1 %7770  ;;  %3947 = vperm.xlu0 %12436, %v11569_v29   ;;  %v7675_v29 = vrot.slane %v16783_v35, 4 }
 0x7c7   : > { %19193 = vst [vmem:[#allocation136_spill] sm:$0xff] %v16896_v50  ;;  %v7673_v50 = vrot.slane %v16756_v31, 4  ;;  %v7694_v46 = vsel %vm619_vm4, %v7678_v44, %v7679_v28  ;;  %v7671_v31 = vrot.slane %v16728_v51, 4  ;;  %v7670_v44 = vrot.slane %v16722_v57, 4 }
 0x7c8   : > { %3942 = vperm.xlu1 %12437, %v11568_v10   ;;  %v7665_v49 = vpop.permute.xlu0 %7664  ;;  %v7692_v10 = vsel %vm619_vm4, %v7676_v1, %v7677_v19  ;;  %v11566_v19 = vld [vmem:[%s18798_s2 + $0xc0] sm:$0xff]  ;;  %v7668_v1 = vrot.slane %v16702_v42, 4  ;;  %v7695_v28 = vsel %vm734_vm5, %v7659_v30, %v7694_v46  ;;  %v7667_v46 = vrot.slane %v16675_v6, 4 }
 0x7c9   : > { %v7681_v59 = vrot.slane %v7665_v49, 4  ;;  %v7690_v49 = vsel %vm619_vm4, %v7674_v55, %v7675_v29  ;;  %v7686_v30 = vsel %vm619_vm4, %v7670_v44, %v7671_v31  ;;  %v12607_v29 = vunpack.i.h.bf16 %v16662_v60 }
 0x7ca   : > { %v7663_v33 = vpop.permute.xlu1 %7662  ;;  %8507 = vperm.xlu0 %12436, %v8485_v53   ;;  %v7691_v55 = vsel %vm734_vm5, %v16796_v54, %v7690_v49  ;;  %v12602_v54 = vunpack.i.h.bf16 %v16660_v18  ;;  %v12606_v31 = vunpack.i.l.bf16 %v16662_v60  ;;  %v7684_v49 = vsel %vm619_vm4, %v7668_v1, %v7669_v45 }
 0x7cb   : > { %v7680_v21 = vrot.slane %v7663_v33, 4  ;;  %v16965_v60 = vrot.slane %v12607_v29, 4  ;;  %v7685_v45 = vsel %vm734_vm5, %v16702_v42, %v7684_v49  ;;  %v7560_v29 = vrot.slane %v16765_v27, 4 }
 0x7cc   : > { %8502 = vperm.xlu1 %12437, %v8484_v2   ;;  %v16919_v35 = vpop.permute.xlu0 %7748  ;;  %v7693_v2 = vsel %vm734_vm5, %v16826_v62, %v7692_v10  ;;  %v8483_v62 = vld [vmem:[%s18800_s4 + $0x8] sm:$0xff] }
 0x7cd   : > { %v7696_v63 = vsel %vm619_vm4, %v7680_v21, %v7681_v59  ;;  %v7688_v59 = vsel %vm619_vm4, %v7672_v7, %v7673_v50  ;;  %v11959_v50 = vcombine.high %v7691_v55, %v7693_v2  ;;  %v12601_v7 = vunpack.i.l.bf16 %v16660_v18 }
 0x7ce   : > { %v7697_v8 = vsel %vm734_vm5, %v7663_v33, %v7696_v63  ;;  %v16929_v51 = vpop.permute.xlu1 %7750  ;;  %3937 = vperm.xlu0 %12436, %v11567_v4   ;;  %v7666_v63 = vrot.slane %v16677_v3, 4  ;;  %v8482_v4 = vld [vmem:[%s18800_s4] sm:$0xff]  ;;  %v7689_v6 = vsel %vm734_vm5, %v16758_v22, %v7688_v59  ;;  %v11958_v18 = vcombine.low %v7691_v55, %v7693_v2 }
 0x7cf   : > { %v11960_v21 = vcombine.low %v7695_v28, %v7697_v8  ;;  %v11961_v53 = vcombine.high %v7695_v28, %v7697_v8  ;;  %v7687_v28 = vsel %vm734_vm5, %v16722_v57, %v7686_v30  ;;  %v16961_v59 = vrot.slane %v12602_v54, 4 }
 0x7d0   : > { %3932 = vperm.xlu1 %12437, %v11566_v19   ;;  %v16941_v33 = vpop.permute.xlu0 %7752  ;;  %v12612_v19 = vunpack.i.h.bf16 %v16667_v15  ;;  %v7682_v8 = vsel %vm619_vm4, %v7666_v63, %v7667_v46  ;;  %v11957_v22 = vcombine.high %v7687_v28, %v7689_v6  ;;  %v16971_v57 = vrot.slane %v12606_v31, 4 }
 0x7d1   : > { %9002 = vmatprep.subr.bf16.mxu1 %v11961_v53  ;;  %v7565_v2 = vrot.slane %v16831_v40, 4  ;;  %v7564_v53 = vrot.slane %v16833_v9, 4  ;;  %v7567_v55 = vrot.slane %v16871_v26, 4  ;;  %v12611_v46 = vunpack.i.l.bf16 %v16667_v15 }
 0x7d2   : > { %9003 = vmatpush1.bf16.msra.mxu1 %v11960_v21  ;;  %v16951_v10 = vpop.permute.xlu1 %8218  ;;  %8497 = vperm.xlu0 %12436, %v8483_v62   ;;  %v16963_v21 = vrot.slane %v12601_v7, 4  ;;  %v16976_v62 = vrot.slane %v12612_v19, 4  ;;  %v7683_v63 = vsel %vm734_vm5, %v16677_v3, %v7682_v8  ;;  %v11956_v42 = vcombine.low %v7687_v28, %v7689_v6 }
 0x7d3   : > { %9004 = vmatprep.subr.bf16.mxu1 %v11959_v50  ;;  %v7557_v30 = vrot.slane %v16707_v52, 4  ;;  %v7562_v50 = vrot.slane %v16803_v23, 4  ;;  %v11955_v54 = vcombine.high %v7683_v63, %v7685_v45  ;;  %v7556_v7 = vrot.slane %v16709_v56, 4 }
 0x7d4   : > { %8492 = vperm.xlu1 %12437, %v8482_v4   ;;  %v16959_v44 = vpop.permute.xlu0 %12619  ;;  %v7566_v4 = vrot.slane %v16866_v25, 4  ;;  %v7561_v26 = vrot.slane %v16763_v37, 4  ;;  %v7563_v3 = vrot.slane %v16794_v0, 4  ;;  %v7580_v6 = vsel %vm619_vm4, %v7564_v53, %v7565_v2 }
 0x7d5   : > { %v12617_v19 = vunpack.i.h.bf16 %v16671_v34  ;;  %v7555_v28 = vrot.slane %v16681_v39, 4  ;;  %v11954_v37 = vcombine.low %v7683_v63, %v7685_v45  ;;  %v12616_v8 = vunpack.i.l.bf16 %v16671_v34 }
 0x7d6   : > { %9005 = vmatpush1.bf16.msra.mxu1 %v11958_v18  ;;  %v16969_v1 = vpop.permute.xlu1 %8222  ;;  %v7582_v52 = vsel %vm619_vm4, %v7566_v4, %v7567_v55  ;;  %v7554_v18 = vrot.slane %v16683_v13, 4  ;;  %v7572_v53 = vsel %vm619_vm4, %v7556_v7, %v7557_v30  ;;  %v7581_v55 = vsel %vm621_vm6, %v16833_v9, %v7580_v6 }
 0x7d7   : > { %9006 = vmatprep.subr.bf16.mxu1 %v11957_v22  ;;  %v7559_v22 = vrot.slane %v16735_v20, 4  ;;  %v7583_v39 = vsel %vm621_vm6, %v16866_v25, %v7582_v52  ;;  %v7558_v20 = vrot.slane %v16730_v12, 4  ;;  %v7576_v63 = vsel %vm619_vm4, %v7560_v29, %v7561_v26 }
 0x7d8   : > { %v7553_v40 = vpop.permute.xlu0 %7552  ;;  %v7570_v30 = vsel %vm619_vm4, %v7554_v18, %v7555_v28  ;;  %v17012_v7 = vrot.slane %v12616_v8, 4  ;;  %v8004_v25 = vrot.slane %v16713_v61, 4  ;;  %v7573_v26 = vsel %vm621_vm6, %v16709_v56, %v7572_v53 }
 0x7d9   : > { %v7569_v31 = vrot.slane %v7553_v40, 4  ;;  %v8007_v40 = vrot.slane %v12611_v46, 4  ;;  %v8006_v46 = vrot.slane %v16737_v41, 4  ;;  %v7577_v29 = vsel %vm621_vm6, %v16765_v27, %v7576_v63 }
 0x7da   : > { %9007 = vmatpush1.bf16.msra.mxu1 %v11956_v42  ;;  %v7551_v15 = vpop.permute.xlu1 %7550  ;;  %v7578_v42 = vsel %vm619_vm4, %v7562_v50, %v7563_v3  ;;  %v7571_v52 = vsel %vm621_vm6, %v16683_v13, %v7570_v30  ;;  %v8014_v28 = vrot.slane %v16876_v43, 4  ;;  %v8008_v27 = vrot.slane %v16771_v58, 4 }
 0x7db   : > { %v7568_v49 = vrot.slane %v7551_v15, 4  ;;  %9008 = vmatprep.subr.bf16.mxu1 %v11955_v54  ;;  %v8005_v54 = vrot.slane %v12617_v19, 4  ;;  %v7579_v9 = vsel %vm621_vm6, %v16803_v23, %v7578_v42  ;;  %v8012_v23 = vrot.slane %v16840_v11, 4 }
 0x7dc   : > { %v16997_v2 = vpop.permute.xlu0 %8210  ;;  %v11951_v3 = vcombine.high %v7579_v9, %v7581_v55  ;;  %v7890_v19 = vrot.slane %v16689_v17, 4  ;;  %v8010_v18 = vrot.slane %v16801_v14, 4  ;;  %v11946_v8 = vcombine.low %v7571_v52, %v7573_v26 }
 0x7dd   : > { %v7584_v0 = vsel %vm619_vm4, %v7568_v49, %v7569_v31  ;;  %v7574_v31 = vsel %vm619_vm4, %v7558_v20, %v7559_v22  ;;  %v8002_v49 = vrot.slane %v16687_v5, 4  ;;  %v17036_v22 = vsel %vm619_vm4, %v8004_v25, %v8005_v54 }
 0x7de   : > { %v7585_v45 = vsel %vm621_vm6, %v7551_v15, %v7584_v0  ;;  %9009 = vmatpush1.bf16.msra.mxu1 %v11954_v37  ;;  %v17005_v34 = vpop.permute.xlu1 %12624  ;;  %v7575_v56 = vsel %vm621_vm6, %v16730_v12, %v7574_v31  ;;  %v11950_v37 = vcombine.low %v7579_v9, %v7581_v55  ;;  %v11947_v0 = vcombine.high %v7571_v52, %v7573_v26 }
 0x7df   : > { %v11952_v50 = vcombine.low %v7583_v39, %v7585_v45  ;;  %v11953_v4 = vcombine.high %v7583_v39, %v7585_v45  ;;  %v11949_v42 = vcombine.high %v7575_v56, %v7577_v29  ;;  %v8022_v53 = vsel %vm619_vm4, %v8006_v46, %v8007_v40 }
 0x7e0   : > { %v17016_v15 = vpop.permute.xlu0 %8214  ;;  %v11948_v39 = vcombine.low %v7575_v56, %v7577_v29  ;;  %v8028_v45 = vsel %vm619_vm4, %v8012_v23, %v16965_v60  ;;  %v7901_v12 = vrot.slane %v16846_v32, 4  ;;  %v8030_v55 = vsel %vm619_vm4, %v8014_v28, %v16963_v21  ;;  %v19194_v29 = vld [vmem:[#allocation125_spill] sm:$0xff]  ;;  %v19196_v28 = vld [vmem:[#allocation128_spill] sm:$0xff] }
 0x7e1   : > { %9010 = vmatprep.subr.bf16.mxu1 %v11953_v4  ;;  %v7902_v63 = vrot.slane %v16881_v36, 4  ;;  %v8024_v40 = vsel %vm619_vm4, %v8008_v27, %v16976_v62  ;;  %v7897_v54 = vrot.slane %v16778_v24, 4  ;;  %v8026_v60 = vsel %vm619_vm4, %v8010_v18, %v16971_v57 }
 0x7e2   : > { %9011 = vmatpush1.bf16.msra.mxu1 %v11952_v50  ;;  %v17024_v6 = vpop.permute.xlu1 %8202  ;;  %v7903_v50 = vrot.slane %v16886_v48, 4  ;;  %v7900_v32 = vrot.slane %v16842_v16, 4  ;;  %v7899_v30 = vrot.slane %v16808_v38, 4  ;;  %v7898_v21 = vrot.slane %v16810_v47, 4 }
 0x7e3   : > { %9012 = vmatprep.subr.bf16.mxu1 %v11951_v3  ;;  %v8029_v9 = vsel %vm1073_vm9, %v16840_v11, %v8028_v45  ;;  %v8031_v24 = vsel %vm1073_vm9, %v16876_v43, %v8030_v55  ;;  %v7894_v23 = vrot.slane %v19194_v29, 4  ;;  %v7896_v56 = vrot.slane %v19196_v28, 4  ;;  %v19198_v55 = vld [vmem:[#allocation124_spill] sm:$0xff] }
 0x7e4   : > { %v17038_v13 = vpop.permute.xlu0 %12629  ;;  %v7916_v62 = vsel %vm619_vm4, %v7900_v32, %v7901_v12  ;;  %v7918_v38 = vsel %vm619_vm4, %v7902_v63, %v7903_v50  ;;  %v8027_v43 = vsel %vm1073_vm9, %v16801_v14, %v8026_v60  ;;  %v8025_v27 = vsel %vm1073_vm9, %v16771_v58, %v8024_v40 }
 0x7e5   : > { %v7914_v18 = vsel %vm619_vm4, %v7898_v21, %v7899_v30  ;;  %v7919_v14 = vsel %vm960_vm7, %v16881_v36, %v7918_v38  ;;  %v7917_v58 = vsel %vm960_vm7, %v16842_v16, %v7916_v62  ;;  %v7893_v63 = vrot.slane %v19198_v55, 4  ;;  %v19199_v16 = vld [vmem:[#allocation123_spill] sm:$0xff] }
 0x7e6   : > { %9013 = vmatpush1.bf16.msra.mxu1 %v11950_v37  ;;  %v7999_v20 = vpop.permute.xlu1 %7998  ;;  %v7912_v50 = vsel %vm619_vm4, %v7896_v56, %v7897_v54  ;;  %v8023_v36 = vsel %vm1073_vm9, %v16737_v41, %v8022_v53  ;;  %v7915_v60 = vsel %vm960_vm7, %v16810_v47, %v7914_v18  ;;  %v11990_v32 = vcombine.low %v8027_v43, %v8029_v9  ;;  %v19204_v56 = vld [vmem:[#allocation129_spill] sm:$0xff] }
 0x7e7   : > { %v8016_v4 = vrot.slane %v7999_v20, 4  ;;  %9014 = vmatprep.subr.bf16.mxu1 %v11949_v42  ;;  %v7892_v30 = vrot.slane %v19199_v16, 4  ;;  %v8021_v41 = vsel %vm1073_vm9, %v16713_v61, %v17036_v22  ;;  %v11988_v62 = vcombine.low %v8023_v36, %v8025_v27  ;;  %v19200_v61 = vld [vmem:[#allocation130_spill] sm:$0xff] }
 0x7e8   : > { %v7887_v25 = vpop.permute.xlu0 %7886  ;;  %v7784_v22 = vrot.slane %v19200_v61, 4 }
 0x7e9   : > { %v8032_v48 = vsel %vm619_vm4, %v8016_v4, %v16961_v59  ;;  %v7904_v31 = vrot.slane %v7887_v25, 4  ;;  %v19195_v59 = vld [vmem:[#allocation126_spill] sm:$0xff]  ;;  %v7908_v53 = vsel %vm619_vm4, %v7892_v30, %v7893_v63 }
 0x7ea   : > { %v8033_v57 = vsel %vm1073_vm9, %v7999_v20, %v8032_v48  ;;  %9015 = vmatpush1.bf16.msra.mxu1 %v11948_v39  ;;  %v7889_v3 = vpop.permute.xlu1 %7888  ;;  %v7895_v52 = vrot.slane %v19195_v59, 4  ;;  %v19197_v39 = vld [vmem:[#allocation121_spill] sm:$0xff]  ;;  %v11975_v48 = vcombine.high %v7915_v60, %v7917_v58 }
 0x7eb   : > { %v11992_v26 = vcombine.low %v8031_v24, %v8033_v57  ;;  %v7905_v46 = vrot.slane %v7889_v3, 4  ;;  %9016 = vmatprep.subr.bf16.mxu1 %v11947_v0  ;;  %v11993_v11 = vcombine.high %v8031_v24, %v8033_v57  ;;  %v11991_v0 = vcombine.high %v8027_v43, %v8029_v9 }
 0x7ec   : > { %v17074_v42 = vpop.permute.xlu0 %8194  ;;  %v7891_v45 = vrot.slane %v19197_v39, 4  ;;  %v7910_v21 = vsel %vm619_vm4, %v7894_v23, %v7895_v52  ;;  %v19202_v23 = vld [vmem:[#allocation134_spill] sm:$0xff]  ;;  %v19203_v52 = vld [vmem:[#allocation127_spill] sm:$0xff]  ;;  %v7785_v43 = vrot.slane %v19204_v56, 4  ;;  %v19217_v56 = vld [vmem:[#allocation117_spill] sm:$0xff] }
 0x7ed   : > { %v7920_v37 = vsel %vm619_vm4, %v7904_v31, %v7905_v46  ;;  %9075 = vmatprep.subr.bf16.mxu0 %v11993_v11  ;;  %v7911_v24 = vsel %vm960_vm7, %v19194_v29, %v7910_v21  ;;  %v19201_v46 = vld [vmem:[#allocation106_spill] sm:$0xff]  ;;  %v7789_v59 = vrot.slane %v19202_v23, 4  ;;  %v7909_v29 = vsel %vm960_vm7, %v19199_v16, %v7908_v53 }
 0x7ee   : > { %9017 = vmatpush1.bf16.msra.mxu1 %v11946_v8  ;;  %9076 = vmatpush1.bf16.msra.mxu0 %v11992_v26  ;;  %v17077_v12 = vpop.permute.xlu1 %8206  ;;  %v7921_v20 = vsel %vm960_vm7, %v7887_v25, %v7920_v37  ;;  %v8018_v8 = vsel %vm619_vm4, %v8002_v49, %v17012_v7  ;;  %v11989_v25 = vcombine.high %v8023_v36, %v8025_v27  ;;  %v7783_v11 = vrot.slane %v19201_v46, 4  ;;  %v19205_v27 = vld [vmem:[#allocation135_spill] sm:$0xff]  ;;  %v19206_v37 = vld [vmem:[#allocation136_spill] sm:$0xff]  ;;  %v19210_v16 = vld [vmem:[#allocation122_spill] sm:$0xff] }
 0x7ef   : > { %9077 = vmatprep.subr.bf16.mxu0 %v11991_v0  ;;  %v11976_v4 = vcombine.low %v7919_v14, %v7921_v20  ;;  %v11977_v40 = vcombine.high %v7919_v14, %v7921_v20  ;;  %v7906_v7 = vsel %vm619_vm4, %v7890_v19, %v7891_v45  ;;  %v7913_v49 = vsel %vm960_vm7, %v19196_v28, %v7912_v50  ;;  %v19207_v0 = vld [vmem:[#allocation131_spill] sm:$0xff]  ;;  %v19208_v45 = vld [vmem:[#allocation132_spill] sm:$0xff]  ;;  %v19209_v20 = vld [vmem:[#allocation133_spill] sm:$0xff] }
 0x7f0   : > { %v17096_v54 = vpop.permute.xlu0 %8198  ;;  %v8019_v9 = vsel %vm1073_vm9, %v16687_v5, %v8018_v8  ;;  %v11974_v19 = vcombine.low %v7915_v60, %v7917_v58  ;;  %v11973_v31 = vcombine.high %v7911_v24, %v7913_v49  ;;  %v7907_v38 = vsel %vm960_vm7, %v16689_v17, %v7906_v7  ;;  %v19212_v7 = vld [vmem:[#allocation101_spill] sm:$0xff] }
 0x7f1   : > { %9018 = vmatprep.subr.bf16.mxu1 %v11977_v40  ;;  %v11987_v3 = vcombine.high %v8019_v9, %v8021_v41  ;;  %v11986_v26 = vcombine.low %v8019_v9, %v8021_v41  ;;  %v7782_v28 = vrot.slane %v19203_v52, 4  ;;  %v7791_v18 = vrot.slane %v19205_v27, 4 }
 0x7f2   : > { %9019 = vmatpush2.bf16.msra.mxu1 %v11976_v4  ;;  %9078 = vmatpush1.bf16.msra.mxu0 %v11990_v32  ;;  %v17104_v47 = vpop.permute.xlu1 %12634  ;;  %v7790_v17 = vrot.slane %v19206_v37, 4  ;;  %v7787_v39 = vrot.slane %v19207_v0, 4  ;;  %v7786_v14 = vrot.slane %v19208_v45, 4  ;;  %v7788_v58 = vrot.slane %v19209_v20, 4 }
 0x7f3   : > { %9020 = vmatprep.subr.bf16.mxu1 %v11975_v48  ;;  %9079 = vmatprep.subr.bf16.mxu0 %v11989_v25  ;;  %v11972_v55 = vcombine.low %v7911_v24, %v7913_v49  ;;  %v7800_v63 = vsel %vm619_vm4, %v7784_v22, %v7785_v43  ;;  %v12621_v50 = vunpack.i.l.bf16 %v16959_v44  ;;  %v11971_v40 = vcombine.high %v7907_v38, %v7909_v29  ;;  %v19211_v25 = vld [vmem:[#allocation120_spill] sm:$0xff]  ;;  %v19218_v43 = vld [vmem:[#allocation115_spill] sm:$0xff] }
 0x7f4   : > { %v17114_v57 = vpop.permute.xlu0 %12639  ;;  %v7804_v8 = vsel %vm619_vm4, %v7788_v58, %v7789_v59  ;;  %v12622_v36 = vunpack.i.h.bf16 %v16959_v44  ;;  %v7778_v30 = vrot.slane %v19210_v16, 4  ;;  %v7806_v21 = vsel %vm619_vm4, %v7790_v17, %v7791_v18 }
 0x7f5   : > { %v19213_v41 = vpack.c.bf16 %v19211_v25, %v19212_v7  ;;  %v7798_v49 = vsel %vm619_vm4, %v7782_v28, %v7783_v11  ;;  %v17143_v53 = vsel %vm847_vm8, %v19200_v61, %v7800_v63  ;;  %v7802_v44 = vsel %vm619_vm4, %v7786_v14, %v7787_v39  ;;  %v19215_v11 = vld [vmem:[#allocation118_spill] sm:$0xff] }
 0x7f6   : > { %9021 = vmatpush2.bf16.msra.mxu1 %v11974_v19  ;;  %9080 = vmatpush1.bf16.msra.mxu0 %v11988_v62  ;;  %v17120_v5 = vpop.permute.xlu1 %8106  ;;  %v11970_v9 = vcombine.low %v7907_v38, %v7909_v29  ;;  %v7781_v62 = vrot.slane %v16941_v33, 4  ;;  %v8239_v19 = vrot.slane %v12621_v50, 4  ;;  %v8241_v61 = vrot.slane %v12622_v36, 4  ;;  %v19214_v38 = vld [vmem:[#allocation119_spill] sm:$0xff]  ;;  %v19221_v50 = vld [vmem:[#allocation114_spill] sm:$0xff] }
 0x7f7   : > { %9022 = vmatprep.subr.bf16.mxu1 %v11973_v31  ;;  %9081 = vmatprep.subr.bf16.mxu0 %v11987_v3  ;;  %v7805_v31 = vsel %vm847_vm8, %v19209_v20, %v7804_v8  ;;  %v7807_v3 = vsel %vm847_vm8, %v19206_v37, %v7806_v21  ;;  %v19216_v33 = vpack.c.bf16 %v19214_v38, %v19215_v11  ;;  %v7780_v59 = vrot.slane %v16929_v51, 4  ;;  %v19224_v21 = vld [vmem:[#allocation109_spill] sm:$0xff]  ;;  %v19230_v38 = vld [vmem:[#allocation107_spill] sm:$0xff] }
 0x7f8   : > { %v7777_v4 = vpop.permute.xlu0 %7776  ;;  %v8238_v29 = vrot.slane %v16951_v10, 4  ;;  %v19219_v27 = vpack.c.bf16 %v19217_v56, %v19218_v43  ;;  %v7799_v18 = vsel %vm847_vm8, %v19203_v52, %v7798_v49  ;;  %v7803_v37 = vsel %vm847_vm8, %v19208_v45, %v7802_v44  ;;  %v19220_v52 = vld [vmem:[#allocation116_spill] sm:$0xff] }
 0x7f9   : > { %v7793_v60 = vrot.slane %v7777_v4, 4  ;;  %v8240_v17 = vrot.slane %v16969_v1, 4  ;;  %v12626_v0 = vunpack.i.l.bf16 %v17005_v34  ;;  %v7796_v39 = vsel %vm619_vm4, %v7780_v59, %v7781_v62 }
 0x7fa   : > { %9023 = vmatpush2.bf16.msra.mxu1 %v11972_v55  ;;  %9082 = vmatpush1.bf16.msra.mxu0 %v11986_v26  ;;  %v7775_v32 = vpop.permute.xlu1 %7774  ;;  %v7779_v26 = vrot.slane %v16919_v35, 4  ;;  %v8254_v14 = vsel %vm619_vm4, %v8238_v29, %v8239_v19  ;;  %v12627_v20 = vunpack.i.h.bf16 %v17005_v34  ;;  %v11967_v55 = vcombine.high %v7803_v37, %v7805_v31 }
 0x7fb   : > { %v7792_v48 = vrot.slane %v7775_v32, 4  ;;  %9024 = vmatprep.subr.bf16.mxu1 %v11971_v40  ;;  %9083 = vmatprep.subr.bf16.mxu0 %v19213_v41  ;;  %v8256_v63 = vsel %vm619_vm4, %v8240_v17, %v8241_v61  ;;  %v19222_v45 = vpack.c.bf16 %v19220_v52, %v19221_v50  ;;  %v11965_v40 = vcombine.high %v7799_v18, %v17143_v53 }
 0x7fc   : > { %v17148_v22 = vpop.permute.xlu0 %8330  ;;  %v7794_v8 = vsel %vm619_vm4, %v7778_v30, %v7779_v26  ;;  %v8236_v36 = vrot.slane %v17016_v15, 4  ;;  %v12637_v34 = vunpack.i.h.bf16 %v17104_v47  ;;  %v8255_v25 = vsel %vm1299_vm10, %v16951_v10, %v8254_v14  ;;  %v19227_v10 = vld [vmem:[#allocation112_spill] sm:$0xff] }
 0x7fd   : > { %v7808_v24 = vsel %vm619_vm4, %v7792_v48, %v7793_v60  ;;  %v12636_v60 = vunpack.i.l.bf16 %v17104_v47  ;;  %v8235_v7 = vrot.slane %v12626_v0, 4  ;;  %v11966_v41 = vcombine.low %v7803_v37, %v7805_v31 }
 0x7fe   : > { %v7809_v46 = vsel %vm847_vm8, %v7775_v32, %v7808_v24  ;;  %9025 = vmatpush2.bf16.msra.mxu1 %v11970_v9  ;;  %9084 = vmatpush1.bf16.msra.mxu0 %v19216_v33  ;;  %v17159_v23 = vpop.permute.xlu1 %12644  ;;  %v19223_v32 = vld [vmem:[#allocation113_spill] sm:$0xff]  ;;  %v7797_v49 = vsel %vm847_vm8, %v16929_v51, %v7796_v39  ;;  %v8257_v30 = vsel %vm1299_vm10, %v16969_v1, %v8256_v63  ;;  %v8237_v44 = vrot.slane %v12627_v20, 4  ;;  %v19226_v24 = vld [vmem:[#allocation111_spill] sm:$0xff] }
 0x7ff   : > { %v11968_v28 = vcombine.low %v7807_v3, %v7809_v46  ;;  %9085 = vmatprep.subr.bf16.mxu0 %v19219_v27  ;;  %v11969_v35 = vcombine.high %v7807_v3, %v7809_v46  ;;  %v19225_v48 = vpack.c.bf16 %v19223_v32, %v19224_v21  ;;  %v12632_v9 = vunpack.i.h.bf16 %v17038_v13  ;;  %v19229_v46 = vld [vmem:[#allocation110_spill] sm:$0xff] }
 0x800   : > { %v17175_v58 = vpop.permute.xlu0 %12649  ;;  %v12631_v47 = vunpack.i.l.bf16 %v17038_v13  ;;  %v8234_v19 = vrot.slane %v16997_v2, 4  ;;  %v19228_v3 = vpack.c.bf16 %v19226_v24, %v19227_v10  ;;  %v7795_v51 = vsel %vm847_vm8, %v19210_v16, %v7794_v8  ;;  %v12926_v32 = vld [vmem:[%s18799_s3] ss:$20 sps:$4 sm:$0xff]  }
 0x801   : > { %9026 = vmatprep.subr.bf16.mxu1 %v11969_v35  ;;  %v8252_v1 = vsel %vm619_vm4, %v8236_v36, %v8237_v44  ;;  %v8232_v26 = vrot.slane %v17077_v12, 4  ;;  %v8229_v61 = vrot.slane %v12637_v34, 4  ;;  %v8227_v13 = vrot.slane %v12636_v60, 4 }
 0x802   : > { %9027 = vmatpush2.bf16.msra.mxu1 %v11968_v28  ;;  %9086 = vmatpush1.bf16.msra.mxu0 %v19222_v45  ;;  %v17181_v4 = vpop.permute.xlu1 %8098  ;;  %v19231_v11 = vpack.c.bf16 %v19229_v46, %v19230_v38  ;;  %v11964_v33 = vcombine.low %v7799_v18, %v17143_v53  ;;  %v8250_v59 = vsel %vm619_vm4, %v8234_v19, %v8235_v7  ;;  %v8233_v56 = vrot.slane %v12632_v9, 4  ;;  %v19232_v53 = vld [vmem:[#allocation108_spill] sm:$0xff]  ;;  %v19233_v18 = vld [vmem:[#allocation105_spill] sm:$0xff] }
 0x803   : > { %9028 = vmatprep.subr.bf16.mxu1 %v11967_v55  ;;  %9087 = vmatprep.subr.bf16.mxu0 %v19225_v48  ;;  %v11963_v29 = vcombine.high %v7795_v51, %v7797_v49  ;;  %v12009_v28 = vcombine.high %v8255_v25, %v8257_v30  ;;  %v8231_v43 = vrot.slane %v12631_v47, 4  ;;  %v8226_v16 = vrot.slane %v17074_v42, 4  ;;  %v12931_v7 = vld [vmem:[%s18799_s3 + $0x2c] ss:$20 sps:$4 sm:$0xff]  }
 0x804   : > { %v17199_v62 = vpop.permute.xlu0 %8322  ;;  %v8228_v27 = vrot.slane %v17096_v54, 4  ;;  %v8253_v37 = vsel %vm1299_vm10, %v17016_v15, %v8252_v1  ;;  %v8230_v17 = vrot.slane %v17024_v6, 4  ;;  %v12641_v0 = vunpack.i.l.bf16 %v17114_v57 }
 0x805   : > { %v19234_v39 = vpack.c.bf16 %v19232_v53, %v19233_v18  ;;  %v11962_v20 = vcombine.low %v7795_v51, %v7797_v49  ;;  %v8248_v55 = vsel %vm619_vm4, %v8232_v26, %v8233_v56  ;;  %v12652_v63 = vunpack.i.h.bf16 %v17175_v58  ;;  %v12934_v18 = vld [vmem:[%s18799_s3 + $0x54] ss:$20 sps:$4 sm:$0xff]  }
 0x806   : > { %9029 = vmatpush2.bf16.msra.mxu1 %v11966_v41  ;;  %9088 = vmatpush1.bf16.msra.mxu0 %v19228_v3  ;;  %v17205_v31 = vpop.permute.xlu1 %8102  ;;  %v8242_v52 = vsel %vm619_vm4, %v8226_v16, %v8227_v13  ;;  %v8244_v15 = vsel %vm619_vm4, %v8228_v27, %v8229_v61  ;;  %v12008_v50 = vcombine.low %v8255_v25, %v8257_v30  ;;  %v12651_v8 = vunpack.i.l.bf16 %v17175_v58 }
 0x807   : > { %9030 = vmatprep.subr.bf16.mxu1 %v11965_v40  ;;  %9089 = vmatprep.subr.bf16.mxu0 %v19231_v11  ;;  %v8251_v45 = vsel %vm1299_vm10, %v16997_v2, %v8250_v59  ;;  %v12646_v40 = vunpack.i.l.bf16 %v17159_v23  ;;  %v8246_v36 = vsel %vm619_vm4, %v8230_v17, %v8231_v43  ;;  %v8249_v21 = vsel %vm1299_vm10, %v17077_v12, %v8248_v55 }
 0x808   : > { %v17218_v35 = vpop.permute.xlu0 %8326  ;;  %v12007_v60 = vcombine.high %v8251_v45, %v8253_v37  ;;  %v8127_v48 = vrot.slane %v12641_v0, 4  ;;  %v17245_v2 = vsel %vm1299_vm10, %v17074_v42, %v8242_v52  ;;  %v17249_v58 = vsel %vm1299_vm10, %v17096_v54, %v8244_v15 }
 0x809   : > { %v8125_v41 = vrot.slane %v12652_v63, 4  ;;  %v8124_v12 = vrot.slane %v17205_v31, 4  ;;  %v12006_v44 = vcombine.low %v8251_v45, %v8253_v37  ;;  %v8247_v9 = vsel %vm1299_vm10, %v17024_v6, %v8246_v36  ;;  %v12929_v37 = vld [vmem:[%s18799_s3 + $0x28] ss:$20 sps:$4 sm:$0xff]  }
 0x80a   : > { %9031 = vmatpush2.bf16.msra.mxu1 %v11964_v33  ;;  %9090 = vmatpush1.bf16.msra.mxu0 %v19234_v39  ;;  %v12655_v14 = vpop.permute.xlu1 %12654  ;;  %v8351_v42 = vrot.slane %v12646_v40, 4  ;;  %v8123_v47 = vrot.slane %v12651_v8, 4  ;;  %v12004_v19 = vcombine.low %v8247_v9, %v8249_v21  ;;  %v8126_v54 = vrot.slane %v17120_v5, 4 }
 0x80b   : > { %9032 = vmatprep.subr.bf16.mxu1 %v11963_v29  ;;  %9091 = vmatprep.subr.bf16.mxu0 %v12009_v28  ;;  %v12657_v49 = vunpack.i.h.bf16 %v12655_v14  ;;  %v12656_v30 = vunpack.i.l.bf16 %v12655_v14  ;;  %v12005_v3 = vcombine.high %v8247_v9, %v8249_v21  ;;  %v12642_v51 = vunpack.i.h.bf16 %v17114_v57  ;;  %v12932_v9 = vld [vmem:[%s18799_s3 + $0x50] ss:$20 sps:$4 sm:$0xff]  }
 0x80c   : > { %v12660_v34 = vpop.permute.xlu0 %12659  ;;  %v8350_v1 = vrot.slane %v17148_v22, 4  ;;  %v8122_v26 = vrot.slane %v17181_v4, 4  ;;  %v12003_v6 = vcombine.high %v17245_v2, %v17249_v58  ;;  %v8142_v13 = vsel %vm619_vm4, %v8126_v54, %v8127_v48 }
 0x80d   : > { %v12662_v24 = vunpack.i.h.bf16 %v12660_v34  ;;  %v8140_v46 = vsel %vm619_vm4, %v8124_v12, %v8125_v41  ;;  %v8349_v38 = vrot.slane %v12657_v49, 4  ;;  %v8347_v11 = vrot.slane %v12656_v30, 4 }
 0x80e   : > { %9033 = vmatpush2.bf16.msra.mxu1 %v11962_v20  ;;  %9092 = vmatpush2.bf16.msra.mxu0 %v12008_v50  ;;  %v17241_v25 = vpop.permute.xlu1 %8090  ;;  %v12647_v33 = vunpack.i.h.bf16 %v17159_v23  ;;  %v8138_v57 = vsel %vm619_vm4, %v8122_v26, %v8123_v47  ;;  %v12661_v59 = vunpack.i.l.bf16 %v12660_v34  ;;  %v8366_v29 = vsel %vm619_vm4, %v8350_v1, %v8351_v42 }
 0x80f   : > { %9093 = vmatprep.subr.bf16.mxu0 %v12007_v60  ;;  %v8346_v28 = vrot.slane %v17199_v62, 4  ;;  %v8348_v56 = vrot.slane %v17218_v35, 4  ;;  %v8121_v43 = vrot.slane %v12662_v24, 4  ;;  %v8129_v17 = vrot.slane %v12642_v51, 4 }
 0x810   : > { %v17258_v10 = vpop.permute.xlu0 %8314  ;;  %v17279_v23 = vsel %vm1186_vm11, %v17205_v31, %v8140_v46  ;;  %v12002_v53 = vcombine.low %v17245_v2, %v17249_v58  ;;  %v8143_v39 = vsel %vm1186_vm11, %v17120_v5, %v8142_v13  ;;  %v8353_v31 = vrot.slane %v12647_v33, 4 }
 0x811   : > { %9035 = vmatmul.mubr.bf16.vlgmr.msra.gmra.mxu1 %v12926_v32  ;;  %v8362_v20 = vsel %vm619_vm4, %v8346_v28, %v8347_v11  ;;  %v8364_v55 = vsel %vm619_vm4, %v8348_v56, %v8349_v38  ;;  %v8139_v63 = vsel %vm1186_vm11, %v17181_v4, %v8138_v57  ;;  %v8119_v52 = vrot.slane %v12661_v59, 4 }
 0x812   : > { %v8095_v61 = vpop.permute.xlu1 %8094  ;;  %9094 = vmatpush2.bf16.msra.mxu0 %v12006_v44  ;;  %9044 = vmatprep.mubr.bf16.mxu1 %v12931_v7  ;;  %v8367_v15 = vsel %vm1412_vm12, %v17148_v22, %v8366_v29  ;;  %v8118_v50 = vrot.slane %v17241_v25, 4  ;;  %v11999_v8 = vcombine.high %v8139_v63, %v17279_v23  ;;  %v8363_v4 = vsel %vm1412_vm12, %v17199_v62, %v8362_v20 }
 0x813   : > { %9095 = vmatprep.subr.bf16.mxu0 %v12005_v3  ;;  %v8120_v16 = vrot.slane %v8095_v61, 4  ;;  %v8365_v22 = vsel %vm1412_vm12, %v17218_v35, %v8364_v55  ;;  %v8342_v7 = vrot.slane %v17258_v10, 4  ;;  %v11998_v1 = vcombine.low %v8139_v63, %v17279_v23 }
 0x814   : > { %v17272_v27 = vpop.permute.xlu0 %8318  ;;  %v8134_v58 = vsel %vm619_vm4, %v8118_v50, %v8119_v52  ;;  %v12015_v33 = vcombine.high %v8363_v4, %v8365_v22  ;;  %v12944_v50 = vld [vmem:[%s18799_s3 + $0x34] ss:$20 sps:$4 sm:$0xff]  }
 0x815   : > { %v8136_v45 = vsel %vm619_vm4, %v8120_v16, %v8121_v43  ;;  %v8344_v49 = vrot.slane %v17272_v27, 4  ;;  %v8135_v26 = vsel %vm1186_vm11, %v17241_v25, %v8134_v58  ;;  %v12014_v43 = vcombine.low %v8363_v4, %v8365_v22  ;;  %v12941_v4 = vld [vmem:[%s18799_s3 + $0x10] ss:$20 sps:$4 sm:$0xff]   ;;  %v12949_v58 = vld [vmem:[%s18799_s3 + $0x60] ss:$20 sps:$4 sm:$0xff]  }
 0x816   : > { %v8111_v0 = vpop.permute.xlu1 %8110  ;;  %9096 = vmatpush2.bf16.msra.mxu0 %v12004_v19  ;;  %v8137_v41 = vsel %vm1186_vm11, %v8095_v61, %v8136_v45  ;;  %v12942_v22 = vld [vmem:[%s18799_s3 + $0x30] ss:$20 sps:$4 sm:$0xff]  }
 0x817   : > { %v8128_v14 = vrot.slane %v8111_v0, 4  ;;  %9097 = vmatprep.subr.bf16.mxu0 %v12003_v6  ;;  %v12937_v6 = vld [vmem:[%s18799_s3 + $0x7c] ss:$20 sps:$4 sm:$0xff]   ;;  %v11997_v11 = vcombine.high %v8135_v26, %v8137_v41  ;;  %v11996_v56 = vcombine.low %v8135_v26, %v8137_v41 }
 0x818   : > { %v8335_v40 = vpop.permute.xlu0 %8334  ;;  %v12953_v41 = vld [vmem:[%s18799_s3 + $0x88] ss:$20 sps:$4 sm:$0xff]  }
 0x819   : > { %v8144_v5 = vsel %vm619_vm4, %v8128_v14, %v8129_v17  ;;  %9045 = vmatmul.mubr.bf16.gmra.mxu1 %v12929_v37  ;;  %v8352_v34 = vrot.slane %v8335_v40, 4  ;;  %v12935_v17 = vld [vmem:[%s18799_s3 + $0x78] ss:$20 sps:$4 sm:$0xff]  }
 0x81a   : > { %v8145_v36 = vsel %vm1186_vm11, %v8111_v0, %v8144_v5  ;;  %v12665_v60 = vpop.permute.xlu1 %12664  ;;  %9098 = vmatpush2.bf16.msra.mxu0 %v12002_v53  ;;  %9054 = vmatprep.mubr.bf16.mxu1 %v12934_v18 }
 0x81b   : > { %v12000_v32 = vcombine.low %v8143_v39, %v8145_v36  ;;  %v12667_v21 = vunpack.i.h.bf16 %v12665_v60  ;;  %v12666_v48 = vunpack.i.l.bf16 %v12665_v60  ;;  %v12001_v2 = vcombine.high %v8143_v39, %v8145_v36 }
 0x81c   : > { %v8368_v12 = vsel %vm619_vm4, %v8352_v34, %v8353_v31  ;;  %v12670_v35 = vpop.permute.xlu0 %12669 }
 0x81d   : > { %v8369_v30 = vsel %vm1412_vm12, %v8335_v40, %v8368_v12  ;;  %v8345_v62 = vrot.slane %v12667_v21, 4  ;;  %v8343_v44 = vrot.slane %v12666_v48, 4  ;;  %9099 = vmatprep.subr.bf16.mxu0 %v12001_v2  ;;  %v12672_v47 = vunpack.i.h.bf16 %v12670_v35  ;;  %v12945_v21 = vld [vmem:[%s18799_s3 + $0x38] ss:$20 sps:$4 sm:$0xff]  }
 0x81e   : > { %v12016_v42 = vcombine.low %v8367_v15, %v8369_v30  ;;  %v12671_v19 = vunpack.i.l.bf16 %v12670_v35  ;;  %v8083_v54 = vpop.permute.xlu1 %8082  ;;  %9100 = vmatpush2.bf16.msra.mxu0 %v12000_v32  ;;  %v12017_v24 = vcombine.high %v8367_v15, %v8369_v30  ;;  %v12938_v15 = vld [vmem:[%s18799_s3 + $0x8] ss:$20 sps:$4 sm:$0xff]   ;;  %v19235_v40 = vmov 0   ;;  %v12946_v48 = vld [vmem:[%s18799_s3 + $0x58] ss:$20 sps:$4 sm:$0xff]  }
 0x81f   : > { %9101 = vmatprep.subr.bf16.mxu0 %v11999_v8  ;;  %v8358_v3 = vsel %vm619_vm4, %v8342_v7, %v8343_v44  ;;  %v8360_v51 = vsel %vm619_vm4, %v8344_v49, %v8345_v62  ;;  %v8117_v13 = vrot.slane %v12672_v47, 4  ;;  %v8114_v46 = vrot.slane %v8083_v54, 4  ;;  %v12948_v32 = vld [vmem:[%s18799_s3 + $0x5c] ss:$20 sps:$4 sm:$0xff]   ;;  %v12952_v2 = vld [vmem:[%s18799_s3 + $0x84] ss:$20 sps:$4 sm:$0xff]  }
 0x820   : > { %v8115_v61 = vrot.slane %v12671_v19, 4  ;;  %9156 = vmatprep.subr.bf16.mxu1 %v12017_v24  ;;  %v8307_v38 = vpop.permute.xlu0 %8306  ;;  %v8359_v59 = vsel %vm1412_vm12, %v17258_v10, %v8358_v3  ;;  %v8361_v25 = vsel %vm1412_vm12, %v17272_v27, %v8360_v51  ;;  %v12950_v7 = vld [vmem:[%s18799_s3 + $0x80] ss:$20 sps:$4 sm:$0xff]   ;;  %v9938_v12 = vld [vmem:[#allocation2 + $0x16c] sm:$0xf] }
 0x821   : > { %9055 = vmatmul.mubr.bf16.gmra.mxu1 %v12932_v9  ;;  %v12013_v37 = vcombine.high %v8359_v59, %v8361_v25  ;;  %v12012_v20 = vcombine.low %v8359_v59, %v8361_v25  ;;  %v8338_v55 = vrot.slane %v8307_v38, 4  ;;  %v9940_v49 = vld [vmem:[#allocation2 + $0x17c] sm:$0xf]  ;;  %v9934_v30 = vld [vmem:[#allocation2 + $0x14c] sm:$0xf] }
 0x822   : > { %v8087_v57 = vpop.permute.xlu1 %8086  ;;  %9102 = vmatpush2.bf16.msra.mxu0 %v11998_v1  ;;  %9157 = vmatpush1.bf16.msra.mxu1 %v12016_v42  ;;  %v8130_v29 = vsel %vm619_vm4, %v8114_v46, %v8115_v61  ;;  %v12678_v62 = vpack.i.bf16 %v9940_v49, %v9938_v12  ;;  %v9936_v44 = vld [vmem:[#allocation2 + $0x15c] sm:$0xf]  ;;  %v9930_v9 = vld [vmem:[#allocation2 + $0x12c] sm:$0xf]  ;;  %v19250_v49 = vld [vmem:[#allocation56_spill] sm:$0xff] }
 0x823   : > { %v8116_v28 = vrot.slane %v8087_v57, 4  ;;  %9103 = vmatprep.subr.bf16.mxu0 %v11997_v11  ;;  %9158 = vmatprep.subr.bf16.mxu1 %v12015_v33  ;;  %v8131_v10 = vsel %vm1186_vm11, %v8083_v54, %v8130_v29  ;;  %v12683_v35 = vpack.i.bf16 %v9936_v44, %v9934_v30  ;;  %v9932_v42 = vld [vmem:[#allocation2 + $0x13c] sm:$0xf]  ;;  %v9926_v47 = vld [vmem:[#allocation2 + $0x10c] sm:$0xf] }
 0x824   : > { %9064 = vmatprep.mubr.bf16.mxu1 %v12937_v6  ;;  %v8311_v27 = vpop.permute.xlu0 %8310  ;;  %12679 = vrot.lane.b32.xlu0 %v12678_v62, %s13027_s29  ;;  %v12688_v19 = vpack.i.bf16 %v9932_v42, %v9930_v9  ;;  %v9928_v54 = vld [vmem:[#allocation2 + $0x11c] sm:$0xf]  ;;  %v19253_v42 = vld [vmem:[#allocation53_spill] sm:$0xff] }
 0x825   : > { %v8132_v16 = vsel %vm619_vm4, %v8116_v28, %v8117_v13  ;;  %v8340_v31 = vrot.slane %v8311_v27, 4  ;;  %12684 = vrot.lane.b32.xlu1 %v12683_v35, %s13027_s29  ;;  %v12693_v24 = vpack.i.bf16 %v9928_v54, %v9926_v47  ;;  %v19251_v62 = vld [vmem:[#allocation79_spill] sm:$0xff]  ;;  %v19252_v35 = vld [vmem:[#allocation52_spill] sm:$0xff] }
 0x826   : > { %v8133_v23 = vsel %vm1186_vm11, %v8087_v57, %v8132_v16  ;;  %v12675_v0 = vpop.permute.xlu1 %12674  ;;  %9104 = vmatpush2.bf16.msra.mxu0 %v11996_v56  ;;  %9159 = vmatpush1.bf16.msra.mxu1 %v12014_v43 }
 0x827   : > { %v11994_v53 = vcombine.low %v8131_v10, %v8133_v23  ;;  %v12677_v18 = vunpack.i.h.bf16 %v12675_v0  ;;  %v12676_v39 = vunpack.i.l.bf16 %v12675_v0  ;;  %9160 = vmatprep.subr.bf16.mxu1 %v12013_v37  ;;  %v11995_v14 = vcombine.high %v8131_v10, %v8133_v23  ;;  %v19236_v37 = vld [vmem:[#allocation70_spill] sm:$0xff]  ;;  %v19237_v23 = vld [vmem:[#allocation71_spill] sm:$0xff] }
 0x828   : > { %12689 = vrot.lane.b32.xlu0 %v12688_v19, %s13027_s29  ;;  %v19238_v0 = vld [vmem:[#allocation67_spill] sm:$0xff]  ;;  %v19254_v19 = vld [vmem:[#allocation49_spill] sm:$0xff] }
 0x829   : > { %v8341_v63 = vrot.slane %v12677_v18, 4  ;;  %v8339_v52 = vrot.slane %v12676_v39, 4  ;;  %9065 = vmatmul.mubr.bf16.gmra.mxu1 %v12935_v17  ;;  %9105 = vmatprep.subr.bf16.mxu0 %v11995_v14  ;;  %v19239_v18 = vld [vmem:[#allocation64_spill] sm:$0xff] }
 0x82a   : > { %9106 = vmatpush2.bf16.msra.mxu0 %v11994_v53  ;;  %9161 = vmatpush1.bf16.msra.mxu1 %v12012_v20  ;;  %v19240_v20 = vld [vmem:[#allocation69_spill] sm:$0xff] }
 0x82b   : > { %v8354_v45 = vsel %vm619_vm4, %v8338_v55, %v8339_v52  ;;  %v8356_v5 = vsel %vm619_vm4, %v8340_v31, %v8341_v63  ;;  %9180 = vmatprep.mubr.bf16.mxu1 %v19235_v40  ;;  %12694 = vrot.lane.b32.xlu1 %v12693_v24, %s13027_s29  ;;  %v19241_v31 = vld [vmem:[#allocation66_spill] sm:$0xff]  ;;  %v19242_v52 = vld [vmem:[#allocation61_spill] sm:$0xff] }
 0x82c   : > { %v8355_v8 = vsel %vm1412_vm12, %v8307_v38, %v8354_v45  ;;  %v8357_v36 = vsel %vm1412_vm12, %v8311_v27, %v8356_v5  ;;  %v19243_v5 = vld [vmem:[#allocation75_spill] sm:$0xff] }
 0x82d   : > { %9108 = vmatmul.mubr.bf16.vlgmr.msra.gmra.mxu0 %v12938_v15  ;;  %v12010_v34 = vcombine.low %v8355_v8, %v8357_v36  ;;  %v12011_v60 = vcombine.high %v8355_v8, %v8357_v36  ;;  %v19244_v36 = vld [vmem:[#allocation62_spill] sm:$0xff] }
 0x82e   : > { %9117 = vmatprep.mubr.bf16.mxu0 %v12944_v50 }
 0x82f   : > { %9162 = vmatprep.subr.bf16.mxu1 %v12011_v60  ;;  %v19245_v60 = vld [vmem:[#allocation58_spill] sm:$0xff] }
 0x830   : > { %9163 = vmatpush1.bf16.msra.mxu1 %v12010_v34 }
 0x831   : > { %v3968_v3 = vpop.permute.xlu0 %3967 }
 0x832   : > { %v4663_v17 = vadd.f32 %v19236_v37, %v3968_v3  ;;  %v4665_v27 = vadd.f32 %v19237_v23, %v3968_v3  ;;  %v19255_v3 = vld [vmem:[#allocation76_spill] sm:$0xff] }
 0x833   : > { %12018 = vmatmul.mubr.msk.bf16.vlgmr.msra.gmra.mxu1 %vm2220_vm13, %v12941_v4  ;;  %v3963_v51 = vpop.permute.xlu1 %3962 }
 0x834   : > { %9190 = vmatprep.mubr.bf16.mxu1 %v19235_v40  ;;  %v4659_v53 = vadd.f32 %v19238_v0, %v3963_v51  ;;  %v4661_v55 = vadd.f32 %v19240_v20, %v3963_v51  ;;  %v4776_v8 = vadd.f32 %v19243_v5, %v4663_v17  ;;  %v19258_v17 = vld [vmem:[#allocation50_spill] sm:$0xff]  ;;  %v19261_v0 = vld [vmem:[#allocation80_spill] sm:$0xff]  ;;  %v19263_v20 = vld [vmem:[#allocation81_spill] sm:$0xff] }
 0x835   : > { %9118 = vmatmul.mubr.bf16.gmra.mxu0 %v12942_v22  ;;  %v17380_v1 = vpop.permute.xlu0 %8527  ;;  %v19246_v22 = vld [vmem:[#allocation59_spill] sm:$0xff] }
 0x836   : > { %9127 = vmatprep.mubr.bf16.mxu0 %v12948_v32  ;;  %v4774_v51 = vadd.f32 %v19255_v3, %v4661_v55  ;;  %v19266_v55 = vld [vmem:[#allocation100_spill] sm:$0xff] }
 0x837   : > { %v17382_v26 = vpop.permute.xlu1 %8522 }
 0x839   : > { %v3958_v61 = vpop.permute.xlu0 %3957 }
 0x83a   : > { %v4653_v39 = vadd.f32 %v19239_v18, %v3958_v61  ;;  %v4655_v63 = vadd.f32 %v19241_v31, %v3958_v61  ;;  %v19256_v61 = vld [vmem:[#allocation77_spill] sm:$0xff]  ;;  %v19262_v18 = vld [vmem:[#allocation83_spill] sm:$0xff] }
 0x83b   : > { %12019 = vmatmul.mubr.msk.bf16.gmra.mxu1 %vm2220_vm13, %v12945_v21  ;;  %v3953_v6 = vpop.permute.xlu1 %3952 }
 0x83c   : > { %9200 = vmatprep.mubr.bf16.mxu1 %v19235_v40  ;;  %v4649_v15 = vadd.f32 %v19242_v52, %v3953_v6  ;;  %v4651_v34 = vadd.f32 %v19244_v36, %v3953_v6  ;;  %v4766_v44 = vadd.f32 %v19251_v62, %v4653_v39  ;;  %v4768_v6 = vadd.f32 %v19256_v61, %v4655_v63 }
 0x83d   : > { %9128 = vmatmul.mubr.bf16.gmra.mxu0 %v12946_v48  ;;  %v17384_v13 = vpop.permute.xlu0 %8517  ;;  %v19247_v48 = vld [vmem:[#allocation73_spill] sm:$0xff] }
 0x83e   : > { %9137 = vmatprep.mubr.bf16.mxu0 %v12952_v2  ;;  %v4778_v2 = vadd.f32 %v19247_v48, %v4665_v27  ;;  %v19259_v27 = vld [vmem:[#allocation103_spill] sm:$0xff] }
 0x83f   : > { %v17386_v46 = vpop.permute.xlu1 %8512 }
 0x841   : > { %v3948_v57 = vpop.permute.xlu0 %3947 }
 0x842   : > { %v4643_v4 = vadd.f32 %v19245_v60, %v3948_v57  ;;  %v4645_v32 = vadd.f32 %v19246_v22, %v3948_v57  ;;  %v19257_v57 = vld [vmem:[#allocation82_spill] sm:$0xff] }
 0x843   : > { %12020 = vmatmul.mubr.msk.bf16.gmra.mxu1 %vm2220_vm13, %v12949_v58  ;;  %v3943_v59 = vpop.permute.xlu1 %3942  ;;  %v19248_v58 = vld [vmem:[#allocation78_spill] sm:$0xff]  ;;  %v4762_v37 = vadd.f32 %v19257_v57, %v4649_v15 }
 0x844   : > { %9210 = vmatprep.mubr.bf16.mxu1 %v19235_v40  ;;  %v4641_v30 = vadd.f32 %v19250_v49, %v3943_v59  ;;  %v4756_v39 = vadd.f32 %v19262_v18, %v4643_v4  ;;  %v4758_v31 = vadd.f32 %v19263_v20, %v4645_v32  ;;  %v19268_v15 = vld [vmem:[#allocation86_spill] sm:$0xff]  ;;  %v19272_v4 = vld [vmem:[#allocation85_spill] sm:$0xff]  ;;  %v19273_v32 = vld [vmem:[#allocation88_spill] sm:$0xff] }
 0x845   : > { %9138 = vmatmul.mubr.bf16.gmra.mxu0 %v12950_v7  ;;  %v17400_v56 = vpop.permute.xlu0 %8507  ;;  %v4772_v7 = vadd.f32 %v19248_v58, %v4659_v53  ;;  %v4764_v53 = vadd.f32 %v19261_v0, %v4651_v34  ;;  %v19271_v34 = vld [vmem:[#allocation87_spill] sm:$0xff] }
 0x847   : > { %v17402_v43 = vpop.permute.xlu1 %8502  ;;  %v17449_v63 = vadd.f32 %v19266_v55, %v4772_v7  ;;  %v19275_v7 = vld [vmem:[#allocation99_spill] sm:$0xff] }
 0x849   : > { %v3938_v50 = vpop.permute.xlu0 %3937  ;;  %19267 = vst [vmem:[#allocation128_spill] sm:$0xff] %v17449_v63 }
 0x84a   : > { %v4633_v9 = vadd.f32 %v19252_v35, %v3938_v50  ;;  %v4635_v47 = vadd.f32 %v19253_v42, %v3938_v50  ;;  %v19264_v50 = vld [vmem:[#allocation104_spill] sm:$0xff]  ;;  %v17465_v35 = vadd.f32 %v19275_v7, %v4768_v6 }
 0x84b   : > { %12021 = vmatmul.mubr.msk.bf16.gmra.mxu1 %vm2220_vm13, %v12953_v41  ;;  %v3933_v45 = vpop.permute.xlu1 %3932  ;;  %v19249_v41 = vld [vmem:[#allocation55_spill] sm:$0xff]  ;;  %v17446_v5 = vadd.f32 %v19264_v50, %v4778_v2  ;;  %v19274_v2 = vld [vmem:[#allocation102_spill] sm:$0xff]  ;;  %v19282_v6 = vld [vmem:[#allocation92_spill] sm:$0xff] }
 0x84c   : > { %v4639_v12 = vadd.f32 %v19249_v41, %v3943_v59  ;;  %v4629_v54 = vadd.f32 %v19254_v19, %v3933_v45  ;;  %v4631_v23 = vadd.f32 %v19258_v17, %v3933_v45  ;;  %v17438_v59 = vadd.f32 %v19259_v27, %v4776_v8  ;;  %v19269_v45 = vld [vmem:[#allocation84_spill] sm:$0xff]  ;;  %v19270_v8 = vld [vmem:[#allocation98_spill] sm:$0xff]  ;;  %v19278_v19 = vld [vmem:[#allocation97_spill] sm:$0xff] }
 0x84d   : > { %19265 = vst [vmem:[#allocation126_spill] sm:$0xff] %v17446_v5  ;;  %v4754_v60 = vadd.f32 %v19269_v45, %v4641_v30  ;;  %v17454_v22 = vadd.f32 %v19270_v8, %v4766_v44  ;;  %v4746_v48 = vadd.f32 %v19271_v34, %v4633_v9  ;;  %v4748_v58 = vadd.f32 %v19272_v4, %v4635_v47  ;;  %v19277_v30 = vld [vmem:[#allocation89_spill] sm:$0xff]  ;;  %v19279_v9 = vld [vmem:[#allocation94_spill] sm:$0xff]  ;;  %v19289_v45 = vld [vmem:[#allocation72_spill] sm:$0xff] }
 0x84e   : > { %19260 = vst [vmem:[#allocation125_spill] sm:$0xff] %v17438_v59  ;;  %v4752_v36 = vadd.f32 %v19268_v15, %v4639_v12  ;;  %v4742_v41 = vadd.f32 %v19273_v32, %v4629_v54  ;;  %v17462_v62 = vadd.f32 %v19274_v2, %v4774_v51  ;;  %v19276_v12 = vld [vmem:[#allocation96_spill] sm:$0xff]  ;;  %v4744_v44 = vadd.f32 %v19277_v30, %v4631_v23  ;;  %v19280_v54 = vld [vmem:[#allocation95_spill] sm:$0xff] }
 0x84f   : > { %v17468_v42 = vadd.f32 %v19276_v12, %v4762_v37  ;;  %v17472_v3 = vadd.f32 %v19278_v19, %v4764_v53  ;;  %v17475_v47 = vadd.f32 %v19279_v9, %v4756_v39  ;;  %v17478_v61 = vadd.f32 %v19280_v54, %v4758_v31  ;;  %v19283_v37 = vld [vmem:[#allocation93_spill] sm:$0xff]  ;;  %v19286_v53 = vld [vmem:[#allocation90_spill] sm:$0xff]  ;;  %v19287_v39 = vld [vmem:[#allocation91_spill] sm:$0xff]  ;;  %v8493_v4 = vpop.permute.xlu1 %8492 }
 0x850   : > { %v17483_v51 = vmul.f32 0.2, %v17438_v59  ;;  %v17486_v17 = vadd.f32 %v19282_v6, %v4752_v36  ;;  %v17489_v27 = vadd.f32 %v19283_v37, %v4754_v60  ;;  %v17492_v23 = vmul.f32 0.2, %v17449_v63  ;;  %v19288_v31 = vld [vmem:[#allocation74_spill] sm:$0xff] }
 0x851   : > { %v17495_v0 = vmul.f32 0.2, %v17446_v5  ;;  %v17498_v18 = vadd.f32 %v19286_v53, %v4746_v48  ;;  %v17501_v20 = vadd.f32 %v19287_v39, %v4748_v58  ;;  %v17504_v50 = vadd.f32 %v19288_v31, %v4742_v41  ;;  %v8498_v39 = vpop.permute.xlu0 %8497 }
 0x852   : > { %19281 = vst [vmem:[#allocation121_spill] sm:$0xff] %v17483_v51  ;;  %19284 = vst [vmem:[#allocation124_spill] sm:$0xff] %v17492_v23  ;;  %v17509_v36 = vmul.f32 0.2, %v17454_v22  ;;  %v17512_v60 = vadd.f32 %v19289_v45, %v4744_v44  ;;  %v17515_v8 = vmul.f32 0.2, %v17468_v42 }
 0x853   : > { %19285 = vst [vmem:[#allocation123_spill] sm:$0xff] %v17495_v0  ;;  %v17518_v34 = vmul.f32 0.2, %v17465_v35  ;;  %v17521_v48 = vmul.f32 0.2, %v17462_v62 }
 0x854   : > { %v17524_v32 = vmul.f32 0.2, %v17475_v47  ;;  %v17527_v41 = vmul.f32 0.2, %v17478_v61  ;;  %v17530_v2 = vmul.f32 0.2, %v17472_v3 }
 0x855   : > { %v17536_v30 = vmul.f32 0.2, %v17486_v17  ;;  %v17539_v44 = vmul.f32 0.2, %v17489_v27  ;;  %v4909_v6 = vmul.f32 0.2, %v17504_v50 }
 0x856   : > { %v17547_v37 = vmul.f32 0.2, %v17498_v18  ;;  %v17550_v53 = vmul.f32 0.2, %v17501_v20  ;;  %v4910_v7 = vmul.f32 0.2, %v17512_v60 }
 0x857   : > { %v4945_v19 = vmax.f32 %v17486_v17, %v17536_v30  ;;  %v4941_v0 = vmax.f32 %v17504_v50, %v4909_v6  ;;  %v19299_v17 = vmax.f32 %v17489_v27, %v17539_v44 }
 0x858   : > { %v4943_v5 = vmax.f32 %v17498_v18, %v17547_v37 }
 0x8d1   : > { %v17388_v38 = vpop.f32.mrf.mxu1 }
 0x8d2   : > { %v9037_v12 = vadd.f32 %v17388_v38, %v8493_v4  ;;  %v4944_v38 = vmax.f32 %v17501_v20, %v17550_v53 }
 0x8d3   : > { %v17390_v11 = vpop.f32.mrf.mxu1 }
 0x8d4   : > { %v9039_v31 = vadd.f32 %v17390_v11, %v8493_v4 }
 0x8d5   : > { %v17392_v33 = vpop.f32.mrf.mxu1 }
 0x8d7   : > { %v17394_v25 = vpop.f32.mrf.mxu1 }
 0x8d9   : > { %v17396_v29 = vpop.f32.mrf.mxu1 }
 0x8da   : > { %v9047_v50 = vadd.f32 %v17396_v29, %v17402_v43 }
 0x8db   : > { %v17398_v28 = vpop.f32.mrf.mxu1 }
 0x8dc   : > { %v9049_v6 = vadd.f32 %v17398_v28, %v17402_v43 }
 0x8dd   : > { %v17404_v16 = vpop.f32.mrf.mxu1 }
 0x8de   : > { %v9051_v18 = vadd.f32 %v17404_v16, %v17400_v56 }
 0x8df   : > { %v17407_v10 = vpop.f32.mrf.mxu1 }
 0x8e1   : > { %v17412_v14 = vpop.f32.mrf.mxu1 }
 0x8e3   : > { %v17421_v21 = vpop.f32.mrf.mxu1 }
 0x8e4   : > { %v17590_v29 = vadd.f32 %v17421_v21, %v17386_v46 }
 0x8e5   : > { %v17431_v24 = vpop.f32.mrf.mxu1 }
 0x8e6   : > { %v17594_v28 = vadd.f32 %v17431_v24, %v17384_v13 }
 0x8e7   : > { %v17443_v52 = vpop.f32.mrf.mxu1 }
 0x8e9   : > { %v17459_v49 = vpop.f32.mrf.mxu1 }
 0x8eb   : > { %v17480_v57 = vpop.f32.mrf.mxu1 }
 0x8ed   : > { %v17506_v55 = vpop.f32.mrf.mxu1  ;;  %v9109_v15 = vpop.f32.mrf.mxu0 }
 0x8ee   : > { %v9110_v45 = vadd.f32 %v9109_v15, %v9037_v12  ;;  %v9041_v15 = vadd.f32 %v17392_v33, %v8498_v39 }
 0x8ef   : > { %v9111_v58 = vpop.f32.mrf.mxu0  ;;  %v17543_v9 = vpop.f32.mrf.mxu1 }
 0x8f0   : > { %v9112_v4 = vadd.f32 %v9111_v58, %v9039_v31  ;;  %v9043_v31 = vadd.f32 %v17394_v25, %v8498_v39  ;;  %v9057_v25 = vadd.f32 %v17412_v14, %v17386_v46  ;;  %v17604_v14 = vadd.f32 %v17459_v49, %v17382_v26 }
 0x8f1   : > { %v9113_v54 = vpop.f32.mrf.mxu0  ;;  %v17608_v46 = vadd.f32 %v17480_v57, %v17382_v26 }
 0x8f2   : > { %v9114_v63 = vadd.f32 %v9113_v54, %v9041_v15  ;;  %v9053_v54 = vadd.f32 %v17407_v10, %v17400_v56  ;;  %v17598_v56 = vadd.f32 %v17443_v52, %v17384_v13  ;;  %v17612_v13 = vadd.f32 %v17506_v55, %v17380_v1  ;;  %v19294_v55 = vld [vmem:[#allocation6_spill] sm:$0xff] }
 0x8f3   : > { %v9115_v40 = vpop.f32.mrf.mxu0  ;;  %v9182_v51 = vpop.f32.mrf.mxu1 }
 0x8f4   : > { %v9183_v12 = vadd.f32 %v9182_v51, %v9110_v45  ;;  %v4942_v51 = vmax.f32 %v17512_v60, %v4910_v7  ;;  %v9116_v43 = vadd.f32 %v9115_v40, %v9043_v31 }
 0x8f5   : > { %v9119_v23 = vpop.f32.mrf.mxu0  ;;  %v9184_v59 = vpop.f32.mrf.mxu1 }
 0x8f6   : > { %v9221_v33 = vmul.f32 0.2, %v9183_v12  ;;  %v9185_v58 = vadd.f32 %v9184_v59, %v9112_v4  ;;  %v9120_v21 = vadd.f32 %v9119_v23, %v9047_v50  ;;  %v19292_v4 = vld [vmem:[#allocation4_spill] sm:$0xff]  ;;  %v19295_v50 = vld [vmem:[#allocation7_spill] sm:$0xff] }
 0x8f7   : > { %v9121_v20 = vpop.f32.mrf.mxu0  ;;  %v9186_v37 = vpop.f32.mrf.mxu1 }
 0x8f8   : > { %v9237_v53 = vmax.f32 %v9183_v12, %v9221_v33  ;;  %v9222_v45 = vmul.f32 0.2, %v9185_v58  ;;  %v9187_v60 = vadd.f32 %v9186_v37, %v9114_v63  ;;  %v19293_v12 = vld [vmem:[#allocation5_spill] sm:$0xff]  ;;  %v17632_v37 = vadd.f32 %v17543_v9, %v17380_v1 }
 0x8f9   : > { %v9123_v16 = vpop.f32.mrf.mxu0  ;;  %v9188_v59 = vpop.f32.mrf.mxu1 }
 0x8fa   : > { %v17600_v10 = vadd.f32 %v9237_v53, %v4941_v0  ;;  %v9238_v63 = vmax.f32 %v9185_v58, %v9222_v45  ;;  %v9223_v7 = vmul.f32 0.2, %v9187_v60  ;;  %v9189_v40 = vadd.f32 %v9188_v59, %v9116_v43 }
 0x8fb   : > { %v9125_v24 = vpop.f32.mrf.mxu0  ;;  %v9192_v39 = vpop.f32.mrf.mxu1  ;;  %v9122_v0 = vadd.f32 %v9121_v20, %v9049_v6 }
 0x8fc   : > { %19290 = vst [vmem:[#allocation130_spill] sm:$0xff] %v17600_v10  ;;  %v17614_v52 = vadd.f32 %v9238_v63, %v4942_v51  ;;  %v9239_v15 = vmax.f32 %v9187_v60, %v9223_v7  ;;  %v9325_v49 = vmul.f32 %v19292_v4, %v17600_v10  ;;  %v9397_v33 = vmul.f32 %v19293_v12, %v17600_v10 }
 0x8fd   : > { %v9224_v26 = vmul.f32 0.2, %v9189_v40  ;;  %v9193_v57 = vadd.f32 %v9192_v39, %v9120_v21  ;;  %v9129_v23 = vpop.f32.mrf.mxu0  ;;  %v9194_v58 = vpop.f32.mrf.mxu1  ;;  %v9124_v21 = vadd.f32 %v9123_v16, %v9051_v18  ;;  %v9126_v39 = vadd.f32 %v9125_v24, %v9053_v54  ;;  %v10160_v18 = vld [vmem:[#allocation2 + $0x5c] sm:$0xf] }
 0x8fe   : > { %19291 = vst [vmem:[#allocation106_spill] sm:$0xff] %v17614_v52  ;;  %v17622_v31 = vpack.c.bf16 %v17614_v52, %v17600_v10  ;;  %v9326_v51 = vmul.f32 %v19294_v55, %v17614_v52  ;;  %v9398_v6 = vmul.f32 %v19295_v50, %v17614_v52  ;;  %v17628_v20 = vadd.f32 %v9239_v15, %v4943_v5 }
 0x8ff   : > { %v9240_v53 = vmax.f32 %v9189_v40, %v9224_v26  ;;  %v9225_v45 = vmul.f32 0.2, %v9193_v57  ;;  %v9195_v60 = vadd.f32 %v9194_v58, %v9122_v0  ;;  %v9131_v43 = vpop.f32.mrf.mxu0  ;;  %v9196_v59 = vpop.f32.mrf.mxu1  ;;  %v9130_v58 = vadd.f32 %v9129_v23, %v9057_v25 }
 0x900   : > { %19296 = vst [vmem:[#allocation134_spill] sm:$0xff] %v17628_v20  ;;  %v12282_v63 = vpack.c.bf16 %v9326_v51, %v9325_v49  ;;  %v17634_v7 = vpack.c.bf16 %v9398_v6, %v9397_v33  ;;  %9317 = vst [vmem:[#allocation2 + $0x4] sm:$0xff] %v17622_v31  ;;  %v9327_v5 = vmul.f32 %v19292_v4, %v17628_v20 }
 0x901   : > { %v17639_v15 = vadd.f32 %v9240_v53, %v4944_v38  ;;  %v9241_v11 = vmax.f32 %v9193_v57, %v9225_v45  ;;  %v9226_v1 = vmul.f32 0.2, %v9195_v60  ;;  %v9133_v9 = vpop.f32.mrf.mxu0  ;;  %v9198_v40 = vpop.f32.mrf.mxu1  ;;  %v9399_v0 = vmul.f32 %v19293_v12, %v17628_v20 }
 0x902   : > { %9389 = vst [vmem:[#allocation2 + $0x84] sm:$0xff] %v12282_v63  ;;  %9461 = vst [vmem:[#allocation2 + $0x104] sm:$0xff] %v17634_v7  ;;  %v9197_v49 = vadd.f32 %v9196_v59, %v9124_v21  ;;  %v9199_v33 = vadd.f32 %v9198_v40, %v9126_v39  ;;  %v9132_v63 = vadd.f32 %v9131_v43, %v17590_v29 }
 0x903   : > { %19297 = vst [vmem:[#allocation127_spill] sm:$0xff] %v17639_v15  ;;  %v17648_v54 = vpack.c.bf16 %v17639_v15, %v17628_v20  ;;  %v9328_v38 = vmul.f32 %v19294_v55, %v17639_v15  ;;  %v9400_v16 = vmul.f32 %v19295_v50, %v17639_v15  ;;  %v17657_v24 = vadd.f32 %v9241_v11, %v4945_v19  ;;  %v9135_v26 = vpop.f32.mrf.mxu0  ;;  %v9202_v57 = vpop.f32.mrf.mxu1 }
 0x904   : > { %v9242_v51 = vmax.f32 %v9195_v60, %v9226_v1  ;;  %v9227_v6 = vmul.f32 0.2, %v9197_v49  ;;  %v9228_v53 = vmul.f32 0.2, %v9199_v33  ;;  %v9134_v21 = vadd.f32 %v9133_v9, %v17594_v28 }
 0x905   : > { %19298 = vst [vmem:[#allocation129_spill] sm:$0xff] %v17657_v24  ;;  %v12283_v45 = vpack.c.bf16 %v9328_v38, %v9327_v5  ;;  %v17659_v59 = vpack.c.bf16 %v9400_v16, %v9399_v0  ;;  %9318 = vst [vmem:[#allocation2 + $0x14] sm:$0xff] %v17648_v54  ;;  %v9139_v39 = vpop.f32.mrf.mxu0  ;;  %v9204_v40 = vpop.f32.mrf.mxu1  ;;  %v9203_v25 = vadd.f32 %v9202_v57, %v9130_v58 }
 0x906   : > { %v17667_v30 = vadd.f32 %v9242_v51, %v19299_v17  ;;  %v9243_v19 = vmax.f32 %v9197_v49, %v9227_v6  ;;  %v9244_v11 = vmax.f32 %v9199_v33, %v9228_v53  ;;  %v9329_v23 = vmul.f32 %v19292_v4, %v17657_v24 }
 0x907   : > { %9390 = vst [vmem:[#allocation2 + $0x94] sm:$0xff] %v12283_v45  ;;  %9462 = vst [vmem:[#allocation2 + $0x114] sm:$0xff] %v17659_v59  ;;  %v9401_v29 = vmul.f32 %v19293_v12, %v17657_v24  ;;  %v9136_v28 = vadd.f32 %v9135_v26, %v17598_v56  ;;  %v9205_v60 = vadd.f32 %v9204_v40, %v9132_v63  ;;  %v9141_v43 = vpop.f32.mrf.mxu0  ;;  %v9206_v5 = vpop.f32.mrf.mxu1  ;;  %v9590_v27 = vld [vmem:[#allocation2 + $0x8] sm:$0xf]  ;;  %v9589_v44 = vld [vmem:[#allocation2] sm:$0xff] }
 0x908   : > { %19300 = vst [vmem:[#allocation135_spill] sm:$0xff] %v17667_v30  ;;  %v17677_v1 = vpack.c.bf16 %v17667_v30, %v17657_v24  ;;  %v9330_v9 = vmul.f32 %v19294_v55, %v17667_v30  ;;  %v9402_v0 = vmul.f32 %v19295_v50, %v17667_v30  ;;  %v19301_v49 = vmax.f32 %v17475_v47, %v17524_v32 }
 0x909   : > { %9623 = vrot.lane.b32.xlu0 %v9590_v27, %s13023_s25  ;;  %v19303_v56 = vmax.f32 %v17478_v61, %v17527_v41  ;;  %v9229_v16 = vmul.f32 0.2, %v9203_v25  ;;  %v9140_v26 = vadd.f32 %v9139_v39, %v17604_v14  ;;  %v9230_v57 = vmul.f32 0.2, %v9205_v60  ;;  %9621 = vrot.lane.b32.xlu1 %v9589_v44, %s13023_s25  ;;  %v9143_v58 = vpop.f32.mrf.mxu0  ;;  %v9208_v51 = vpop.f32.mrf.mxu1  ;;  %v9478_v39 = vld [vmem:[#allocation2 + $0x88] sm:$0xf] }
 0x90a   : > { %v17686_v33 = vadd.f32 %v9243_v19, %v19301_v49  ;;  %v17696_v6 = vpack.c.bf16 %v9330_v9, %v9329_v23  ;;  %v17698_v47 = vpack.c.bf16 %v9402_v0, %v9401_v29  ;;  %9319 = vst [vmem:[#allocation2 + $0x24] sm:$0xff] %v17677_v1  ;;  %v9142_v17 = vadd.f32 %v9141_v43, %v17608_v46  ;;  %v9477_v29 = vld [vmem:[#allocation2 + $0x80] sm:$0xff] }
 0x90b   : > { %v17692_v38 = vadd.f32 %v9244_v11, %v19303_v56  ;;  %v9245_v45 = vmax.f32 %v9203_v25, %v9229_v16  ;;  %v9212_v63 = vpop.f32.mrf.mxu1  ;;  %v9246_v40 = vmax.f32 %v9205_v60, %v9230_v57  ;;  %v9207_v19 = vadd.f32 %v9206_v5, %v9134_v21  ;;  %v9145_v23 = vpop.f32.mrf.mxu0 }
 0x90c   : > { %19302 = vst [vmem:[#allocation136_spill] sm:$0xff] %v17686_v33  ;;  %v9331_v32 = vmul.f32 %v19292_v4, %v17686_v33  ;;  %v9403_v61 = vmul.f32 %v19293_v12, %v17686_v33  ;;  %9391 = vst [vmem:[#allocation2 + $0xa4] sm:$0xff] %v17696_v6  ;;  %v9209_v11 = vadd.f32 %v9208_v51, %v9136_v28 }
 0x90d   : > { %19304 = vst [vmem:[#allocation131_spill] sm:$0xff] %v17692_v38  ;;  %v17707_v41 = vpack.c.bf16 %v17692_v38, %v17686_v33  ;;  %v9332_v14 = vmul.f32 %v19294_v55, %v17692_v38  ;;  %v9404_v53 = vmul.f32 %v19295_v50, %v17692_v38  ;;  %9463 = vst [vmem:[#allocation2 + $0x124] sm:$0xff] %v17698_v47  ;;  %9511 = vrot.lane.b32.xlu0 %v9478_v39, %s13024_s26  ;;  %v9214_v46 = vpop.f32.mrf.mxu1 }
 0x90e   : > { %v19305_v25 = vmax.f32 %v17468_v42, %v17515_v8  ;;  %v9144_v60 = vadd.f32 %v9143_v58, %v17612_v13  ;;  %9509 = vrot.lane.b32.xlu1 %v9477_v29, %s13024_s26  ;;  %v19307_v21 = vmax.f32 %v17472_v3, %v17530_v2  ;;  %v9231_v43 = vmul.f32 0.2, %v9207_v19 }
 0x90f   : > { %v17717_v27 = vpack.c.bf16 %v9332_v14, %v9331_v32  ;;  %v17719_v44 = vpack.c.bf16 %v9404_v53, %v9403_v61  ;;  %9320 = vst [vmem:[#allocation2 + $0x34] sm:$0xff] %v17707_v41  ;;  %v9232_v5 = vmul.f32 0.2, %v9209_v11  ;;  %v9213_v0 = vadd.f32 %v9212_v63, %v9140_v26  ;;  %v9216_v56 = vpop.f32.mrf.mxu1 }
 0x910   : > { %v17725_v9 = vadd.f32 %v9245_v45, %v19305_v25  ;;  %v17732_v28 = vadd.f32 %v9246_v40, %v19307_v21  ;;  %v9146_v13 = vadd.f32 %v9145_v23, %v17632_v37  ;;  %v9215_v49 = vadd.f32 %v9214_v46, %v9142_v17  ;;  %v19313_v46 = vld [vmem:[#allocation128_spill] sm:$0xff] }
 0x911   : > { %9392 = vst [vmem:[#allocation2 + $0xb4] sm:$0xff] %v17717_v27  ;;  %9464 = vst [vmem:[#allocation2 + $0x134] sm:$0xff] %v17719_v44  ;;  %v9247_v26 = vmax.f32 %v9207_v19, %v9231_v43  ;;  %9957 = vrot.lane.b32.xlu0 %v17634_v7, %s13027_s29  ;;  %v9248_v57 = vmax.f32 %v9209_v11, %v9232_v5  ;;  %v9233_v58 = vmul.f32 0.2, %v9213_v0  ;;  %v9218_v32 = vpop.f32.mrf.mxu1  ;;  %v9814_v11 = vld [vmem:[#allocation2 + $0x88] sm:$0xf] }
 0x912   : > { %19306 = vst [vmem:[#allocation132_spill] sm:$0xff] %v17725_v9  ;;  %19308 = vst [vmem:[#allocation133_spill] sm:$0xff] %v17732_v28  ;;  %v9333_v42 = vmul.f32 %v19292_v4, %v17725_v9  ;;  %v9405_v8 = vmul.f32 %v19293_v12, %v17725_v9  ;;  %v17743_v3 = vpack.c.bf16 %v17732_v28, %v17725_v9  ;;  %v9234_v51 = vmul.f32 0.2, %v9215_v49  ;;  %v19314_v21 = vld [vmem:[#allocation124_spill] sm:$0xff] }
 0x913   : > { %v9334_v2 = vmul.f32 %v19294_v55, %v17732_v28  ;;  %v9406_v16 = vmul.f32 %v19295_v50, %v17732_v28  ;;  %v9217_v37 = vadd.f32 %v9216_v56, %v9144_v60  ;;  %9845 = vrot.lane.b32.xlu1 %v9477_v29, %s13025_s27  ;;  %v19309_v53 = vmax.f32 %v17454_v22, %v17509_v36 }
 0x914   : > { %9321 = vst [vmem:[#allocation2 + $0x44] sm:$0xff] %v17743_v3  ;;  %v9219_v63 = vadd.f32 %v9218_v32, %v9146_v13  ;;  %v19311_v7 = vmax.f32 %v17465_v35, %v17518_v34  ;;  %v9249_v40 = vmax.f32 %v9213_v0, %v9233_v58  ;;  %v9250_v17 = vmax.f32 %v9215_v49, %v9234_v51  ;;  %v9701_v34 = vld [vmem:[#allocation2 + $0x100] sm:$0xff]  ;;  %v19318_v0 = vld [vmem:[#allocation123_spill] sm:$0xff]  ;;  %v19321_v32 = vld [vmem:[#allocation121_spill] sm:$0xff] }
 0x915   : > { %v17752_v61 = vpack.c.bf16 %v9334_v2, %v9333_v42  ;;  %v17754_v14 = vpack.c.bf16 %v9406_v16, %v9405_v8  ;;  %v17760_v45 = vadd.f32 %v9247_v26, %v19309_v53  ;;  %v9235_v19 = vmul.f32 0.2, %v9217_v37  ;;  %9847 = vrot.lane.b32.xlu0 %v9814_v11, %s13025_s27  ;;  %v19319_v42 = vld [vmem:[#allocation126_spill] sm:$0xff]  ;;  %v9592_v26 = vld [vmem:[#allocation2 + $0x18] sm:$0xf] }
 0x916   : > { %v17765_v39 = vadd.f32 %v9248_v57, %v19311_v7  ;;  %v4954_v36 = vmax.f32 %v17462_v62, %v17521_v48  ;;  %v9236_v35 = vmul.f32 0.2, %v9219_v63  ;;  %v19315_v43 = vmax.f32 %v19313_v46, %v19314_v21  ;;  %v9591_v7 = vld [vmem:[#allocation2 + $0x10] sm:$0xff] }
 0x917   : > { %19310 = vst [vmem:[#allocation122_spill] sm:$0xff] %v17760_v45  ;;  %9393 = vst [vmem:[#allocation2 + $0xc4] sm:$0xff] %v17752_v61  ;;  %v9335_v23 = vmul.f32 %v19292_v4, %v17760_v45  ;;  %v9407_v22 = vmul.f32 %v19293_v12, %v17760_v45  ;;  %9733 = vrot.lane.b32.xlu1 %v9701_v34, %s13026_s28  ;;  %v9251_v48 = vmax.f32 %v9217_v37, %v9235_v19  ;;  %v19320_v37 = vld [vmem:[#allocation125_spill] sm:$0xff]  ;;  %v9480_v34 = vld [vmem:[#allocation2 + $0x98] sm:$0xf] }
 0x918   : > { %19312 = vst [vmem:[#allocation120_spill] sm:$0xff] %v17765_v39  ;;  %9465 = vst [vmem:[#allocation2 + $0x144] sm:$0xff] %v17754_v14  ;;  %v17778_v29 = vpack.c.bf16 %v17765_v39, %v17760_v45  ;;  %v9336_v25 = vmul.f32 %v19294_v55, %v17765_v39  ;;  %v9408_v60 = vmul.f32 %v19295_v50, %v17765_v39 }
 0x919   : > { %v17787_v5 = vadd.f32 %v9249_v40, %v19315_v43  ;;  %v17790_v62 = vadd.f32 %v9250_v17, %v4954_v36  ;;  %v4956_v8 = vmax.f32 %v19319_v42, %v19318_v0  ;;  %v9252_v13 = vmax.f32 %v9219_v63, %v9236_v35  ;;  %9627 = vrot.lane.b32.xlu0 %v9592_v26, %s13023_s25  ;;  %v9816_v0 = vld [vmem:[#allocation2 + $0x98] sm:$0xf]  ;;  %v9593_v42 = vld [vmem:[#allocation2 + $0x20] sm:$0xff] }
 0x91a   : > { %v17794_v49 = vpack.c.bf16 %v9336_v25, %v9335_v23  ;;  %v17796_v56 = vpack.c.bf16 %v9408_v60, %v9407_v22  ;;  %9322 = vst [vmem:[#allocation2 + $0x54] sm:$0xff] %v17778_v29  ;;  %v19322_v53 = vmax.f32 %v19320_v37, %v19321_v32  ;;  %v9705_v26 = vld [vmem:[#allocation2 + $0x120] sm:$0xff]  ;;  %v9484_v37 = vld [vmem:[#allocation2 + $0xb8] sm:$0xf]  ;;  %v9483_v32 = vld [vmem:[#allocation2 + $0xb0] sm:$0xff] }
 0x91b   : > { %19316 = vst [vmem:[#allocation101_spill] sm:$0xff] %v17787_v5  ;;  %19317 = vst [vmem:[#allocation119_spill] sm:$0xff] %v17790_v62  ;;  %v9337_v2 = vmul.f32 %v19292_v4, %v17787_v5  ;;  %v9409_v16 = vmul.f32 %v19293_v12, %v17787_v5  ;;  %v17805_v57 = vpack.c.bf16 %v17790_v62, %v17787_v5  ;;  %9625 = vrot.lane.b32.xlu1 %v9591_v7, %s13023_s25  ;;  %v9820_v7 = vld [vmem:[#allocation2 + $0xb8] sm:$0xf] }
 0x91c   : > { %v9338_v58 = vmul.f32 %v19294_v55, %v17790_v62  ;;  %v9410_v51 = vmul.f32 %v19295_v50, %v17790_v62  ;;  %v17814_v63 = vadd.f32 %v9251_v48, %v19322_v53  ;;  %9394 = vst [vmem:[#allocation2 + $0xd4] sm:$0xff] %v17794_v49  ;;  %9466 = vst [vmem:[#allocation2 + $0x154] sm:$0xff] %v17796_v56  ;;  %v9708_v53 = vld [vmem:[#allocation2 + $0x138] sm:$0xf] }
 0x91d   : > { %v17819_v40 = vadd.f32 %v9252_v13, %v4956_v8  ;;  %9323 = vst [vmem:[#allocation2 + $0x64] sm:$0xff] %v17805_v57  ;;  %9515 = vrot.lane.b32.xlu0 %v9480_v34, %s13024_s26  ;;  %v9594_v8 = vld [vmem:[#allocation2 + $0x28] sm:$0xf] }
 0x91e   : > { %19323 = vst [vmem:[#allocation118_spill] sm:$0xff] %v17814_v63  ;;  %v17822_v17 = vpack.c.bf16 %v9338_v58, %v9337_v2  ;;  %v17824_v19 = vpack.c.bf16 %v9410_v51, %v9409_v16  ;;  %v9339_v11 = vmul.f32 %v19292_v4, %v17814_v63  ;;  %v9411_v23 = vmul.f32 %v19293_v12, %v17814_v63  ;;  %v9479_v4 = vld [vmem:[#allocation2 + $0x90] sm:$0xff]  ;;  %v9482_v13 = vld [vmem:[#allocation2 + $0xa8] sm:$0xf]  ;;  %v9596_v58 = vld [vmem:[#allocation2 + $0x38] sm:$0xf] }
 0x91f   : > { %19324 = vst [vmem:[#allocation117_spill] sm:$0xff] %v17819_v40  ;;  %v17833_v22 = vpack.c.bf16 %v17819_v40, %v17814_v63  ;;  %v9340_v36 = vmul.f32 %v19294_v55, %v17819_v40  ;;  %v9412_v35 = vmul.f32 %v19295_v50, %v17819_v40  ;;  %9513 = vrot.lane.b32.xlu1 %v9479_v4, %s13024_s26  ;;  %v9818_v2 = vld [vmem:[#allocation2 + $0xa8] sm:$0xf]  ;;  %v9595_v51 = vld [vmem:[#allocation2 + $0x30] sm:$0xff]  ;;  %v9485_v34 = vld [vmem:[#allocation2 + $0xc0] sm:$0xff] }
 0x920   : > { %9395 = vst [vmem:[#allocation2 + $0xe4] sm:$0xff] %v17822_v17  ;;  %9467 = vst [vmem:[#allocation2 + $0x164] sm:$0xff] %v17824_v19  ;;  %v9706_v16 = vld [vmem:[#allocation2 + $0x128] sm:$0xf]  ;;  %v10050_v50 = vld [vmem:[#allocation2 + $0xec] sm:$0xf] }
 0x921   : > { %v17842_v25 = vpack.c.bf16 %v9340_v36, %v9339_v11  ;;  %v17844_v12 = vpack.c.bf16 %v9412_v35, %v9411_v23  ;;  %9324 = vst [vmem:[#allocation2 + $0x74] sm:$0xff] %v17833_v22  ;;  %9961 = vrot.lane.b32.xlu0 %v17659_v59, %s13027_s29  ;;  %v9481_v59 = vld [vmem:[#allocation2 + $0xa0] sm:$0xff]  ;;  %v9598_v11 = vld [vmem:[#allocation2 + $0x48] sm:$0xf]  ;;  %v9707_v23 = vld [vmem:[#allocation2 + $0x130] sm:$0xff] }
 0x922   : > { %v9486_v36 = vld [vmem:[#allocation2 + $0xc8] sm:$0xf]  ;;  %v9597_v35 = vld [vmem:[#allocation2 + $0x40] sm:$0xff]  ;;  %v10052_v55 = vld [vmem:[#allocation2 + $0xfc] sm:$0xf] }
 0x923   : > { %9396 = vst [vmem:[#allocation2 + $0xf4] sm:$0xff] %v17842_v25  ;;  %9468 = vst [vmem:[#allocation2 + $0x174] sm:$0xff] %v17844_v12  ;;  %9849 = vrot.lane.b32.xlu1 %v9479_v4, %s13025_s27  ;;  %v9822_v4 = vld [vmem:[#allocation2 + $0xc8] sm:$0xf]  ;;  %v12072_v63 = vld [vmem:[%s18800_s4 + $0x50] sm:$0xff] }
 0x925   : > { %9851 = vrot.lane.b32.xlu0 %v9816_v0, %s13025_s27  ;;  %v9710_v0 = vld [vmem:[#allocation2 + $0x148] sm:$0xf] }
 0x927   : > { %9629 = vrot.lane.b32.xlu1 %v9593_v42, %s13023_s25  ;;  %v9709_v42 = vld [vmem:[#allocation2 + $0x140] sm:$0xff] }
 0x929   : > { %9631 = vrot.lane.b32.xlu0 %v9594_v8, %s13023_s25  ;;  %v9600_v8 = vld [vmem:[#allocation2 + $0x58] sm:$0xf] }
 0x92a   : > { %v9716_v24 = vld [vmem:[#allocation2 + $0x178] sm:$0xf] }
 0x92b   : > { %9517 = vrot.lane.b32.xlu1 %v9481_v59, %s13024_s26 }
 0x92d   : > { %9519 = vrot.lane.b32.xlu0 %v9482_v13, %s13024_s26  ;;  %v9488_v13 = vld [vmem:[#allocation2 + $0xd8] sm:$0xf] }
 0x92f   : > { %9965 = vrot.lane.b32.xlu1 %v17698_v47, %s13027_s29 }
 0x931   : > { %9853 = vrot.lane.b32.xlu0 %v9481_v59, %s13025_s27  ;;  %v9599_v59 = vld [vmem:[#allocation2 + $0x50] sm:$0xff] }
 0x933   : > { %9855 = vrot.lane.b32.xlu1 %v9818_v2, %s13025_s27  ;;  %v9487_v2 = vld [vmem:[#allocation2 + $0xd0] sm:$0xff] }
 0x935   : > { %9743 = vrot.lane.b32.xlu0 %v9706_v16, %s13026_s28  ;;  %v9824_v16 = vld [vmem:[#allocation2 + $0xd8] sm:$0xf] }
 0x937   : > { %9741 = vrot.lane.b32.xlu1 %v9705_v26, %s13026_s28  ;;  %v9711_v26 = vld [vmem:[#allocation2 + $0x150] sm:$0xff] }
 0x939   : > { %9635 = vrot.lane.b32.xlu0 %v9596_v58, %s13023_s25  ;;  %v9712_v58 = vld [vmem:[#allocation2 + $0x158] sm:$0xf] }
 0x93b   : > { %9633 = vrot.lane.b32.xlu1 %v9595_v51, %s13023_s25  ;;  %v9601_v51 = vld [vmem:[#allocation2 + $0x60] sm:$0xff] }
 0x93d   : > { %9523 = vrot.lane.b32.xlu0 %v9484_v37, %s13024_s26  ;;  %v17909_v37 = vpop.permute.xlu0 %12679 }
 0x93f   : > { %9521 = vrot.lane.b32.xlu1 %v9483_v32, %s13024_s26 }
 0x941   : > { %9857 = vrot.lane.b32.xlu0 %v9483_v32, %s13025_s27  ;;  %v9602_v32 = vld [vmem:[#allocation2 + $0x68] sm:$0xf] }
 0x943   : > { %9969 = vrot.lane.b32.xlu1 %v17719_v44, %s13027_s29 }
 0x945   : > { %9747 = vrot.lane.b32.xlu0 %v9708_v53, %s13026_s28  ;;  %v17911_v53 = vpop.permute.xlu1 %12684 }
 0x947   : > { %9859 = vrot.lane.b32.xlu1 %v9820_v7, %s13025_s27  ;;  %v9489_v7 = vld [vmem:[#allocation2 + $0xe0] sm:$0xff] }
 0x949   : > { %9639 = vrot.lane.b32.xlu0 %v9598_v11, %s13023_s25  ;;  %v9490_v11 = vld [vmem:[#allocation2 + $0xe8] sm:$0xf] }
 0x94b   : > { %9745 = vrot.lane.b32.xlu1 %v9707_v23, %s13026_s28  ;;  %v17916_v23 = vpop.permute.xlu0 %12689 }
 0x94d   : > { %9527 = vrot.lane.b32.xlu0 %v9486_v36, %s13024_s26  ;;  %v17920_v36 = vpop.permute.xlu1 %12694 }
 0x94f   : > { %9637 = vrot.lane.b32.xlu1 %v9597_v35, %s13023_s25  ;;  %v9826_v35 = vld [vmem:[#allocation2 + $0xe8] sm:$0xf] }
 0x951   : > { %9973 = vrot.lane.b32.xlu0 %v17754_v14, %s13027_s29 }
 0x953   : > { %9525 = vrot.lane.b32.xlu1 %v9485_v34, %s13024_s26 }
 0x955   : > { %9863 = vrot.lane.b32.xlu0 %v9822_v4, %s13025_s27 }
 0x957   : > { %9861 = vrot.lane.b32.xlu1 %v9485_v34, %s13025_s27 }
 0x959   : > { %9751 = vrot.lane.b32.xlu0 %v9710_v0, %s13026_s28  ;;  %v9714_v0 = vld [vmem:[#allocation2 + $0x168] sm:$0xf] }
 0x95b   : > { %9749 = vrot.lane.b32.xlu1 %v9709_v42, %s13026_s28  ;;  %v9713_v42 = vld [vmem:[#allocation2 + $0x160] sm:$0xff] }
 0x95d   : > { %9643 = vrot.lane.b32.xlu0 %v9600_v8, %s13023_s25 }
 0x95f   : > { %9641 = vrot.lane.b32.xlu1 %v9599_v59, %s13023_s25 }
 0x961   : > { %9531 = vrot.lane.b32.xlu0 %v9488_v13, %s13024_s26  ;;  %v9604_v13 = vld [vmem:[#allocation2 + $0x78] sm:$0xf] }
 0x963   : > { %9529 = vrot.lane.b32.xlu1 %v9487_v2, %s13024_s26 }
 0x965   : > { %9977 = vrot.lane.b32.xlu0 %v17796_v56, %s13027_s29 }
 0x967   : > { %9865 = vrot.lane.b32.xlu1 %v9487_v2, %s13025_s27  ;;  %v9603_v2 = vld [vmem:[#allocation2 + $0x70] sm:$0xff] }
 0x969   : > { %9867 = vrot.lane.b32.xlu0 %v9824_v16, %s13025_s27 }
 0x96b   : > { %9753 = vrot.lane.b32.xlu1 %v9711_v26, %s13026_s28 }
 0x96d   : > { %9755 = vrot.lane.b32.xlu0 %v9712_v58, %s13026_s28  ;;  %v9702_v58 = vld [vmem:[#allocation2 + $0x108] sm:$0xf] }
 0x96f   : > { %9645 = vrot.lane.b32.xlu1 %v9601_v51, %s13023_s25  ;;  %v9703_v51 = vld [vmem:[#allocation2 + $0x110] sm:$0xff] }
 0x971   : > { %9647 = vrot.lane.b32.xlu0 %v9602_v32, %s13023_s25  ;;  %v10162_v32 = vld [vmem:[#allocation2 + $0x6c] sm:$0xf] }
 0x973   : > { %9533 = vrot.lane.b32.xlu1 %v9489_v7, %s13024_s26 }
 0x975   : > { %9535 = vrot.lane.b32.xlu0 %v9490_v11, %s13024_s26 }
 0x977   : > { %9981 = vrot.lane.b32.xlu1 %v17824_v19, %s13027_s29 }
 0x979   : > { %9869 = vrot.lane.b32.xlu0 %v9489_v7, %s13025_s27  ;;  %v10164_v7 = vld [vmem:[#allocation2 + $0x7c] sm:$0xf] }
 0x97b   : > { %9871 = vrot.lane.b32.xlu1 %v9826_v35, %s13025_s27  ;;  %v17924_v34 = vpop.permute.xlu0 %9623  ;;  %v17926_v4 = vpop.permute.xlu1 %9621 }
 0x97d   : > { %9759 = vrot.lane.b32.xlu0 %v9714_v0, %s13026_s28  ;;  %v9704_v0 = vld [vmem:[#allocation2 + $0x118] sm:$0xf] }
 0x97f   : > { %9757 = vrot.lane.b32.xlu1 %v9713_v42, %s13026_s28  ;;  %v17930_v8 = vpop.permute.xlu0 %9511  ;;  %v12698_v42 = vpack.i.bf16 %v10164_v7, %v10162_v32  ;;  %v9491_v32 = vld [vmem:[#allocation2 + $0xf0] sm:$0xff] }
 0x980   : > { %v17932_v59 = vpop.permute.xlu1 %9509 }
 0x981   : > { %9651 = vrot.lane.b32.xlu0 %v9604_v13, %s13023_s25 }
 0x983   : > { %9649 = vrot.lane.b32.xlu1 %v9603_v2, %s13023_s25  ;;  %v17936_v16 = vpop.permute.xlu0 %9957 }
 0x985   : > { %v17938_v26 = vpop.permute.xlu1 %9845  ;;  %9735 = vrot.lane.b32.xlu0 %v9702_v58, %s13026_s28 }
 0x987   : > { %9737 = vrot.lane.b32.xlu1 %v9703_v51, %s13026_s28  ;;  %v17942_v11 = vpop.permute.xlu0 %9847  ;;  %v10158_v51 = vld [vmem:[#allocation2 + $0x4c] sm:$0xf] }
 0x989   : > { %v17944_v35 = vpop.permute.xlu1 %9733  ;;  %9739 = vrot.lane.b32.xlu0 %v9704_v0, %s13026_s28  ;;  %v9492_v0 = vld [vmem:[#allocation2 + $0xf8] sm:$0xf] }
 0x98a   : > { %19325 = vst [vmem:[#allocation115_spill] sm:$0xff] %v17944_v35 }
 0x98b   : > { %10205 = vrot.lane.b32.xlu1 %v17805_v57, %s13028_s7  ;;  %v17949_v13 = vpop.permute.xlu0 %9627  ;;  %v12703_v57 = vpack.i.bf16 %v10160_v18, %v10158_v51 }
 0x98d   : > { %v17951_v2 = vpop.permute.xlu1 %9625  ;;  %12699 = vrot.lane.b32.xlu0 %v12698_v42, %s13028_s7  ;;  %v10156_v42 = vld [vmem:[#allocation2 + $0x3c] sm:$0xf] }
 0x98f   : > { %10209 = vrot.lane.b32.xlu1 %v17833_v22, %s13028_s7  ;;  %v17956_v58 = vpop.permute.xlu0 %9515  ;;  %v10154_v22 = vld [vmem:[#allocation2 + $0x2c] sm:$0xf] }
 0x991   : > { %v17958_v48 = vpop.permute.xlu1 %9513  ;;  %9539 = vrot.lane.b32.xlu0 %v9492_v0, %s13024_s26  ;;  %v12708_v0 = vpack.i.bf16 %v10156_v42, %v10154_v22  ;;  %v10152_v42 = vld [vmem:[#allocation2 + $0x1c] sm:$0xf] }
 0x993   : > { %9537 = vrot.lane.b32.xlu1 %v9491_v32, %s13024_s26  ;;  %v17962_v7 = vpop.permute.xlu0 %9961 }
 0x995   : > { %v17964_v43 = vpop.permute.xlu1 %9849  ;;  %10197 = vrot.lane.b32.xlu0 %v17743_v3, %s13028_s7 }
 0x997   : > { %12704 = vrot.lane.b32.xlu1 %v12703_v57, %s13028_s7  ;;  %v17969_v21 = vpop.permute.xlu0 %9851 }
 0x999   : > { %v17971_v46 = vpop.permute.xlu1 %9629  ;;  %10201 = vrot.lane.b32.xlu0 %v17778_v29, %s13028_s7  ;;  %v9828_v29 = vld [vmem:[#allocation2 + $0xf8] sm:$0xf] }
 0x99b   : > { %10189 = vrot.lane.b32.xlu1 %v17677_v1, %s13028_s7  ;;  %v17977_v18 = vpop.permute.xlu0 %9631  ;;  %v10150_v1 = vld [vmem:[#allocation2 + $0xc] sm:$0xf] }
 0x99d   : > { %v17979_v51 = vpop.permute.xlu1 %9517  ;;  %12709 = vrot.lane.b32.xlu0 %v12708_v0, %s13028_s7  ;;  %v12713_v0 = vpack.i.bf16 %v10152_v42, %v10150_v1  ;;  %v10276_v1 = vld [vmem:[#allocation2 + $0x17c] sm:$0xf] }
 0x99f   : > { %9985 = vrot.lane.b32.xlu1 %v17844_v12, %s13027_s29  ;;  %v17984_v3 = vpop.permute.xlu0 %9519 }
 0x9a1   : > { %v17986_v57 = vpop.permute.xlu1 %9965  ;;  %9873 = vrot.lane.b32.xlu0 %v9491_v32, %s13025_s27 }
 0x9a3   : > { %9875 = vrot.lane.b32.xlu1 %v9828_v29, %s13025_s27  ;;  %v17990_v22 = vpop.permute.xlu0 %9853  ;;  %v12718_v29 = vpack.i.bf16 %v10052_v55, %v10050_v50  ;;  %v10046_v50 = vld [vmem:[#allocation2 + $0xcc] sm:$0xf] }
 0x9a5   : > { %v17992_v60 = vpop.permute.xlu1 %9855  ;;  %10181 = vrot.lane.b32.xlu0 %v17622_v31, %s13028_s7 }
 0x9a7   : > { %10193 = vrot.lane.b32.xlu1 %v17707_v41, %s13028_s7  ;;  %v17998_v10 = vpop.permute.xlu0 %9743  ;;  %v10274_v41 = vld [vmem:[#allocation2 + $0x16c] sm:$0xf] }
 0x9a8   : > { %19326 = vst [vmem:[#allocation116_spill] sm:$0xff] %v17998_v10  ;;  %v12723_v55 = vpack.i.bf16 %v10276_v1, %v10274_v41  ;;  %v10270_v1 = vld [vmem:[#allocation2 + $0x14c] sm:$0xf] }
 0x9a9   : > { %v18000_v32 = vpop.permute.xlu1 %9741  ;;  %10185 = vrot.lane.b32.xlu0 %v17648_v54, %s13028_s7  ;;  %v9715_v54 = vld [vmem:[#allocation2 + $0x170] sm:$0xff] }
 0x9aa   : > { %19327 = vst [vmem:[#allocation114_spill] sm:$0xff] %v18000_v32 }
 0x9ab   : > { %12714 = vrot.lane.b32.xlu1 %v12713_v0, %s13028_s7  ;;  %v18005_v20 = vpop.permute.xlu0 %9635  ;;  %v10048_v0 = vld [vmem:[#allocation2 + $0xdc] sm:$0xf] }
 0x9ac   : > { %v9660_v62 = vrot.slane %v18005_v20, 4  ;;  %v9658_v20 = vrot.slane %v17977_v18, 4 }
 0x9ad   : > { %v18007_v52 = vpop.permute.xlu1 %9633  ;;  %12719 = vrot.lane.b32.xlu0 %v12718_v29, %s13029_s8 }
 0x9af   : > { %10093 = vrot.lane.b32.xlu1 %v17822_v17, %s13029_s8  ;;  %v9524_v31 = vpop.permute.xlu0 %9523 }
 0x9b0   : > { %v9548_v42 = vrot.slane %v9524_v31, 4  ;;  %v12728_v31 = vpack.i.bf16 %v10048_v0, %v10046_v50  ;;  %v10042_v0 = vld [vmem:[#allocation2 + $0xac] sm:$0xf] }
 0x9b1   : > { %v9522_v15 = vpop.permute.xlu1 %9521  ;;  %9763 = vrot.lane.b32.xlu0 %v9716_v24, %s13026_s28 }
 0x9b2   : > { %v9547_v33 = vrot.slane %v9522_v15, 4 }
 0x9b3   : > { %9761 = vrot.lane.b32.xlu1 %v9715_v54, %s13026_s28  ;;  %v9858_v30 = vpop.permute.xlu0 %9857 }
 0x9b4   : > { %v9563_v29 = vsel %vm619_vm4, %v9547_v33, %v9548_v42  ;;  %v9883_v54 = vrot.slane %v9858_v30, 4  ;;  %v10272_v42 = vld [vmem:[#allocation2 + $0x15c] sm:$0xf] }
 0x9b5   : > { %v18016_v17 = vsel %vm621_vm6, %v9522_v15, %v9563_v29  ;;  %v18018_v38 = vpop.permute.xlu1 %9969  ;;  %10317 = vrot.lane.b32.xlu0 %v17824_v19, %s13030_s9 }
 0x9b7   : > { %12724 = vrot.lane.b32.xlu1 %v12723_v55, %s13030_s9  ;;  %v9748_v24 = vpop.permute.xlu0 %9747 }
 0x9b8   : > { %v9772_v55 = vrot.slane %v9748_v24, 4 }
 0x9b9   : > { %v9860_v9 = vpop.permute.xlu1 %9859  ;;  %12729 = vrot.lane.b32.xlu0 %v12728_v31, %s13029_s8  ;;  %v10044_v31 = vld [vmem:[#allocation2 + $0xbc] sm:$0xf] }
 0x9ba   : > { %v9884_v41 = vrot.slane %v9860_v9, 4  ;;  %v12956_v9 = vld [vmem:[%s18799_s3 + $0xa4] ss:$20 sps:$4 sm:$0xff]  }
 0x9bb   : > { %10085 = vrot.lane.b32.xlu1 %v17752_v61, %s13029_s8  ;;  %v18027_v33 = vpop.permute.xlu0 %9639  ;;  %v12733_v61 = vpack.i.bf16 %v10272_v42, %v10270_v1  ;;  %11023 = vmatprep.mubr.bf16.mxu1 %v12956_v9 }
 0x9bc   : > { %v9899_v15 = vsel %vm619_vm4, %v9883_v54, %v9884_v41 }
 0x9bd   : > { %v9746_v29 = vpop.permute.xlu1 %9745  ;;  %v18030_v19 = vsel %vm960_vm7, %v9858_v30, %v9899_v15  ;;  %10309 = vrot.lane.b32.xlu0 %v17754_v14, %s13030_s9  ;;  %v12738_v14 = vpack.i.bf16 %v10044_v31, %v10042_v0 }
 0x9be   : > { %19328 = vst [vmem:[#allocation113_spill] sm:$0xff] %v18030_v19  ;;  %v9771_v50 = vrot.slane %v9746_v29, 4 }
 0x9bf   : > { %10089 = vrot.lane.b32.xlu1 %v17794_v49, %s13029_s8  ;;  %v9528_v41 = vpop.permute.xlu0 %9527 }
 0x9c0   : > { %v9787_v54 = vsel %vm619_vm4, %v9771_v50, %v9772_v55  ;;  %v9550_v1 = vrot.slane %v9528_v41, 4 }
 0x9c1   : > { %v18041_v30 = vsel %vm847_vm8, %v9746_v29, %v9787_v54  ;;  %v18043_v24 = vpop.permute.xlu1 %9637  ;;  %10313 = vrot.lane.b32.xlu0 %v17796_v56, %s13030_s9  ;;  %v10266_v54 = vld [vmem:[#allocation2 + $0x12c] sm:$0xf] }
 0x9c2   : > { %19329 = vst [vmem:[#allocation109_spill] sm:$0xff] %v18041_v30 }
 0x9c3   : > { %12734 = vrot.lane.b32.xlu1 %v12733_v61, %s13030_s9  ;;  %v18048_v15 = vpop.permute.xlu0 %9973 }
 0x9c5   : > { %v9526_v49 = vpop.permute.xlu1 %9525  ;;  %12739 = vrot.lane.b32.xlu0 %v12738_v14, %s13029_s8 }
 0x9c6   : > { %v9549_v42 = vrot.slane %v9526_v49, 4 }
 0x9c7   : > { %10077 = vrot.lane.b32.xlu1 %v17696_v6, %s13029_s8  ;;  %v9864_v55 = vpop.permute.xlu0 %9863  ;;  %v10268_v6 = vld [vmem:[#allocation2 + $0x13c] sm:$0xf] }
 0x9c8   : > { %v9565_v29 = vsel %vm619_vm4, %v9549_v42, %v9550_v1  ;;  %v9886_v56 = vrot.slane %v9864_v55, 4  ;;  %v10038_v42 = vld [vmem:[#allocation2 + $0x8c] sm:$0xf] }
 0x9c9   : > { %v18055_v50 = vsel %vm621_vm6, %v9526_v49, %v9565_v29  ;;  %v9862_v9 = vpop.permute.xlu1 %9861  ;;  %10301 = vrot.lane.b32.xlu0 %v17698_v47, %s13030_s9  ;;  %v12743_v47 = vpack.i.bf16 %v10268_v6, %v10266_v54  ;;  %v10262_v6 = vld [vmem:[#allocation2 + $0x10c] sm:$0xf] }
 0x9ca   : > { %v9885_v0 = vrot.slane %v9862_v9, 4 }
 0x9cb   : > { %10081 = vrot.lane.b32.xlu1 %v17717_v27, %s13029_s8  ;;  %v9752_v31 = vpop.permute.xlu0 %9751  ;;  %v10040_v27 = vld [vmem:[#allocation2 + $0x9c] sm:$0xf] }
 0x9cc   : > { %v9901_v61 = vsel %vm619_vm4, %v9885_v0, %v9886_v56  ;;  %v9774_v14 = vrot.slane %v9752_v31, 4  ;;  %v12748_v0 = vpack.i.bf16 %v10040_v27, %v10038_v42  ;;  %v12968_v31 = vld [vmem:[%s18799_s3 + $0xac] ss:$20 sps:$4 sm:$0xff]  }
 0x9cd   : > { %v18063_v41 = vsel %vm960_vm7, %v9862_v9, %v9901_v61  ;;  %v9750_v49 = vpop.permute.xlu1 %9749  ;;  %10305 = vrot.lane.b32.xlu0 %v17719_v44, %s13030_s9  ;;  %v10037_v61 = vld [vmem:[#allocation2 + $0x84] sm:$0xff]  ;;  %11096 = vmatprep.mubr.bf16.mxu0 %v12968_v31 }
 0x9ce   : > { %v9773_v1 = vrot.slane %v9750_v49, 4  ;;  %v1573_v31 = vld [vmem:[%s18798_s2 + $0x48] sm:$0xff] }
 0x9cf   : > { %10097 = vrot.lane.b32.xlu1 %v17842_v25, %s13029_s8  ;;  %v18070_v55 = vpop.permute.xlu0 %9643 }
 0x9d0   : > { %v9789_v29 = vsel %vm619_vm4, %v9773_v1, %v9774_v14  ;;  %v10039_v1 = vld [vmem:[#allocation2 + $0x94] sm:$0xff] }
 0x9d1   : > { %v18073_v56 = vsel %vm847_vm8, %v9750_v49, %v9789_v29  ;;  %v18075_v9 = vpop.permute.xlu1 %9641  ;;  %10321 = vrot.lane.b32.xlu0 %v17844_v12, %s13030_s9  ;;  %v10264_v12 = vld [vmem:[#allocation2 + $0x11c] sm:$0xf]  ;;  %v10261_v49 = vld [vmem:[#allocation2 + $0x104] sm:$0xff] }
 0x9d2   : > { %19330 = vst [vmem:[#allocation111_spill] sm:$0xff] %v18073_v56  ;;  %v9663_v56 = vrot.slane %v18075_v9, 4 }
 0x9d3   : > { %12744 = vrot.lane.b32.xlu1 %v12743_v47, %s13030_s9  ;;  %v18080_v44 = vpop.permute.xlu0 %9531  ;;  %v12753_v47 = vpack.i.bf16 %v10264_v12, %v10262_v6  ;;  %v1572_v6 = vld [vmem:[%s18798_s2 + $0x40] sm:$0xff] }
 0x9d5   : > { %v18082_v25 = vpop.permute.xlu1 %9529  ;;  %12749 = vrot.lane.b32.xlu0 %v12748_v0, %s13029_s8 }
 0x9d7   : > { %10069 = vrot.lane.b32.xlu1 %v10037_v61, %s13029_s8  ;;  %v18089_v54 = vpop.permute.xlu0 %9977  ;;  %v10263_v61 = vld [vmem:[#allocation2 + $0x114] sm:$0xff] }
 0x9d9   : > { %v9866_v14 = vpop.permute.xlu1 %9865  ;;  %10293 = vrot.lane.b32.xlu0 %v10261_v49, %s13030_s9 }
 0x9da   : > { %v9887_v27 = vrot.slane %v9866_v14, 4 }
 0x9db   : > { %10073 = vrot.lane.b32.xlu1 %v10039_v1, %s13029_s8  ;;  %v9868_v42 = vpop.permute.xlu0 %9867  ;;  %s18718_s8 = scalar_lea.vmem %s18801_s5, %s12176_s21 }
 0x9dc   : > { %v9888_v29 = vrot.slane %v9868_v42, 4 }
 0x9dd   : > { %v9754_v0 = vpop.permute.xlu1 %9753  ;;  %10297 = vrot.lane.b32.xlu0 %v10263_v61, %s13030_s9  ;;  %v1575_v61 = vld [vmem:[%s18798_s2 + $0x58] sm:$0xff] }
 0x9de   : > { %v9903_v30 = vsel %vm619_vm4, %v9887_v27, %v9888_v29  ;;  %v9775_v1 = vrot.slane %v9754_v0, 4  ;;  %v12071_v27 = vld [vmem:[%s18800_s4 + $0x48] sm:$0xff] }
 0x9df   : > { %12754 = vrot.lane.b32.xlu1 %v12753_v47, %s13030_s9  ;;  %v9756_v49 = vpop.permute.xlu0 %9755  ;;  %v18103_v12 = vsel %vm960_vm7, %v9866_v14, %v9903_v30  ;;  %v1574_v30 = vld [vmem:[%s18798_s2 + $0x50] sm:$0xff] }
 0x9e0   : > { %v9776_v42 = vrot.slane %v9756_v49, 4 }
 0x9e1   : > { %v9646_v45 = vpop.permute.xlu1 %9645  ;;  %1627 = vperm.xlu0 %12436, %v1573_v31   ;;  %v1579_v31 = vld [vmem:[%s18798_s2 + $0x78] sm:$0xff] }
 0x9e2   : > { %v9791_v29 = vsel %vm619_vm4, %v9775_v1, %v9776_v42  ;;  %v1577_v1 = vld [vmem:[%s18798_s2 + $0x68] sm:$0xff]  ;;  %v9665_v39 = vrot.slane %v9646_v45, 4 }
 0x9e3   : > { %1622 = vperm.xlu1 %12437, %v1572_v6   ;;  %v9648_v35 = vpop.permute.xlu0 %9647  ;;  %v18117_v14 = vsel %vm847_vm8, %v9754_v0, %v9791_v29  ;;  %v1576_v0 = vld [vmem:[%s18798_s2 + $0x60] sm:$0xff] }
 0x9e4   : > { %19331 = vst [vmem:[#allocation112_spill] sm:$0xff] %v18117_v14  ;;  %v9664_v14 = vrot.slane %v18070_v55, 4  ;;  %v9666_v28 = vrot.slane %v9648_v35, 4  ;;  %v9659_v55 = vrot.slane %v18007_v52, 4 }
 0x9e5   : > { %v18119_v49 = vpop.permute.xlu1 %9533  ;;  %1637 = vperm.xlu0 %12436, %v1575_v61  }
 0x9e6   : > { %v9681_v32 = vsel %vm619_vm4, %v9665_v39, %v9666_v28  ;;  %v12074_v28 = vld [vmem:[%s18800_s4 + $0x60] sm:$0xff]  ;;  %v9655_v39 = vrot.slane %v17951_v2, 4 }
 0x9e7   : > { %1632 = vperm.xlu1 %12437, %v1574_v30   ;;  %v18128_v42 = vpop.permute.xlu0 %9535  ;;  %v1578_v30 = vld [vmem:[%s18798_s2 + $0x70] sm:$0xff] }
 0x9e9   : > { %v18133_v29 = vpop.permute.xlu1 %9981  ;;  %1647 = vperm.xlu0 %12436, %v1577_v1  }
 0x9eb   : > { %1642 = vperm.xlu1 %12437, %v1576_v0   ;;  %v18138_v61 = vpop.permute.xlu0 %9869  ;;  %v12070_v0 = vld [vmem:[%s18800_s4 + $0x40] sm:$0xff] }
 0x9ed   : > { %v18143_v6 = vpop.permute.xlu1 %9871  ;;  %1657 = vperm.xlu0 %12436, %v1579_v31   ;;  %v12073_v31 = vld [vmem:[%s18800_s4 + $0x58] sm:$0xff] }
 0x9ef   : > { %1652 = vperm.xlu1 %12437, %v1578_v30   ;;  %v18148_v1 = vpop.permute.xlu0 %9759  ;;  %v9661_v30 = vrot.slane %v18043_v24, 4 }
 0x9f0   : > { %19332 = vst [vmem:[#allocation110_spill] sm:$0xff] %v18148_v1  ;;  %v9656_v1 = vrot.slane %v17949_v13, 4 }
 0x9f1   : > { %v18153_v47 = vpop.permute.xlu1 %9757  ;;  %10486 = vperm.xlu0 %12436, %v12071_v27   ;;  %v9662_v27 = vrot.slane %v18027_v33, 4 }
 0x9f2   : > { %19333 = vst [vmem:[#allocation107_spill] sm:$0xff] %v18153_v47  ;;  %v12075_v47 = vld [vmem:[%s18800_s4 + $0x68] sm:$0xff] }
 0x9f3   : > { %10481 = vperm.xlu1 %12437, %v12070_v0   ;;  %v9652_v5 = vpop.permute.xlu0 %9651  ;;  %v9679_v0 = vsel %vm619_vm4, %v9663_v56, %v9664_v14  ;;  %v9682_v56 = vsel %vm734_vm5, %v9646_v45, %v9681_v32  ;;  %v9657_v14 = vrot.slane %v17971_v46, 4  ;;  %v9654_v45 = vrot.slane %v17924_v34, 4 }
 0x9f4   : > { %v9668_v40 = vrot.slane %v9652_v5, 4  ;;  %v9677_v5 = vsel %vm619_vm4, %v9661_v30, %v9662_v27  ;;  %v9653_v32 = vrot.slane %v17926_v4, 4  ;;  %v9671_v34 = vsel %vm619_vm4, %v9655_v39, %v9656_v1 }
 0x9f5   : > { %v9650_v35 = vpop.permute.xlu1 %9649  ;;  %10496 = vperm.xlu0 %12436, %v12073_v31   ;;  %v9678_v30 = vsel %vm734_vm5, %v18043_v24, %v9677_v5  ;;  %v9552_v1 = vrot.slane %v18080_v44, 4  ;;  %v9551_v39 = vrot.slane %v18082_v25, 4 }
 0x9f6   : > { %v9667_v10 = vrot.slane %v9650_v35, 4 }
 0x9f7   : > { %10491 = vperm.xlu1 %12437, %v12072_v63   ;;  %v18176_v33 = vpop.permute.xlu0 %9735  ;;  %v9680_v63 = vsel %vm734_vm5, %v18075_v9, %v9679_v0  ;;  %v12077_v9 = vld [vmem:[%s18800_s4 + $0x78] sm:$0xff] }
 0x9f8   : > { %v9683_v19 = vsel %vm619_vm4, %v9667_v10, %v9668_v40  ;;  %v9675_v10 = vsel %vm619_vm4, %v9659_v55, %v9660_v62  ;;  %v12110_v0 = vcombine.low %v9678_v30, %v9680_v63 }
 0x9f9   : > { %v9684_v13 = vsel %vm734_vm5, %v9650_v35, %v9683_v19  ;;  %v18186_v18 = vpop.permute.xlu1 %9737  ;;  %10506 = vperm.xlu0 %12436, %v12075_v47   ;;  %v9673_v19 = vsel %vm619_vm4, %v9657_v14, %v9658_v20  ;;  %v12111_v35 = vcombine.high %v9678_v30, %v9680_v63  ;;  %v12076_v47 = vld [vmem:[%s18800_s4 + $0x70] sm:$0xff]  ;;  %v9676_v24 = vsel %vm734_vm5, %v18007_v52, %v9675_v10 }
 0x9fa   : > { %v12112_v40 = vcombine.low %v9682_v56, %v9684_v13  ;;  %v12113_v31 = vcombine.high %v9682_v56, %v9684_v13  ;;  %v9674_v27 = vsel %vm734_vm5, %v17971_v46, %v9673_v19  ;;  %v9669_v20 = vsel %vm619_vm4, %v9653_v32, %v9654_v45 }
 0x9fb   : > { %10501 = vperm.xlu1 %12437, %v12074_v28   ;;  %v18198_v62 = vpop.permute.xlu0 %9739  ;;  %v12109_v28 = vcombine.high %v9674_v27, %v9676_v24  ;;  %v9672_v52 = vsel %vm734_vm5, %v17951_v2, %v9671_v34  ;;  %v9554_v13 = vrot.slane %v18128_v42, 4  ;;  %v9670_v46 = vsel %vm734_vm5, %v17926_v4, %v9669_v20 }
 0x9fc   : > { %10991 = vmatprep.subr.bf16.mxu1 %v12113_v31  ;;  %v12108_v63 = vcombine.low %v9674_v27, %v9676_v24  ;;  %v9553_v14 = vrot.slane %v18119_v49, 4  ;;  %v9567_v30 = vsel %vm619_vm4, %v9551_v39, %v9552_v1  ;;  %v12682_v42 = vunpack.i.h.bf16 %v17909_v37 }
 0x9fd   : > { %10992 = vmatpush1.bf16.msra.mxu1 %v12112_v40  ;;  %v18205_v55 = vpop.permute.xlu1 %10205  ;;  %10516 = vperm.xlu0 %12436, %v12077_v9   ;;  %v12107_v40 = vcombine.high %v9670_v46, %v9672_v52  ;;  %v12681_v45 = vunpack.i.l.bf16 %v17909_v37  ;;  %v12106_v32 = vcombine.low %v9670_v46, %v9672_v52  ;;  %v12687_v4 = vunpack.i.h.bf16 %v17911_v53 }
 0x9fe   : > { %10993 = vmatprep.subr.bf16.mxu1 %v12111_v35  ;;  %v9569_v44 = vsel %vm619_vm4, %v9553_v14, %v9554_v13  ;;  %v12686_v19 = vunpack.i.l.bf16 %v17911_v53  ;;  %v9546_v35 = vrot.slane %v17984_v3, 4  ;;  %v9544_v34 = vrot.slane %v17956_v58, 4 }
 0x9ff   : > { %10511 = vperm.xlu1 %12437, %v12076_v47   ;;  %v18211_v5 = vpop.permute.xlu0 %12699  ;;  %v9568_v27 = vsel %vm621_vm6, %v18082_v25, %v9567_v30  ;;  %v9543_v53 = vrot.slane %v17958_v48, 4  ;;  %v9545_v3 = vrot.slane %v17979_v51, 4  ;;  %v10004_v1 = vrot.slane %v12682_v42, 4 }
 0xa00   : > { %v12692_v58 = vunpack.i.h.bf16 %v17916_v23  ;;  %v9542_v39 = vrot.slane %v17930_v8, 4  ;;  %v9541_v25 = vrot.slane %v17932_v59, 4  ;;  %v12103_v13 = vcombine.high %v18055_v50, %v9568_v27 }
 0xa01   : > { %10994 = vmatpush1.bf16.msra.mxu1 %v12110_v0  ;;  %v18215_v56 = vpop.permute.xlu1 %10209  ;;  %v9570_v0 = vsel %vm621_vm6, %v18119_v49, %v9569_v44  ;;  %v9561_v49 = vsel %vm619_vm4, %v9545_v3, %v9546_v35  ;;  %v12691_v14 = vunpack.i.l.bf16 %v17916_v23  ;;  %v10000_v8 = vrot.slane %v12687_v4, 4 }
 0xa02   : > { %10995 = vmatprep.subr.bf16.mxu1 %v12109_v28  ;;  %v9559_v30 = vsel %vm619_vm4, %v9543_v53, %v9544_v34  ;;  %v10001_v44 = vrot.slane %v18133_v29, 4  ;;  %v12696_v42 = vunpack.i.l.bf16 %v17920_v36  ;;  %v9562_v23 = vsel %vm621_vm6, %v17979_v51, %v9561_v49 }
 0xa03   : > { %v9540_v10 = vpop.permute.xlu0 %9539  ;;  %v12101_v35 = vcombine.high %v9562_v23, %v18016_v17  ;;  %v9995_v4 = vrot.slane %v18018_v38, 4  ;;  %v9994_v34 = vrot.slane %v12691_v14, 4  ;;  %v9890_v53 = vrot.slane %v18143_v6, 4 }
 0xa04   : > { %v9556_v31 = vrot.slane %v9540_v10, 4  ;;  %v12697_v10 = vunpack.i.h.bf16 %v17920_v36  ;;  %v9560_v36 = vsel %vm621_vm6, %v17958_v48, %v9559_v30  ;;  %v12100_v48 = vcombine.low %v9562_v23, %v18016_v17 }
 0xa05   : > { %10996 = vmatpush1.bf16.msra.mxu1 %v12108_v63  ;;  %v9538_v2 = vpop.permute.xlu1 %9537  ;;  %v10002_v63 = vrot.slane %v12681_v45, 4  ;;  %v12102_v45 = vcombine.low %v18055_v50, %v9568_v27  ;;  %v9889_v27 = vrot.slane %v18138_v61, 4  ;;  %v9882_v23 = vrot.slane %v17992_v60, 4 }
 0xa06   : > { %v9555_v9 = vrot.slane %v9538_v2, 4  ;;  %10997 = vmatprep.subr.bf16.mxu1 %v12107_v40  ;;  %v9999_v40 = vrot.slane %v18089_v54, 4 }
 0xa07   : > { %v18231_v24 = vpop.permute.xlu0 %10197  ;;  %v10017_v50 = vsel %vm619_vm4, %v10001_v44, %v10002_v63  ;;  %v9905_v17 = vsel %vm619_vm4, %v9889_v27, %v9890_v53  ;;  %v9878_v53 = vrot.slane %v17942_v11, 4  ;;  %v19334_v11 = vcombine.high %v18063_v41, %v18103_v12 }
 0xa08   : > { %v9571_v47 = vsel %vm619_vm4, %v9555_v9, %v9556_v31  ;;  %v9996_v9 = vrot.slane %v12692_v58, 4  ;;  %v9993_v58 = vrot.slane %v17986_v57, 4 }
 0xa09   : > { %v9572_v37 = vsel %vm621_vm6, %v9538_v2, %v9571_v47  ;;  %10998 = vmatpush1.bf16.msra.mxu1 %v12106_v32  ;;  %v18239_v20 = vpop.permute.xlu1 %12704  ;;  %v9998_v2 = vrot.slane %v12686_v19, 4  ;;  %v9557_v32 = vsel %vm619_vm4, %v9541_v25, %v9542_v39  ;;  %v9997_v19 = vrot.slane %v18048_v15, 4 }
 0xa0a   : > { %v12104_v28 = vcombine.low %v9570_v0, %v9572_v37  ;;  %v12105_v52 = vcombine.high %v9570_v0, %v9572_v37  ;;  %v9992_v0 = vrot.slane %v12697_v10, 4  ;;  %v10015_v37 = vsel %vm619_vm4, %v9999_v40, %v10000_v8 }
 0xa0b   : > { %v18248_v46 = vpop.permute.xlu0 %10201  ;;  %v10011_v39 = vsel %vm619_vm4, %v9995_v4, %v9996_v9  ;;  %v10013_v25 = vsel %vm619_vm4, %v9997_v19, %v9998_v2  ;;  %v10016_v6 = vsel %vm1073_vm9, %v18089_v54, %v10015_v37  ;;  %v10009_v9 = vsel %vm619_vm4, %v9993_v58, %v9994_v34 }
 0xa0c   : > { %10999 = vmatprep.subr.bf16.mxu1 %v12105_v52  ;;  %v9991_v52 = vrot.slane %v17962_v7, 4  ;;  %v10014_v54 = vsel %vm1073_vm9, %v18048_v15, %v10013_v25  ;;  %v9990_v4 = vrot.slane %v12696_v42, 4  ;;  %v10012_v19 = vsel %vm1073_vm9, %v18018_v38, %v10011_v39 }
 0xa0d   : > { %11000 = vmatpush1.bf16.msra.mxu1 %v12104_v28  ;;  %v18253_v31 = vpop.permute.xlu1 %10189  ;;  %v9558_v28 = vsel %vm621_vm6, %v17932_v59, %v9557_v32  ;;  %v10018_v59 = vsel %vm1073_vm9, %v18133_v29, %v10017_v50  ;;  %v9881_v29 = vrot.slane %v17990_v22, 4  ;;  %v9906_v15 = vsel %vm960_vm7, %v18138_v61, %v9905_v17 }
 0xa0e   : > { %11001 = vmatprep.subr.bf16.mxu1 %v12103_v13  ;;  %v12099_v63 = vcombine.high %v9558_v28, %v9560_v36  ;;  %v12098_v44 = vcombine.low %v9558_v28, %v9560_v36  ;;  %v10007_v60 = vsel %vm619_vm4, %v9991_v52, %v9992_v0  ;;  %v9880_v37 = vrot.slane %v17969_v21, 4 }
 0xa0f   : > { %v18265_v47 = vpop.permute.xlu0 %12709  ;;  %v10010_v38 = vsel %vm1073_vm9, %v17986_v57, %v10009_v9  ;;  %v12142_v27 = vcombine.low %v10014_v54, %v10016_v6  ;;  %v9897_v61 = vsel %vm619_vm4, %v9881_v29, %v9882_v23  ;;  %v10008_v21 = vsel %vm1073_vm9, %v17962_v7, %v10007_v60 }
 0xa10   : > { %v12141_v28 = vcombine.high %v10010_v38, %v10012_v19  ;;  %v9877_v57 = vrot.slane %v17938_v26, 4  ;;  %v12140_v39 = vcombine.low %v10010_v38, %v10012_v19  ;;  %v9898_v7 = vsel %vm960_vm7, %v17990_v22, %v9897_v61  ;;  %v19338_v22 = vld [vmem:[#allocation107_spill] sm:$0xff]  ;;  %v19341_v19 = vld [vmem:[#allocation117_spill] sm:$0xff] }
 0xa11   : > { %11002 = vmatpush1.bf16.msra.mxu1 %v12102_v45  ;;  %v9986_v51 = vpop.permute.xlu1 %9985  ;;  %v12143_v45 = vcombine.high %v10014_v54, %v10016_v6  ;;  %v9777_v17 = vrot.slane %v19338_v22, 4  ;;  %v12701_v9 = vunpack.i.l.bf16 %v18211_v5  ;;  %v12702_v29 = vunpack.i.h.bf16 %v18211_v5  ;;  %v19345_v61 = vld [vmem:[#allocation101_spill] sm:$0xff] }
 0xa12   : > { %v10003_v3 = vrot.slane %v9986_v51, 4  ;;  %11003 = vmatprep.subr.bf16.mxu1 %v12101_v35  ;;  %v9893_v25 = vsel %vm619_vm4, %v9877_v57, %v9878_v53  ;;  %v9766_v38 = vrot.slane %v18176_v33, 4  ;;  %v10225_v57 = vrot.slane %v18205_v55, 4 }
 0xa13   : > { %v9874_v13 = vpop.permute.xlu0 %9873  ;;  %v10227_v33 = vrot.slane %v18215_v56, 4 }
 0xa14   : > { %v10019_v49 = vsel %vm619_vm4, %v10003_v3, %v10004_v1  ;;  %v9891_v10 = vrot.slane %v9874_v13, 4  ;;  %v9989_v1 = vrot.slane %v17936_v16, 4  ;;  %v9879_v3 = vrot.slane %v17964_v43, 4 }
 0xa15   : > { %v10020_v14 = vsel %vm1073_vm9, %v9986_v51, %v10019_v49  ;;  %11004 = vmatpush1.bf16.msra.mxu1 %v12100_v48  ;;  %v9876_v40 = vpop.permute.xlu1 %9875 }
 0xa16   : > { %v12144_v8 = vcombine.low %v10018_v59, %v10020_v14  ;;  %v12145_v30 = vcombine.high %v10018_v59, %v10020_v14  ;;  %v9892_v2 = vrot.slane %v9876_v40, 4  ;;  %11005 = vmatprep.subr.bf16.mxu1 %v12099_v63  ;;  %v10005_v42 = vsel %vm619_vm4, %v9989_v1, %v9990_v4  ;;  %v19340_v1 = vld [vmem:[#allocation114_spill] sm:$0xff] }
 0xa17   : > { %v18294_v35 = vpop.permute.xlu0 %10181  ;;  %v9895_v58 = vsel %vm619_vm4, %v9879_v3, %v9880_v37  ;;  %v10006_v48 = vsel %vm1073_vm9, %v17936_v16, %v10005_v42  ;;  %v19336_v59 = vcombine.low %v18063_v41, %v18103_v12  ;;  %v19339_v41 = vld [vmem:[#allocation116_spill] sm:$0xff]  ;;  %v9768_v37 = vrot.slane %v18198_v62, 4  ;;  %v19344_v3 = vld [vmem:[#allocation118_spill] sm:$0xff] }
 0xa18   : > { %v9907_v32 = vsel %vm619_vm4, %v9891_v10, %v9892_v2  ;;  %11064 = vmatprep.subr.bf16.mxu0 %v12145_v30  ;;  %v12139_v6 = vcombine.high %v10006_v48, %v10008_v21  ;;  %v9896_v16 = vsel %vm960_vm7, %v17964_v43, %v9895_v58  ;;  %v19337_v10 = vld [vmem:[#allocation110_spill] sm:$0xff]  ;;  %v9894_v2 = vsel %vm960_vm7, %v17938_v26, %v9893_v25  ;;  %v19342_v26 = vld [vmem:[#allocation119_spill] sm:$0xff] }
 0xa19   : > { %11006 = vmatpush1.bf16.msra.mxu1 %v12098_v44  ;;  %11065 = vmatpush1.bf16.msra.mxu0 %v12144_v8  ;;  %v18298_v34 = vpop.permute.xlu1 %10193  ;;  %v9908_v36 = vsel %vm960_vm7, %v9874_v13, %v9907_v32  ;;  %v19335_v13 = vld [vmem:[#allocation113_spill] sm:$0xff]  ;;  %v9778_v40 = vrot.slane %v19337_v10, 4  ;;  %v12138_v8 = vcombine.low %v10006_v48, %v10008_v21  ;;  %v9770_v12 = vrot.slane %v19339_v41, 4  ;;  %v19347_v48 = vld [vmem:[#allocation120_spill] sm:$0xff] }
 0xa1a   : > { %11066 = vmatprep.subr.bf16.mxu0 %v12143_v45  ;;  %v12128_v51 = vcombine.low %v9906_v15, %v9908_v36  ;;  %v12129_v50 = vcombine.high %v9906_v15, %v9908_v36  ;;  %v12125_v63 = vcombine.high %v9898_v7, %v19335_v13  ;;  %v12124_v30 = vcombine.low %v9898_v7, %v19335_v13  ;;  %v19350_v13 = vld [vmem:[#allocation115_spill] sm:$0xff] }
 0xa1b   : > { %v18311_v0 = vpop.permute.xlu0 %10185  ;;  %v9769_v44 = vrot.slane %v19340_v1, 4  ;;  %v12123_v43 = vcombine.high %v9894_v2, %v9896_v16  ;;  %v9793_v32 = vsel %vm619_vm4, %v9777_v17, %v9778_v40  ;;  %v19343_v15 = vpack.c.bf16 %v19341_v19, %v19342_v26  ;;  %v19351_v17 = vld [vmem:[#allocation122_spill] sm:$0xff] }
 0xa1c   : > { %11007 = vmatprep.subr.bf16.mxu1 %v12129_v50  ;;  %v12122_v36 = vcombine.low %v9894_v2, %v9896_v16  ;;  %v9794_v42 = vsel %vm847_vm8, %v19338_v22, %v9793_v32  ;;  %v9767_v62 = vrot.slane %v18186_v18, 4  ;;  %v12706_v25 = vunpack.i.l.bf16 %v18239_v20 }
 0xa1d   : > { %11008 = vmatpush2.bf16.msra.mxu1 %v12128_v51  ;;  %11067 = vmatpush1.bf16.msra.mxu0 %v12142_v27  ;;  %v18315_v52 = vpop.permute.xlu1 %12714  ;;  %v9785_v60 = vsel %vm619_vm4, %v9769_v44, %v9770_v12  ;;  %v10226_v51 = vrot.slane %v12701_v9, 4  ;;  %v10228_v27 = vrot.slane %v12702_v29, 4  ;;  %v12707_v16 = vunpack.i.h.bf16 %v18239_v20  ;;  %v19354_v9 = vld [vmem:[#allocation111_spill] sm:$0xff] }
 0xa1e   : > { %11009 = vmatprep.subr.bf16.mxu1 %v19334_v11  ;;  %11068 = vmatprep.subr.bf16.mxu0 %v12141_v28  ;;  %v19346_v28 = vpack.c.bf16 %v19344_v3, %v19345_v61  ;;  %v9786_v40 = vsel %vm847_vm8, %v19340_v1, %v9785_v60  ;;  %v10223_v12 = vrot.slane %v18248_v46, 4  ;;  %v12717_v20 = vunpack.i.h.bf16 %v18315_v52  ;;  %v19358_v29 = vld [vmem:[#allocation135_spill] sm:$0xff] }
 0xa1f   : > { %v18327_v49 = vpop.permute.xlu0 %12719  ;;  %v10243_v22 = vsel %vm619_vm4, %v10227_v33, %v10228_v27  ;;  %v12716_v44 = vunpack.i.l.bf16 %v18315_v52  ;;  %v10222_v19 = vrot.slane %v12706_v25, 4  ;;  %v12711_v60 = vunpack.i.l.bf16 %v18265_v47  ;;  %v19365_v61 = vld [vmem:[#allocation127_spill] sm:$0xff] }
 0xa20   : > { %v10244_v52 = vsel %vm1299_vm10, %v18215_v56, %v10243_v22  ;;  %v10213_v33 = vrot.slane %v18294_v35, 4  ;;  %v10215_v25 = vrot.slane %v18311_v0, 4 }
 0xa21   : > { %11010 = vmatpush2.bf16.msra.mxu1 %v19336_v59  ;;  %11069 = vmatpush1.bf16.msra.mxu0 %v12140_v39  ;;  %v18333_v14 = vpop.permute.xlu1 %10093  ;;  %v19348_v39 = vld [vmem:[#allocation133_spill] sm:$0xff]  ;;  %v10241_v59 = vsel %vm619_vm4, %v10225_v57, %v10226_v51  ;;  %v10221_v51 = vrot.slane %v18231_v24, 4  ;;  %v10214_v3 = vrot.slane %v12716_v44, 4 }
 0xa22   : > { %11011 = vmatprep.subr.bf16.mxu1 %v12125_v63  ;;  %11070 = vmatprep.subr.bf16.mxu0 %v12139_v6  ;;  %v19349_v7 = vpack.c.bf16 %v19347_v48, %v19348_v39  ;;  %v9765_v63 = vrot.slane %v19350_v13, 4  ;;  %v9783_v6 = vsel %vm619_vm4, %v9767_v62, %v9768_v37 }
 0xa23   : > { %v9764_v54 = vpop.permute.xlu0 %9763  ;;  %v9784_v26 = vsel %vm847_vm8, %v18186_v18, %v9783_v6  ;;  %v10217_v6 = vrot.slane %v18253_v31, 4 }
 0xa24   : > { %v9780_v23 = vrot.slane %v9764_v54, 4  ;;  %v9781_v41 = vsel %vm619_vm4, %v9765_v63, %v9766_v38  ;;  %v19355_v54 = vld [vmem:[#allocation112_spill] sm:$0xff] }
 0xa25   : > { %11012 = vmatpush2.bf16.msra.mxu1 %v12124_v30  ;;  %11071 = vmatpush1.bf16.msra.mxu0 %v12138_v8  ;;  %v9762_v45 = vpop.permute.xlu1 %9761  ;;  %v19352_v8 = vld [vmem:[#allocation132_spill] sm:$0xff]  ;;  %v19356_v1 = vcombine.high %v19354_v9, %v19355_v54  ;;  %v9782_v56 = vsel %vm847_vm8, %v19350_v13, %v9781_v41 }
 0xa26   : > { %v9779_v4 = vrot.slane %v9762_v45, 4  ;;  %11013 = vmatprep.subr.bf16.mxu1 %v12123_v43  ;;  %11072 = vmatprep.subr.bf16.mxu0 %v19343_v15  ;;  %v19353_v30 = vpack.c.bf16 %v19351_v17, %v19352_v8  ;;  %v19357_v43 = vld [vmem:[#allocation131_spill] sm:$0xff]  ;;  %v10224_v15 = vrot.slane %v12707_v16, 4  ;;  %v12115_v48 = vcombine.high %v9782_v56, %v9784_v26  ;;  %v19368_v16 = vld [vmem:[#allocation134_spill] sm:$0xff] }
 0xa27   : > { %v18353_v50 = vpop.permute.xlu0 %10317  ;;  %v12114_v8 = vcombine.low %v9782_v56, %v9784_v26  ;;  %v12722_v56 = vunpack.i.h.bf16 %v18327_v49 }
 0xa28   : > { %v9795_v5 = vsel %vm619_vm4, %v9779_v4, %v9780_v23  ;;  %v19359_v23 = vpack.c.bf16 %v19357_v43, %v19358_v29  ;;  %v10242_v4 = vsel %vm1299_vm10, %v18205_v55, %v10241_v59  ;;  %v19362_v55 = vld [vmem:[#allocation136_spill] sm:$0xff]  ;;  %v10239_v27 = vsel %vm619_vm4, %v10223_v12, %v10224_v15 }
 0xa29   : > { %v9796_v53 = vsel %vm847_vm8, %v9762_v45, %v9795_v5  ;;  %11014 = vmatpush2.bf16.msra.mxu1 %v12122_v36  ;;  %11073 = vmatpush1.bf16.msra.mxu0 %v19346_v28  ;;  %v18362_v21 = vpop.permute.xlu1 %12724  ;;  %v19360_v45 = vld [vmem:[#allocation109_spill] sm:$0xff]  ;;  %v12712_v36 = vunpack.i.h.bf16 %v18265_v47  ;;  %v19361_v5 = vcombine.low %v19354_v9, %v19355_v54  ;;  %v10219_v47 = vrot.slane %v18298_v34, 4  ;;  %v19366_v28 = vld [vmem:[#allocation106_spill] sm:$0xff] }
 0xa2a   : > { %v12120_v58 = vcombine.low %v9794_v42, %v9796_v53  ;;  %v12121_v11 = vcombine.high %v9794_v42, %v9796_v53  ;;  %11074 = vmatprep.subr.bf16.mxu0 %v19349_v7  ;;  %v12117_v32 = vcombine.high %v9786_v40, %v19360_v45  ;;  %v19363_v42 = vld [vmem:[#allocation129_spill] sm:$0xff]  ;;  %v10216_v53 = vrot.slane %v12717_v20, 4 }
 0xa2b   : > { %v18375_v10 = vpop.permute.xlu0 %12729  ;;  %v19364_v38 = vpack.c.bf16 %v19362_v55, %v19363_v42  ;;  %v19367_v62 = vpack.c.bf16 %v19365_v61, %v19366_v28  ;;  %v12116_v57 = vcombine.low %v9786_v40, %v19360_v45  ;;  %v10220_v39 = vrot.slane %v12712_v36, 4  ;;  %v19369_v40 = vld [vmem:[#allocation130_spill] sm:$0xff] }
 0xa2c   : > { %11015 = vmatprep.subr.bf16.mxu1 %v12121_v11  ;;  %v10237_v11 = vsel %vm619_vm4, %v10221_v51, %v10222_v19  ;;  %v10218_v7 = vrot.slane %v12711_v60, 4  ;;  %v10240_v63 = vsel %vm1299_vm10, %v18248_v46, %v10239_v27  ;;  %v12721_v59 = vunpack.i.l.bf16 %v18327_v49  ;;  %v12959_v19 = vld [vmem:[%s18799_s3 + $0xcc] ss:$20 sps:$4 sm:$0xff]  }
 0xa2d   : > { %11016 = vmatpush2.bf16.msra.mxu1 %v12120_v58  ;;  %11075 = vmatpush1.bf16.msra.mxu0 %v19353_v30  ;;  %v18383_v2 = vpop.permute.xlu1 %10085  ;;  %v12161_v58 = vcombine.high %v10242_v4, %v10244_v52  ;;  %v19370_v22 = vpack.c.bf16 %v19368_v16, %v19369_v40  ;;  %v10235_v30 = vsel %vm619_vm4, %v10219_v47, %v10220_v39  ;;  %v12732_v20 = vunpack.i.h.bf16 %v18375_v10  ;;  %v12962_v40 = vld [vmem:[%s18799_s3 + $0xf4] ss:$20 sps:$4 sm:$0xff]  }
 0xa2e   : > { %11017 = vmatprep.subr.bf16.mxu1 %v19356_v1  ;;  %11076 = vmatprep.subr.bf16.mxu0 %v19359_v23  ;;  %v10231_v41 = vsel %vm619_vm4, %v10215_v25, %v10216_v53  ;;  %v10229_v12 = vsel %vm619_vm4, %v10213_v33, %v10214_v3  ;;  %v12160_v46 = vcombine.low %v10242_v4, %v10244_v52  ;;  %v12726_v9 = vunpack.i.l.bf16 %v18362_v21  ;;  %v12954_v23 = vld [vmem:[%s18799_s3 + $0xa0] ss:$20 sps:$4 sm:$0xff]  }
 0xa2f   : > { %v18404_v37 = vpop.permute.xlu0 %10309  ;;  %v10238_v44 = vsel %vm1299_vm10, %v18231_v24, %v10237_v11  ;;  %v12731_v54 = vunpack.i.l.bf16 %v18375_v10  ;;  %v10233_v43 = vsel %vm619_vm4, %v10217_v6, %v10218_v7  ;;  %v10236_v45 = vsel %vm1299_vm10, %v18298_v34, %v10235_v30 }
 0xa30   : > { %v12159_v1 = vcombine.high %v10238_v44, %v10240_v63  ;;  %v18453_v24 = vsel %vm1299_vm10, %v18294_v35, %v10229_v12  ;;  %v18457_v10 = vsel %vm1299_vm10, %v18311_v0, %v10231_v41  ;;  %v10112_v26 = vrot.slane %v12732_v20, 4 }
 0xa31   : > { %11018 = vmatpush2.bf16.msra.mxu1 %v19361_v5  ;;  %11077 = vmatpush1.bf16.msra.mxu0 %v19364_v38  ;;  %v18413_v18 = vpop.permute.xlu1 %10089  ;;  %v12158_v36 = vcombine.low %v10238_v44, %v10240_v63  ;;  %v10234_v60 = vsel %vm1299_vm10, %v18253_v31, %v10233_v43  ;;  %v10338_v35 = vrot.slane %v12726_v9, 4  ;;  %v10110_v51 = vrot.slane %v12731_v54, 4  ;;  %v12957_v63 = vld [vmem:[%s18799_s3 + $0xc8] ss:$20 sps:$4 sm:$0xff]  }
 0xa32   : > { %11019 = vmatprep.subr.bf16.mxu1 %v12117_v32  ;;  %11078 = vmatprep.subr.bf16.mxu0 %v19367_v62  ;;  %v10114_v32 = vrot.slane %v12721_v59, 4  ;;  %v10111_v34 = vrot.slane %v18413_v18, 4  ;;  %v12156_v5 = vcombine.low %v10234_v60, %v10236_v45  ;;  %v12157_v55 = vcombine.high %v10234_v60, %v10236_v45  ;;  %v12960_v60 = vld [vmem:[%s18799_s3 + $0xf0] ss:$20 sps:$4 sm:$0xff]  }
 0xa33   : > { %v18426_v13 = vpop.permute.xlu0 %10313  ;;  %v10113_v0 = vrot.slane %v18333_v14, 4  ;;  %v10337_v27 = vrot.slane %v18353_v50, 4  ;;  %v10109_v47 = vrot.slane %v18383_v2, 4  ;;  %v12155_v31 = vcombine.high %v18453_v24, %v18457_v10 }
 0xa34   : > { %v10127_v61 = vsel %vm619_vm4, %v10111_v34, %v10112_v26  ;;  %v10335_v39 = vrot.slane %v18426_v13, 4  ;;  %v10116_v6 = vrot.slane %v12722_v56, 4  ;;  %v12154_v16 = vcombine.low %v18453_v24, %v18457_v10 }
 0xa35   : > { %11020 = vmatpush2.bf16.msra.mxu1 %v12116_v57  ;;  %11079 = vmatpush1.bf16.msra.mxu0 %v19370_v22  ;;  %v12735_v17 = vpop.permute.xlu1 %12734  ;;  %v10129_v3 = vsel %vm619_vm4, %v10113_v0, %v10114_v32  ;;  %v12727_v57 = vunpack.i.h.bf16 %v18362_v21  ;;  %v10125_v49 = vsel %vm619_vm4, %v10109_v47, %v10110_v51  ;;  %v10353_v11 = vsel %vm619_vm4, %v10337_v27, %v10338_v35 }
 0xa36   : > { %11021 = vmatprep.subr.bf16.mxu1 %v12115_v48  ;;  %11080 = vmatprep.subr.bf16.mxu0 %v12161_v58  ;;  %v12737_v52 = vunpack.i.h.bf16 %v12735_v17  ;;  %v12736_v15 = vunpack.i.l.bf16 %v12735_v17  ;;  %v10333_v48 = vrot.slane %v18404_v37, 4  ;;  %v18487_v21 = vsel %vm1186_vm11, %v18413_v18, %v10127_v61 }
 0xa37   : > { %v12740_v29 = vpop.permute.xlu0 %12739  ;;  %v10130_v22 = vsel %vm1186_vm11, %v18333_v14, %v10129_v3  ;;  %v10340_v18 = vrot.slane %v12727_v57, 4  ;;  %v10126_v41 = vsel %vm1186_vm11, %v18383_v2, %v10125_v49  ;;  %v10354_v20 = vsel %vm1412_vm12, %v18353_v50, %v10353_v11 }
 0xa38   : > { %v12742_v42 = vunpack.i.h.bf16 %v12740_v29  ;;  %v10336_v28 = vrot.slane %v12737_v52, 4  ;;  %v10334_v62 = vrot.slane %v12736_v15, 4  ;;  %v12741_v58 = vunpack.i.l.bf16 %v12740_v29 }
 0xa39   : > { %11022 = vmatpush2.bf16.msra.mxu1 %v12114_v8  ;;  %11081 = vmatpush2.bf16.msra.mxu0 %v12160_v46  ;;  %v18449_v4 = vpop.permute.xlu1 %10077  ;;  %v12151_v46 = vcombine.high %v10126_v41, %v18487_v21  ;;  %v12150_v27 = vcombine.low %v10126_v41, %v18487_v21 }
 0xa3a   : > { %11082 = vmatprep.subr.bf16.mxu0 %v12159_v1  ;;  %v10108_v7 = vrot.slane %v12742_v42, 4  ;;  %v10351_v17 = vsel %vm619_vm4, %v10335_v39, %v10336_v28  ;;  %v10349_v8 = vsel %vm619_vm4, %v10333_v48, %v10334_v62  ;;  %v10106_v12 = vrot.slane %v12741_v58, 4 }
 0xa3b   : > { %v18466_v38 = vpop.permute.xlu0 %10301  ;;  %v10105_v44 = vrot.slane %v18449_v4, 4  ;;  %v10350_v2 = vsel %vm1412_vm12, %v18404_v37, %v10349_v8  ;;  %v10352_v50 = vsel %vm1412_vm12, %v18426_v13, %v10351_v17 }
 0xa3c   : > { %11024 = vmatmul.mubr.bf16.vlgmr.msra.gmra.mxu1 %v12954_v23  ;;  %v12167_v57 = vcombine.high %v10350_v2, %v10352_v50 }
 0xa3d   : > { %v10082_v53 = vpop.permute.xlu1 %10081  ;;  %11083 = vmatpush2.bf16.msra.mxu0 %v12158_v36  ;;  %11033 = vmatprep.mubr.bf16.mxu1 %v12959_v19  ;;  %v10121_v10 = vsel %vm619_vm4, %v10105_v44, %v10106_v12  ;;  %v10329_v19 = vrot.slane %v18466_v38, 4 }
 0xa3e   : > { %11084 = vmatprep.subr.bf16.mxu0 %v12157_v55  ;;  %v10107_v33 = vrot.slane %v10082_v53, 4  ;;  %v10122_v47 = vsel %vm1186_vm11, %v18449_v4, %v10121_v10  ;;  %v12977_v10 = vld [vmem:[%s18799_s3 + $0x100] ss:$20 sps:$4 sm:$0xff]  }
 0xa3f   : > { %v18480_v25 = vpop.permute.xlu0 %10305 }
 0xa40   : > { %v10123_v14 = vsel %vm619_vm4, %v10107_v33, %v10108_v7  ;;  %v10331_v52 = vrot.slane %v18480_v25, 4  ;;  %v12166_v7 = vcombine.low %v10350_v2, %v10352_v50  ;;  %v12969_v2 = vld [vmem:[%s18799_s3 + $0xb0] ss:$20 sps:$4 sm:$0xff]  }
 0xa41   : > { %v10098_v59 = vpop.permute.xlu1 %10097  ;;  %11085 = vmatpush2.bf16.msra.mxu0 %v12156_v5  ;;  %v10124_v26 = vsel %vm1186_vm11, %v10082_v53, %v10123_v14  ;;  %v12970_v50 = vld [vmem:[%s18799_s3 + $0xd0] ss:$20 sps:$4 sm:$0xff]  }
 0xa42   : > { %v10115_v30 = vrot.slane %v10098_v59, 4  ;;  %11086 = vmatprep.subr.bf16.mxu0 %v12155_v31  ;;  %v12965_v31 = vld [vmem:[%s18799_s3 + $0x11c] ss:$20 sps:$4 sm:$0xff]   ;;  %v12149_v3 = vcombine.high %v10122_v47, %v10124_v26  ;;  %v12148_v39 = vcombine.low %v10122_v47, %v10124_v26 }
 0xa43   : > { %v10322_v54 = vpop.permute.xlu0 %10321  ;;  %v12981_v26 = vld [vmem:[%s18799_s3 + $0x128] ss:$20 sps:$4 sm:$0xff]   ;;  %v19372_v47 = vld [vmem:[#allocation10_spill] sm:$0xff] }
 0xa44   : > { %v10131_v9 = vsel %vm619_vm4, %v10115_v30, %v10116_v6  ;;  %11034 = vmatmul.mubr.bf16.gmra.mxu1 %v12957_v63  ;;  %v10339_v43 = vrot.slane %v10322_v54, 4  ;;  %v12963_v6 = vld [vmem:[%s18799_s3 + $0x118] ss:$20 sps:$4 sm:$0xff]  }
 0xa45   : > { %v10132_v1 = vsel %vm1186_vm11, %v10098_v59, %v10131_v9  ;;  %v12745_v29 = vpop.permute.xlu1 %12744  ;;  %11087 = vmatpush2.bf16.msra.mxu0 %v12154_v16  ;;  %11043 = vmatprep.mubr.bf16.mxu1 %v12962_v40  ;;  %v19371_v9 = vmov 0  }
 0xa46   : > { %v12152_v23 = vcombine.low %v10130_v22, %v10132_v1  ;;  %v12153_v45 = vcombine.high %v10130_v22, %v10132_v1  ;;  %v12747_v32 = vunpack.i.h.bf16 %v12745_v29  ;;  %v12746_v24 = vunpack.i.l.bf16 %v12745_v29 }
 0xa47   : > { %v10355_v34 = vsel %vm619_vm4, %v10339_v43, %v10340_v18  ;;  %v12750_v13 = vpop.permute.xlu0 %12749 }
 0xa48   : > { %v10356_v15 = vsel %vm1412_vm12, %v10322_v54, %v10355_v34  ;;  %v10332_v37 = vrot.slane %v12747_v32, 4  ;;  %v10330_v36 = vrot.slane %v12746_v24, 4  ;;  %11088 = vmatprep.subr.bf16.mxu0 %v12153_v45  ;;  %v12752_v5 = vunpack.i.h.bf16 %v12750_v13  ;;  %v12973_v45 = vld [vmem:[%s18799_s3 + $0xd8] ss:$20 sps:$4 sm:$0xff]  }
 0xa49   : > { %v12168_v35 = vcombine.low %v10354_v20, %v10356_v15  ;;  %v12169_v51 = vcombine.high %v10354_v20, %v10356_v15  ;;  %v12751_v55 = vunpack.i.l.bf16 %v12750_v13  ;;  %v10070_v0 = vpop.permute.xlu1 %10069  ;;  %11089 = vmatpush2.bf16.msra.mxu0 %v12152_v23  ;;  %v12966_v20 = vld [vmem:[%s18799_s3 + $0xa8] ss:$20 sps:$4 sm:$0xff]   ;;  %v12974_v32 = vld [vmem:[%s18799_s3 + $0xf8] ss:$20 sps:$4 sm:$0xff]  }
 0xa4a   : > { %v10347_v42 = vsel %vm619_vm4, %v10331_v52, %v10332_v37  ;;  %v10345_v56 = vsel %vm619_vm4, %v10329_v19, %v10330_v36  ;;  %11090 = vmatprep.subr.bf16.mxu0 %v12151_v46  ;;  %v10104_v61 = vrot.slane %v12752_v5, 4  ;;  %v10101_v28 = vrot.slane %v10070_v0, 4  ;;  %v12972_v46 = vld [vmem:[%s18799_s3 + $0xd4] ss:$20 sps:$4 sm:$0xff]   ;;  %v12976_v23 = vld [vmem:[%s18799_s3 + $0xfc] ss:$20 sps:$4 sm:$0xff]  }
 0xa4b   : > { %v10102_v53 = vrot.slane %v12751_v55, 4  ;;  %11145 = vmatprep.subr.bf16.mxu1 %v12169_v51  ;;  %v10294_v62 = vpop.permute.xlu0 %10293  ;;  %v10346_v58 = vsel %vm1412_vm12, %v18466_v38, %v10345_v56  ;;  %v10348_v4 = vsel %vm1412_vm12, %v18480_v25, %v10347_v42  ;;  %v12980_v24 = vld [vmem:[%s18799_s3 + $0x124] ss:$20 sps:$4 sm:$0xff]   ;;  %v12978_v19 = vld [vmem:[%s18799_s3 + $0x120] ss:$20 sps:$4 sm:$0xff]  }
 0xa4c   : > { %11044 = vmatmul.mubr.bf16.gmra.mxu1 %v12960_v60  ;;  %v12165_v63 = vcombine.high %v10346_v58, %v10348_v4  ;;  %v12164_v8 = vcombine.low %v10346_v58, %v10348_v4  ;;  %v10325_v30 = vrot.slane %v10294_v62, 4  ;;  %v19376_v58 = vld [vmem:[#allocation14_spill] sm:$0xff] }
 0xa4d   : > { %v10074_v49 = vpop.permute.xlu1 %10073  ;;  %11091 = vmatpush2.bf16.msra.mxu0 %v12150_v27  ;;  %11146 = vmatpush1.bf16.msra.mxu1 %v12168_v35  ;;  %v10117_v11 = vsel %vm619_vm4, %v10101_v28, %v10102_v53 }
 0xa4e   : > { %v10103_v48 = vrot.slane %v10074_v49, 4  ;;  %11092 = vmatprep.subr.bf16.mxu0 %v12149_v3  ;;  %11147 = vmatprep.subr.bf16.mxu1 %v12167_v57  ;;  %v10118_v38 = vsel %vm1186_vm11, %v10070_v0, %v10117_v11  ;;  %v19377_v11 = vld [vmem:[#allocation15_spill] sm:$0xff] }
 0xa4f   : > { %11053 = vmatprep.mubr.bf16.mxu1 %v12965_v31  ;;  %v10298_v25 = vpop.permute.xlu0 %10297  ;;  %v19373_v31 = vld [vmem:[#allocation11_spill] sm:$0xff] }
 0xa50   : > { %v10119_v33 = vsel %vm619_vm4, %v10103_v48, %v10104_v61  ;;  %v10327_v18 = vrot.slane %v10298_v25, 4  ;;  %v19374_v61 = vld [vmem:[#allocation8_spill] sm:$0xff] }
 0xa51   : > { %v10120_v21 = vsel %vm1186_vm11, %v10074_v49, %v10119_v33  ;;  %v12755_v59 = vpop.permute.xlu1 %12754  ;;  %11093 = vmatpush2.bf16.msra.mxu0 %v12148_v39  ;;  %11148 = vmatpush1.bf16.msra.mxu1 %v12166_v7  ;;  %v19378_v7 = vld [vmem:[#allocation12_spill] sm:$0xff] }
 0xa52   : > { %v12146_v16 = vcombine.low %v10118_v38, %v10120_v21  ;;  %v12147_v40 = vcombine.high %v10118_v38, %v10120_v21  ;;  %v12757_v22 = vunpack.i.h.bf16 %v12755_v59  ;;  %v12756_v17 = vunpack.i.l.bf16 %v12755_v59  ;;  %11149 = vmatprep.subr.bf16.mxu1 %v12165_v63  ;;  %v19379_v63 = vld [vmem:[#allocation13_spill] sm:$0xff]  ;;  %v19380_v21 = vld [vmem:[#allocation39_spill] sm:$0xff] }
 0xa53   : > { %v19381_v59 = vld [vmem:[#allocation37_spill] sm:$0xff] }
 0xa54   : > { %v10328_v41 = vrot.slane %v12757_v22, 4  ;;  %v10326_v12 = vrot.slane %v12756_v17, 4  ;;  %11054 = vmatmul.mubr.bf16.gmra.mxu1 %v12963_v6  ;;  %11094 = vmatprep.subr.bf16.mxu0 %v12147_v40  ;;  %v19382_v40 = vld [vmem:[#allocation40_spill] sm:$0xff]  ;;  %v19383_v17 = vld [vmem:[#allocation41_spill] sm:$0xff] }
 0xa55   : > { %11095 = vmatpush2.bf16.msra.mxu0 %v12146_v16  ;;  %11150 = vmatpush1.bf16.msra.mxu1 %v12164_v8 }
 0xa56   : > { %v10343_v44 = vsel %vm619_vm4, %v10327_v18, %v10328_v41  ;;  %v10341_v14 = vsel %vm619_vm4, %v10325_v30, %v10326_v12  ;;  %11169 = vmatprep.mubr.bf16.mxu1 %v19371_v9  ;;  %v19384_v41 = vld [vmem:[#allocation35_spill] sm:$0xff] }
 0xa57   : > { %v10342_v54 = vsel %vm1412_vm12, %v10294_v62, %v10341_v14  ;;  %v10344_v1 = vsel %vm1412_vm12, %v10298_v25, %v10343_v44  ;;  %v19375_v62 = vld [vmem:[#allocation9_spill] sm:$0xff]  ;;  %v19386_v44 = vld [vmem:[#allocation38_spill] sm:$0xff] }
 0xa58   : > { %11097 = vmatmul.mubr.bf16.vlgmr.msra.gmra.mxu0 %v12966_v20  ;;  %v12162_v43 = vcombine.low %v10342_v54, %v10344_v1  ;;  %v12163_v29 = vcombine.high %v10342_v54, %v10344_v1  ;;  %v19385_v20 = vld [vmem:[#allocation33_spill] sm:$0xff]  ;;  %v19388_v1 = vld [vmem:[#allocation18_spill] sm:$0xff] }
 0xa59   : > { %11106 = vmatprep.mubr.bf16.mxu0 %v12972_v46 }
 0xa5a   : > { %11151 = vmatprep.subr.bf16.mxu1 %v12163_v29  ;;  %v19389_v29 = vld [vmem:[#allocation19_spill] sm:$0xff] }
 0xa5b   : > { %11152 = vmatpush1.bf16.msra.mxu1 %v12162_v43 }
 0xa5c   : > { %v1628_v60 = vpop.permute.xlu0 %1627 }
 0xa5d   : > { %v2324_v53 = vadd.f32 %v19372_v47, %v1628_v60  ;;  %v2326_v3 = vadd.f32 %v19373_v31, %v1628_v60  ;;  %v19395_v47 = vld [vmem:[#allocation17_spill] sm:$0xff] }
 0xa5e   : > { %12170 = vmatmul.mubr.msk.bf16.vlgmr.msra.gmra.mxu1 %vm2220_vm13, %v12969_v2  ;;  %v1623_v37 = vpop.permute.xlu1 %1622 }
 0xa5f   : > { %11179 = vmatprep.mubr.bf16.mxu1 %v19371_v9  ;;  %v2320_v28 = vadd.f32 %v19374_v61, %v1623_v37  ;;  %v2322_v57 = vadd.f32 %v19375_v62, %v1623_v37  ;;  %v2437_v25 = vadd.f32 %v19380_v21, %v2324_v53  ;;  %v2439_v16 = vadd.f32 %v19381_v59, %v2326_v3  ;;  %v19393_v37 = vld [vmem:[#allocation24_spill] sm:$0xff]  ;;  %v19396_v61 = vld [vmem:[#allocation46_spill] sm:$0xff]  ;;  %v19397_v62 = vld [vmem:[#allocation47_spill] sm:$0xff] }
 0xa60   : > { %11107 = vmatmul.mubr.bf16.gmra.mxu0 %v12970_v50  ;;  %v1638_v0 = vpop.permute.xlu0 %1637 }
 0xa61   : > { %11116 = vmatprep.mubr.bf16.mxu0 %v12976_v23  ;;  %v2334_v4 = vadd.f32 %v19376_v58, %v1638_v0  ;;  %v2336_v48 = vadd.f32 %v19377_v11, %v1638_v0  ;;  %v2433_v22 = vadd.f32 %v19382_v40, %v2320_v28  ;;  %v2435_v8 = vadd.f32 %v19383_v17, %v2322_v57  ;;  %v19390_v23 = vld [vmem:[#allocation42_spill] sm:$0xff]  ;;  %v19398_v58 = vld [vmem:[#allocation44_spill] sm:$0xff]  ;;  %v19399_v11 = vld [vmem:[#allocation45_spill] sm:$0xff] }
 0xa62   : > { %v1633_v51 = vpop.permute.xlu1 %1632 }
 0xa63   : > { %v2330_v33 = vadd.f32 %v19378_v7, %v1633_v51  ;;  %v2332_v6 = vadd.f32 %v19379_v63, %v1633_v51  ;;  %v2447_v12 = vadd.f32 %v19384_v41, %v2334_v4  ;;  %v2449_v46 = vadd.f32 %v19385_v20, %v2336_v48  ;;  %v19394_v51 = vld [vmem:[#allocation16_spill] sm:$0xff] }
 0xa64   : > { %v1648_v39 = vpop.permute.xlu0 %1647  ;;  %v18638_v60 = vadd.f32 %v19393_v37, %v2435_v8  ;;  %v19403_v8 = vld [vmem:[#allocation32_spill] sm:$0xff]  ;;  %v19406_v37 = vld [vmem:[#allocation22_spill] sm:$0xff] }
 0xa65   : > { %v2443_v14 = vadd.f32 %v19386_v44, %v2330_v33  ;;  %v2344_v43 = vadd.f32 %v19388_v1, %v1648_v39  ;;  %v2346_v2 = vadd.f32 %v19389_v29, %v1648_v39  ;;  %v18645_v28 = vadd.f32 %v19396_v61, %v2447_v12  ;;  %v19400_v39 = vld [vmem:[#allocation31_spill] sm:$0xff]  ;;  %v19401_v33 = vld [vmem:[#allocation29_spill] sm:$0xff] }
 0xa66   : > { %12171 = vmatmul.mubr.msk.bf16.gmra.mxu1 %vm2220_vm13, %v12973_v45  ;;  %v1643_v56 = vpop.permute.xlu1 %1642  ;;  %v18629_v45 = vadd.f32 %v19390_v23, %v2437_v25  ;;  %v18648_v57 = vadd.f32 %v19397_v62, %v2449_v46  ;;  %v2601_v40 = vmul.f32 0.2, %v18638_v60  ;;  %v19408_v61 = vld [vmem:[#allocation51_spill] sm:$0xff] }
 0xa67   : > { %11189 = vmatprep.mubr.bf16.mxu1 %v19371_v9  ;;  %v2340_v0 = vadd.f32 %v19394_v51, %v1643_v56  ;;  %v2342_v53 = vadd.f32 %v19395_v47, %v1643_v56  ;;  %v18651_v4 = vadd.f32 %v19398_v58, %v2443_v14  ;;  %v2457_v7 = vadd.f32 %v19400_v39, %v2344_v43  ;;  %v19404_v43 = vld [vmem:[#allocation54_spill] sm:$0xff]  ;;  %v19409_v58 = vld [vmem:[#allocation23_spill] sm:$0xff]  ;;  %v19410_v39 = vld [vmem:[#allocation20_spill] sm:$0xff] }
 0xa68   : > { %11117 = vmatmul.mubr.bf16.gmra.mxu0 %v12974_v32  ;;  %v19391_v32 = vld [vmem:[#allocation43_spill] sm:$0xff]  ;;  %v2459_v63 = vadd.f32 %v19401_v33, %v2346_v2  ;;  %v18659_v21 = vmul.f32 0.2, %v18629_v45  ;;  %v18671_v46 = vmul.f32 0.2, %v18645_v28  ;;  %v19405_v2 = vld [vmem:[#allocation57_spill] sm:$0xff] }
 0xa69   : > { %11126 = vmatprep.mubr.bf16.mxu0 %v12980_v24  ;;  %v18632_v24 = vadd.f32 %v19391_v32, %v2439_v16  ;;  %v2455_v41 = vadd.f32 %v19403_v8, %v2342_v53  ;;  %v18674_v44 = vmul.f32 0.2, %v18648_v57  ;;  %v18684_v29 = vadd.f32 %v19404_v43, %v2457_v7  ;;  %v19407_v53 = vld [vmem:[#allocation48_spill] sm:$0xff] }
 0xa6a   : > { %v1653_v30 = vpop.permute.xlu1 %1652  ;;  %v18687_v23 = vadd.f32 %v19405_v2, %v2459_v63 }
 0xa6b   : > { %v18662_v25 = vmul.f32 0.2, %v18632_v24  ;;  %v18695_v62 = vadd.f32 %v19408_v61, %v2455_v41  ;;  %v2350_v7 = vadd.f32 %v19410_v39, %v1653_v30 }
 0xa6e   : > { %12172 = vmatmul.mubr.msk.bf16.gmra.mxu1 %vm2220_vm13, %v12977_v10  ;;  %v1658_v10 = vpop.permute.xlu0 %1657  ;;  %v10482_v56 = vpop.permute.xlu1 %10481 }
 0xa6f   : > { %11199 = vmatprep.mubr.bf16.mxu1 %v19371_v9  ;;  %v19387_v9 = vld [vmem:[#allocation36_spill] sm:$0xff]  ;;  %v2354_v51 = vadd.f32 %v19406_v37, %v1658_v10  ;;  %v19412_v37 = vld [vmem:[#allocation27_spill] sm:$0xff] }
 0xa70   : > { %11127 = vmatmul.mubr.bf16.gmra.mxu0 %v12978_v19  ;;  %v2445_v54 = vadd.f32 %v19387_v9, %v2332_v6  ;;  %v19392_v19 = vld [vmem:[#allocation26_spill] sm:$0xff] }
 0xa72   : > { %v18654_v48 = vadd.f32 %v19399_v11, %v2445_v54  ;;  %v10487_v14 = vpop.permute.xlu0 %10486  ;;  %v18678_v54 = vmul.f32 0.2, %v18651_v4  ;;  %v2356_v11 = vadd.f32 %v19409_v58, %v1658_v10  ;;  %v19413_v58 = vld [vmem:[#allocation25_spill] sm:$0xff] }
 0xa74   : > { %v18681_v1 = vmul.f32 0.2, %v18654_v48  ;;  %v18722_v39 = vadd.f32 %v19413_v58, %v2356_v11 }
 0xa76   : > { %12173 = vmatmul.mubr.msk.bf16.gmra.mxu1 %vm2220_vm13, %v12981_v26  ;;  %v18635_v26 = vadd.f32 %v19392_v19, %v2433_v22  ;;  %v19402_v22 = vld [vmem:[#allocation34_spill] sm:$0xff] }
 0xa77   : > { %v2453_v17 = vadd.f32 %v19402_v22, %v2340_v0  ;;  %v10492_v22 = vpop.permute.xlu1 %10491 }
 0xa78   : > { %v2600_v16 = vmul.f32 0.2, %v18635_v26 }
 0xa7a   : > { %v2632_v10 = vmax.f32 %v18635_v26, %v2600_v16  ;;  %v10497_v16 = vpop.permute.xlu0 %10496 }
 0xafc   : > { %v11025_v34 = vpop.f32.mrf.mxu1 }
 0xafd   : > { %v11026_v59 = vadd.f32 %v11025_v34, %v10482_v56 }
 0xafe   : > { %v18584_v52 = vpop.f32.mrf.mxu1 }
 0xaff   : > { %v11028_v34 = vadd.f32 %v18584_v52, %v10482_v56  ;;  %v19411_v56 = vld [vmem:[#allocation21_spill] sm:$0xff] }
 0xb00   : > { %v18586_v15 = vpop.f32.mrf.mxu1 }
 0xb01   : > { %v11030_v0 = vadd.f32 %v18586_v15, %v10487_v14 }
 0xb02   : > { %v18588_v36 = vpop.f32.mrf.mxu1 }
 0xb03   : > { %v11032_v41 = vadd.f32 %v18588_v36, %v10487_v14  ;;  %v2633_v36 = vmax.f32 %v18638_v60, %v2601_v40 }
 0xb04   : > { %v18590_v13 = vpop.f32.mrf.mxu1 }
 0xb05   : > { %v11036_v2 = vadd.f32 %v18590_v13, %v10492_v22 }
 0xb06   : > { %v18592_v35 = vpop.f32.mrf.mxu1 }
 0xb08   : > { %v18594_v5 = vpop.f32.mrf.mxu1 }
 0xb0a   : > { %v18596_v55 = vpop.f32.mrf.mxu1 }
 0xb0c   : > { %v18598_v42 = vpop.f32.mrf.mxu1 }
 0xb0e   : > { %v18600_v27 = vpop.f32.mrf.mxu1 }
 0xb10   : > { %v18606_v49 = vpop.f32.mrf.mxu1 }
 0xb12   : > { %v18612_v38 = vpop.f32.mrf.mxu1 }
 0xb14   : > { %v18618_v18 = vpop.f32.mrf.mxu1 }
 0xb16   : > { %v18626_v50 = vpop.f32.mrf.mxu1 }
 0xb18   : > { %v18642_v31 = vpop.f32.mrf.mxu1  ;;  %v11098_v3 = vpop.f32.mrf.mxu0 }
 0xb19   : > { %v11099_v9 = vadd.f32 %v11098_v3, %v11026_v59  ;;  %v18692_v3 = vadd.f32 %v19407_v53, %v2453_v17  ;;  %v2352_v59 = vadd.f32 %v19411_v56, %v1653_v30  ;;  %v18704_v17 = vmul.f32 0.2, %v18687_v23 }
 0xb1a   : > { %v11100_v6 = vpop.f32.mrf.mxu0  ;;  %v18668_v12 = vpop.f32.mrf.mxu1 }
 0xb1b   : > { %v11101_v52 = vadd.f32 %v11100_v6, %v11028_v34  ;;  %v18701_v34 = vmul.f32 0.2, %v18684_v29 }
 0xb1c   : > { %v11102_v20 = vpop.f32.mrf.mxu0 }
 0xb1d   : > { %v11103_v8 = vadd.f32 %v11102_v20, %v11030_v0  ;;  %v18710_v0 = vadd.f32 %v19412_v37, %v2354_v51 }
 0xb1e   : > { %v11104_v32 = vpop.f32.mrf.mxu0  ;;  %v11171_v19 = vpop.f32.mrf.mxu1 }
 0xb1f   : > { %v11172_v47 = vadd.f32 %v11171_v19, %v11099_v9  ;;  %v11105_v53 = vadd.f32 %v11104_v32, %v11032_v41  ;;  %v2634_v32 = vmax.f32 %v18629_v45, %v18659_v21  ;;  %v19415_v41 = vld [vmem:[#allocation28_spill] sm:$0xff]  ;;  %v10502_v21 = vpop.permute.xlu1 %10501 }
 0xb20   : > { %v11108_v33 = vpop.f32.mrf.mxu0  ;;  %v11173_v63 = vpop.f32.mrf.mxu1 }
 0xb21   : > { %v11210_v15 = vmul.f32 0.2, %v11172_v47  ;;  %v11174_v6 = vadd.f32 %v11173_v63, %v11101_v52  ;;  %v11038_v52 = vadd.f32 %v18592_v35, %v10492_v22  ;;  %v11040_v35 = vadd.f32 %v18594_v5, %v10497_v16 }
 0xb22   : > { %v11110_v9 = vpop.f32.mrf.mxu0  ;;  %v11175_v43 = vpop.f32.mrf.mxu1 }
 0xb23   : > { %v11226_v30 = vmax.f32 %v11172_v47, %v11210_v15  ;;  %v11211_v19 = vmul.f32 0.2, %v11174_v6  ;;  %v11176_v20 = vadd.f32 %v11175_v43, %v11103_v8  ;;  %v11109_v47 = vadd.f32 %v11108_v33, %v11036_v2 }
 0xb24   : > { %v11112_v26 = vpop.f32.mrf.mxu0  ;;  %v11177_v13 = vpop.f32.mrf.mxu1  ;;  %v11111_v40 = vadd.f32 %v11110_v9, %v11038_v52  ;;  %v18729_v33 = vmul.f32 0.2, %v18692_v3  ;;  %v11042_v9 = vadd.f32 %v18596_v55, %v10497_v16 }
 0xb25   : > { %v11242_v14 = vadd.f32 %v11226_v30, %v2632_v10  ;;  %v11227_v61 = vmax.f32 %v11174_v6, %v11211_v19  ;;  %v11212_v51 = vmul.f32 0.2, %v11176_v20  ;;  %v11178_v63 = vadd.f32 %v11177_v13, %v11105_v53  ;;  %v19414_v6 = vld [vmem:[#allocation30_spill] sm:$0xff] }
 0xb26   : > { %v11114_v56 = vpop.f32.mrf.mxu0  ;;  %v11181_v22 = vpop.f32.mrf.mxu1  ;;  %v2463_v11 = vadd.f32 %v19414_v6, %v2350_v7  ;;  %v2465_v10 = vadd.f32 %v19415_v41, %v2352_v59  ;;  %v11113_v30 = vadd.f32 %v11112_v26, %v11040_v35  ;;  %v2636_v7 = vmax.f32 %v18651_v4, %v18678_v54  ;;  %v19417_v6 = vld [vmem:[#allocation60_spill] sm:$0xff] }
 0xb27   : > { %11258 = vst [vmem:[%s18718_s8] sm:$0xff] %v11242_v14  ;;  %v11243_v60 = vadd.f32 %v11227_v61, %v2633_v36  ;;  %v11228_v8 = vmax.f32 %v11176_v20, %v11212_v51  ;;  %v11182_v15 = vadd.f32 %v11181_v22, %v11109_v47  ;;  %v11213_v5 = vmul.f32 0.2, %v11178_v63  ;;  %v10507_v4 = vpop.permute.xlu0 %10506 }
 0xb28   : > { %v11118_v43 = vpop.f32.mrf.mxu0  ;;  %v11183_v45 = vpop.f32.mrf.mxu1  ;;  %v2635_v20 = vmax.f32 %v18632_v24, %v18662_v25  ;;  %v11046_v36 = vadd.f32 %v18598_v42, %v10502_v21  ;;  %v11048_v47 = vadd.f32 %v18600_v27, %v10502_v21  ;;  %v11115_v55 = vadd.f32 %v11114_v56, %v11042_v9 }
 0xb29   : > { %11259 = vst [vmem:[%s18718_s8 + $0x8] sm:$0xff] %v11243_v60  ;;  %v11244_v2 = vadd.f32 %v11228_v8, %v2634_v32  ;;  %v11214_v19 = vmul.f32 0.2, %v11182_v15  ;;  %v11184_v37 = vadd.f32 %v11183_v45, %v11111_v40  ;;  %v11229_v52 = vmax.f32 %v11178_v63, %v11213_v5  ;;  %v19416_v8 = vld [vmem:[#allocation65_spill] sm:$0xff]  ;;  %v10512_v45 = vpop.permute.xlu1 %10511 }
 0xb2a   : > { %v11120_v59 = vpop.f32.mrf.mxu0  ;;  %v11185_v53 = vpop.f32.mrf.mxu1  ;;  %v2637_v24 = vmax.f32 %v18654_v48, %v18681_v1  ;;  %v11119_v51 = vadd.f32 %v11118_v43, %v11046_v36  ;;  %v2609_v35 = vmul.f32 0.2, %v18695_v62  ;;  %v11050_v32 = vadd.f32 %v18606_v49, %v10507_v4  ;;  %v19418_v49 = vld [vmem:[#allocation63_spill] sm:$0xff] }
 0xb2b   : > { %11260 = vst [vmem:[%s18718_s8 + $0x10] sm:$0xff] %v11244_v2  ;;  %v11230_v13 = vmax.f32 %v11182_v15, %v11214_v19  ;;  %v11215_v14 = vmul.f32 0.2, %v11184_v37  ;;  %v11186_v26 = vadd.f32 %v11185_v53, %v11113_v30  ;;  %v11245_v61 = vadd.f32 %v11229_v52, %v2635_v20 }
 0xb2c   : > { %v11122_v25 = vpop.f32.mrf.mxu0  ;;  %v11187_v16 = vpop.f32.mrf.mxu1  ;;  %v2638_v27 = vmax.f32 %v18645_v28, %v18671_v46  ;;  %v11121_v1 = vadd.f32 %v11120_v59, %v11048_v47  ;;  %v18752_v15 = vadd.f32 %v19416_v8, %v18710_v0  ;;  %v18755_v41 = vadd.f32 %v19417_v6, %v2463_v11 }
 0xb2d   : > { %v11246_v54 = vadd.f32 %v11230_v13, %v2636_v7  ;;  %v11231_v58 = vmax.f32 %v11184_v37, %v11215_v14  ;;  %v11216_v42 = vmul.f32 0.2, %v11186_v26  ;;  %11261 = vst [vmem:[%s18718_s8 + $0x18] sm:$0xff] %v11245_v61  ;;  %v11188_v63 = vadd.f32 %v11187_v16, %v11115_v55 }
 0xb2e   : > { %v11124_v56 = vpop.f32.mrf.mxu0  ;;  %v11191_v22 = vpop.f32.mrf.mxu1  ;;  %v18758_v5 = vadd.f32 %v19418_v49, %v2465_v10  ;;  %v11123_v2 = vadd.f32 %v11122_v25, %v11050_v32  ;;  %v11052_v37 = vadd.f32 %v18612_v38, %v10507_v4  ;;  %v2639_v0 = vmax.f32 %v18648_v57, %v18674_v44 }
 0xb2f   : > { %11262 = vst [vmem:[%s18718_s8 + $0x20] sm:$0xff] %v11246_v54  ;;  %v11247_v48 = vadd.f32 %v11231_v58, %v2637_v24  ;;  %v11232_v60 = vmax.f32 %v11186_v26, %v11216_v42  ;;  %v11192_v40 = vadd.f32 %v11191_v22, %v11119_v51  ;;  %v11217_v28 = vmul.f32 0.2, %v11188_v63  ;;  %v10517_v26 = vpop.permute.xlu0 %10516  ;;  %v19419_v51 = vld [vmem:[#allocation68_spill] sm:$0xff] }
 0xb30   : > { %v11128_v46 = vpop.f32.mrf.mxu0  ;;  %v11193_v43 = vpop.f32.mrf.mxu1  ;;  %v2640_v10 = vmax.f32 %v18692_v3, %v18729_v33  ;;  %v11056_v52 = vadd.f32 %v18618_v18, %v10512_v45  ;;  %v11058_v36 = vadd.f32 %v18626_v50, %v10512_v45  ;;  %v11125_v38 = vadd.f32 %v11124_v56, %v11052_v37 }
 0xb31   : > { %11263 = vst [vmem:[%s18718_s8 + $0x28] sm:$0xff] %v11247_v48  ;;  %v11248_v21 = vadd.f32 %v11232_v60, %v2638_v27  ;;  %v11218_v30 = vmul.f32 0.2, %v11192_v40  ;;  %v11194_v19 = vadd.f32 %v11193_v43, %v11121_v1  ;;  %v11233_v11 = vmax.f32 %v11188_v63, %v11217_v28 }
 0xb32   : > { %v11130_v9 = vpop.f32.mrf.mxu0  ;;  %v11195_v20 = vpop.f32.mrf.mxu1  ;;  %v2641_v57 = vmax.f32 %v18695_v62, %v2609_v35  ;;  %v11129_v33 = vadd.f32 %v11128_v46, %v11056_v52  ;;  %v2612_v18 = vmul.f32 0.2, %v18755_v41  ;;  %v11060_v55 = vadd.f32 %v18642_v31, %v10517_v26 }
 0xb33   : > { %11264 = vst [vmem:[%s18718_s8 + $0x30] sm:$0xff] %v11248_v21  ;;  %v11234_v7 = vmax.f32 %v11192_v40, %v11218_v30  ;;  %v11219_v59 = vmul.f32 0.2, %v11194_v19  ;;  %v11196_v53 = vadd.f32 %v11195_v20, %v11123_v2  ;;  %v11249_v13 = vadd.f32 %v11233_v11, %v2639_v0 }
 0xb34   : > { %v11132_v44 = vpop.f32.mrf.mxu0  ;;  %v11197_v14 = vpop.f32.mrf.mxu1  ;;  %v2642_v50 = vmax.f32 %v18684_v29, %v18701_v34  ;;  %v11131_v16 = vadd.f32 %v11130_v9, %v11058_v36  ;;  %v2582_v58 = vadd.f32 %v19419_v51, %v18722_v39  ;;  %v2613_v42 = vmul.f32 0.2, %v18758_v5 }
 0xb35   : > { %v11250_v3 = vadd.f32 %v11234_v7, %v2640_v10  ;;  %v11235_v47 = vmax.f32 %v11194_v19, %v11219_v59  ;;  %v11220_v61 = vmul.f32 0.2, %v11196_v53  ;;  %11265 = vst [vmem:[%s18718_s8 + $0x38] sm:$0xff] %v11249_v13  ;;  %v11198_v24 = vadd.f32 %v11197_v14, %v11125_v38 }
 0xb36   : > { %v11201_v25 = vpop.f32.mrf.mxu1  ;;  %v11062_v31 = vadd.f32 %v18668_v12, %v10517_v26  ;;  %v11134_v32 = vpop.f32.mrf.mxu0  ;;  %v11133_v34 = vadd.f32 %v11132_v44, %v11060_v55  ;;  %v2614_v22 = vmul.f32 0.2, %v18752_v15  ;;  %v2643_v48 = vmax.f32 %v18687_v23, %v18704_v17 }
 0xb37   : > { %11266 = vst [vmem:[%s18718_s8 + $0x40] sm:$0xff] %v11250_v3  ;;  %v11251_v62 = vadd.f32 %v11235_v47, %v2641_v57  ;;  %v11236_v4 = vmax.f32 %v11196_v53, %v11220_v61  ;;  %v11202_v54 = vadd.f32 %v11201_v25, %v11129_v33  ;;  %v11221_v35 = vmul.f32 0.2, %v11198_v24 }
 0xb38   : > { %v11203_v27 = vpop.f32.mrf.mxu1  ;;  %v2644_v39 = vmax.f32 %v18755_v41, %v2612_v18  ;;  %v11135_v12 = vadd.f32 %v11134_v32, %v11062_v31  ;;  %v2615_v49 = vmul.f32 0.2, %v2582_v58  ;;  %v2645_v46 = vmax.f32 %v18758_v5, %v2613_v42 }
 0xb39   : > { %11267 = vst [vmem:[%s18718_s8 + $0x48] sm:$0xff] %v11251_v62  ;;  %v11252_v29 = vadd.f32 %v11236_v4, %v2642_v50  ;;  %v11222_v63 = vmul.f32 0.2, %v11202_v54  ;;  %v11204_v56 = vadd.f32 %v11203_v27, %v11131_v16  ;;  %v11237_v1 = vmax.f32 %v11198_v24, %v11221_v35 }
 0xb3a   : > { %v11205_v60 = vpop.f32.mrf.mxu1  ;;  %v2646_v2 = vmax.f32 %v18752_v15, %v2614_v22  ;;  %v2647_v0 = vmax.f32 %v2582_v58, %v2615_v49 }
 0xb3b   : > { %11268 = vst [vmem:[%s18718_s8 + $0x50] sm:$0xff] %v11252_v29  ;;  %v11238_v40 = vmax.f32 %v11202_v54, %v11222_v63  ;;  %v11223_v8 = vmul.f32 0.2, %v11204_v56  ;;  %v11206_v6 = vadd.f32 %v11205_v60, %v11133_v34  ;;  %v11253_v28 = vadd.f32 %v11237_v1, %v2643_v48 }
 0xb3c   : > { %v11207_v43 = vpop.f32.mrf.mxu1 }
 0xb3d   : > { %v11254_v45 = vadd.f32 %v11238_v40, %v2644_v39  ;;  %v11239_v23 = vmax.f32 %v11204_v56, %v11223_v8  ;;  %v11224_v17 = vmul.f32 0.2, %v11206_v6  ;;  %v11208_v21 = vadd.f32 %v11207_v43, %v11135_v12  ;;  %11269 = vst [vmem:[%s18718_s8 + $0x58] sm:$0xff] %v11253_v28 }
 0xb3f   : > { %11270 = vst [vmem:[%s18718_s8 + $0x60] sm:$0xff] %v11254_v45  ;;  %v11255_v41 = vadd.f32 %v11239_v23, %v2645_v46  ;;  %v11240_v30 = vmax.f32 %v11206_v6, %v11224_v17  ;;  %v11225_v19 = vmul.f32 0.2, %v11208_v21 }
 0xb41   : > { %11271 = vst [vmem:[%s18718_s8 + $0x68] sm:$0xff] %v11255_v41  ;;  %v11256_v37 = vadd.f32 %v11240_v30, %v2646_v2  ;;  %v11241_v11 = vmax.f32 %v11208_v21, %v11225_v19 }
 0xb43   : > { %11272 = vst [vmem:[%s18718_s8 + $0x70] sm:$0xff] %v11256_v37  ;;  %v11257_v5 = vadd.f32 %v11241_v11, %v2647_v0 }
 0xb45   : > { %11273 = vst [vmem:[%s18718_s8 + $0x78] sm:$0xff] %v11257_v5 }
 0xb46 PF: > { %s15_s18 = sadd.s32 1, %s13019_s18  }
 0xb47   : > { %p12_p4 = scmp.ge.s32.totalorder %s15_s18, 4  }
 0xb49   :  { %14 = sbr.rel (!%p12_p4) target bundleno = 1 (0x1), region = 78 }

</bundles_post_ra>
